<compile_context>
chip_gen: v7x
topology: tpu7x:2x2x1
jax: 0.10.0
libtpu: 0.0.40
codegen_flags: <defaults>
</compile_context>

<pallas_src>
import functools

import jax
import jax.numpy as jnp
from jax.experimental import pallas as pl
from jax.experimental.pallas import tpu as pltpu

# ----------------------------- model dims (module defaults) -----------------
INPUT_SIZE = 5        # vocab
VOCAB_PAD = 8         # embedding table padded to 8 rows (sublane alignment)
EMB = 64              # embedding_dim
HID = 128             # hidden_size
BN_EPS = 1e-5

_VMEM = pl.BlockSpec(memory_space=pltpu.MemorySpace.VMEM)
_ANY = pl.BlockSpec(memory_space=pl.ANY)


# ----------------------------- fused forward kernel -------------------------
def _lstm_step(h, c, gates_in, whh):
    """One recurrence step.

    gates_in : (B, 4H) f32, already holds x_t @ W_ih + (b_ih + b_hh).
    whh      : (H, 4H) bf16, gate columns ordered (i, f, o, g).
    """
    gates = gates_in + jnp.dot(h.astype(jnp.bfloat16), whh,
                               preferred_element_type=jnp.float32)
    # sigmoid(x) == 0.5 * tanh(0.5 * x) + 0.5  -> one EUP push per element
    sig = 0.5 * jnp.tanh(0.5 * gates[:, 0:3 * HID]) + 0.5
    i = sig[:, 0 * HID:1 * HID]
    f = sig[:, 1 * HID:2 * HID]
    o = sig[:, 2 * HID:3 * HID]
    g = jnp.tanh(gates[:, 3 * HID:4 * HID])
    c = f * c + i * g
    h = o * jnp.tanh(c)
    return h, c


def _fused_kernel(ids_ref, tab_f0, tab_b0, whh_f0, whh_b0,
                  b_f0, b_b0, b_f1, b_b1,
                  wih1_hbm, whh1_hbm, w1_hbm,
                  b1, s1, t1, w2, b2, s2, t2, w3, b3,
                  out_ref,
                  wih1_v, whh1_v, w1_v, sems, *, T, B):
    TB = T * B
    f32 = jnp.float32
    bf16 = jnp.bfloat16

    # ---- start layer-1 / MLP weight DMAs; they overlap the layer-0 recurrence ----
    cp_wih1 = pltpu.make_async_copy(wih1_hbm, wih1_v, sems.at[0])
    cp_whh1 = pltpu.make_async_copy(whh1_hbm, whh1_v, sems.at[1])
    cp_w1 = pltpu.make_async_copy(w1_hbm, w1_v, sems.at[2])
    cp_wih1.start()
    cp_whh1.start()
    cp_w1.start()

    # ---- embedding fused with layer-0 input projection: onehot @ (emb @ W_ih) ----
    ids = ids_ref[...]                                               # (T*B, 1) int32
    onehot = (ids == jax.lax.broadcasted_iota(jnp.int32, (TB, VOCAB_PAD), 1)
              ).astype(bf16)                                         # (T*B, V)
    gf0 = jnp.dot(onehot, tab_f0[...], preferred_element_type=f32) + b_f0[...]
    gb0 = jnp.dot(onehot, tab_b0[...], preferred_element_type=f32) + b_b0[...]

    Wf0 = whh_f0[...]                                                # (H, 4H) bf16
    Wb0 = whh_b0[...]

    zero = jnp.zeros((B, HID), f32)
    hf, cf, hb, cb = zero, zero, zero, zero
    hs_f = [None] * T
    hs_b = [None] * T
    for t in range(T):                         # static, fully unrolled time loop
        tb = T - 1 - t                         # backward direction reads time T-1-t
        hf, cf = _lstm_step(hf, cf, gf0[t * B:(t + 1) * B], Wf0)
        hb, cb = _lstm_step(hb, cb, gb0[tb * B:(tb + 1) * B], Wb0)
        hs_f[t] = hf
        hs_b[tb] = hb

    # layer-1 input sequence built in registers/values (no VMEM round-trip)
    l1in = jnp.concatenate(
        [jnp.concatenate([hs_f[t], hs_b[t]], axis=1) for t in range(T)], axis=0
    ).astype(bf16)                                                   # (T*B, 2H)

    # ---- layer-1 weights must have landed by now ----
    cp_wih1.wait()
    cp_whh1.wait()
    cp_w1.wait()

    gf1 = jnp.dot(l1in, wih1_v[0], preferred_element_type=f32) + b_f1[...]
    gb1 = jnp.dot(l1in, wih1_v[1], preferred_element_type=f32) + b_b1[...]
    Wf1 = whh1_v[0]                                                  # (H, 4H) bf16
    Wb1 = whh1_v[1]

    hf, cf, hb, cb = zero, zero, zero, zero
    for t in range(T):
        tb = T - 1 - t
        hf, cf = _lstm_step(hf, cf, gf1[t * B:(t + 1) * B], Wf1)
        hb, cb = _lstm_step(hb, cb, gb1[tb * B:(tb + 1) * B], Wb1)
    # hf == hidden[-2] (layer-1 fwd final), hb == hidden[-1] (layer-1 bwd final)
    final_hidden = jnp.concatenate([hf, hb], axis=1).astype(bf16)    # (B, 2H)

    # ---- predictor: Linear + folded-BN(eval) + ReLU (x2), final Linear, F.relu ----
    h1 = jnp.dot(final_hidden, w1_v[...], preferred_element_type=f32) + b1[...]
    h1 = jnp.maximum(h1 * s1[...] + t1[...], 0.0)
    h2 = jnp.dot(h1.astype(bf16), w2[...], preferred_element_type=f32) + b2[...]
    h2 = jnp.maximum(h2 * s2[...] + t2[...], 0.0)
    h3 = jnp.dot(h2.astype(bf16), w3[...], preferred_element_type=f32) + b3[...]
    out_ref[...] = jnp.maximum(h3, 0.0)        # (B, 128) lane-dense; col 0 is the answer


# ----------------------------- wrapper ---------------------------------------
@jax.jit
def cpg_predictor_forward(tokens, emb_table, lstm_params, mlp_params):
    B, T = tokens.shape
    Bp = max(8, ((B + 7) // 8) * 8)            # pad batch to sublane multiple
    bf16 = jnp.bfloat16

    tok_p = jnp.pad(tokens, ((0, Bp - B), (0, 0)))        # padded rows use token 0
    # time-major flat ids: row index = t*Bp + b
    ids_tm = jnp.transpose(tok_p, (1, 0)).reshape(T * Bp, 1).astype(jnp.int32)

    (w_f0, u_f0, b_f0), (w_b0, u_b0, b_b0), (w_f1, u_f1, b_f1), (w_b1, u_b1, b_b1) = lstm_params
    w1, b1, s1, t1, w2, b2, s2, t2, w3, b3 = mlp_params

    # fuse embedding into the layer-0 input projection (tiny matmul, done once here)
    tab_f0 = (emb_table @ w_f0).astype(bf16)              # (VOCAB_PAD, 4H)
    tab_b0 = (emb_table @ w_b0).astype(bf16)

    # heavy layer-1 weights, stacked fwd/bwd so a single DMA moves each group
    wih1 = jnp.stack([w_f1, w_b1]).astype(bf16)           # (2, 2H, 4H)
    whh1 = jnp.stack([u_f1, u_b1]).astype(bf16)           # (2, H, 4H)

    # lane-pad the final 1-wide linear so the kernel's output store stays lane-dense
    w3p = jnp.pad(w3, ((0, 0), (0, 128 - w3.shape[1]))).astype(bf16)
    b3p = jnp.pad(b3, ((0, 0), (0, 128 - b3.shape[1])))

    out = pl.pallas_call(
        functools.partial(_fused_kernel, T=T, B=Bp),
        out_shape=jax.ShapeDtypeStruct((Bp, 128), jnp.float32),
        in_specs=[_VMEM] * 9 + [_ANY] * 3 + [_VMEM] * 9,
        out_specs=_VMEM,
        scratch_shapes=[
            pltpu.VMEM((2, 2 * HID, 4 * HID), bf16),      # wih1 landing buffer
            pltpu.VMEM((2, HID, 4 * HID), bf16),          # whh1 landing buffer
            pltpu.VMEM((2 * HID, HID), bf16),             # w1 landing buffer
            pltpu.SemaphoreType.DMA((3,)),
        ],
    )(ids_tm, tab_f0, tab_b0,
      u_f0.astype(bf16), u_b0.astype(bf16),
      b_f0, b_b0, b_f1, b_b1,
      wih1, whh1, w1.astype(bf16),
      b1, s1, t1, w2.astype(bf16), b2, s2, t2, w3p, b3p)

    return out[:B, 0]                                     # (B,)


# ----------------------------- parameter construction -----------------------
def _uniform(key, shape, scale):
    return jax.random.uniform(key, shape, jnp.float32, -scale, scale)


def init_params(key):
    k = 1.0 / jnp.sqrt(HID)
    keys = iter(jax.random.split(key, 64))
    params = {}

    # embedding table, padded to 8 rows; rows >= INPUT_SIZE are never selected
    emb = jax.random.normal(next(keys), (INPUT_SIZE, EMB), jnp.float32)
    params["emb"] = jnp.concatenate(
        [emb, jnp.zeros((VOCAB_PAD - INPUT_SIZE, EMB), jnp.float32)], 0)

    # LSTM: layer 0 (input EMB) and layer 1 (input 2*HID), forward + reverse dirs.
    # Stored transposed: W_ih as (E_in, 4H), W_hh as (H, 4H); b = b_ih + b_hh folded.
    # In-kernel gate-column convention is (i, f, o, g); weights here are random, so
    # this is just a convention.  To load trained PyTorch weights (i, f, g, o),
    # permute the last two H-wide gate blocks when building these matrices.
    lstm = []
    for in_dim in (EMB, 2 * HID):
        for _direction in range(2):
            wih = _uniform(next(keys), (4 * HID, in_dim), k)
            whh = _uniform(next(keys), (4 * HID, HID), k)
            b_ih = _uniform(next(keys), (4 * HID,), k)
            b_hh = _uniform(next(keys), (4 * HID,), k)
            lstm.append((wih.T, whh.T, (b_ih + b_hh).reshape(1, 4 * HID)))
    params["lstm"] = lstm

    # predictor: Linear(256,128) BN ReLU Drop Linear(128,64) BN ReLU Drop Linear(64,1)
    def linear(kw, kb, n_in, n_out):
        s = 1.0 / jnp.sqrt(n_in)
        return _uniform(kw, (n_in, n_out), s), _uniform(kb, (1, n_out), s)

    w1, b1 = linear(next(keys), next(keys), 2 * HID, HID)
    w2, b2 = linear(next(keys), next(keys), HID, HID // 2)
    w3, b3 = linear(next(keys), next(keys), HID // 2, 1)

    def bn_fold(kg, kb, n):
        gamma = 1.0 + 0.1 * jax.random.normal(kg, (1, n), jnp.float32)
        beta = 0.1 * jax.random.normal(kb, (1, n), jnp.float32)
        run_mean = jnp.zeros((1, n), jnp.float32)   # eval-mode running stats
        run_var = jnp.ones((1, n), jnp.float32)
        scale = gamma / jnp.sqrt(run_var + BN_EPS)
        shift = beta - run_mean * scale
        return scale, shift

    s1, t1 = bn_fold(next(keys), next(keys), HID)
    s2, t2 = bn_fold(next(keys), next(keys), HID // 2)
    params["mlp"] = (w1, b1, s1, t1, w2, b2, s2, t2, w3, b3)
    return params


# ----------------------------- main ------------------------------------------
if __name__ == "__main__":
    key = jax.random.PRNGKey(0)
    k_tok, k_par = jax.random.split(key)

    B, T = 4, 8
    tokens = jax.random.randint(k_tok, (B, T), 0, INPUT_SIZE, dtype=jnp.int32)

    params = init_params(k_par)
    out = cpg_predictor_forward(tokens, params["emb"], params["lstm"], params["mlp"])
    out = jax.block_until_ready(out)

    assert out.shape == (B,), out.shape
    assert bool(jnp.all(jnp.isfinite(out)))
    assert bool(jnp.all(out >= 0.0))   # final F.relu
    print("KERNEL_OK")
</pallas_src>

<mosaic_0001>
module attributes {stable_mosaic.version = 11 : i64} {
  func.func @_fused_kernel(%arg0: memref<64x1xi32, #tpu.memory_space<vmem>>, %arg1: memref<8x512xbf16, #tpu.memory_space<vmem>>, %arg2: memref<8x512xbf16, #tpu.memory_space<vmem>>, %arg3: memref<128x512xbf16, #tpu.memory_space<vmem>>, %arg4: memref<128x512xbf16, #tpu.memory_space<vmem>>, %arg5: memref<1x512xf32, #tpu.memory_space<vmem>>, %arg6: memref<1x512xf32, #tpu.memory_space<vmem>>, %arg7: memref<1x512xf32, #tpu.memory_space<vmem>>, %arg8: memref<1x512xf32, #tpu.memory_space<vmem>>, %arg9: memref<2x256x512xbf16, #tpu.memory_space<any>>, %arg10: memref<2x128x512xbf16, #tpu.memory_space<any>>, %arg11: memref<256x128xbf16, #tpu.memory_space<any>>, %arg12: memref<1x128xf32, #tpu.memory_space<vmem>>, %arg13: memref<1x128xf32, #tpu.memory_space<vmem>>, %arg14: memref<1x128xf32, #tpu.memory_space<vmem>>, %arg15: memref<128x64xbf16, #tpu.memory_space<vmem>>, %arg16: memref<1x64xf32, #tpu.memory_space<vmem>>, %arg17: memref<1x64xf32, #tpu.memory_space<vmem>>, %arg18: memref<1x64xf32, #tpu.memory_space<vmem>>, %arg19: memref<64x128xbf16, #tpu.memory_space<vmem>>, %arg20: memref<1x128xf32, #tpu.memory_space<vmem>>, %arg21: memref<8x128xf32, #tpu.memory_space<vmem>>, %arg22: memref<2x256x512xbf16, #tpu.memory_space<vmem>>, %arg23: memref<2x128x512xbf16, #tpu.memory_space<vmem>>, %arg24: memref<256x128xbf16, #tpu.memory_space<vmem>>, %arg25: memref<3x!tpu.dma_semaphore, #tpu.memory_space<semaphore_mem>>) attributes {dimension_semantics = [], scalar_prefetch = 0 : i64, scratch_operands = 4 : i64, tpu.core_type = #tpu.core_type<tc>} {
    %c0_i32 = arith.constant 0 : i32
    %0 = tpu.memref_slice %arg25[%c0_i32] : memref<3x!tpu.dma_semaphore, #tpu.memory_space<semaphore_mem>> -> memref<1x!tpu.dma_semaphore, #tpu.memory_space<semaphore_mem>>
    %1 = tpu.memref_squeeze %0 : memref<1x!tpu.dma_semaphore, #tpu.memory_space<semaphore_mem>> -> memref<!tpu.dma_semaphore, #tpu.memory_space<semaphore_mem>>
    tpu.enqueue_dma source(%arg9 : memref<2x256x512xbf16, #tpu.memory_space<any>>) target(%arg22 : memref<2x256x512xbf16, #tpu.memory_space<vmem>>) target_semaphore(%1 : memref<!tpu.dma_semaphore, #tpu.memory_space<semaphore_mem>>)
    %c1_i32 = arith.constant 1 : i32
    %2 = tpu.memref_slice %arg25[%c1_i32] : memref<3x!tpu.dma_semaphore, #tpu.memory_space<semaphore_mem>> -> memref<1x!tpu.dma_semaphore, #tpu.memory_space<semaphore_mem>>
    %3 = tpu.memref_squeeze %2 : memref<1x!tpu.dma_semaphore, #tpu.memory_space<semaphore_mem>> -> memref<!tpu.dma_semaphore, #tpu.memory_space<semaphore_mem>>
    tpu.enqueue_dma source(%arg10 : memref<2x128x512xbf16, #tpu.memory_space<any>>) target(%arg23 : memref<2x128x512xbf16, #tpu.memory_space<vmem>>) target_semaphore(%3 : memref<!tpu.dma_semaphore, #tpu.memory_space<semaphore_mem>>)
    %c2_i32 = arith.constant 2 : i32
    %4 = tpu.memref_slice %arg25[%c2_i32] : memref<3x!tpu.dma_semaphore, #tpu.memory_space<semaphore_mem>> -> memref<1x!tpu.dma_semaphore, #tpu.memory_space<semaphore_mem>>
    %5 = tpu.memref_squeeze %4 : memref<1x!tpu.dma_semaphore, #tpu.memory_space<semaphore_mem>> -> memref<!tpu.dma_semaphore, #tpu.memory_space<semaphore_mem>>
    tpu.enqueue_dma source(%arg11 : memref<256x128xbf16, #tpu.memory_space<any>>) target(%arg24 : memref<256x128xbf16, #tpu.memory_space<vmem>>) target_semaphore(%5 : memref<!tpu.dma_semaphore, #tpu.memory_space<semaphore_mem>>)
    %c0 = arith.constant 0 : index
    %c0_0 = arith.constant 0 : index
    %6 = vector.load %arg0[%c0, %c0_0] : memref<64x1xi32, #tpu.memory_space<vmem>>, vector<64x1xi32>
    %7 = tpu.iota {dimensions = array<i32: 1>} : vector<64x8xi32>
    %8 = vector.broadcast %6 : vector<64x1xi32> to vector<64x8xi32>
    %9 = arith.cmpi eq, %8, %7 : vector<64x8xi32>
    %10 = arith.extui %9 : vector<64x8xi1> to vector<64x8xi32>
    %11 = arith.sitofp %10 : vector<64x8xi32> to vector<64x8xf32>
    %12 = arith.truncf %11 : vector<64x8xf32> to vector<64x8xbf16>
    %c0_1 = arith.constant 0 : index
    %c0_2 = arith.constant 0 : index
    %13 = vector.load %arg1[%c0_1, %c0_2] : memref<8x512xbf16, #tpu.memory_space<vmem>>, vector<8x512xbf16>
    %cst = arith.constant dense<0.000000e+00> : vector<64x512xf32>
    %14 = tpu.matmul %12, %13, %cst {dimension_numbers = #tpu.dot_dimension_numbers<[1], [0], [0], [1], [0, 0, 1, 1], [], []>} : vector<64x8xbf16>, vector<8x512xbf16>, vector<64x512xf32> -> vector<64x512xf32>
    %c0_3 = arith.constant 0 : index
    %c0_4 = arith.constant 0 : index
    %15 = vector.load %arg5[%c0_3, %c0_4] : memref<1x512xf32, #tpu.memory_space<vmem>>, vector<1x512xf32>
    %16 = vector.broadcast %15 : vector<1x512xf32> to vector<64x512xf32>
    %17 = arith.addf %14, %16 : vector<64x512xf32>
    %c0_5 = arith.constant 0 : index
    %c0_6 = arith.constant 0 : index
    %18 = vector.load %arg2[%c0_5, %c0_6] : memref<8x512xbf16, #tpu.memory_space<vmem>>, vector<8x512xbf16>
    %cst_7 = arith.constant dense<0.000000e+00> : vector<64x512xf32>
    %19 = tpu.matmul %12, %18, %cst_7 {dimension_numbers = #tpu.dot_dimension_numbers<[1], [0], [0], [1], [0, 0, 1, 1], [], []>} : vector<64x8xbf16>, vector<8x512xbf16>, vector<64x512xf32> -> vector<64x512xf32>
    %c0_8 = arith.constant 0 : index
    %c0_9 = arith.constant 0 : index
    %20 = vector.load %arg6[%c0_8, %c0_9] : memref<1x512xf32, #tpu.memory_space<vmem>>, vector<1x512xf32>
    %21 = vector.broadcast %20 : vector<1x512xf32> to vector<64x512xf32>
    %22 = arith.addf %19, %21 : vector<64x512xf32>
    %c0_10 = arith.constant 0 : index
    %c0_11 = arith.constant 0 : index
    %23 = vector.load %arg3[%c0_10, %c0_11] : memref<128x512xbf16, #tpu.memory_space<vmem>>, vector<128x512xbf16>
    %c0_12 = arith.constant 0 : index
    %c0_13 = arith.constant 0 : index
    %24 = vector.load %arg4[%c0_12, %c0_13] : memref<128x512xbf16, #tpu.memory_space<vmem>>, vector<128x512xbf16>
    %cst_14 = arith.constant 0.000000e+00 : f32
    %25 = vector.broadcast %cst_14 : f32 to vector<8x128xf32>
    %26 = vector.extract_strided_slice %17 {offsets = [0, 0], sizes = [8, 512], strides = [1, 1]} : vector<64x512xf32> to vector<8x512xf32>
    %27 = arith.truncf %25 : vector<8x128xf32> to vector<8x128xbf16>
    %cst_15 = arith.constant dense<0.000000e+00> : vector<8x512xf32>
    %28 = tpu.matmul %27, %23, %cst_15 {dimension_numbers = #tpu.dot_dimension_numbers<[1], [0], [0], [1], [0, 0, 1, 1], [], []>} : vector<8x128xbf16>, vector<128x512xbf16>, vector<8x512xf32> -> vector<8x512xf32>
    %29 = arith.addf %26, %28 : vector<8x512xf32>
    %30 = vector.extract_strided_slice %29 {offsets = [0, 0], sizes = [8, 384], strides = [1, 1]} : vector<8x512xf32> to vector<8x384xf32>
    %cst_16 = arith.constant 5.000000e-01 : f32
    %31 = vector.broadcast %cst_16 : f32 to vector<8x384xf32>
    %32 = arith.mulf %31, %30 : vector<8x384xf32>
    %33 = math.tanh %32 : vector<8x384xf32>
    %cst_17 = arith.constant 5.000000e-01 : f32
    %34 = vector.broadcast %cst_17 : f32 to vector<8x384xf32>
    %35 = arith.mulf %34, %33 : vector<8x384xf32>
    %cst_18 = arith.constant 5.000000e-01 : f32
    %36 = vector.broadcast %cst_18 : f32 to vector<8x384xf32>
    %37 = arith.addf %35, %36 : vector<8x384xf32>
    %38 = vector.extract_strided_slice %37 {offsets = [0, 0], sizes = [8, 128], strides = [1, 1]} : vector<8x384xf32> to vector<8x128xf32>
    %39 = vector.extract_strided_slice %37 {offsets = [0, 128], sizes = [8, 128], strides = [1, 1]} : vector<8x384xf32> to vector<8x128xf32>
    %40 = vector.extract_strided_slice %37 {offsets = [0, 256], sizes = [8, 128], strides = [1, 1]} : vector<8x384xf32> to vector<8x128xf32>
    %41 = vector.extract_strided_slice %29 {offsets = [0, 384], sizes = [8, 128], strides = [1, 1]} : vector<8x512xf32> to vector<8x128xf32>
    %42 = math.tanh %41 : vector<8x128xf32>
    %43 = arith.mulf %39, %25 : vector<8x128xf32>
    %44 = arith.mulf %38, %42 : vector<8x128xf32>
    %45 = arith.addf %43, %44 : vector<8x128xf32>
    %46 = math.tanh %45 : vector<8x128xf32>
    %47 = arith.mulf %40, %46 : vector<8x128xf32>
    %48 = vector.extract_strided_slice %22 {offsets = [56, 0], sizes = [8, 512], strides = [1, 1]} : vector<64x512xf32> to vector<8x512xf32>
    %49 = arith.truncf %25 : vector<8x128xf32> to vector<8x128xbf16>
    %cst_19 = arith.constant dense<0.000000e+00> : vector<8x512xf32>
    %50 = tpu.matmul %49, %24, %cst_19 {dimension_numbers = #tpu.dot_dimension_numbers<[1], [0], [0], [1], [0, 0, 1, 1], [], []>} : vector<8x128xbf16>, vector<128x512xbf16>, vector<8x512xf32> -> vector<8x512xf32>
    %51 = arith.addf %48, %50 : vector<8x512xf32>
    %52 = vector.extract_strided_slice %51 {offsets = [0, 0], sizes = [8, 384], strides = [1, 1]} : vector<8x512xf32> to vector<8x384xf32>
    %cst_20 = arith.constant 5.000000e-01 : f32
    %53 = vector.broadcast %cst_20 : f32 to vector<8x384xf32>
    %54 = arith.mulf %53, %52 : vector<8x384xf32>
    %55 = math.tanh %54 : vector<8x384xf32>
    %cst_21 = arith.constant 5.000000e-01 : f32
    %56 = vector.broadcast %cst_21 : f32 to vector<8x384xf32>
    %57 = arith.mulf %56, %55 : vector<8x384xf32>
    %cst_22 = arith.constant 5.000000e-01 : f32
    %58 = vector.broadcast %cst_22 : f32 to vector<8x384xf32>
    %59 = arith.addf %57, %58 : vector<8x384xf32>
    %60 = vector.extract_strided_slice %59 {offsets = [0, 0], sizes = [8, 128], strides = [1, 1]} : vector<8x384xf32> to vector<8x128xf32>
    %61 = vector.extract_strided_slice %59 {offsets = [0, 128], sizes = [8, 128], strides = [1, 1]} : vector<8x384xf32> to vector<8x128xf32>
    %62 = vector.extract_strided_slice %59 {offsets = [0, 256], sizes = [8, 128], strides = [1, 1]} : vector<8x384xf32> to vector<8x128xf32>
    %63 = vector.extract_strided_slice %51 {offsets = [0, 384], sizes = [8, 128], strides = [1, 1]} : vector<8x512xf32> to vector<8x128xf32>
    %64 = math.tanh %63 : vector<8x128xf32>
    %65 = arith.mulf %61, %25 : vector<8x128xf32>
    %66 = arith.mulf %60, %64 : vector<8x128xf32>
    %67 = arith.addf %65, %66 : vector<8x128xf32>
    %68 = math.tanh %67 : vector<8x128xf32>
    %69 = arith.mulf %62, %68 : vector<8x128xf32>
    %70 = vector.extract_strided_slice %17 {offsets = [8, 0], sizes = [8, 512], strides = [1, 1]} : vector<64x512xf32> to vector<8x512xf32>
    %71 = arith.truncf %47 : vector<8x128xf32> to vector<8x128xbf16>
    %cst_23 = arith.constant dense<0.000000e+00> : vector<8x512xf32>
    %72 = tpu.matmul %71, %23, %cst_23 {dimension_numbers = #tpu.dot_dimension_numbers<[1], [0], [0], [1], [0, 0, 1, 1], [], []>} : vector<8x128xbf16>, vector<128x512xbf16>, vector<8x512xf32> -> vector<8x512xf32>
    %73 = arith.addf %70, %72 : vector<8x512xf32>
    %74 = vector.extract_strided_slice %73 {offsets = [0, 0], sizes = [8, 384], strides = [1, 1]} : vector<8x512xf32> to vector<8x384xf32>
    %cst_24 = arith.constant 5.000000e-01 : f32
    %75 = vector.broadcast %cst_24 : f32 to vector<8x384xf32>
    %76 = arith.mulf %75, %74 : vector<8x384xf32>
    %77 = math.tanh %76 : vector<8x384xf32>
    %cst_25 = arith.constant 5.000000e-01 : f32
    %78 = vector.broadcast %cst_25 : f32 to vector<8x384xf32>
    %79 = arith.mulf %78, %77 : vector<8x384xf32>
    %cst_26 = arith.constant 5.000000e-01 : f32
    %80 = vector.broadcast %cst_26 : f32 to vector<8x384xf32>
    %81 = arith.addf %79, %80 : vector<8x384xf32>
    %82 = vector.extract_strided_slice %81 {offsets = [0, 0], sizes = [8, 128], strides = [1, 1]} : vector<8x384xf32> to vector<8x128xf32>
    %83 = vector.extract_strided_slice %81 {offsets = [0, 128], sizes = [8, 128], strides = [1, 1]} : vector<8x384xf32> to vector<8x128xf32>
    %84 = vector.extract_strided_slice %81 {offsets = [0, 256], sizes = [8, 128], strides = [1, 1]} : vector<8x384xf32> to vector<8x128xf32>
    %85 = vector.extract_strided_slice %73 {offsets = [0, 384], sizes = [8, 128], strides = [1, 1]} : vector<8x512xf32> to vector<8x128xf32>
    %86 = math.tanh %85 : vector<8x128xf32>
    %87 = arith.mulf %83, %45 : vector<8x128xf32>
    %88 = arith.mulf %82, %86 : vector<8x128xf32>
    %89 = arith.addf %87, %88 : vector<8x128xf32>
    %90 = math.tanh %89 : vector<8x128xf32>
    %91 = arith.mulf %84, %90 : vector<8x128xf32>
    %92 = vector.extract_strided_slice %22 {offsets = [48, 0], sizes = [8, 512], strides = [1, 1]} : vector<64x512xf32> to vector<8x512xf32>
    %93 = arith.truncf %69 : vector<8x128xf32> to vector<8x128xbf16>
    %cst_27 = arith.constant dense<0.000000e+00> : vector<8x512xf32>
    %94 = tpu.matmul %93, %24, %cst_27 {dimension_numbers = #tpu.dot_dimension_numbers<[1], [0], [0], [1], [0, 0, 1, 1], [], []>} : vector<8x128xbf16>, vector<128x512xbf16>, vector<8x512xf32> -> vector<8x512xf32>
    %95 = arith.addf %92, %94 : vector<8x512xf32>
    %96 = vector.extract_strided_slice %95 {offsets = [0, 0], sizes = [8, 384], strides = [1, 1]} : vector<8x512xf32> to vector<8x384xf32>
    %cst_28 = arith.constant 5.000000e-01 : f32
    %97 = vector.broadcast %cst_28 : f32 to vector<8x384xf32>
    %98 = arith.mulf %97, %96 : vector<8x384xf32>
    %99 = math.tanh %98 : vector<8x384xf32>
    %cst_29 = arith.constant 5.000000e-01 : f32
    %100 = vector.broadcast %cst_29 : f32 to vector<8x384xf32>
    %101 = arith.mulf %100, %99 : vector<8x384xf32>
    %cst_30 = arith.constant 5.000000e-01 : f32
    %102 = vector.broadcast %cst_30 : f32 to vector<8x384xf32>
    %103 = arith.addf %101, %102 : vector<8x384xf32>
    %104 = vector.extract_strided_slice %103 {offsets = [0, 0], sizes = [8, 128], strides = [1, 1]} : vector<8x384xf32> to vector<8x128xf32>
    %105 = vector.extract_strided_slice %103 {offsets = [0, 128], sizes = [8, 128], strides = [1, 1]} : vector<8x384xf32> to vector<8x128xf32>
    %106 = vector.extract_strided_slice %103 {offsets = [0, 256], sizes = [8, 128], strides = [1, 1]} : vector<8x384xf32> to vector<8x128xf32>
    %107 = vector.extract_strided_slice %95 {offsets = [0, 384], sizes = [8, 128], strides = [1, 1]} : vector<8x512xf32> to vector<8x128xf32>
    %108 = math.tanh %107 : vector<8x128xf32>
    %109 = arith.mulf %105, %67 : vector<8x128xf32>
    %110 = arith.mulf %104, %108 : vector<8x128xf32>
    %111 = arith.addf %109, %110 : vector<8x128xf32>
    %112 = math.tanh %111 : vector<8x128xf32>
    %113 = arith.mulf %106, %112 : vector<8x128xf32>
    %114 = vector.extract_strided_slice %17 {offsets = [16, 0], sizes = [8, 512], strides = [1, 1]} : vector<64x512xf32> to vector<8x512xf32>
    %115 = arith.truncf %91 : vector<8x128xf32> to vector<8x128xbf16>
    %cst_31 = arith.constant dense<0.000000e+00> : vector<8x512xf32>
    %116 = tpu.matmul %115, %23, %cst_31 {dimension_numbers = #tpu.dot_dimension_numbers<[1], [0], [0], [1], [0, 0, 1, 1], [], []>} : vector<8x128xbf16>, vector<128x512xbf16>, vector<8x512xf32> -> vector<8x512xf32>
    %117 = arith.addf %114, %116 : vector<8x512xf32>
    %118 = vector.extract_strided_slice %117 {offsets = [0, 0], sizes = [8, 384], strides = [1, 1]} : vector<8x512xf32> to vector<8x384xf32>
    %cst_32 = arith.constant 5.000000e-01 : f32
    %119 = vector.broadcast %cst_32 : f32 to vector<8x384xf32>
    %120 = arith.mulf %119, %118 : vector<8x384xf32>
    %121 = math.tanh %120 : vector<8x384xf32>
    %cst_33 = arith.constant 5.000000e-01 : f32
    %122 = vector.broadcast %cst_33 : f32 to vector<8x384xf32>
    %123 = arith.mulf %122, %121 : vector<8x384xf32>
    %cst_34 = arith.constant 5.000000e-01 : f32
    %124 = vector.broadcast %cst_34 : f32 to vector<8x384xf32>
    %125 = arith.addf %123, %124 : vector<8x384xf32>
    %126 = vector.extract_strided_slice %125 {offsets = [0, 0], sizes = [8, 128], strides = [1, 1]} : vector<8x384xf32> to vector<8x128xf32>
    %127 = vector.extract_strided_slice %125 {offsets = [0, 128], sizes = [8, 128], strides = [1, 1]} : vector<8x384xf32> to vector<8x128xf32>
    %128 = vector.extract_strided_slice %125 {offsets = [0, 256], sizes = [8, 128], strides = [1, 1]} : vector<8x384xf32> to vector<8x128xf32>
    %129 = vector.extract_strided_slice %117 {offsets = [0, 384], sizes = [8, 128], strides = [1, 1]} : vector<8x512xf32> to vector<8x128xf32>
    %130 = math.tanh %129 : vector<8x128xf32>
    %131 = arith.mulf %127, %89 : vector<8x128xf32>
    %132 = arith.mulf %126, %130 : vector<8x128xf32>
    %133 = arith.addf %131, %132 : vector<8x128xf32>
    %134 = math.tanh %133 : vector<8x128xf32>
    %135 = arith.mulf %128, %134 : vector<8x128xf32>
    %136 = vector.extract_strided_slice %22 {offsets = [40, 0], sizes = [8, 512], strides = [1, 1]} : vector<64x512xf32> to vector<8x512xf32>
    %137 = arith.truncf %113 : vector<8x128xf32> to vector<8x128xbf16>
    %cst_35 = arith.constant dense<0.000000e+00> : vector<8x512xf32>
    %138 = tpu.matmul %137, %24, %cst_35 {dimension_numbers = #tpu.dot_dimension_numbers<[1], [0], [0], [1], [0, 0, 1, 1], [], []>} : vector<8x128xbf16>, vector<128x512xbf16>, vector<8x512xf32> -> vector<8x512xf32>
    %139 = arith.addf %136, %138 : vector<8x512xf32>
    %140 = vector.extract_strided_slice %139 {offsets = [0, 0], sizes = [8, 384], strides = [1, 1]} : vector<8x512xf32> to vector<8x384xf32>
    %cst_36 = arith.constant 5.000000e-01 : f32
    %141 = vector.broadcast %cst_36 : f32 to vector<8x384xf32>
    %142 = arith.mulf %141, %140 : vector<8x384xf32>
    %143 = math.tanh %142 : vector<8x384xf32>
    %cst_37 = arith.constant 5.000000e-01 : f32
    %144 = vector.broadcast %cst_37 : f32 to vector<8x384xf32>
    %145 = arith.mulf %144, %143 : vector<8x384xf32>
    %cst_38 = arith.constant 5.000000e-01 : f32
    %146 = vector.broadcast %cst_38 : f32 to vector<8x384xf32>
    %147 = arith.addf %145, %146 : vector<8x384xf32>
    %148 = vector.extract_strided_slice %147 {offsets = [0, 0], sizes = [8, 128], strides = [1, 1]} : vector<8x384xf32> to vector<8x128xf32>
    %149 = vector.extract_strided_slice %147 {offsets = [0, 128], sizes = [8, 128], strides = [1, 1]} : vector<8x384xf32> to vector<8x128xf32>
    %150 = vector.extract_strided_slice %147 {offsets = [0, 256], sizes = [8, 128], strides = [1, 1]} : vector<8x384xf32> to vector<8x128xf32>
    %151 = vector.extract_strided_slice %139 {offsets = [0, 384], sizes = [8, 128], strides = [1, 1]} : vector<8x512xf32> to vector<8x128xf32>
    %152 = math.tanh %151 : vector<8x128xf32>
    %153 = arith.mulf %149, %111 : vector<8x128xf32>
    %154 = arith.mulf %148, %152 : vector<8x128xf32>
    %155 = arith.addf %153, %154 : vector<8x128xf32>
    %156 = math.tanh %155 : vector<8x128xf32>
    %157 = arith.mulf %150, %156 : vector<8x128xf32>
    %158 = vector.extract_strided_slice %17 {offsets = [24, 0], sizes = [8, 512], strides = [1, 1]} : vector<64x512xf32> to vector<8x512xf32>
    %159 = arith.truncf %135 : vector<8x128xf32> to vector<8x128xbf16>
    %cst_39 = arith.constant dense<0.000000e+00> : vector<8x512xf32>
    %160 = tpu.matmul %159, %23, %cst_39 {dimension_numbers = #tpu.dot_dimension_numbers<[1], [0], [0], [1], [0, 0, 1, 1], [], []>} : vector<8x128xbf16>, vector<128x512xbf16>, vector<8x512xf32> -> vector<8x512xf32>
    %161 = arith.addf %158, %160 : vector<8x512xf32>
    %162 = vector.extract_strided_slice %161 {offsets = [0, 0], sizes = [8, 384], strides = [1, 1]} : vector<8x512xf32> to vector<8x384xf32>
    %cst_40 = arith.constant 5.000000e-01 : f32
    %163 = vector.broadcast %cst_40 : f32 to vector<8x384xf32>
    %164 = arith.mulf %163, %162 : vector<8x384xf32>
    %165 = math.tanh %164 : vector<8x384xf32>
    %cst_41 = arith.constant 5.000000e-01 : f32
    %166 = vector.broadcast %cst_41 : f32 to vector<8x384xf32>
    %167 = arith.mulf %166, %165 : vector<8x384xf32>
    %cst_42 = arith.constant 5.000000e-01 : f32
    %168 = vector.broadcast %cst_42 : f32 to vector<8x384xf32>
    %169 = arith.addf %167, %168 : vector<8x384xf32>
    %170 = vector.extract_strided_slice %169 {offsets = [0, 0], sizes = [8, 128], strides = [1, 1]} : vector<8x384xf32> to vector<8x128xf32>
    %171 = vector.extract_strided_slice %169 {offsets = [0, 128], sizes = [8, 128], strides = [1, 1]} : vector<8x384xf32> to vector<8x128xf32>
    %172 = vector.extract_strided_slice %169 {offsets = [0, 256], sizes = [8, 128], strides = [1, 1]} : vector<8x384xf32> to vector<8x128xf32>
    %173 = vector.extract_strided_slice %161 {offsets = [0, 384], sizes = [8, 128], strides = [1, 1]} : vector<8x512xf32> to vector<8x128xf32>
    %174 = math.tanh %173 : vector<8x128xf32>
    %175 = arith.mulf %171, %133 : vector<8x128xf32>
    %176 = arith.mulf %170, %174 : vector<8x128xf32>
    %177 = arith.addf %175, %176 : vector<8x128xf32>
    %178 = math.tanh %177 : vector<8x128xf32>
    %179 = arith.mulf %172, %178 : vector<8x128xf32>
    %180 = vector.extract_strided_slice %22 {offsets = [32, 0], sizes = [8, 512], strides = [1, 1]} : vector<64x512xf32> to vector<8x512xf32>
    %181 = arith.truncf %157 : vector<8x128xf32> to vector<8x128xbf16>
    %cst_43 = arith.constant dense<0.000000e+00> : vector<8x512xf32>
    %182 = tpu.matmul %181, %24, %cst_43 {dimension_numbers = #tpu.dot_dimension_numbers<[1], [0], [0], [1], [0, 0, 1, 1], [], []>} : vector<8x128xbf16>, vector<128x512xbf16>, vector<8x512xf32> -> vector<8x512xf32>
    %183 = arith.addf %180, %182 : vector<8x512xf32>
    %184 = vector.extract_strided_slice %183 {offsets = [0, 0], sizes = [8, 384], strides = [1, 1]} : vector<8x512xf32> to vector<8x384xf32>
    %cst_44 = arith.constant 5.000000e-01 : f32
    %185 = vector.broadcast %cst_44 : f32 to vector<8x384xf32>
    %186 = arith.mulf %185, %184 : vector<8x384xf32>
    %187 = math.tanh %186 : vector<8x384xf32>
    %cst_45 = arith.constant 5.000000e-01 : f32
    %188 = vector.broadcast %cst_45 : f32 to vector<8x384xf32>
    %189 = arith.mulf %188, %187 : vector<8x384xf32>
    %cst_46 = arith.constant 5.000000e-01 : f32
    %190 = vector.broadcast %cst_46 : f32 to vector<8x384xf32>
    %191 = arith.addf %189, %190 : vector<8x384xf32>
    %192 = vector.extract_strided_slice %191 {offsets = [0, 0], sizes = [8, 128], strides = [1, 1]} : vector<8x384xf32> to vector<8x128xf32>
    %193 = vector.extract_strided_slice %191 {offsets = [0, 128], sizes = [8, 128], strides = [1, 1]} : vector<8x384xf32> to vector<8x128xf32>
    %194 = vector.extract_strided_slice %191 {offsets = [0, 256], sizes = [8, 128], strides = [1, 1]} : vector<8x384xf32> to vector<8x128xf32>
    %195 = vector.extract_strided_slice %183 {offsets = [0, 384], sizes = [8, 128], strides = [1, 1]} : vector<8x512xf32> to vector<8x128xf32>
    %196 = math.tanh %195 : vector<8x128xf32>
    %197 = arith.mulf %193, %155 : vector<8x128xf32>
    %198 = arith.mulf %192, %196 : vector<8x128xf32>
    %199 = arith.addf %197, %198 : vector<8x128xf32>
    %200 = math.tanh %199 : vector<8x128xf32>
    %201 = arith.mulf %194, %200 : vector<8x128xf32>
    %202 = vector.extract_strided_slice %17 {offsets = [32, 0], sizes = [8, 512], strides = [1, 1]} : vector<64x512xf32> to vector<8x512xf32>
    %203 = arith.truncf %179 : vector<8x128xf32> to vector<8x128xbf16>
    %cst_47 = arith.constant dense<0.000000e+00> : vector<8x512xf32>
    %204 = tpu.matmul %203, %23, %cst_47 {dimension_numbers = #tpu.dot_dimension_numbers<[1], [0], [0], [1], [0, 0, 1, 1], [], []>} : vector<8x128xbf16>, vector<128x512xbf16>, vector<8x512xf32> -> vector<8x512xf32>
    %205 = arith.addf %202, %204 : vector<8x512xf32>
    %206 = vector.extract_strided_slice %205 {offsets = [0, 0], sizes = [8, 384], strides = [1, 1]} : vector<8x512xf32> to vector<8x384xf32>
    %cst_48 = arith.constant 5.000000e-01 : f32
    %207 = vector.broadcast %cst_48 : f32 to vector<8x384xf32>
    %208 = arith.mulf %207, %206 : vector<8x384xf32>
    %209 = math.tanh %208 : vector<8x384xf32>
    %cst_49 = arith.constant 5.000000e-01 : f32
    %210 = vector.broadcast %cst_49 : f32 to vector<8x384xf32>
    %211 = arith.mulf %210, %209 : vector<8x384xf32>
    %cst_50 = arith.constant 5.000000e-01 : f32
    %212 = vector.broadcast %cst_50 : f32 to vector<8x384xf32>
    %213 = arith.addf %211, %212 : vector<8x384xf32>
    %214 = vector.extract_strided_slice %213 {offsets = [0, 0], sizes = [8, 128], strides = [1, 1]} : vector<8x384xf32> to vector<8x128xf32>
    %215 = vector.extract_strided_slice %213 {offsets = [0, 128], sizes = [8, 128], strides = [1, 1]} : vector<8x384xf32> to vector<8x128xf32>
    %216 = vector.extract_strided_slice %213 {offsets = [0, 256], sizes = [8, 128], strides = [1, 1]} : vector<8x384xf32> to vector<8x128xf32>
    %217 = vector.extract_strided_slice %205 {offsets = [0, 384], sizes = [8, 128], strides = [1, 1]} : vector<8x512xf32> to vector<8x128xf32>
    %218 = math.tanh %217 : vector<8x128xf32>
    %219 = arith.mulf %215, %177 : vector<8x128xf32>
    %220 = arith.mulf %214, %218 : vector<8x128xf32>
    %221 = arith.addf %219, %220 : vector<8x128xf32>
    %222 = math.tanh %221 : vector<8x128xf32>
    %223 = arith.mulf %216, %222 : vector<8x128xf32>
    %224 = vector.extract_strided_slice %22 {offsets = [24, 0], sizes = [8, 512], strides = [1, 1]} : vector<64x512xf32> to vector<8x512xf32>
    %225 = arith.truncf %201 : vector<8x128xf32> to vector<8x128xbf16>
    %cst_51 = arith.constant dense<0.000000e+00> : vector<8x512xf32>
    %226 = tpu.matmul %225, %24, %cst_51 {dimension_numbers = #tpu.dot_dimension_numbers<[1], [0], [0], [1], [0, 0, 1, 1], [], []>} : vector<8x128xbf16>, vector<128x512xbf16>, vector<8x512xf32> -> vector<8x512xf32>
    %227 = arith.addf %224, %226 : vector<8x512xf32>
    %228 = vector.extract_strided_slice %227 {offsets = [0, 0], sizes = [8, 384], strides = [1, 1]} : vector<8x512xf32> to vector<8x384xf32>
    %cst_52 = arith.constant 5.000000e-01 : f32
    %229 = vector.broadcast %cst_52 : f32 to vector<8x384xf32>
    %230 = arith.mulf %229, %228 : vector<8x384xf32>
    %231 = math.tanh %230 : vector<8x384xf32>
    %cst_53 = arith.constant 5.000000e-01 : f32
    %232 = vector.broadcast %cst_53 : f32 to vector<8x384xf32>
    %233 = arith.mulf %232, %231 : vector<8x384xf32>
    %cst_54 = arith.constant 5.000000e-01 : f32
    %234 = vector.broadcast %cst_54 : f32 to vector<8x384xf32>
    %235 = arith.addf %233, %234 : vector<8x384xf32>
    %236 = vector.extract_strided_slice %235 {offsets = [0, 0], sizes = [8, 128], strides = [1, 1]} : vector<8x384xf32> to vector<8x128xf32>
    %237 = vector.extract_strided_slice %235 {offsets = [0, 128], sizes = [8, 128], strides = [1, 1]} : vector<8x384xf32> to vector<8x128xf32>
    %238 = vector.extract_strided_slice %235 {offsets = [0, 256], sizes = [8, 128], strides = [1, 1]} : vector<8x384xf32> to vector<8x128xf32>
    %239 = vector.extract_strided_slice %227 {offsets = [0, 384], sizes = [8, 128], strides = [1, 1]} : vector<8x512xf32> to vector<8x128xf32>
    %240 = math.tanh %239 : vector<8x128xf32>
    %241 = arith.mulf %237, %199 : vector<8x128xf32>
    %242 = arith.mulf %236, %240 : vector<8x128xf32>
    %243 = arith.addf %241, %242 : vector<8x128xf32>
    %244 = math.tanh %243 : vector<8x128xf32>
    %245 = arith.mulf %238, %244 : vector<8x128xf32>
    %246 = vector.extract_strided_slice %17 {offsets = [40, 0], sizes = [8, 512], strides = [1, 1]} : vector<64x512xf32> to vector<8x512xf32>
    %247 = arith.truncf %223 : vector<8x128xf32> to vector<8x128xbf16>
    %cst_55 = arith.constant dense<0.000000e+00> : vector<8x512xf32>
    %248 = tpu.matmul %247, %23, %cst_55 {dimension_numbers = #tpu.dot_dimension_numbers<[1], [0], [0], [1], [0, 0, 1, 1], [], []>} : vector<8x128xbf16>, vector<128x512xbf16>, vector<8x512xf32> -> vector<8x512xf32>
    %249 = arith.addf %246, %248 : vector<8x512xf32>
    %250 = vector.extract_strided_slice %249 {offsets = [0, 0], sizes = [8, 384], strides = [1, 1]} : vector<8x512xf32> to vector<8x384xf32>
    %cst_56 = arith.constant 5.000000e-01 : f32
    %251 = vector.broadcast %cst_56 : f32 to vector<8x384xf32>
    %252 = arith.mulf %251, %250 : vector<8x384xf32>
    %253 = math.tanh %252 : vector<8x384xf32>
    %cst_57 = arith.constant 5.000000e-01 : f32
    %254 = vector.broadcast %cst_57 : f32 to vector<8x384xf32>
    %255 = arith.mulf %254, %253 : vector<8x384xf32>
    %cst_58 = arith.constant 5.000000e-01 : f32
    %256 = vector.broadcast %cst_58 : f32 to vector<8x384xf32>
    %257 = arith.addf %255, %256 : vector<8x384xf32>
    %258 = vector.extract_strided_slice %257 {offsets = [0, 0], sizes = [8, 128], strides = [1, 1]} : vector<8x384xf32> to vector<8x128xf32>
    %259 = vector.extract_strided_slice %257 {offsets = [0, 128], sizes = [8, 128], strides = [1, 1]} : vector<8x384xf32> to vector<8x128xf32>
    %260 = vector.extract_strided_slice %257 {offsets = [0, 256], sizes = [8, 128], strides = [1, 1]} : vector<8x384xf32> to vector<8x128xf32>
    %261 = vector.extract_strided_slice %249 {offsets = [0, 384], sizes = [8, 128], strides = [1, 1]} : vector<8x512xf32> to vector<8x128xf32>
    %262 = math.tanh %261 : vector<8x128xf32>
    %263 = arith.mulf %259, %221 : vector<8x128xf32>
    %264 = arith.mulf %258, %262 : vector<8x128xf32>
    %265 = arith.addf %263, %264 : vector<8x128xf32>
    %266 = math.tanh %265 : vector<8x128xf32>
    %267 = arith.mulf %260, %266 : vector<8x128xf32>
    %268 = vector.extract_strided_slice %22 {offsets = [16, 0], sizes = [8, 512], strides = [1, 1]} : vector<64x512xf32> to vector<8x512xf32>
    %269 = arith.truncf %245 : vector<8x128xf32> to vector<8x128xbf16>
    %cst_59 = arith.constant dense<0.000000e+00> : vector<8x512xf32>
    %270 = tpu.matmul %269, %24, %cst_59 {dimension_numbers = #tpu.dot_dimension_numbers<[1], [0], [0], [1], [0, 0, 1, 1], [], []>} : vector<8x128xbf16>, vector<128x512xbf16>, vector<8x512xf32> -> vector<8x512xf32>
    %271 = arith.addf %268, %270 : vector<8x512xf32>
    %272 = vector.extract_strided_slice %271 {offsets = [0, 0], sizes = [8, 384], strides = [1, 1]} : vector<8x512xf32> to vector<8x384xf32>
    %cst_60 = arith.constant 5.000000e-01 : f32
    %273 = vector.broadcast %cst_60 : f32 to vector<8x384xf32>
    %274 = arith.mulf %273, %272 : vector<8x384xf32>
    %275 = math.tanh %274 : vector<8x384xf32>
    %cst_61 = arith.constant 5.000000e-01 : f32
    %276 = vector.broadcast %cst_61 : f32 to vector<8x384xf32>
    %277 = arith.mulf %276, %275 : vector<8x384xf32>
    %cst_62 = arith.constant 5.000000e-01 : f32
    %278 = vector.broadcast %cst_62 : f32 to vector<8x384xf32>
    %279 = arith.addf %277, %278 : vector<8x384xf32>
    %280 = vector.extract_strided_slice %279 {offsets = [0, 0], sizes = [8, 128], strides = [1, 1]} : vector<8x384xf32> to vector<8x128xf32>
    %281 = vector.extract_strided_slice %279 {offsets = [0, 128], sizes = [8, 128], strides = [1, 1]} : vector<8x384xf32> to vector<8x128xf32>
    %282 = vector.extract_strided_slice %279 {offsets = [0, 256], sizes = [8, 128], strides = [1, 1]} : vector<8x384xf32> to vector<8x128xf32>
    %283 = vector.extract_strided_slice %271 {offsets = [0, 384], sizes = [8, 128], strides = [1, 1]} : vector<8x512xf32> to vector<8x128xf32>
    %284 = math.tanh %283 : vector<8x128xf32>
    %285 = arith.mulf %281, %243 : vector<8x128xf32>
    %286 = arith.mulf %280, %284 : vector<8x128xf32>
    %287 = arith.addf %285, %286 : vector<8x128xf32>
    %288 = math.tanh %287 : vector<8x128xf32>
    %289 = arith.mulf %282, %288 : vector<8x128xf32>
    %290 = vector.extract_strided_slice %17 {offsets = [48, 0], sizes = [8, 512], strides = [1, 1]} : vector<64x512xf32> to vector<8x512xf32>
    %291 = arith.truncf %267 : vector<8x128xf32> to vector<8x128xbf16>
    %cst_63 = arith.constant dense<0.000000e+00> : vector<8x512xf32>
    %292 = tpu.matmul %291, %23, %cst_63 {dimension_numbers = #tpu.dot_dimension_numbers<[1], [0], [0], [1], [0, 0, 1, 1], [], []>} : vector<8x128xbf16>, vector<128x512xbf16>, vector<8x512xf32> -> vector<8x512xf32>
    %293 = arith.addf %290, %292 : vector<8x512xf32>
    %294 = vector.extract_strided_slice %293 {offsets = [0, 0], sizes = [8, 384], strides = [1, 1]} : vector<8x512xf32> to vector<8x384xf32>
    %cst_64 = arith.constant 5.000000e-01 : f32
    %295 = vector.broadcast %cst_64 : f32 to vector<8x384xf32>
    %296 = arith.mulf %295, %294 : vector<8x384xf32>
    %297 = math.tanh %296 : vector<8x384xf32>
    %cst_65 = arith.constant 5.000000e-01 : f32
    %298 = vector.broadcast %cst_65 : f32 to vector<8x384xf32>
    %299 = arith.mulf %298, %297 : vector<8x384xf32>
    %cst_66 = arith.constant 5.000000e-01 : f32
    %300 = vector.broadcast %cst_66 : f32 to vector<8x384xf32>
    %301 = arith.addf %299, %300 : vector<8x384xf32>
    %302 = vector.extract_strided_slice %301 {offsets = [0, 0], sizes = [8, 128], strides = [1, 1]} : vector<8x384xf32> to vector<8x128xf32>
    %303 = vector.extract_strided_slice %301 {offsets = [0, 128], sizes = [8, 128], strides = [1, 1]} : vector<8x384xf32> to vector<8x128xf32>
    %304 = vector.extract_strided_slice %301 {offsets = [0, 256], sizes = [8, 128], strides = [1, 1]} : vector<8x384xf32> to vector<8x128xf32>
    %305 = vector.extract_strided_slice %293 {offsets = [0, 384], sizes = [8, 128], strides = [1, 1]} : vector<8x512xf32> to vector<8x128xf32>
    %306 = math.tanh %305 : vector<8x128xf32>
    %307 = arith.mulf %303, %265 : vector<8x128xf32>
    %308 = arith.mulf %302, %306 : vector<8x128xf32>
    %309 = arith.addf %307, %308 : vector<8x128xf32>
    %310 = math.tanh %309 : vector<8x128xf32>
    %311 = arith.mulf %304, %310 : vector<8x128xf32>
    %312 = vector.extract_strided_slice %22 {offsets = [8, 0], sizes = [8, 512], strides = [1, 1]} : vector<64x512xf32> to vector<8x512xf32>
    %313 = arith.truncf %289 : vector<8x128xf32> to vector<8x128xbf16>
    %cst_67 = arith.constant dense<0.000000e+00> : vector<8x512xf32>
    %314 = tpu.matmul %313, %24, %cst_67 {dimension_numbers = #tpu.dot_dimension_numbers<[1], [0], [0], [1], [0, 0, 1, 1], [], []>} : vector<8x128xbf16>, vector<128x512xbf16>, vector<8x512xf32> -> vector<8x512xf32>
    %315 = arith.addf %312, %314 : vector<8x512xf32>
    %316 = vector.extract_strided_slice %315 {offsets = [0, 0], sizes = [8, 384], strides = [1, 1]} : vector<8x512xf32> to vector<8x384xf32>
    %cst_68 = arith.constant 5.000000e-01 : f32
    %317 = vector.broadcast %cst_68 : f32 to vector<8x384xf32>
    %318 = arith.mulf %317, %316 : vector<8x384xf32>
    %319 = math.tanh %318 : vector<8x384xf32>
    %cst_69 = arith.constant 5.000000e-01 : f32
    %320 = vector.broadcast %cst_69 : f32 to vector<8x384xf32>
    %321 = arith.mulf %320, %319 : vector<8x384xf32>
    %cst_70 = arith.constant 5.000000e-01 : f32
    %322 = vector.broadcast %cst_70 : f32 to vector<8x384xf32>
    %323 = arith.addf %321, %322 : vector<8x384xf32>
    %324 = vector.extract_strided_slice %323 {offsets = [0, 0], sizes = [8, 128], strides = [1, 1]} : vector<8x384xf32> to vector<8x128xf32>
    %325 = vector.extract_strided_slice %323 {offsets = [0, 128], sizes = [8, 128], strides = [1, 1]} : vector<8x384xf32> to vector<8x128xf32>
    %326 = vector.extract_strided_slice %323 {offsets = [0, 256], sizes = [8, 128], strides = [1, 1]} : vector<8x384xf32> to vector<8x128xf32>
    %327 = vector.extract_strided_slice %315 {offsets = [0, 384], sizes = [8, 128], strides = [1, 1]} : vector<8x512xf32> to vector<8x128xf32>
    %328 = math.tanh %327 : vector<8x128xf32>
    %329 = arith.mulf %325, %287 : vector<8x128xf32>
    %330 = arith.mulf %324, %328 : vector<8x128xf32>
    %331 = arith.addf %329, %330 : vector<8x128xf32>
    %332 = math.tanh %331 : vector<8x128xf32>
    %333 = arith.mulf %326, %332 : vector<8x128xf32>
    %334 = vector.extract_strided_slice %17 {offsets = [56, 0], sizes = [8, 512], strides = [1, 1]} : vector<64x512xf32> to vector<8x512xf32>
    %335 = arith.truncf %311 : vector<8x128xf32> to vector<8x128xbf16>
    %cst_71 = arith.constant dense<0.000000e+00> : vector<8x512xf32>
    %336 = tpu.matmul %335, %23, %cst_71 {dimension_numbers = #tpu.dot_dimension_numbers<[1], [0], [0], [1], [0, 0, 1, 1], [], []>} : vector<8x128xbf16>, vector<128x512xbf16>, vector<8x512xf32> -> vector<8x512xf32>
    %337 = arith.addf %334, %336 : vector<8x512xf32>
    %338 = vector.extract_strided_slice %337 {offsets = [0, 0], sizes = [8, 384], strides = [1, 1]} : vector<8x512xf32> to vector<8x384xf32>
    %cst_72 = arith.constant 5.000000e-01 : f32
    %339 = vector.broadcast %cst_72 : f32 to vector<8x384xf32>
    %340 = arith.mulf %339, %338 : vector<8x384xf32>
    %341 = math.tanh %340 : vector<8x384xf32>
    %cst_73 = arith.constant 5.000000e-01 : f32
    %342 = vector.broadcast %cst_73 : f32 to vector<8x384xf32>
    %343 = arith.mulf %342, %341 : vector<8x384xf32>
    %cst_74 = arith.constant 5.000000e-01 : f32
    %344 = vector.broadcast %cst_74 : f32 to vector<8x384xf32>
    %345 = arith.addf %343, %344 : vector<8x384xf32>
    %346 = vector.extract_strided_slice %345 {offsets = [0, 0], sizes = [8, 128], strides = [1, 1]} : vector<8x384xf32> to vector<8x128xf32>
    %347 = vector.extract_strided_slice %345 {offsets = [0, 128], sizes = [8, 128], strides = [1, 1]} : vector<8x384xf32> to vector<8x128xf32>
    %348 = vector.extract_strided_slice %345 {offsets = [0, 256], sizes = [8, 128], strides = [1, 1]} : vector<8x384xf32> to vector<8x128xf32>
    %349 = vector.extract_strided_slice %337 {offsets = [0, 384], sizes = [8, 128], strides = [1, 1]} : vector<8x512xf32> to vector<8x128xf32>
    %350 = math.tanh %349 : vector<8x128xf32>
    %351 = arith.mulf %347, %309 : vector<8x128xf32>
    %352 = arith.mulf %346, %350 : vector<8x128xf32>
    %353 = arith.addf %351, %352 : vector<8x128xf32>
    %354 = math.tanh %353 : vector<8x128xf32>
    %355 = arith.mulf %348, %354 : vector<8x128xf32>
    %356 = vector.extract_strided_slice %22 {offsets = [0, 0], sizes = [8, 512], strides = [1, 1]} : vector<64x512xf32> to vector<8x512xf32>
    %357 = arith.truncf %333 : vector<8x128xf32> to vector<8x128xbf16>
    %cst_75 = arith.constant dense<0.000000e+00> : vector<8x512xf32>
    %358 = tpu.matmul %357, %24, %cst_75 {dimension_numbers = #tpu.dot_dimension_numbers<[1], [0], [0], [1], [0, 0, 1, 1], [], []>} : vector<8x128xbf16>, vector<128x512xbf16>, vector<8x512xf32> -> vector<8x512xf32>
    %359 = arith.addf %356, %358 : vector<8x512xf32>
    %360 = vector.extract_strided_slice %359 {offsets = [0, 0], sizes = [8, 384], strides = [1, 1]} : vector<8x512xf32> to vector<8x384xf32>
    %cst_76 = arith.constant 5.000000e-01 : f32
    %361 = vector.broadcast %cst_76 : f32 to vector<8x384xf32>
    %362 = arith.mulf %361, %360 : vector<8x384xf32>
    %363 = math.tanh %362 : vector<8x384xf32>
    %cst_77 = arith.constant 5.000000e-01 : f32
    %364 = vector.broadcast %cst_77 : f32 to vector<8x384xf32>
    %365 = arith.mulf %364, %363 : vector<8x384xf32>
    %cst_78 = arith.constant 5.000000e-01 : f32
    %366 = vector.broadcast %cst_78 : f32 to vector<8x384xf32>
    %367 = arith.addf %365, %366 : vector<8x384xf32>
    %368 = vector.extract_strided_slice %367 {offsets = [0, 0], sizes = [8, 128], strides = [1, 1]} : vector<8x384xf32> to vector<8x128xf32>
    %369 = vector.extract_strided_slice %367 {offsets = [0, 128], sizes = [8, 128], strides = [1, 1]} : vector<8x384xf32> to vector<8x128xf32>
    %370 = vector.extract_strided_slice %367 {offsets = [0, 256], sizes = [8, 128], strides = [1, 1]} : vector<8x384xf32> to vector<8x128xf32>
    %371 = vector.extract_strided_slice %359 {offsets = [0, 384], sizes = [8, 128], strides = [1, 1]} : vector<8x512xf32> to vector<8x128xf32>
    %372 = math.tanh %371 : vector<8x128xf32>
    %373 = arith.mulf %369, %331 : vector<8x128xf32>
    %374 = arith.mulf %368, %372 : vector<8x128xf32>
    %375 = arith.addf %373, %374 : vector<8x128xf32>
    %376 = math.tanh %375 : vector<8x128xf32>
    %377 = arith.mulf %370, %376 : vector<8x128xf32>
    %378 = tpu.concatenate %47, %377 in 1 : vector<8x128xf32>, vector<8x128xf32> -> vector<8x256xf32>
    %379 = tpu.concatenate %91, %333 in 1 : vector<8x128xf32>, vector<8x128xf32> -> vector<8x256xf32>
    %380 = tpu.concatenate %135, %289 in 1 : vector<8x128xf32>, vector<8x128xf32> -> vector<8x256xf32>
    %381 = tpu.concatenate %179, %245 in 1 : vector<8x128xf32>, vector<8x128xf32> -> vector<8x256xf32>
    %382 = tpu.concatenate %223, %201 in 1 : vector<8x128xf32>, vector<8x128xf32> -> vector<8x256xf32>
    %383 = tpu.concatenate %267, %157 in 1 : vector<8x128xf32>, vector<8x128xf32> -> vector<8x256xf32>
    %384 = tpu.concatenate %311, %113 in 1 : vector<8x128xf32>, vector<8x128xf32> -> vector<8x256xf32>
    %385 = tpu.concatenate %355, %69 in 1 : vector<8x128xf32>, vector<8x128xf32> -> vector<8x256xf32>
    %386 = tpu.concatenate %378, %379, %380, %381, %382, %383, %384, %385 in 0 : vector<8x256xf32>, vector<8x256xf32>, vector<8x256xf32>, vector<8x256xf32>, vector<8x256xf32>, vector<8x256xf32>, vector<8x256xf32>, vector<8x256xf32> -> vector<64x256xf32>
    %387 = arith.truncf %386 : vector<64x256xf32> to vector<64x256xbf16>
    %c0_i32_79 = arith.constant 0 : i32
    %388 = tpu.memref_slice %arg25[%c0_i32_79] : memref<3x!tpu.dma_semaphore, #tpu.memory_space<semaphore_mem>> -> memref<1x!tpu.dma_semaphore, #tpu.memory_space<semaphore_mem>>
    %389 = tpu.memref_squeeze %388 : memref<1x!tpu.dma_semaphore, #tpu.memory_space<semaphore_mem>> -> memref<!tpu.dma_semaphore, #tpu.memory_space<semaphore_mem>>
    tpu.wait_dma2 semaphore(%389 : memref<!tpu.dma_semaphore, #tpu.memory_space<semaphore_mem>>) src(%arg9 : memref<2x256x512xbf16, #tpu.memory_space<any>>) dst(%arg22 : memref<2x256x512xbf16, #tpu.memory_space<vmem>>)
    %c1_i32_80 = arith.constant 1 : i32
    %390 = tpu.memref_slice %arg25[%c1_i32_80] : memref<3x!tpu.dma_semaphore, #tpu.memory_space<semaphore_mem>> -> memref<1x!tpu.dma_semaphore, #tpu.memory_space<semaphore_mem>>
    %391 = tpu.memref_squeeze %390 : memref<1x!tpu.dma_semaphore, #tpu.memory_space<semaphore_mem>> -> memref<!tpu.dma_semaphore, #tpu.memory_space<semaphore_mem>>
    tpu.wait_dma2 semaphore(%391 : memref<!tpu.dma_semaphore, #tpu.memory_space<semaphore_mem>>) src(%arg10 : memref<2x128x512xbf16, #tpu.memory_space<any>>) dst(%arg23 : memref<2x128x512xbf16, #tpu.memory_space<vmem>>)
    %c2_i32_81 = arith.constant 2 : i32
    %392 = tpu.memref_slice %arg25[%c2_i32_81] : memref<3x!tpu.dma_semaphore, #tpu.memory_space<semaphore_mem>> -> memref<1x!tpu.dma_semaphore, #tpu.memory_space<semaphore_mem>>
    %393 = tpu.memref_squeeze %392 : memref<1x!tpu.dma_semaphore, #tpu.memory_space<semaphore_mem>> -> memref<!tpu.dma_semaphore, #tpu.memory_space<semaphore_mem>>
    tpu.wait_dma2 semaphore(%393 : memref<!tpu.dma_semaphore, #tpu.memory_space<semaphore_mem>>) src(%arg11 : memref<256x128xbf16, #tpu.memory_space<any>>) dst(%arg24 : memref<256x128xbf16, #tpu.memory_space<vmem>>)
    %c0_82 = arith.constant 0 : index
    %c0_83 = arith.constant 0 : index
    %c0_84 = arith.constant 0 : index
    %394 = vector.load %arg22[%c0_82, %c0_83, %c0_84] : memref<2x256x512xbf16, #tpu.memory_space<vmem>>, vector<1x256x512xbf16>
    %395 = vector.shape_cast %394 : vector<1x256x512xbf16> to vector<256x512xbf16>
    %cst_85 = arith.constant dense<0.000000e+00> : vector<64x512xf32>
    %396 = tpu.matmul %387, %395, %cst_85 {dimension_numbers = #tpu.dot_dimension_numbers<[1], [0], [0], [1], [0, 0, 1, 1], [], []>} : vector<64x256xbf16>, vector<256x512xbf16>, vector<64x512xf32> -> vector<64x512xf32>
    %c0_86 = arith.constant 0 : index
    %c0_87 = arith.constant 0 : index
    %397 = vector.load %arg7[%c0_86, %c0_87] : memref<1x512xf32, #tpu.memory_space<vmem>>, vector<1x512xf32>
    %398 = vector.broadcast %397 : vector<1x512xf32> to vector<64x512xf32>
    %399 = arith.addf %396, %398 : vector<64x512xf32>
    %c1 = arith.constant 1 : index
    %c0_88 = arith.constant 0 : index
    %c0_89 = arith.constant 0 : index
    %400 = vector.load %arg22[%c1, %c0_88, %c0_89] : memref<2x256x512xbf16, #tpu.memory_space<vmem>>, vector<1x256x512xbf16>
    %401 = vector.shape_cast %400 : vector<1x256x512xbf16> to vector<256x512xbf16>
    %cst_90 = arith.constant dense<0.000000e+00> : vector<64x512xf32>
    %402 = tpu.matmul %387, %401, %cst_90 {dimension_numbers = #tpu.dot_dimension_numbers<[1], [0], [0], [1], [0, 0, 1, 1], [], []>} : vector<64x256xbf16>, vector<256x512xbf16>, vector<64x512xf32> -> vector<64x512xf32>
    %c0_91 = arith.constant 0 : index
    %c0_92 = arith.constant 0 : index
    %403 = vector.load %arg8[%c0_91, %c0_92] : memref<1x512xf32, #tpu.memory_space<vmem>>, vector<1x512xf32>
    %404 = vector.broadcast %403 : vector<1x512xf32> to vector<64x512xf32>
    %405 = arith.addf %402, %404 : vector<64x512xf32>
    %c0_93 = arith.constant 0 : index
    %c0_94 = arith.constant 0 : index
    %c0_95 = arith.constant 0 : index
    %406 = vector.load %arg23[%c0_93, %c0_94, %c0_95] : memref<2x128x512xbf16, #tpu.memory_space<vmem>>, vector<1x128x512xbf16>
    %407 = vector.shape_cast %406 : vector<1x128x512xbf16> to vector<128x512xbf16>
    %c1_96 = arith.constant 1 : index
    %c0_97 = arith.constant 0 : index
    %c0_98 = arith.constant 0 : index
    %408 = vector.load %arg23[%c1_96, %c0_97, %c0_98] : memref<2x128x512xbf16, #tpu.memory_space<vmem>>, vector<1x128x512xbf16>
    %409 = vector.shape_cast %408 : vector<1x128x512xbf16> to vector<128x512xbf16>
    %410 = vector.extract_strided_slice %399 {offsets = [0, 0], sizes = [8, 512], strides = [1, 1]} : vector<64x512xf32> to vector<8x512xf32>
    %411 = arith.truncf %25 : vector<8x128xf32> to vector<8x128xbf16>
    %cst_99 = arith.constant dense<0.000000e+00> : vector<8x512xf32>
    %412 = tpu.matmul %411, %407, %cst_99 {dimension_numbers = #tpu.dot_dimension_numbers<[1], [0], [0], [1], [0, 0, 1, 1], [], []>} : vector<8x128xbf16>, vector<128x512xbf16>, vector<8x512xf32> -> vector<8x512xf32>
    %413 = arith.addf %410, %412 : vector<8x512xf32>
    %414 = vector.extract_strided_slice %413 {offsets = [0, 0], sizes = [8, 384], strides = [1, 1]} : vector<8x512xf32> to vector<8x384xf32>
    %cst_100 = arith.constant 5.000000e-01 : f32
    %415 = vector.broadcast %cst_100 : f32 to vector<8x384xf32>
    %416 = arith.mulf %415, %414 : vector<8x384xf32>
    %417 = math.tanh %416 : vector<8x384xf32>
    %cst_101 = arith.constant 5.000000e-01 : f32
    %418 = vector.broadcast %cst_101 : f32 to vector<8x384xf32>
    %419 = arith.mulf %418, %417 : vector<8x384xf32>
    %cst_102 = arith.constant 5.000000e-01 : f32
    %420 = vector.broadcast %cst_102 : f32 to vector<8x384xf32>
    %421 = arith.addf %419, %420 : vector<8x384xf32>
    %422 = vector.extract_strided_slice %421 {offsets = [0, 0], sizes = [8, 128], strides = [1, 1]} : vector<8x384xf32> to vector<8x128xf32>
    %423 = vector.extract_strided_slice %421 {offsets = [0, 128], sizes = [8, 128], strides = [1, 1]} : vector<8x384xf32> to vector<8x128xf32>
    %424 = vector.extract_strided_slice %421 {offsets = [0, 256], sizes = [8, 128], strides = [1, 1]} : vector<8x384xf32> to vector<8x128xf32>
    %425 = vector.extract_strided_slice %413 {offsets = [0, 384], sizes = [8, 128], strides = [1, 1]} : vector<8x512xf32> to vector<8x128xf32>
    %426 = math.tanh %425 : vector<8x128xf32>
    %427 = arith.mulf %423, %25 : vector<8x128xf32>
    %428 = arith.mulf %422, %426 : vector<8x128xf32>
    %429 = arith.addf %427, %428 : vector<8x128xf32>
    %430 = math.tanh %429 : vector<8x128xf32>
    %431 = arith.mulf %424, %430 : vector<8x128xf32>
    %432 = vector.extract_strided_slice %405 {offsets = [56, 0], sizes = [8, 512], strides = [1, 1]} : vector<64x512xf32> to vector<8x512xf32>
    %433 = arith.truncf %25 : vector<8x128xf32> to vector<8x128xbf16>
    %cst_103 = arith.constant dense<0.000000e+00> : vector<8x512xf32>
    %434 = tpu.matmul %433, %409, %cst_103 {dimension_numbers = #tpu.dot_dimension_numbers<[1], [0], [0], [1], [0, 0, 1, 1], [], []>} : vector<8x128xbf16>, vector<128x512xbf16>, vector<8x512xf32> -> vector<8x512xf32>
    %435 = arith.addf %432, %434 : vector<8x512xf32>
    %436 = vector.extract_strided_slice %435 {offsets = [0, 0], sizes = [8, 384], strides = [1, 1]} : vector<8x512xf32> to vector<8x384xf32>
    %cst_104 = arith.constant 5.000000e-01 : f32
    %437 = vector.broadcast %cst_104 : f32 to vector<8x384xf32>
    %438 = arith.mulf %437, %436 : vector<8x384xf32>
    %439 = math.tanh %438 : vector<8x384xf32>
    %cst_105 = arith.constant 5.000000e-01 : f32
    %440 = vector.broadcast %cst_105 : f32 to vector<8x384xf32>
    %441 = arith.mulf %440, %439 : vector<8x384xf32>
    %cst_106 = arith.constant 5.000000e-01 : f32
    %442 = vector.broadcast %cst_106 : f32 to vector<8x384xf32>
    %443 = arith.addf %441, %442 : vector<8x384xf32>
    %444 = vector.extract_strided_slice %443 {offsets = [0, 0], sizes = [8, 128], strides = [1, 1]} : vector<8x384xf32> to vector<8x128xf32>
    %445 = vector.extract_strided_slice %443 {offsets = [0, 128], sizes = [8, 128], strides = [1, 1]} : vector<8x384xf32> to vector<8x128xf32>
    %446 = vector.extract_strided_slice %443 {offsets = [0, 256], sizes = [8, 128], strides = [1, 1]} : vector<8x384xf32> to vector<8x128xf32>
    %447 = vector.extract_strided_slice %435 {offsets = [0, 384], sizes = [8, 128], strides = [1, 1]} : vector<8x512xf32> to vector<8x128xf32>
    %448 = math.tanh %447 : vector<8x128xf32>
    %449 = arith.mulf %445, %25 : vector<8x128xf32>
    %450 = arith.mulf %444, %448 : vector<8x128xf32>
    %451 = arith.addf %449, %450 : vector<8x128xf32>
    %452 = math.tanh %451 : vector<8x128xf32>
    %453 = arith.mulf %446, %452 : vector<8x128xf32>
    %454 = vector.extract_strided_slice %399 {offsets = [8, 0], sizes = [8, 512], strides = [1, 1]} : vector<64x512xf32> to vector<8x512xf32>
    %455 = arith.truncf %431 : vector<8x128xf32> to vector<8x128xbf16>
    %cst_107 = arith.constant dense<0.000000e+00> : vector<8x512xf32>
    %456 = tpu.matmul %455, %407, %cst_107 {dimension_numbers = #tpu.dot_dimension_numbers<[1], [0], [0], [1], [0, 0, 1, 1], [], []>} : vector<8x128xbf16>, vector<128x512xbf16>, vector<8x512xf32> -> vector<8x512xf32>
    %457 = arith.addf %454, %456 : vector<8x512xf32>
    %458 = vector.extract_strided_slice %457 {offsets = [0, 0], sizes = [8, 384], strides = [1, 1]} : vector<8x512xf32> to vector<8x384xf32>
    %cst_108 = arith.constant 5.000000e-01 : f32
    %459 = vector.broadcast %cst_108 : f32 to vector<8x384xf32>
    %460 = arith.mulf %459, %458 : vector<8x384xf32>
    %461 = math.tanh %460 : vector<8x384xf32>
    %cst_109 = arith.constant 5.000000e-01 : f32
    %462 = vector.broadcast %cst_109 : f32 to vector<8x384xf32>
    %463 = arith.mulf %462, %461 : vector<8x384xf32>
    %cst_110 = arith.constant 5.000000e-01 : f32
    %464 = vector.broadcast %cst_110 : f32 to vector<8x384xf32>
    %465 = arith.addf %463, %464 : vector<8x384xf32>
    %466 = vector.extract_strided_slice %465 {offsets = [0, 0], sizes = [8, 128], strides = [1, 1]} : vector<8x384xf32> to vector<8x128xf32>
    %467 = vector.extract_strided_slice %465 {offsets = [0, 128], sizes = [8, 128], strides = [1, 1]} : vector<8x384xf32> to vector<8x128xf32>
    %468 = vector.extract_strided_slice %465 {offsets = [0, 256], sizes = [8, 128], strides = [1, 1]} : vector<8x384xf32> to vector<8x128xf32>
    %469 = vector.extract_strided_slice %457 {offsets = [0, 384], sizes = [8, 128], strides = [1, 1]} : vector<8x512xf32> to vector<8x128xf32>
    %470 = math.tanh %469 : vector<8x128xf32>
    %471 = arith.mulf %467, %429 : vector<8x128xf32>
    %472 = arith.mulf %466, %470 : vector<8x128xf32>
    %473 = arith.addf %471, %472 : vector<8x128xf32>
    %474 = math.tanh %473 : vector<8x128xf32>
    %475 = arith.mulf %468, %474 : vector<8x128xf32>
    %476 = vector.extract_strided_slice %405 {offsets = [48, 0], sizes = [8, 512], strides = [1, 1]} : vector<64x512xf32> to vector<8x512xf32>
    %477 = arith.truncf %453 : vector<8x128xf32> to vector<8x128xbf16>
    %cst_111 = arith.constant dense<0.000000e+00> : vector<8x512xf32>
    %478 = tpu.matmul %477, %409, %cst_111 {dimension_numbers = #tpu.dot_dimension_numbers<[1], [0], [0], [1], [0, 0, 1, 1], [], []>} : vector<8x128xbf16>, vector<128x512xbf16>, vector<8x512xf32> -> vector<8x512xf32>
    %479 = arith.addf %476, %478 : vector<8x512xf32>
    %480 = vector.extract_strided_slice %479 {offsets = [0, 0], sizes = [8, 384], strides = [1, 1]} : vector<8x512xf32> to vector<8x384xf32>
    %cst_112 = arith.constant 5.000000e-01 : f32
    %481 = vector.broadcast %cst_112 : f32 to vector<8x384xf32>
    %482 = arith.mulf %481, %480 : vector<8x384xf32>
    %483 = math.tanh %482 : vector<8x384xf32>
    %cst_113 = arith.constant 5.000000e-01 : f32
    %484 = vector.broadcast %cst_113 : f32 to vector<8x384xf32>
    %485 = arith.mulf %484, %483 : vector<8x384xf32>
    %cst_114 = arith.constant 5.000000e-01 : f32
    %486 = vector.broadcast %cst_114 : f32 to vector<8x384xf32>
    %487 = arith.addf %485, %486 : vector<8x384xf32>
    %488 = vector.extract_strided_slice %487 {offsets = [0, 0], sizes = [8, 128], strides = [1, 1]} : vector<8x384xf32> to vector<8x128xf32>
    %489 = vector.extract_strided_slice %487 {offsets = [0, 128], sizes = [8, 128], strides = [1, 1]} : vector<8x384xf32> to vector<8x128xf32>
    %490 = vector.extract_strided_slice %487 {offsets = [0, 256], sizes = [8, 128], strides = [1, 1]} : vector<8x384xf32> to vector<8x128xf32>
    %491 = vector.extract_strided_slice %479 {offsets = [0, 384], sizes = [8, 128], strides = [1, 1]} : vector<8x512xf32> to vector<8x128xf32>
    %492 = math.tanh %491 : vector<8x128xf32>
    %493 = arith.mulf %489, %451 : vector<8x128xf32>
    %494 = arith.mulf %488, %492 : vector<8x128xf32>
    %495 = arith.addf %493, %494 : vector<8x128xf32>
    %496 = math.tanh %495 : vector<8x128xf32>
    %497 = arith.mulf %490, %496 : vector<8x128xf32>
    %498 = vector.extract_strided_slice %399 {offsets = [16, 0], sizes = [8, 512], strides = [1, 1]} : vector<64x512xf32> to vector<8x512xf32>
    %499 = arith.truncf %475 : vector<8x128xf32> to vector<8x128xbf16>
    %cst_115 = arith.constant dense<0.000000e+00> : vector<8x512xf32>
    %500 = tpu.matmul %499, %407, %cst_115 {dimension_numbers = #tpu.dot_dimension_numbers<[1], [0], [0], [1], [0, 0, 1, 1], [], []>} : vector<8x128xbf16>, vector<128x512xbf16>, vector<8x512xf32> -> vector<8x512xf32>
    %501 = arith.addf %498, %500 : vector<8x512xf32>
    %502 = vector.extract_strided_slice %501 {offsets = [0, 0], sizes = [8, 384], strides = [1, 1]} : vector<8x512xf32> to vector<8x384xf32>
    %cst_116 = arith.constant 5.000000e-01 : f32
    %503 = vector.broadcast %cst_116 : f32 to vector<8x384xf32>
    %504 = arith.mulf %503, %502 : vector<8x384xf32>
    %505 = math.tanh %504 : vector<8x384xf32>
    %cst_117 = arith.constant 5.000000e-01 : f32
    %506 = vector.broadcast %cst_117 : f32 to vector<8x384xf32>
    %507 = arith.mulf %506, %505 : vector<8x384xf32>
    %cst_118 = arith.constant 5.000000e-01 : f32
    %508 = vector.broadcast %cst_118 : f32 to vector<8x384xf32>
    %509 = arith.addf %507, %508 : vector<8x384xf32>
    %510 = vector.extract_strided_slice %509 {offsets = [0, 0], sizes = [8, 128], strides = [1, 1]} : vector<8x384xf32> to vector<8x128xf32>
    %511 = vector.extract_strided_slice %509 {offsets = [0, 128], sizes = [8, 128], strides = [1, 1]} : vector<8x384xf32> to vector<8x128xf32>
    %512 = vector.extract_strided_slice %509 {offsets = [0, 256], sizes = [8, 128], strides = [1, 1]} : vector<8x384xf32> to vector<8x128xf32>
    %513 = vector.extract_strided_slice %501 {offsets = [0, 384], sizes = [8, 128], strides = [1, 1]} : vector<8x512xf32> to vector<8x128xf32>
    %514 = math.tanh %513 : vector<8x128xf32>
    %515 = arith.mulf %511, %473 : vector<8x128xf32>
    %516 = arith.mulf %510, %514 : vector<8x128xf32>
    %517 = arith.addf %515, %516 : vector<8x128xf32>
    %518 = math.tanh %517 : vector<8x128xf32>
    %519 = arith.mulf %512, %518 : vector<8x128xf32>
    %520 = vector.extract_strided_slice %405 {offsets = [40, 0], sizes = [8, 512], strides = [1, 1]} : vector<64x512xf32> to vector<8x512xf32>
    %521 = arith.truncf %497 : vector<8x128xf32> to vector<8x128xbf16>
    %cst_119 = arith.constant dense<0.000000e+00> : vector<8x512xf32>
    %522 = tpu.matmul %521, %409, %cst_119 {dimension_numbers = #tpu.dot_dimension_numbers<[1], [0], [0], [1], [0, 0, 1, 1], [], []>} : vector<8x128xbf16>, vector<128x512xbf16>, vector<8x512xf32> -> vector<8x512xf32>
    %523 = arith.addf %520, %522 : vector<8x512xf32>
    %524 = vector.extract_strided_slice %523 {offsets = [0, 0], sizes = [8, 384], strides = [1, 1]} : vector<8x512xf32> to vector<8x384xf32>
    %cst_120 = arith.constant 5.000000e-01 : f32
    %525 = vector.broadcast %cst_120 : f32 to vector<8x384xf32>
    %526 = arith.mulf %525, %524 : vector<8x384xf32>
    %527 = math.tanh %526 : vector<8x384xf32>
    %cst_121 = arith.constant 5.000000e-01 : f32
    %528 = vector.broadcast %cst_121 : f32 to vector<8x384xf32>
    %529 = arith.mulf %528, %527 : vector<8x384xf32>
    %cst_122 = arith.constant 5.000000e-01 : f32
    %530 = vector.broadcast %cst_122 : f32 to vector<8x384xf32>
    %531 = arith.addf %529, %530 : vector<8x384xf32>
    %532 = vector.extract_strided_slice %531 {offsets = [0, 0], sizes = [8, 128], strides = [1, 1]} : vector<8x384xf32> to vector<8x128xf32>
    %533 = vector.extract_strided_slice %531 {offsets = [0, 128], sizes = [8, 128], strides = [1, 1]} : vector<8x384xf32> to vector<8x128xf32>
    %534 = vector.extract_strided_slice %531 {offsets = [0, 256], sizes = [8, 128], strides = [1, 1]} : vector<8x384xf32> to vector<8x128xf32>
    %535 = vector.extract_strided_slice %523 {offsets = [0, 384], sizes = [8, 128], strides = [1, 1]} : vector<8x512xf32> to vector<8x128xf32>
    %536 = math.tanh %535 : vector<8x128xf32>
    %537 = arith.mulf %533, %495 : vector<8x128xf32>
    %538 = arith.mulf %532, %536 : vector<8x128xf32>
    %539 = arith.addf %537, %538 : vector<8x128xf32>
    %540 = math.tanh %539 : vector<8x128xf32>
    %541 = arith.mulf %534, %540 : vector<8x128xf32>
    %542 = vector.extract_strided_slice %399 {offsets = [24, 0], sizes = [8, 512], strides = [1, 1]} : vector<64x512xf32> to vector<8x512xf32>
    %543 = arith.truncf %519 : vector<8x128xf32> to vector<8x128xbf16>
    %cst_123 = arith.constant dense<0.000000e+00> : vector<8x512xf32>
    %544 = tpu.matmul %543, %407, %cst_123 {dimension_numbers = #tpu.dot_dimension_numbers<[1], [0], [0], [1], [0, 0, 1, 1], [], []>} : vector<8x128xbf16>, vector<128x512xbf16>, vector<8x512xf32> -> vector<8x512xf32>
    %545 = arith.addf %542, %544 : vector<8x512xf32>
    %546 = vector.extract_strided_slice %545 {offsets = [0, 0], sizes = [8, 384], strides = [1, 1]} : vector<8x512xf32> to vector<8x384xf32>
    %cst_124 = arith.constant 5.000000e-01 : f32
    %547 = vector.broadcast %cst_124 : f32 to vector<8x384xf32>
    %548 = arith.mulf %547, %546 : vector<8x384xf32>
    %549 = math.tanh %548 : vector<8x384xf32>
    %cst_125 = arith.constant 5.000000e-01 : f32
    %550 = vector.broadcast %cst_125 : f32 to vector<8x384xf32>
    %551 = arith.mulf %550, %549 : vector<8x384xf32>
    %cst_126 = arith.constant 5.000000e-01 : f32
    %552 = vector.broadcast %cst_126 : f32 to vector<8x384xf32>
    %553 = arith.addf %551, %552 : vector<8x384xf32>
    %554 = vector.extract_strided_slice %553 {offsets = [0, 0], sizes = [8, 128], strides = [1, 1]} : vector<8x384xf32> to vector<8x128xf32>
    %555 = vector.extract_strided_slice %553 {offsets = [0, 128], sizes = [8, 128], strides = [1, 1]} : vector<8x384xf32> to vector<8x128xf32>
    %556 = vector.extract_strided_slice %553 {offsets = [0, 256], sizes = [8, 128], strides = [1, 1]} : vector<8x384xf32> to vector<8x128xf32>
    %557 = vector.extract_strided_slice %545 {offsets = [0, 384], sizes = [8, 128], strides = [1, 1]} : vector<8x512xf32> to vector<8x128xf32>
    %558 = math.tanh %557 : vector<8x128xf32>
    %559 = arith.mulf %555, %517 : vector<8x128xf32>
    %560 = arith.mulf %554, %558 : vector<8x128xf32>
    %561 = arith.addf %559, %560 : vector<8x128xf32>
    %562 = math.tanh %561 : vector<8x128xf32>
    %563 = arith.mulf %556, %562 : vector<8x128xf32>
    %564 = vector.extract_strided_slice %405 {offsets = [32, 0], sizes = [8, 512], strides = [1, 1]} : vector<64x512xf32> to vector<8x512xf32>
    %565 = arith.truncf %541 : vector<8x128xf32> to vector<8x128xbf16>
    %cst_127 = arith.constant dense<0.000000e+00> : vector<8x512xf32>
    %566 = tpu.matmul %565, %409, %cst_127 {dimension_numbers = #tpu.dot_dimension_numbers<[1], [0], [0], [1], [0, 0, 1, 1], [], []>} : vector<8x128xbf16>, vector<128x512xbf16>, vector<8x512xf32> -> vector<8x512xf32>
    %567 = arith.addf %564, %566 : vector<8x512xf32>
    %568 = vector.extract_strided_slice %567 {offsets = [0, 0], sizes = [8, 384], strides = [1, 1]} : vector<8x512xf32> to vector<8x384xf32>
    %cst_128 = arith.constant 5.000000e-01 : f32
    %569 = vector.broadcast %cst_128 : f32 to vector<8x384xf32>
    %570 = arith.mulf %569, %568 : vector<8x384xf32>
    %571 = math.tanh %570 : vector<8x384xf32>
    %cst_129 = arith.constant 5.000000e-01 : f32
    %572 = vector.broadcast %cst_129 : f32 to vector<8x384xf32>
    %573 = arith.mulf %572, %571 : vector<8x384xf32>
    %cst_130 = arith.constant 5.000000e-01 : f32
    %574 = vector.broadcast %cst_130 : f32 to vector<8x384xf32>
    %575 = arith.addf %573, %574 : vector<8x384xf32>
    %576 = vector.extract_strided_slice %575 {offsets = [0, 0], sizes = [8, 128], strides = [1, 1]} : vector<8x384xf32> to vector<8x128xf32>
    %577 = vector.extract_strided_slice %575 {offsets = [0, 128], sizes = [8, 128], strides = [1, 1]} : vector<8x384xf32> to vector<8x128xf32>
    %578 = vector.extract_strided_slice %575 {offsets = [0, 256], sizes = [8, 128], strides = [1, 1]} : vector<8x384xf32> to vector<8x128xf32>
    %579 = vector.extract_strided_slice %567 {offsets = [0, 384], sizes = [8, 128], strides = [1, 1]} : vector<8x512xf32> to vector<8x128xf32>
    %580 = math.tanh %579 : vector<8x128xf32>
    %581 = arith.mulf %577, %539 : vector<8x128xf32>
    %582 = arith.mulf %576, %580 : vector<8x128xf32>
    %583 = arith.addf %581, %582 : vector<8x128xf32>
    %584 = math.tanh %583 : vector<8x128xf32>
    %585 = arith.mulf %578, %584 : vector<8x128xf32>
    %586 = vector.extract_strided_slice %399 {offsets = [32, 0], sizes = [8, 512], strides = [1, 1]} : vector<64x512xf32> to vector<8x512xf32>
    %587 = arith.truncf %563 : vector<8x128xf32> to vector<8x128xbf16>
    %cst_131 = arith.constant dense<0.000000e+00> : vector<8x512xf32>
    %588 = tpu.matmul %587, %407, %cst_131 {dimension_numbers = #tpu.dot_dimension_numbers<[1], [0], [0], [1], [0, 0, 1, 1], [], []>} : vector<8x128xbf16>, vector<128x512xbf16>, vector<8x512xf32> -> vector<8x512xf32>
    %589 = arith.addf %586, %588 : vector<8x512xf32>
    %590 = vector.extract_strided_slice %589 {offsets = [0, 0], sizes = [8, 384], strides = [1, 1]} : vector<8x512xf32> to vector<8x384xf32>
    %cst_132 = arith.constant 5.000000e-01 : f32
    %591 = vector.broadcast %cst_132 : f32 to vector<8x384xf32>
    %592 = arith.mulf %591, %590 : vector<8x384xf32>
    %593 = math.tanh %592 : vector<8x384xf32>
    %cst_133 = arith.constant 5.000000e-01 : f32
    %594 = vector.broadcast %cst_133 : f32 to vector<8x384xf32>
    %595 = arith.mulf %594, %593 : vector<8x384xf32>
    %cst_134 = arith.constant 5.000000e-01 : f32
    %596 = vector.broadcast %cst_134 : f32 to vector<8x384xf32>
    %597 = arith.addf %595, %596 : vector<8x384xf32>
    %598 = vector.extract_strided_slice %597 {offsets = [0, 0], sizes = [8, 128], strides = [1, 1]} : vector<8x384xf32> to vector<8x128xf32>
    %599 = vector.extract_strided_slice %597 {offsets = [0, 128], sizes = [8, 128], strides = [1, 1]} : vector<8x384xf32> to vector<8x128xf32>
    %600 = vector.extract_strided_slice %597 {offsets = [0, 256], sizes = [8, 128], strides = [1, 1]} : vector<8x384xf32> to vector<8x128xf32>
    %601 = vector.extract_strided_slice %589 {offsets = [0, 384], sizes = [8, 128], strides = [1, 1]} : vector<8x512xf32> to vector<8x128xf32>
    %602 = math.tanh %601 : vector<8x128xf32>
    %603 = arith.mulf %599, %561 : vector<8x128xf32>
    %604 = arith.mulf %598, %602 : vector<8x128xf32>
    %605 = arith.addf %603, %604 : vector<8x128xf32>
    %606 = math.tanh %605 : vector<8x128xf32>
    %607 = arith.mulf %600, %606 : vector<8x128xf32>
    %608 = vector.extract_strided_slice %405 {offsets = [24, 0], sizes = [8, 512], strides = [1, 1]} : vector<64x512xf32> to vector<8x512xf32>
    %609 = arith.truncf %585 : vector<8x128xf32> to vector<8x128xbf16>
    %cst_135 = arith.constant dense<0.000000e+00> : vector<8x512xf32>
    %610 = tpu.matmul %609, %409, %cst_135 {dimension_numbers = #tpu.dot_dimension_numbers<[1], [0], [0], [1], [0, 0, 1, 1], [], []>} : vector<8x128xbf16>, vector<128x512xbf16>, vector<8x512xf32> -> vector<8x512xf32>
    %611 = arith.addf %608, %610 : vector<8x512xf32>
    %612 = vector.extract_strided_slice %611 {offsets = [0, 0], sizes = [8, 384], strides = [1, 1]} : vector<8x512xf32> to vector<8x384xf32>
    %cst_136 = arith.constant 5.000000e-01 : f32
    %613 = vector.broadcast %cst_136 : f32 to vector<8x384xf32>
    %614 = arith.mulf %613, %612 : vector<8x384xf32>
    %615 = math.tanh %614 : vector<8x384xf32>
    %cst_137 = arith.constant 5.000000e-01 : f32
    %616 = vector.broadcast %cst_137 : f32 to vector<8x384xf32>
    %617 = arith.mulf %616, %615 : vector<8x384xf32>
    %cst_138 = arith.constant 5.000000e-01 : f32
    %618 = vector.broadcast %cst_138 : f32 to vector<8x384xf32>
    %619 = arith.addf %617, %618 : vector<8x384xf32>
    %620 = vector.extract_strided_slice %619 {offsets = [0, 0], sizes = [8, 128], strides = [1, 1]} : vector<8x384xf32> to vector<8x128xf32>
    %621 = vector.extract_strided_slice %619 {offsets = [0, 128], sizes = [8, 128], strides = [1, 1]} : vector<8x384xf32> to vector<8x128xf32>
    %622 = vector.extract_strided_slice %619 {offsets = [0, 256], sizes = [8, 128], strides = [1, 1]} : vector<8x384xf32> to vector<8x128xf32>
    %623 = vector.extract_strided_slice %611 {offsets = [0, 384], sizes = [8, 128], strides = [1, 1]} : vector<8x512xf32> to vector<8x128xf32>
    %624 = math.tanh %623 : vector<8x128xf32>
    %625 = arith.mulf %621, %583 : vector<8x128xf32>
    %626 = arith.mulf %620, %624 : vector<8x128xf32>
    %627 = arith.addf %625, %626 : vector<8x128xf32>
    %628 = math.tanh %627 : vector<8x128xf32>
    %629 = arith.mulf %622, %628 : vector<8x128xf32>
    %630 = vector.extract_strided_slice %399 {offsets = [40, 0], sizes = [8, 512], strides = [1, 1]} : vector<64x512xf32> to vector<8x512xf32>
    %631 = arith.truncf %607 : vector<8x128xf32> to vector<8x128xbf16>
    %cst_139 = arith.constant dense<0.000000e+00> : vector<8x512xf32>
    %632 = tpu.matmul %631, %407, %cst_139 {dimension_numbers = #tpu.dot_dimension_numbers<[1], [0], [0], [1], [0, 0, 1, 1], [], []>} : vector<8x128xbf16>, vector<128x512xbf16>, vector<8x512xf32> -> vector<8x512xf32>
    %633 = arith.addf %630, %632 : vector<8x512xf32>
    %634 = vector.extract_strided_slice %633 {offsets = [0, 0], sizes = [8, 384], strides = [1, 1]} : vector<8x512xf32> to vector<8x384xf32>
    %cst_140 = arith.constant 5.000000e-01 : f32
    %635 = vector.broadcast %cst_140 : f32 to vector<8x384xf32>
    %636 = arith.mulf %635, %634 : vector<8x384xf32>
    %637 = math.tanh %636 : vector<8x384xf32>
    %cst_141 = arith.constant 5.000000e-01 : f32
    %638 = vector.broadcast %cst_141 : f32 to vector<8x384xf32>
    %639 = arith.mulf %638, %637 : vector<8x384xf32>
    %cst_142 = arith.constant 5.000000e-01 : f32
    %640 = vector.broadcast %cst_142 : f32 to vector<8x384xf32>
    %641 = arith.addf %639, %640 : vector<8x384xf32>
    %642 = vector.extract_strided_slice %641 {offsets = [0, 0], sizes = [8, 128], strides = [1, 1]} : vector<8x384xf32> to vector<8x128xf32>
    %643 = vector.extract_strided_slice %641 {offsets = [0, 128], sizes = [8, 128], strides = [1, 1]} : vector<8x384xf32> to vector<8x128xf32>
    %644 = vector.extract_strided_slice %641 {offsets = [0, 256], sizes = [8, 128], strides = [1, 1]} : vector<8x384xf32> to vector<8x128xf32>
    %645 = vector.extract_strided_slice %633 {offsets = [0, 384], sizes = [8, 128], strides = [1, 1]} : vector<8x512xf32> to vector<8x128xf32>
    %646 = math.tanh %645 : vector<8x128xf32>
    %647 = arith.mulf %643, %605 : vector<8x128xf32>
    %648 = arith.mulf %642, %646 : vector<8x128xf32>
    %649 = arith.addf %647, %648 : vector<8x128xf32>
    %650 = math.tanh %649 : vector<8x128xf32>
    %651 = arith.mulf %644, %650 : vector<8x128xf32>
    %652 = vector.extract_strided_slice %405 {offsets = [16, 0], sizes = [8, 512], strides = [1, 1]} : vector<64x512xf32> to vector<8x512xf32>
    %653 = arith.truncf %629 : vector<8x128xf32> to vector<8x128xbf16>
    %cst_143 = arith.constant dense<0.000000e+00> : vector<8x512xf32>
    %654 = tpu.matmul %653, %409, %cst_143 {dimension_numbers = #tpu.dot_dimension_numbers<[1], [0], [0], [1], [0, 0, 1, 1], [], []>} : vector<8x128xbf16>, vector<128x512xbf16>, vector<8x512xf32> -> vector<8x512xf32>
    %655 = arith.addf %652, %654 : vector<8x512xf32>
    %656 = vector.extract_strided_slice %655 {offsets = [0, 0], sizes = [8, 384], strides = [1, 1]} : vector<8x512xf32> to vector<8x384xf32>
    %cst_144 = arith.constant 5.000000e-01 : f32
    %657 = vector.broadcast %cst_144 : f32 to vector<8x384xf32>
    %658 = arith.mulf %657, %656 : vector<8x384xf32>
    %659 = math.tanh %658 : vector<8x384xf32>
    %cst_145 = arith.constant 5.000000e-01 : f32
    %660 = vector.broadcast %cst_145 : f32 to vector<8x384xf32>
    %661 = arith.mulf %660, %659 : vector<8x384xf32>
    %cst_146 = arith.constant 5.000000e-01 : f32
    %662 = vector.broadcast %cst_146 : f32 to vector<8x384xf32>
    %663 = arith.addf %661, %662 : vector<8x384xf32>
    %664 = vector.extract_strided_slice %663 {offsets = [0, 0], sizes = [8, 128], strides = [1, 1]} : vector<8x384xf32> to vector<8x128xf32>
    %665 = vector.extract_strided_slice %663 {offsets = [0, 128], sizes = [8, 128], strides = [1, 1]} : vector<8x384xf32> to vector<8x128xf32>
    %666 = vector.extract_strided_slice %663 {offsets = [0, 256], sizes = [8, 128], strides = [1, 1]} : vector<8x384xf32> to vector<8x128xf32>
    %667 = vector.extract_strided_slice %655 {offsets = [0, 384], sizes = [8, 128], strides = [1, 1]} : vector<8x512xf32> to vector<8x128xf32>
    %668 = math.tanh %667 : vector<8x128xf32>
    %669 = arith.mulf %665, %627 : vector<8x128xf32>
    %670 = arith.mulf %664, %668 : vector<8x128xf32>
    %671 = arith.addf %669, %670 : vector<8x128xf32>
    %672 = math.tanh %671 : vector<8x128xf32>
    %673 = arith.mulf %666, %672 : vector<8x128xf32>
    %674 = vector.extract_strided_slice %399 {offsets = [48, 0], sizes = [8, 512], strides = [1, 1]} : vector<64x512xf32> to vector<8x512xf32>
    %675 = arith.truncf %651 : vector<8x128xf32> to vector<8x128xbf16>
    %cst_147 = arith.constant dense<0.000000e+00> : vector<8x512xf32>
    %676 = tpu.matmul %675, %407, %cst_147 {dimension_numbers = #tpu.dot_dimension_numbers<[1], [0], [0], [1], [0, 0, 1, 1], [], []>} : vector<8x128xbf16>, vector<128x512xbf16>, vector<8x512xf32> -> vector<8x512xf32>
    %677 = arith.addf %674, %676 : vector<8x512xf32>
    %678 = vector.extract_strided_slice %677 {offsets = [0, 0], sizes = [8, 384], strides = [1, 1]} : vector<8x512xf32> to vector<8x384xf32>
    %cst_148 = arith.constant 5.000000e-01 : f32
    %679 = vector.broadcast %cst_148 : f32 to vector<8x384xf32>
    %680 = arith.mulf %679, %678 : vector<8x384xf32>
    %681 = math.tanh %680 : vector<8x384xf32>
    %cst_149 = arith.constant 5.000000e-01 : f32
    %682 = vector.broadcast %cst_149 : f32 to vector<8x384xf32>
    %683 = arith.mulf %682, %681 : vector<8x384xf32>
    %cst_150 = arith.constant 5.000000e-01 : f32
    %684 = vector.broadcast %cst_150 : f32 to vector<8x384xf32>
    %685 = arith.addf %683, %684 : vector<8x384xf32>
    %686 = vector.extract_strided_slice %685 {offsets = [0, 0], sizes = [8, 128], strides = [1, 1]} : vector<8x384xf32> to vector<8x128xf32>
    %687 = vector.extract_strided_slice %685 {offsets = [0, 128], sizes = [8, 128], strides = [1, 1]} : vector<8x384xf32> to vector<8x128xf32>
    %688 = vector.extract_strided_slice %685 {offsets = [0, 256], sizes = [8, 128], strides = [1, 1]} : vector<8x384xf32> to vector<8x128xf32>
    %689 = vector.extract_strided_slice %677 {offsets = [0, 384], sizes = [8, 128], strides = [1, 1]} : vector<8x512xf32> to vector<8x128xf32>
    %690 = math.tanh %689 : vector<8x128xf32>
    %691 = arith.mulf %687, %649 : vector<8x128xf32>
    %692 = arith.mulf %686, %690 : vector<8x128xf32>
    %693 = arith.addf %691, %692 : vector<8x128xf32>
    %694 = math.tanh %693 : vector<8x128xf32>
    %695 = arith.mulf %688, %694 : vector<8x128xf32>
    %696 = vector.extract_strided_slice %405 {offsets = [8, 0], sizes = [8, 512], strides = [1, 1]} : vector<64x512xf32> to vector<8x512xf32>
    %697 = arith.truncf %673 : vector<8x128xf32> to vector<8x128xbf16>
    %cst_151 = arith.constant dense<0.000000e+00> : vector<8x512xf32>
    %698 = tpu.matmul %697, %409, %cst_151 {dimension_numbers = #tpu.dot_dimension_numbers<[1], [0], [0], [1], [0, 0, 1, 1], [], []>} : vector<8x128xbf16>, vector<128x512xbf16>, vector<8x512xf32> -> vector<8x512xf32>
    %699 = arith.addf %696, %698 : vector<8x512xf32>
    %700 = vector.extract_strided_slice %699 {offsets = [0, 0], sizes = [8, 384], strides = [1, 1]} : vector<8x512xf32> to vector<8x384xf32>
    %cst_152 = arith.constant 5.000000e-01 : f32
    %701 = vector.broadcast %cst_152 : f32 to vector<8x384xf32>
    %702 = arith.mulf %701, %700 : vector<8x384xf32>
    %703 = math.tanh %702 : vector<8x384xf32>
    %cst_153 = arith.constant 5.000000e-01 : f32
    %704 = vector.broadcast %cst_153 : f32 to vector<8x384xf32>
    %705 = arith.mulf %704, %703 : vector<8x384xf32>
    %cst_154 = arith.constant 5.000000e-01 : f32
    %706 = vector.broadcast %cst_154 : f32 to vector<8x384xf32>
    %707 = arith.addf %705, %706 : vector<8x384xf32>
    %708 = vector.extract_strided_slice %707 {offsets = [0, 0], sizes = [8, 128], strides = [1, 1]} : vector<8x384xf32> to vector<8x128xf32>
    %709 = vector.extract_strided_slice %707 {offsets = [0, 128], sizes = [8, 128], strides = [1, 1]} : vector<8x384xf32> to vector<8x128xf32>
    %710 = vector.extract_strided_slice %707 {offsets = [0, 256], sizes = [8, 128], strides = [1, 1]} : vector<8x384xf32> to vector<8x128xf32>
    %711 = vector.extract_strided_slice %699 {offsets = [0, 384], sizes = [8, 128], strides = [1, 1]} : vector<8x512xf32> to vector<8x128xf32>
    %712 = math.tanh %711 : vector<8x128xf32>
    %713 = arith.mulf %709, %671 : vector<8x128xf32>
    %714 = arith.mulf %708, %712 : vector<8x128xf32>
    %715 = arith.addf %713, %714 : vector<8x128xf32>
    %716 = math.tanh %715 : vector<8x128xf32>
    %717 = arith.mulf %710, %716 : vector<8x128xf32>
    %718 = vector.extract_strided_slice %399 {offsets = [56, 0], sizes = [8, 512], strides = [1, 1]} : vector<64x512xf32> to vector<8x512xf32>
    %719 = arith.truncf %695 : vector<8x128xf32> to vector<8x128xbf16>
    %cst_155 = arith.constant dense<0.000000e+00> : vector<8x512xf32>
    %720 = tpu.matmul %719, %407, %cst_155 {dimension_numbers = #tpu.dot_dimension_numbers<[1], [0], [0], [1], [0, 0, 1, 1], [], []>} : vector<8x128xbf16>, vector<128x512xbf16>, vector<8x512xf32> -> vector<8x512xf32>
    %721 = arith.addf %718, %720 : vector<8x512xf32>
    %722 = vector.extract_strided_slice %721 {offsets = [0, 0], sizes = [8, 384], strides = [1, 1]} : vector<8x512xf32> to vector<8x384xf32>
    %cst_156 = arith.constant 5.000000e-01 : f32
    %723 = vector.broadcast %cst_156 : f32 to vector<8x384xf32>
    %724 = arith.mulf %723, %722 : vector<8x384xf32>
    %725 = math.tanh %724 : vector<8x384xf32>
    %cst_157 = arith.constant 5.000000e-01 : f32
    %726 = vector.broadcast %cst_157 : f32 to vector<8x384xf32>
    %727 = arith.mulf %726, %725 : vector<8x384xf32>
    %cst_158 = arith.constant 5.000000e-01 : f32
    %728 = vector.broadcast %cst_158 : f32 to vector<8x384xf32>
    %729 = arith.addf %727, %728 : vector<8x384xf32>
    %730 = vector.extract_strided_slice %729 {offsets = [0, 0], sizes = [8, 128], strides = [1, 1]} : vector<8x384xf32> to vector<8x128xf32>
    %731 = vector.extract_strided_slice %729 {offsets = [0, 128], sizes = [8, 128], strides = [1, 1]} : vector<8x384xf32> to vector<8x128xf32>
    %732 = vector.extract_strided_slice %729 {offsets = [0, 256], sizes = [8, 128], strides = [1, 1]} : vector<8x384xf32> to vector<8x128xf32>
    %733 = vector.extract_strided_slice %721 {offsets = [0, 384], sizes = [8, 128], strides = [1, 1]} : vector<8x512xf32> to vector<8x128xf32>
    %734 = math.tanh %733 : vector<8x128xf32>
    %735 = arith.mulf %731, %693 : vector<8x128xf32>
    %736 = arith.mulf %730, %734 : vector<8x128xf32>
    %737 = arith.addf %735, %736 : vector<8x128xf32>
    %738 = math.tanh %737 : vector<8x128xf32>
    %739 = arith.mulf %732, %738 : vector<8x128xf32>
    %740 = vector.extract_strided_slice %405 {offsets = [0, 0], sizes = [8, 512], strides = [1, 1]} : vector<64x512xf32> to vector<8x512xf32>
    %741 = arith.truncf %717 : vector<8x128xf32> to vector<8x128xbf16>
    %cst_159 = arith.constant dense<0.000000e+00> : vector<8x512xf32>
    %742 = tpu.matmul %741, %409, %cst_159 {dimension_numbers = #tpu.dot_dimension_numbers<[1], [0], [0], [1], [0, 0, 1, 1], [], []>} : vector<8x128xbf16>, vector<128x512xbf16>, vector<8x512xf32> -> vector<8x512xf32>
    %743 = arith.addf %740, %742 : vector<8x512xf32>
    %744 = vector.extract_strided_slice %743 {offsets = [0, 0], sizes = [8, 384], strides = [1, 1]} : vector<8x512xf32> to vector<8x384xf32>
    %cst_160 = arith.constant 5.000000e-01 : f32
    %745 = vector.broadcast %cst_160 : f32 to vector<8x384xf32>
    %746 = arith.mulf %745, %744 : vector<8x384xf32>
    %747 = math.tanh %746 : vector<8x384xf32>
    %cst_161 = arith.constant 5.000000e-01 : f32
    %748 = vector.broadcast %cst_161 : f32 to vector<8x384xf32>
    %749 = arith.mulf %748, %747 : vector<8x384xf32>
    %cst_162 = arith.constant 5.000000e-01 : f32
    %750 = vector.broadcast %cst_162 : f32 to vector<8x384xf32>
    %751 = arith.addf %749, %750 : vector<8x384xf32>
    %752 = vector.extract_strided_slice %751 {offsets = [0, 0], sizes = [8, 128], strides = [1, 1]} : vector<8x384xf32> to vector<8x128xf32>
    %753 = vector.extract_strided_slice %751 {offsets = [0, 128], sizes = [8, 128], strides = [1, 1]} : vector<8x384xf32> to vector<8x128xf32>
    %754 = vector.extract_strided_slice %751 {offsets = [0, 256], sizes = [8, 128], strides = [1, 1]} : vector<8x384xf32> to vector<8x128xf32>
    %755 = vector.extract_strided_slice %743 {offsets = [0, 384], sizes = [8, 128], strides = [1, 1]} : vector<8x512xf32> to vector<8x128xf32>
    %756 = math.tanh %755 : vector<8x128xf32>
    %757 = arith.mulf %753, %715 : vector<8x128xf32>
    %758 = arith.mulf %752, %756 : vector<8x128xf32>
    %759 = arith.addf %757, %758 : vector<8x128xf32>
    %760 = math.tanh %759 : vector<8x128xf32>
    %761 = arith.mulf %754, %760 : vector<8x128xf32>
    %762 = tpu.concatenate %739, %761 in 1 : vector<8x128xf32>, vector<8x128xf32> -> vector<8x256xf32>
    %763 = arith.truncf %762 : vector<8x256xf32> to vector<8x256xbf16>
    %c0_163 = arith.constant 0 : index
    %c0_164 = arith.constant 0 : index
    %764 = vector.load %arg24[%c0_163, %c0_164] : memref<256x128xbf16, #tpu.memory_space<vmem>>, vector<256x128xbf16>
    %cst_165 = arith.constant dense<0.000000e+00> : vector<8x128xf32>
    %765 = tpu.matmul %763, %764, %cst_165 {dimension_numbers = #tpu.dot_dimension_numbers<[1], [0], [0], [1], [0, 0, 1, 1], [], []>} : vector<8x256xbf16>, vector<256x128xbf16>, vector<8x128xf32> -> vector<8x128xf32>
    %c0_166 = arith.constant 0 : index
    %c0_167 = arith.constant 0 : index
    %766 = vector.load %arg12[%c0_166, %c0_167] : memref<1x128xf32, #tpu.memory_space<vmem>>, vector<1x128xf32>
    %767 = vector.broadcast %766 : vector<1x128xf32> to vector<8x128xf32>
    %768 = arith.addf %765, %767 : vector<8x128xf32>
    %c0_168 = arith.constant 0 : index
    %c0_169 = arith.constant 0 : index
    %769 = vector.load %arg13[%c0_168, %c0_169] : memref<1x128xf32, #tpu.memory_space<vmem>>, vector<1x128xf32>
    %770 = vector.broadcast %769 : vector<1x128xf32> to vector<8x128xf32>
    %771 = arith.mulf %768, %770 : vector<8x128xf32>
    %c0_170 = arith.constant 0 : index
    %c0_171 = arith.constant 0 : index
    %772 = vector.load %arg14[%c0_170, %c0_171] : memref<1x128xf32, #tpu.memory_space<vmem>>, vector<1x128xf32>
    %773 = vector.broadcast %772 : vector<1x128xf32> to vector<8x128xf32>
    %774 = arith.addf %771, %773 : vector<8x128xf32>
    %cst_172 = arith.constant 0.000000e+00 : f32
    %775 = vector.broadcast %cst_172 : f32 to vector<8x128xf32>
    %776 = arith.maximumf %774, %775 : vector<8x128xf32>
    %777 = arith.truncf %776 : vector<8x128xf32> to vector<8x128xbf16>
    %c0_173 = arith.constant 0 : index
    %c0_174 = arith.constant 0 : index
    %778 = vector.load %arg15[%c0_173, %c0_174] : memref<128x64xbf16, #tpu.memory_space<vmem>>, vector<128x64xbf16>
    %cst_175 = arith.constant dense<0.000000e+00> : vector<8x64xf32>
    %779 = tpu.matmul %777, %778, %cst_175 {dimension_numbers = #tpu.dot_dimension_numbers<[1], [0], [0], [1], [0, 0, 1, 1], [], []>} : vector<8x128xbf16>, vector<128x64xbf16>, vector<8x64xf32> -> vector<8x64xf32>
    %c0_176 = arith.constant 0 : index
    %c0_177 = arith.constant 0 : index
    %780 = vector.load %arg16[%c0_176, %c0_177] : memref<1x64xf32, #tpu.memory_space<vmem>>, vector<1x64xf32>
    %781 = vector.broadcast %780 : vector<1x64xf32> to vector<8x64xf32>
    %782 = arith.addf %779, %781 : vector<8x64xf32>
    %c0_178 = arith.constant 0 : index
    %c0_179 = arith.constant 0 : index
    %783 = vector.load %arg17[%c0_178, %c0_179] : memref<1x64xf32, #tpu.memory_space<vmem>>, vector<1x64xf32>
    %784 = vector.broadcast %783 : vector<1x64xf32> to vector<8x64xf32>
    %785 = arith.mulf %782, %784 : vector<8x64xf32>
    %c0_180 = arith.constant 0 : index
    %c0_181 = arith.constant 0 : index
    %786 = vector.load %arg18[%c0_180, %c0_181] : memref<1x64xf32, #tpu.memory_space<vmem>>, vector<1x64xf32>
    %787 = vector.broadcast %786 : vector<1x64xf32> to vector<8x64xf32>
    %788 = arith.addf %785, %787 : vector<8x64xf32>
    %cst_182 = arith.constant 0.000000e+00 : f32
    %789 = vector.broadcast %cst_182 : f32 to vector<8x64xf32>
    %790 = arith.maximumf %788, %789 : vector<8x64xf32>
    %791 = arith.truncf %790 : vector<8x64xf32> to vector<8x64xbf16>
    %c0_183 = arith.constant 0 : index
    %c0_184 = arith.constant 0 : index
    %792 = vector.load %arg19[%c0_183, %c0_184] : memref<64x128xbf16, #tpu.memory_space<vmem>>, vector<64x128xbf16>
    %cst_185 = arith.constant dense<0.000000e+00> : vector<8x128xf32>
    %793 = tpu.matmul %791, %792, %cst_185 {dimension_numbers = #tpu.dot_dimension_numbers<[1], [0], [0], [1], [0, 0, 1, 1], [], []>} : vector<8x64xbf16>, vector<64x128xbf16>, vector<8x128xf32> -> vector<8x128xf32>
    %c0_186 = arith.constant 0 : index
    %c0_187 = arith.constant 0 : index
    %794 = vector.load %arg20[%c0_186, %c0_187] : memref<1x128xf32, #tpu.memory_space<vmem>>, vector<1x128xf32>
    %795 = vector.broadcast %794 : vector<1x128xf32> to vector<8x128xf32>
    %796 = arith.addf %793, %795 : vector<8x128xf32>
    %cst_188 = arith.constant 0.000000e+00 : f32
    %797 = vector.broadcast %cst_188 : f32 to vector<8x128xf32>
    %798 = arith.maximumf %796, %797 : vector<8x128xf32>
    %c0_189 = arith.constant 0 : index
    %c0_190 = arith.constant 0 : index
    %799 = vector.load %arg21[%c0_189, %c0_190] : memref<8x128xf32, #tpu.memory_space<vmem>>, vector<8x128xf32>
    tpu.vector_store %arg21[%c0_189, %c0_190], %798 {strides = array<i32>} : memref<8x128xf32, #tpu.memory_space<vmem>>, vector<8x128xf32>,
    return
  }
}

</mosaic_0001>

<bundles_post_ra>
// kernel: cpg_predictor_forward.1
= control target key start
LH: loop header
LB: loop body
LE: loop exit
PB: predicated region body
PF: predicated region fallthrough
CT: control target
= control target key end

     0   :  { %s11944_s0 = inlined_call_operand.vmem [shape: s32[64,1], index: 0, kind: input, shape index: {}]   ;;  %s11945_s1 = inlined_call_operand.vmem [shape: bf16[8,512], index: 1, kind: input, shape index: {}]   ;;  %s11946_s2 = inlined_call_operand.vmem [shape: bf16[8,512], index: 2, kind: input, shape index: {}]   ;;  %s11947_s3 = inlined_call_operand.vmem [shape: bf16[128,512], index: 3, kind: input, shape index: {}]   ;;  %s11948_s4 = inlined_call_operand.vmem [shape: bf16[128,512], index: 4, kind: input, shape index: {}]   ;;  %s11949_s5 = inlined_call_operand.vmem [shape: f32[1,512], index: 5, kind: input, shape index: {}]   ;;  %s11950_s6 = inlined_call_operand.vmem [shape: f32[1,512], index: 6, kind: input, shape index: {}]   ;;  %s11951_s7 = inlined_call_operand.vmem [shape: f32[1,512], index: 7, kind: input, shape index: {}]   ;;  %s11952_s8 = inlined_call_operand.vmem [shape: f32[1,512], index: 8, kind: input, shape index: {}]   ;;  %s11953_s9 = inlined_call_operand.vmem [shape: bf16[2,256,512], index: 9, kind: input, shape index: {}]   ;;  %s11954_s10 = inlined_call_operand.vmem [shape: bf16[2,128,512], index: 10, kind: input, shape index: {}]   ;;  %s11955_s11 = inlined_call_operand.vmem [shape: bf16[256,128], index: 11, kind: input, shape index: {}]   ;;  %s11956_s12 = inlined_call_operand.vmem [shape: f32[1,128], index: 12, kind: input, shape index: {}]   ;;  %s11957_s13 = inlined_call_operand.vmem [shape: f32[1,128], index: 13, kind: input, shape index: {}]   ;;  %s11958_s14 = inlined_call_operand.vmem [shape: f32[1,128], index: 14, kind: input, shape index: {}]   ;;  %s11959_s15 = inlined_call_operand.vmem [shape: bf16[128,64], index: 15, kind: input, shape index: {}]   ;;  %s11960_s16 = inlined_call_operand.vmem [shape: f32[1,64], index: 16, kind: input, shape index: {}]   ;;  %s11961_s17 = inlined_call_operand.vmem [shape: f32[1,64], index: 17, kind: input, shape index: {}]   ;;  %s11962_s18 = inlined_call_operand.vmem [shape: f32[1,64], index: 18, kind: input, shape index: {}]   ;;  %s11963_s19 = inlined_call_operand.vmem [shape: bf16[64,128], index: 19, kind: input, shape index: {}]   ;;  %s11964_s20 = inlined_call_operand.vmem [shape: f32[1,128], index: 20, kind: input, shape index: {}]   ;;  %s11965_s21 = inlined_call_operand.vmem [shape: f32[8,128], index: 21, kind: output, shape index: {}]  }
   0x1   :  { %12165 = sst [smem:[#allocation116_spill]] %s11944_s0  ;;  %v80_v0 = vld [vmem:[%s11953_s9] sm:$0xf]  ;;  %v82_v1 = vld [vmem:[%s11953_s9 + $0x10] sm:$0xf] }
   0x2   :  { %12166 = sst [smem:[#allocation117_spill]] %s11945_s1  ;;  %v84_v2 = vld [vmem:[%s11953_s9 + $0x4] sm:$0xf]  ;;  %81 = vst [vmem:[#allocation2] sm:$0xf] %v80_v0  ;;  %v94_v7 = vld [vmem:[%s11953_s9 + $0x1c] sm:$0xff]  }
   0x3   :  { %12167 = sst [smem:[#allocation118_spill]] %s11946_s2  ;;  %83 = vst [vmem:[#allocation2 + $0x4] sm:$0xf] %v82_v1  ;;  %85 = vst [vmem:[#allocation2 + $0x8] sm:$0xf] %v84_v2  ;;  %v110_v14 = vld [vmem:[%s11953_s9 + $0x3c] sm:$0xff]  }
   0x4   :  { %12168 = sst [smem:[#allocation119_spill]] %s11947_s3  ;;  %v86_v3 = vld [vmem:[%s11953_s9 + $0x14] sm:$0xf]  ;;  %v88_v4 = vld [vmem:[%s11953_s9 + $0x8] sm:$0xf]  ;;  %95 = vst [vmem:[#allocation2 + $0x1c] sm:$0xff] %v94_v7  }
   0x5   :  { %12169 = sst [smem:[#allocation120_spill]] %s11948_s4  ;;  %v90_v5 = vld [vmem:[%s11953_s9 + $0x18] sm:$0xf]  ;;  %87 = vst [vmem:[#allocation2 + $0xc] sm:$0xf] %v86_v3  ;;  %111 = vst [vmem:[#allocation2 + $0x3c] sm:$0xff] %v110_v14  }
   0x6   :  { %12170 = sst [smem:[#allocation121_spill]] %s11949_s5  ;;  %89 = vst [vmem:[#allocation2 + $0x10] sm:$0xf] %v88_v4  ;;  %91 = vst [vmem:[#allocation2 + $0x14] sm:$0xf] %v90_v5  ;;  %v126_v21 = vld [vmem:[%s11953_s9 + $0x5c] sm:$0xff]  }
   0x7   :  { %v92_v6 = vld [vmem:[%s11953_s9 + $0xc] sm:$0xf]  ;;  %v98_v8 = vld [vmem:[%s11953_s9 + $0x30] sm:$0xf]  ;;  %v100_v9 = vld [vmem:[%s11953_s9 + $0x24] sm:$0xf] }
   0x8   :  { %93 = vst [vmem:[#allocation2 + $0x18] sm:$0xf] %v92_v6  ;;  %99 = vst [vmem:[#allocation2 + $0x24] sm:$0xf] %v98_v8  ;;  %v102_v10 = vld [vmem:[%s11953_s9 + $0x34] sm:$0xf] }
   0x9   :  { %v104_v11 = vld [vmem:[%s11953_s9 + $0x28] sm:$0xf]  ;;  %101 = vst [vmem:[#allocation2 + $0x28] sm:$0xf] %v100_v9  ;;  %103 = vst [vmem:[#allocation2 + $0x2c] sm:$0xf] %v102_v10 }
   0xa   :  { %105 = vst [vmem:[#allocation2 + $0x30] sm:$0xf] %v104_v11  ;;  %v106_v12 = vld [vmem:[%s11953_s9 + $0x38] sm:$0xf]  ;;  %v108_v13 = vld [vmem:[%s11953_s9 + $0x2c] sm:$0xf] }
   0xb   :  { %107 = vst [vmem:[#allocation2 + $0x34] sm:$0xf] %v106_v12  ;;  %109 = vst [vmem:[#allocation2 + $0x38] sm:$0xf] %v108_v13  ;;  %v114_v15 = vld [vmem:[%s11953_s9 + $0x50] sm:$0xf] }
   0xc   :  { %v116_v16 = vld [vmem:[%s11953_s9 + $0x44] sm:$0xf]  ;;  %v118_v17 = vld [vmem:[%s11953_s9 + $0x54] sm:$0xf]  ;;  %115 = vst [vmem:[#allocation2 + $0x44] sm:$0xf] %v114_v15 }
   0xd   :  { %117 = vst [vmem:[#allocation2 + $0x48] sm:$0xf] %v116_v16  ;;  %119 = vst [vmem:[#allocation2 + $0x4c] sm:$0xf] %v118_v17  ;;  %v120_v18 = vld [vmem:[%s11953_s9 + $0x48] sm:$0xf] }
   0xe   :  { %v122_v19 = vld [vmem:[%s11953_s9 + $0x58] sm:$0xf]  ;;  %v124_v20 = vld [vmem:[%s11953_s9 + $0x4c] sm:$0xf]  ;;  %121 = vst [vmem:[#allocation2 + $0x50] sm:$0xf] %v120_v18 }
   0xf   :  { %123 = vst [vmem:[#allocation2 + $0x54] sm:$0xf] %v122_v19  ;;  %125 = vst [vmem:[#allocation2 + $0x58] sm:$0xf] %v124_v20  ;;  %v130_v22 = vld [vmem:[%s11953_s9 + $0x70] sm:$0xf] }
  0x10   :  { %v132_v23 = vld [vmem:[%s11953_s9 + $0x64] sm:$0xf]  ;;  %127 = vst [vmem:[#allocation2 + $0x5c] sm:$0xff] %v126_v21   ;;  %131 = vst [vmem:[#allocation2 + $0x64] sm:$0xf] %v130_v22  ;;  %v142_v28 = vld [vmem:[%s11953_s9 + $0x7c] sm:$0xff]  }
  0x11   :  { %133 = vst [vmem:[#allocation2 + $0x68] sm:$0xf] %v132_v23  ;;  %v134_v24 = vld [vmem:[%s11953_s9 + $0x74] sm:$0xf]  ;;  %v136_v25 = vld [vmem:[%s11953_s9 + $0x68] sm:$0xf] }
  0x12   :  { %v138_v26 = vld [vmem:[%s11953_s9 + $0x78] sm:$0xf]  ;;  %135 = vst [vmem:[#allocation2 + $0x6c] sm:$0xf] %v134_v24  ;;  %137 = vst [vmem:[#allocation2 + $0x70] sm:$0xf] %v136_v25 }
  0x13   :  { %139 = vst [vmem:[#allocation2 + $0x74] sm:$0xf] %v138_v26  ;;  %v140_v27 = vld [vmem:[%s11953_s9 + $0x6c] sm:$0xf]  ;;  %v146_v29 = vld [vmem:[%s11953_s9 + $0x90] sm:$0xf] }
  0x14   :  { %141 = vst [vmem:[#allocation2 + $0x78] sm:$0xf] %v140_v27  ;;  %143 = vst [vmem:[#allocation2 + $0x7c] sm:$0xff] %v142_v28   ;;  %v148_v30 = vld [vmem:[%s11953_s9 + $0x84] sm:$0xf]  ;;  %v158_v35 = vld [vmem:[%s11953_s9 + $0x9c] sm:$0xff]  }
  0x15   :  { %147 = vst [vmem:[#allocation2 + $0x84] sm:$0xf] %v146_v29  ;;  %v150_v31 = vld [vmem:[%s11953_s9 + $0x94] sm:$0xf]  ;;  %v152_v32 = vld [vmem:[%s11953_s9 + $0x88] sm:$0xf] }
  0x16   :  { %149 = vst [vmem:[#allocation2 + $0x88] sm:$0xf] %v148_v30  ;;  %151 = vst [vmem:[#allocation2 + $0x8c] sm:$0xf] %v150_v31  ;;  %v154_v33 = vld [vmem:[%s11953_s9 + $0x98] sm:$0xf] }
  0x17   :  { %153 = vst [vmem:[#allocation2 + $0x90] sm:$0xf] %v152_v32  ;;  %v156_v34 = vld [vmem:[%s11953_s9 + $0x8c] sm:$0xf]  ;;  %155 = vst [vmem:[#allocation2 + $0x94] sm:$0xf] %v154_v33 }
  0x18   :  { %157 = vst [vmem:[#allocation2 + $0x98] sm:$0xf] %v156_v34  ;;  %159 = vst [vmem:[#allocation2 + $0x9c] sm:$0xff] %v158_v35   ;;  %v162_v36 = vld [vmem:[%s11953_s9 + $0xb0] sm:$0xf]  ;;  %v174_v42 = vld [vmem:[%s11953_s9 + $0xbc] sm:$0xff]  }
  0x19   :  { %v164_v37 = vld [vmem:[%s11953_s9 + $0xa4] sm:$0xf]  ;;  %v166_v38 = vld [vmem:[%s11953_s9 + $0xb4] sm:$0xf]  ;;  %163 = vst [vmem:[#allocation2 + $0xa4] sm:$0xf] %v162_v36 }
  0x1a   :  { %165 = vst [vmem:[#allocation2 + $0xa8] sm:$0xf] %v164_v37  ;;  %167 = vst [vmem:[#allocation2 + $0xac] sm:$0xf] %v166_v38  ;;  %v168_v39 = vld [vmem:[%s11953_s9 + $0xa8] sm:$0xf] }
  0x1b   :  { %v170_v40 = vld [vmem:[%s11953_s9 + $0xb8] sm:$0xf]  ;;  %v172_v41 = vld [vmem:[%s11953_s9 + $0xac] sm:$0xf]  ;;  %169 = vst [vmem:[#allocation2 + $0xb0] sm:$0xf] %v168_v39 }
  0x1c   :  { %171 = vst [vmem:[#allocation2 + $0xb4] sm:$0xf] %v170_v40  ;;  %173 = vst [vmem:[#allocation2 + $0xb8] sm:$0xf] %v172_v41  ;;  %v178_v43 = vld [vmem:[%s11953_s9 + $0xd0] sm:$0xf] }
  0x1d   :  { %v180_v44 = vld [vmem:[%s11953_s9 + $0xc4] sm:$0xf]  ;;  %175 = vst [vmem:[#allocation2 + $0xbc] sm:$0xff] %v174_v42   ;;  %179 = vst [vmem:[#allocation2 + $0xc4] sm:$0xf] %v178_v43  ;;  %v190_v49 = vld [vmem:[%s11953_s9 + $0xdc] sm:$0xff]  }
  0x1e   :  { %181 = vst [vmem:[#allocation2 + $0xc8] sm:$0xf] %v180_v44  ;;  %v182_v45 = vld [vmem:[%s11953_s9 + $0xd4] sm:$0xf]  ;;  %v184_v46 = vld [vmem:[%s11953_s9 + $0xc8] sm:$0xf] }
  0x1f   :  { %v186_v47 = vld [vmem:[%s11953_s9 + $0xd8] sm:$0xf]  ;;  %183 = vst [vmem:[#allocation2 + $0xcc] sm:$0xf] %v182_v45  ;;  %185 = vst [vmem:[#allocation2 + $0xd0] sm:$0xf] %v184_v46 }
  0x20   :  { %187 = vst [vmem:[#allocation2 + $0xd4] sm:$0xf] %v186_v47  ;;  %v188_v48 = vld [vmem:[%s11953_s9 + $0xcc] sm:$0xf]  ;;  %v194_v50 = vld [vmem:[%s11953_s9 + $0xf0] sm:$0xf] }
  0x21   :  { %189 = vst [vmem:[#allocation2 + $0xd8] sm:$0xf] %v188_v48  ;;  %191 = vst [vmem:[#allocation2 + $0xdc] sm:$0xff] %v190_v49   ;;  %v196_v51 = vld [vmem:[%s11953_s9 + $0xe4] sm:$0xf]  ;;  %v206_v56 = vld [vmem:[%s11953_s9 + $0xfc] sm:$0xff]  }
  0x22   :  { %195 = vst [vmem:[#allocation2 + $0xe4] sm:$0xf] %v194_v50  ;;  %v198_v52 = vld [vmem:[%s11953_s9 + $0xf4] sm:$0xf]  ;;  %v200_v53 = vld [vmem:[%s11953_s9 + $0xe8] sm:$0xf] }
  0x23   :  { %197 = vst [vmem:[#allocation2 + $0xe8] sm:$0xf] %v196_v51  ;;  %199 = vst [vmem:[#allocation2 + $0xec] sm:$0xf] %v198_v52  ;;  %v202_v54 = vld [vmem:[%s11953_s9 + $0xf8] sm:$0xf] }
  0x24   :  { %201 = vst [vmem:[#allocation2 + $0xf0] sm:$0xf] %v200_v53  ;;  %v204_v55 = vld [vmem:[%s11953_s9 + $0xec] sm:$0xf]  ;;  %203 = vst [vmem:[#allocation2 + $0xf4] sm:$0xf] %v202_v54 }
  0x25   :  { %205 = vst [vmem:[#allocation2 + $0xf8] sm:$0xf] %v204_v55  ;;  %207 = vst [vmem:[#allocation2 + $0xfc] sm:$0xff] %v206_v56   ;;  %v210_v57 = vld [vmem:[%s11953_s9 + $0x110] sm:$0xf]  ;;  %v222_v63 = vld [vmem:[%s11953_s9 + $0x11c] sm:$0xff]  }
  0x26   :  { %v212_v58 = vld [vmem:[%s11953_s9 + $0x104] sm:$0xf]  ;;  %v214_v59 = vld [vmem:[%s11953_s9 + $0x114] sm:$0xf]  ;;  %211 = vst [vmem:[#allocation2 + $0x104] sm:$0xf] %v210_v57 }
  0x27   :  { %213 = vst [vmem:[#allocation2 + $0x108] sm:$0xf] %v212_v58  ;;  %215 = vst [vmem:[#allocation2 + $0x10c] sm:$0xf] %v214_v59  ;;  %v216_v60 = vld [vmem:[%s11953_s9 + $0x108] sm:$0xf] }
  0x28   :  { %v218_v61 = vld [vmem:[%s11953_s9 + $0x118] sm:$0xf]  ;;  %v220_v62 = vld [vmem:[%s11953_s9 + $0x10c] sm:$0xf]  ;;  %217 = vst [vmem:[#allocation2 + $0x110] sm:$0xf] %v216_v60 }
  0x29   :  { %219 = vst [vmem:[#allocation2 + $0x114] sm:$0xf] %v218_v61  ;;  %221 = vst [vmem:[#allocation2 + $0x118] sm:$0xf] %v220_v62  ;;  %v226_v0 = vld [vmem:[%s11953_s9 + $0x130] sm:$0xf] }
  0x2a   :  { %v228_v1 = vld [vmem:[%s11953_s9 + $0x124] sm:$0xf]  ;;  %223 = vst [vmem:[#allocation2 + $0x11c] sm:$0xff] %v222_v63   ;;  %227 = vst [vmem:[#allocation2 + $0x124] sm:$0xf] %v226_v0  ;;  %v238_v6 = vld [vmem:[%s11953_s9 + $0x13c] sm:$0xff]  }
  0x2b   :  { %229 = vst [vmem:[#allocation2 + $0x128] sm:$0xf] %v228_v1  ;;  %v230_v2 = vld [vmem:[%s11953_s9 + $0x134] sm:$0xf]  ;;  %v232_v3 = vld [vmem:[%s11953_s9 + $0x128] sm:$0xf] }
  0x2c   :  { %v234_v4 = vld [vmem:[%s11953_s9 + $0x138] sm:$0xf]  ;;  %231 = vst [vmem:[#allocation2 + $0x12c] sm:$0xf] %v230_v2  ;;  %233 = vst [vmem:[#allocation2 + $0x130] sm:$0xf] %v232_v3 }
  0x2d   :  { %235 = vst [vmem:[#allocation2 + $0x134] sm:$0xf] %v234_v4  ;;  %v236_v5 = vld [vmem:[%s11953_s9 + $0x12c] sm:$0xf]  ;;  %v242_v7 = vld [vmem:[%s11953_s9 + $0x150] sm:$0xf] }
  0x2e   :  { %237 = vst [vmem:[#allocation2 + $0x138] sm:$0xf] %v236_v5  ;;  %239 = vst [vmem:[#allocation2 + $0x13c] sm:$0xff] %v238_v6   ;;  %v244_v8 = vld [vmem:[%s11953_s9 + $0x144] sm:$0xf]  ;;  %v254_v13 = vld [vmem:[%s11953_s9 + $0x15c] sm:$0xff]  }
  0x2f   :  { %243 = vst [vmem:[#allocation2 + $0x144] sm:$0xf] %v242_v7  ;;  %v246_v9 = vld [vmem:[%s11953_s9 + $0x154] sm:$0xf]  ;;  %v248_v10 = vld [vmem:[%s11953_s9 + $0x148] sm:$0xf] }
  0x30   :  { %245 = vst [vmem:[#allocation2 + $0x148] sm:$0xf] %v244_v8  ;;  %247 = vst [vmem:[#allocation2 + $0x14c] sm:$0xf] %v246_v9  ;;  %v250_v11 = vld [vmem:[%s11953_s9 + $0x158] sm:$0xf] }
  0x31   :  { %249 = vst [vmem:[#allocation2 + $0x150] sm:$0xf] %v248_v10  ;;  %v252_v12 = vld [vmem:[%s11953_s9 + $0x14c] sm:$0xf]  ;;  %251 = vst [vmem:[#allocation2 + $0x154] sm:$0xf] %v250_v11 }
  0x32   :  { %253 = vst [vmem:[#allocation2 + $0x158] sm:$0xf] %v252_v12  ;;  %255 = vst [vmem:[#allocation2 + $0x15c] sm:$0xff] %v254_v13   ;;  %v258_v14 = vld [vmem:[%s11953_s9 + $0x170] sm:$0xf]  ;;  %v270_v20 = vld [vmem:[%s11953_s9 + $0x17c] sm:$0xff]  }
  0x33   :  { %v260_v15 = vld [vmem:[%s11953_s9 + $0x164] sm:$0xf]  ;;  %v262_v16 = vld [vmem:[%s11953_s9 + $0x174] sm:$0xf]  ;;  %259 = vst [vmem:[#allocation2 + $0x164] sm:$0xf] %v258_v14 }
  0x34   :  { %261 = vst [vmem:[#allocation2 + $0x168] sm:$0xf] %v260_v15  ;;  %263 = vst [vmem:[#allocation2 + $0x16c] sm:$0xf] %v262_v16  ;;  %v264_v17 = vld [vmem:[%s11953_s9 + $0x168] sm:$0xf] }
  0x35   :  { %v266_v18 = vld [vmem:[%s11953_s9 + $0x178] sm:$0xf]  ;;  %v268_v19 = vld [vmem:[%s11953_s9 + $0x16c] sm:$0xf]  ;;  %265 = vst [vmem:[#allocation2 + $0x170] sm:$0xf] %v264_v17 }
  0x36   :  { %267 = vst [vmem:[#allocation2 + $0x174] sm:$0xf] %v266_v18  ;;  %269 = vst [vmem:[#allocation2 + $0x178] sm:$0xf] %v268_v19  ;;  %v274_v21 = vld [vmem:[%s11953_s9 + $0x190] sm:$0xf] }
  0x37   :  { %v276_v22 = vld [vmem:[%s11953_s9 + $0x184] sm:$0xf]  ;;  %271 = vst [vmem:[#allocation2 + $0x17c] sm:$0xff] %v270_v20   ;;  %275 = vst [vmem:[#allocation2 + $0x184] sm:$0xf] %v274_v21  ;;  %v286_v27 = vld [vmem:[%s11953_s9 + $0x19c] sm:$0xff]  }
  0x38   :  { %277 = vst [vmem:[#allocation2 + $0x188] sm:$0xf] %v276_v22  ;;  %v278_v23 = vld [vmem:[%s11953_s9 + $0x194] sm:$0xf]  ;;  %v280_v24 = vld [vmem:[%s11953_s9 + $0x188] sm:$0xf] }
  0x39   :  { %v282_v25 = vld [vmem:[%s11953_s9 + $0x198] sm:$0xf]  ;;  %279 = vst [vmem:[#allocation2 + $0x18c] sm:$0xf] %v278_v23  ;;  %281 = vst [vmem:[#allocation2 + $0x190] sm:$0xf] %v280_v24 }
  0x3a   :  { %283 = vst [vmem:[#allocation2 + $0x194] sm:$0xf] %v282_v25  ;;  %v284_v26 = vld [vmem:[%s11953_s9 + $0x18c] sm:$0xf]  ;;  %v290_v28 = vld [vmem:[%s11953_s9 + $0x1b0] sm:$0xf] }
  0x3b   :  { %285 = vst [vmem:[#allocation2 + $0x198] sm:$0xf] %v284_v26  ;;  %287 = vst [vmem:[#allocation2 + $0x19c] sm:$0xff] %v286_v27   ;;  %v292_v29 = vld [vmem:[%s11953_s9 + $0x1a4] sm:$0xf]  ;;  %v302_v34 = vld [vmem:[%s11953_s9 + $0x1bc] sm:$0xff]  }
  0x3c   :  { %291 = vst [vmem:[#allocation2 + $0x1a4] sm:$0xf] %v290_v28  ;;  %v294_v30 = vld [vmem:[%s11953_s9 + $0x1b4] sm:$0xf]  ;;  %v296_v31 = vld [vmem:[%s11953_s9 + $0x1a8] sm:$0xf] }
  0x3d   :  { %293 = vst [vmem:[#allocation2 + $0x1a8] sm:$0xf] %v292_v29  ;;  %295 = vst [vmem:[#allocation2 + $0x1ac] sm:$0xf] %v294_v30  ;;  %v298_v32 = vld [vmem:[%s11953_s9 + $0x1b8] sm:$0xf] }
  0x3e   :  { %297 = vst [vmem:[#allocation2 + $0x1b0] sm:$0xf] %v296_v31  ;;  %v300_v33 = vld [vmem:[%s11953_s9 + $0x1ac] sm:$0xf]  ;;  %299 = vst [vmem:[#allocation2 + $0x1b4] sm:$0xf] %v298_v32 }
  0x3f   :  { %301 = vst [vmem:[#allocation2 + $0x1b8] sm:$0xf] %v300_v33  ;;  %303 = vst [vmem:[#allocation2 + $0x1bc] sm:$0xff] %v302_v34   ;;  %v306_v35 = vld [vmem:[%s11953_s9 + $0x1d0] sm:$0xf]  ;;  %v318_v41 = vld [vmem:[%s11953_s9 + $0x1dc] sm:$0xff]  }
  0x40   :  { %v308_v36 = vld [vmem:[%s11953_s9 + $0x1c4] sm:$0xf]  ;;  %v310_v37 = vld [vmem:[%s11953_s9 + $0x1d4] sm:$0xf]  ;;  %307 = vst [vmem:[#allocation2 + $0x1c4] sm:$0xf] %v306_v35 }
  0x41   :  { %309 = vst [vmem:[#allocation2 + $0x1c8] sm:$0xf] %v308_v36  ;;  %311 = vst [vmem:[#allocation2 + $0x1cc] sm:$0xf] %v310_v37  ;;  %v312_v38 = vld [vmem:[%s11953_s9 + $0x1c8] sm:$0xf] }
  0x42   :  { %v314_v39 = vld [vmem:[%s11953_s9 + $0x1d8] sm:$0xf]  ;;  %v316_v40 = vld [vmem:[%s11953_s9 + $0x1cc] sm:$0xf]  ;;  %313 = vst [vmem:[#allocation2 + $0x1d0] sm:$0xf] %v312_v38 }
  0x43   :  { %315 = vst [vmem:[#allocation2 + $0x1d4] sm:$0xf] %v314_v39  ;;  %317 = vst [vmem:[#allocation2 + $0x1d8] sm:$0xf] %v316_v40  ;;  %v322_v42 = vld [vmem:[%s11953_s9 + $0x1f0] sm:$0xf] }
  0x44   :  { %v324_v43 = vld [vmem:[%s11953_s9 + $0x1e4] sm:$0xf]  ;;  %319 = vst [vmem:[#allocation2 + $0x1dc] sm:$0xff] %v318_v41   ;;  %323 = vst [vmem:[#allocation2 + $0x1e4] sm:$0xf] %v322_v42  ;;  %v334_v48 = vld [vmem:[%s11953_s9 + $0x1fc] sm:$0xff]  }
  0x45   :  { %325 = vst [vmem:[#allocation2 + $0x1e8] sm:$0xf] %v324_v43  ;;  %v326_v44 = vld [vmem:[%s11953_s9 + $0x1f4] sm:$0xf]  ;;  %v328_v45 = vld [vmem:[%s11953_s9 + $0x1e8] sm:$0xf] }
  0x46   :  { %v330_v46 = vld [vmem:[%s11953_s9 + $0x1f8] sm:$0xf]  ;;  %327 = vst [vmem:[#allocation2 + $0x1ec] sm:$0xf] %v326_v44  ;;  %329 = vst [vmem:[#allocation2 + $0x1f0] sm:$0xf] %v328_v45 }
  0x47   :  { %331 = vst [vmem:[#allocation2 + $0x1f4] sm:$0xf] %v330_v46  ;;  %v332_v47 = vld [vmem:[%s11953_s9 + $0x1ec] sm:$0xf]  ;;  %v338_v49 = vld [vmem:[%s11953_s9 + $0x210] sm:$0xf] }
  0x48   :  { %333 = vst [vmem:[#allocation2 + $0x1f8] sm:$0xf] %v332_v47  ;;  %335 = vst [vmem:[#allocation2 + $0x1fc] sm:$0xff] %v334_v48   ;;  %v340_v50 = vld [vmem:[%s11953_s9 + $0x204] sm:$0xf]  ;;  %v350_v55 = vld [vmem:[%s11953_s9 + $0x21c] sm:$0xff]  }
  0x49   :  { %339 = vst [vmem:[#allocation2 + $0x204] sm:$0xf] %v338_v49  ;;  %v342_v51 = vld [vmem:[%s11953_s9 + $0x214] sm:$0xf]  ;;  %v344_v52 = vld [vmem:[%s11953_s9 + $0x208] sm:$0xf] }
  0x4a   :  { %341 = vst [vmem:[#allocation2 + $0x208] sm:$0xf] %v340_v50  ;;  %343 = vst [vmem:[#allocation2 + $0x20c] sm:$0xf] %v342_v51  ;;  %v346_v53 = vld [vmem:[%s11953_s9 + $0x218] sm:$0xf] }
  0x4b   :  { %345 = vst [vmem:[#allocation2 + $0x210] sm:$0xf] %v344_v52  ;;  %v348_v54 = vld [vmem:[%s11953_s9 + $0x20c] sm:$0xf]  ;;  %347 = vst [vmem:[#allocation2 + $0x214] sm:$0xf] %v346_v53 }
  0x4c   :  { %349 = vst [vmem:[#allocation2 + $0x218] sm:$0xf] %v348_v54  ;;  %351 = vst [vmem:[#allocation2 + $0x21c] sm:$0xff] %v350_v55   ;;  %v354_v56 = vld [vmem:[%s11953_s9 + $0x230] sm:$0xf]  ;;  %v366_v62 = vld [vmem:[%s11953_s9 + $0x23c] sm:$0xff]  }
  0x4d   :  { %v356_v57 = vld [vmem:[%s11953_s9 + $0x224] sm:$0xf]  ;;  %v358_v58 = vld [vmem:[%s11953_s9 + $0x234] sm:$0xf]  ;;  %355 = vst [vmem:[#allocation2 + $0x224] sm:$0xf] %v354_v56 }
  0x4e   :  { %357 = vst [vmem:[#allocation2 + $0x228] sm:$0xf] %v356_v57  ;;  %359 = vst [vmem:[#allocation2 + $0x22c] sm:$0xf] %v358_v58  ;;  %v360_v59 = vld [vmem:[%s11953_s9 + $0x228] sm:$0xf] }
  0x4f   :  { %v362_v60 = vld [vmem:[%s11953_s9 + $0x238] sm:$0xf]  ;;  %v364_v61 = vld [vmem:[%s11953_s9 + $0x22c] sm:$0xf]  ;;  %361 = vst [vmem:[#allocation2 + $0x230] sm:$0xf] %v360_v59 }
  0x50   :  { %363 = vst [vmem:[#allocation2 + $0x234] sm:$0xf] %v362_v60  ;;  %365 = vst [vmem:[#allocation2 + $0x238] sm:$0xf] %v364_v61  ;;  %v370_v63 = vld [vmem:[%s11953_s9 + $0x250] sm:$0xf] }
  0x51   :  { %v372_v0 = vld [vmem:[%s11953_s9 + $0x244] sm:$0xf]  ;;  %367 = vst [vmem:[#allocation2 + $0x23c] sm:$0xff] %v366_v62   ;;  %371 = vst [vmem:[#allocation2 + $0x244] sm:$0xf] %v370_v63  ;;  %v382_v5 = vld [vmem:[%s11953_s9 + $0x25c] sm:$0xff]  }
  0x52   :  { %373 = vst [vmem:[#allocation2 + $0x248] sm:$0xf] %v372_v0  ;;  %v374_v1 = vld [vmem:[%s11953_s9 + $0x254] sm:$0xf]  ;;  %v376_v2 = vld [vmem:[%s11953_s9 + $0x248] sm:$0xf] }
  0x53   :  { %v378_v3 = vld [vmem:[%s11953_s9 + $0x258] sm:$0xf]  ;;  %375 = vst [vmem:[#allocation2 + $0x24c] sm:$0xf] %v374_v1  ;;  %377 = vst [vmem:[#allocation2 + $0x250] sm:$0xf] %v376_v2 }
  0x54   :  { %379 = vst [vmem:[#allocation2 + $0x254] sm:$0xf] %v378_v3  ;;  %v380_v4 = vld [vmem:[%s11953_s9 + $0x24c] sm:$0xf]  ;;  %v386_v6 = vld [vmem:[%s11953_s9 + $0x270] sm:$0xf] }
  0x55   :  { %381 = vst [vmem:[#allocation2 + $0x258] sm:$0xf] %v380_v4  ;;  %383 = vst [vmem:[#allocation2 + $0x25c] sm:$0xff] %v382_v5   ;;  %v388_v7 = vld [vmem:[%s11953_s9 + $0x264] sm:$0xf]  ;;  %v398_v12 = vld [vmem:[%s11953_s9 + $0x27c] sm:$0xff]  }
  0x56   :  { %387 = vst [vmem:[#allocation2 + $0x264] sm:$0xf] %v386_v6  ;;  %v390_v8 = vld [vmem:[%s11953_s9 + $0x274] sm:$0xf]  ;;  %v392_v9 = vld [vmem:[%s11953_s9 + $0x268] sm:$0xf] }
  0x57   :  { %389 = vst [vmem:[#allocation2 + $0x268] sm:$0xf] %v388_v7  ;;  %391 = vst [vmem:[#allocation2 + $0x26c] sm:$0xf] %v390_v8  ;;  %v394_v10 = vld [vmem:[%s11953_s9 + $0x278] sm:$0xf] }
  0x58   :  { %393 = vst [vmem:[#allocation2 + $0x270] sm:$0xf] %v392_v9  ;;  %v396_v11 = vld [vmem:[%s11953_s9 + $0x26c] sm:$0xf]  ;;  %395 = vst [vmem:[#allocation2 + $0x274] sm:$0xf] %v394_v10 }
  0x59   :  { %397 = vst [vmem:[#allocation2 + $0x278] sm:$0xf] %v396_v11  ;;  %399 = vst [vmem:[#allocation2 + $0x27c] sm:$0xff] %v398_v12   ;;  %v402_v13 = vld [vmem:[%s11953_s9 + $0x290] sm:$0xf]  ;;  %v414_v19 = vld [vmem:[%s11953_s9 + $0x29c] sm:$0xff]  }
  0x5a   :  { %v404_v14 = vld [vmem:[%s11953_s9 + $0x284] sm:$0xf]  ;;  %v406_v15 = vld [vmem:[%s11953_s9 + $0x294] sm:$0xf]  ;;  %403 = vst [vmem:[#allocation2 + $0x284] sm:$0xf] %v402_v13 }
  0x5b   :  { %405 = vst [vmem:[#allocation2 + $0x288] sm:$0xf] %v404_v14  ;;  %407 = vst [vmem:[#allocation2 + $0x28c] sm:$0xf] %v406_v15  ;;  %v408_v16 = vld [vmem:[%s11953_s9 + $0x288] sm:$0xf] }
  0x5c   :  { %v410_v17 = vld [vmem:[%s11953_s9 + $0x298] sm:$0xf]  ;;  %v412_v18 = vld [vmem:[%s11953_s9 + $0x28c] sm:$0xf]  ;;  %409 = vst [vmem:[#allocation2 + $0x290] sm:$0xf] %v408_v16 }
  0x5d   :  { %411 = vst [vmem:[#allocation2 + $0x294] sm:$0xf] %v410_v17  ;;  %413 = vst [vmem:[#allocation2 + $0x298] sm:$0xf] %v412_v18  ;;  %v418_v20 = vld [vmem:[%s11953_s9 + $0x2b0] sm:$0xf] }
  0x5e   :  { %v420_v21 = vld [vmem:[%s11953_s9 + $0x2a4] sm:$0xf]  ;;  %415 = vst [vmem:[#allocation2 + $0x29c] sm:$0xff] %v414_v19   ;;  %419 = vst [vmem:[#allocation2 + $0x2a4] sm:$0xf] %v418_v20  ;;  %v430_v26 = vld [vmem:[%s11953_s9 + $0x2bc] sm:$0xff]  }
  0x5f   :  { %421 = vst [vmem:[#allocation2 + $0x2a8] sm:$0xf] %v420_v21  ;;  %v422_v22 = vld [vmem:[%s11953_s9 + $0x2b4] sm:$0xf]  ;;  %v424_v23 = vld [vmem:[%s11953_s9 + $0x2a8] sm:$0xf] }
  0x60   :  { %v426_v24 = vld [vmem:[%s11953_s9 + $0x2b8] sm:$0xf]  ;;  %423 = vst [vmem:[#allocation2 + $0x2ac] sm:$0xf] %v422_v22  ;;  %425 = vst [vmem:[#allocation2 + $0x2b0] sm:$0xf] %v424_v23 }
  0x61   :  { %427 = vst [vmem:[#allocation2 + $0x2b4] sm:$0xf] %v426_v24  ;;  %v428_v25 = vld [vmem:[%s11953_s9 + $0x2ac] sm:$0xf]  ;;  %v434_v27 = vld [vmem:[%s11953_s9 + $0x2d0] sm:$0xf] }
  0x62   :  { %429 = vst [vmem:[#allocation2 + $0x2b8] sm:$0xf] %v428_v25  ;;  %431 = vst [vmem:[#allocation2 + $0x2bc] sm:$0xff] %v430_v26   ;;  %v436_v28 = vld [vmem:[%s11953_s9 + $0x2c4] sm:$0xf]  ;;  %v446_v33 = vld [vmem:[%s11953_s9 + $0x2dc] sm:$0xff]  }
  0x63   :  { %435 = vst [vmem:[#allocation2 + $0x2c4] sm:$0xf] %v434_v27  ;;  %v438_v29 = vld [vmem:[%s11953_s9 + $0x2d4] sm:$0xf]  ;;  %v440_v30 = vld [vmem:[%s11953_s9 + $0x2c8] sm:$0xf] }
  0x64   :  { %437 = vst [vmem:[#allocation2 + $0x2c8] sm:$0xf] %v436_v28  ;;  %439 = vst [vmem:[#allocation2 + $0x2cc] sm:$0xf] %v438_v29  ;;  %v442_v31 = vld [vmem:[%s11953_s9 + $0x2d8] sm:$0xf] }
  0x65   :  { %441 = vst [vmem:[#allocation2 + $0x2d0] sm:$0xf] %v440_v30  ;;  %v444_v32 = vld [vmem:[%s11953_s9 + $0x2cc] sm:$0xf]  ;;  %443 = vst [vmem:[#allocation2 + $0x2d4] sm:$0xf] %v442_v31 }
  0x66   :  { %445 = vst [vmem:[#allocation2 + $0x2d8] sm:$0xf] %v444_v32  ;;  %447 = vst [vmem:[#allocation2 + $0x2dc] sm:$0xff] %v446_v33   ;;  %v450_v34 = vld [vmem:[%s11953_s9 + $0x2f0] sm:$0xf]  ;;  %v462_v40 = vld [vmem:[%s11953_s9 + $0x2fc] sm:$0xff]  }
  0x67   :  { %v452_v35 = vld [vmem:[%s11953_s9 + $0x2e4] sm:$0xf]  ;;  %v454_v36 = vld [vmem:[%s11953_s9 + $0x2f4] sm:$0xf]  ;;  %451 = vst [vmem:[#allocation2 + $0x2e4] sm:$0xf] %v450_v34 }
  0x68   :  { %453 = vst [vmem:[#allocation2 + $0x2e8] sm:$0xf] %v452_v35  ;;  %455 = vst [vmem:[#allocation2 + $0x2ec] sm:$0xf] %v454_v36  ;;  %v456_v37 = vld [vmem:[%s11953_s9 + $0x2e8] sm:$0xf] }
  0x69   :  { %v458_v38 = vld [vmem:[%s11953_s9 + $0x2f8] sm:$0xf]  ;;  %v460_v39 = vld [vmem:[%s11953_s9 + $0x2ec] sm:$0xf]  ;;  %457 = vst [vmem:[#allocation2 + $0x2f0] sm:$0xf] %v456_v37 }
  0x6a   :  { %459 = vst [vmem:[#allocation2 + $0x2f4] sm:$0xf] %v458_v38  ;;  %461 = vst [vmem:[#allocation2 + $0x2f8] sm:$0xf] %v460_v39  ;;  %v466_v41 = vld [vmem:[%s11953_s9 + $0x310] sm:$0xf] }
  0x6b   :  { %v468_v42 = vld [vmem:[%s11953_s9 + $0x304] sm:$0xf]  ;;  %463 = vst [vmem:[#allocation2 + $0x2fc] sm:$0xff] %v462_v40   ;;  %467 = vst [vmem:[#allocation2 + $0x304] sm:$0xf] %v466_v41  ;;  %v478_v47 = vld [vmem:[%s11953_s9 + $0x31c] sm:$0xff]  }
  0x6c   :  { %469 = vst [vmem:[#allocation2 + $0x308] sm:$0xf] %v468_v42  ;;  %v470_v43 = vld [vmem:[%s11953_s9 + $0x314] sm:$0xf]  ;;  %v472_v44 = vld [vmem:[%s11953_s9 + $0x308] sm:$0xf] }
  0x6d   :  { %v474_v45 = vld [vmem:[%s11953_s9 + $0x318] sm:$0xf]  ;;  %471 = vst [vmem:[#allocation2 + $0x30c] sm:$0xf] %v470_v43  ;;  %473 = vst [vmem:[#allocation2 + $0x310] sm:$0xf] %v472_v44 }
  0x6e   :  { %475 = vst [vmem:[#allocation2 + $0x314] sm:$0xf] %v474_v45  ;;  %v476_v46 = vld [vmem:[%s11953_s9 + $0x30c] sm:$0xf]  ;;  %v482_v48 = vld [vmem:[%s11953_s9 + $0x330] sm:$0xf] }
  0x6f   :  { %477 = vst [vmem:[#allocation2 + $0x318] sm:$0xf] %v476_v46  ;;  %479 = vst [vmem:[#allocation2 + $0x31c] sm:$0xff] %v478_v47   ;;  %v484_v49 = vld [vmem:[%s11953_s9 + $0x324] sm:$0xf]  ;;  %v494_v54 = vld [vmem:[%s11953_s9 + $0x33c] sm:$0xff]  }
  0x70   :  { %483 = vst [vmem:[#allocation2 + $0x324] sm:$0xf] %v482_v48  ;;  %v486_v50 = vld [vmem:[%s11953_s9 + $0x334] sm:$0xf]  ;;  %v488_v51 = vld [vmem:[%s11953_s9 + $0x328] sm:$0xf] }
  0x71   :  { %485 = vst [vmem:[#allocation2 + $0x328] sm:$0xf] %v484_v49  ;;  %487 = vst [vmem:[#allocation2 + $0x32c] sm:$0xf] %v486_v50  ;;  %v490_v52 = vld [vmem:[%s11953_s9 + $0x338] sm:$0xf] }
  0x72   :  { %489 = vst [vmem:[#allocation2 + $0x330] sm:$0xf] %v488_v51  ;;  %v492_v53 = vld [vmem:[%s11953_s9 + $0x32c] sm:$0xf]  ;;  %491 = vst [vmem:[#allocation2 + $0x334] sm:$0xf] %v490_v52 }
  0x73   :  { %493 = vst [vmem:[#allocation2 + $0x338] sm:$0xf] %v492_v53  ;;  %495 = vst [vmem:[#allocation2 + $0x33c] sm:$0xff] %v494_v54   ;;  %v498_v55 = vld [vmem:[%s11953_s9 + $0x350] sm:$0xf]  ;;  %v510_v61 = vld [vmem:[%s11953_s9 + $0x35c] sm:$0xff]  }
  0x74   :  { %v500_v56 = vld [vmem:[%s11953_s9 + $0x344] sm:$0xf]  ;;  %v502_v57 = vld [vmem:[%s11953_s9 + $0x354] sm:$0xf]  ;;  %499 = vst [vmem:[#allocation2 + $0x344] sm:$0xf] %v498_v55 }
  0x75   :  { %501 = vst [vmem:[#allocation2 + $0x348] sm:$0xf] %v500_v56  ;;  %503 = vst [vmem:[#allocation2 + $0x34c] sm:$0xf] %v502_v57  ;;  %v504_v58 = vld [vmem:[%s11953_s9 + $0x348] sm:$0xf] }
  0x76   :  { %v506_v59 = vld [vmem:[%s11953_s9 + $0x358] sm:$0xf]  ;;  %v508_v60 = vld [vmem:[%s11953_s9 + $0x34c] sm:$0xf]  ;;  %505 = vst [vmem:[#allocation2 + $0x350] sm:$0xf] %v504_v58 }
  0x77   :  { %507 = vst [vmem:[#allocation2 + $0x354] sm:$0xf] %v506_v59  ;;  %509 = vst [vmem:[#allocation2 + $0x358] sm:$0xf] %v508_v60  ;;  %v514_v62 = vld [vmem:[%s11953_s9 + $0x370] sm:$0xf] }
  0x78   :  { %v516_v63 = vld [vmem:[%s11953_s9 + $0x364] sm:$0xf]  ;;  %511 = vst [vmem:[#allocation2 + $0x35c] sm:$0xff] %v510_v61   ;;  %515 = vst [vmem:[#allocation2 + $0x364] sm:$0xf] %v514_v62  ;;  %v526_v4 = vld [vmem:[%s11953_s9 + $0x37c] sm:$0xff]  }
  0x79   :  { %517 = vst [vmem:[#allocation2 + $0x368] sm:$0xf] %v516_v63  ;;  %v518_v0 = vld [vmem:[%s11953_s9 + $0x374] sm:$0xf]  ;;  %v520_v1 = vld [vmem:[%s11953_s9 + $0x368] sm:$0xf] }
  0x7a   :  { %v522_v2 = vld [vmem:[%s11953_s9 + $0x378] sm:$0xf]  ;;  %519 = vst [vmem:[#allocation2 + $0x36c] sm:$0xf] %v518_v0  ;;  %521 = vst [vmem:[#allocation2 + $0x370] sm:$0xf] %v520_v1 }
  0x7b   :  { %523 = vst [vmem:[#allocation2 + $0x374] sm:$0xf] %v522_v2  ;;  %v524_v3 = vld [vmem:[%s11953_s9 + $0x36c] sm:$0xf]  ;;  %v530_v5 = vld [vmem:[%s11953_s9 + $0x390] sm:$0xf] }
  0x7c   :  { %525 = vst [vmem:[#allocation2 + $0x378] sm:$0xf] %v524_v3  ;;  %527 = vst [vmem:[#allocation2 + $0x37c] sm:$0xff] %v526_v4   ;;  %v532_v6 = vld [vmem:[%s11953_s9 + $0x384] sm:$0xf]  ;;  %v542_v11 = vld [vmem:[%s11953_s9 + $0x39c] sm:$0xff]  }
  0x7d   :  { %531 = vst [vmem:[#allocation2 + $0x384] sm:$0xf] %v530_v5  ;;  %v534_v7 = vld [vmem:[%s11953_s9 + $0x394] sm:$0xf]  ;;  %v536_v8 = vld [vmem:[%s11953_s9 + $0x388] sm:$0xf] }
  0x7e   :  { %533 = vst [vmem:[#allocation2 + $0x388] sm:$0xf] %v532_v6  ;;  %535 = vst [vmem:[#allocation2 + $0x38c] sm:$0xf] %v534_v7  ;;  %v538_v9 = vld [vmem:[%s11953_s9 + $0x398] sm:$0xf] }
  0x7f   :  { %537 = vst [vmem:[#allocation2 + $0x390] sm:$0xf] %v536_v8  ;;  %v540_v10 = vld [vmem:[%s11953_s9 + $0x38c] sm:$0xf]  ;;  %539 = vst [vmem:[#allocation2 + $0x394] sm:$0xf] %v538_v9 }
  0x80   :  { %541 = vst [vmem:[#allocation2 + $0x398] sm:$0xf] %v540_v10  ;;  %543 = vst [vmem:[#allocation2 + $0x39c] sm:$0xff] %v542_v11   ;;  %v546_v12 = vld [vmem:[%s11953_s9 + $0x3b0] sm:$0xf]  ;;  %v558_v18 = vld [vmem:[%s11953_s9 + $0x3bc] sm:$0xff]  }
  0x81   :  { %v548_v13 = vld [vmem:[%s11953_s9 + $0x3a4] sm:$0xf]  ;;  %v550_v14 = vld [vmem:[%s11953_s9 + $0x3b4] sm:$0xf]  ;;  %547 = vst [vmem:[#allocation2 + $0x3a4] sm:$0xf] %v546_v12 }
  0x82   :  { %549 = vst [vmem:[#allocation2 + $0x3a8] sm:$0xf] %v548_v13  ;;  %551 = vst [vmem:[#allocation2 + $0x3ac] sm:$0xf] %v550_v14  ;;  %v552_v15 = vld [vmem:[%s11953_s9 + $0x3a8] sm:$0xf] }
  0x83   :  { %v554_v16 = vld [vmem:[%s11953_s9 + $0x3b8] sm:$0xf]  ;;  %v556_v17 = vld [vmem:[%s11953_s9 + $0x3ac] sm:$0xf]  ;;  %553 = vst [vmem:[#allocation2 + $0x3b0] sm:$0xf] %v552_v15 }
  0x84   :  { %555 = vst [vmem:[#allocation2 + $0x3b4] sm:$0xf] %v554_v16  ;;  %557 = vst [vmem:[#allocation2 + $0x3b8] sm:$0xf] %v556_v17  ;;  %v562_v19 = vld [vmem:[%s11953_s9 + $0x3d0] sm:$0xf] }
  0x85   :  { %v564_v20 = vld [vmem:[%s11953_s9 + $0x3c4] sm:$0xf]  ;;  %559 = vst [vmem:[#allocation2 + $0x3bc] sm:$0xff] %v558_v18   ;;  %563 = vst [vmem:[#allocation2 + $0x3c4] sm:$0xf] %v562_v19  ;;  %v574_v25 = vld [vmem:[%s11953_s9 + $0x3dc] sm:$0xff]  }
  0x86   :  { %565 = vst [vmem:[#allocation2 + $0x3c8] sm:$0xf] %v564_v20  ;;  %v566_v21 = vld [vmem:[%s11953_s9 + $0x3d4] sm:$0xf]  ;;  %v568_v22 = vld [vmem:[%s11953_s9 + $0x3c8] sm:$0xf] }
  0x87   :  { %v570_v23 = vld [vmem:[%s11953_s9 + $0x3d8] sm:$0xf]  ;;  %567 = vst [vmem:[#allocation2 + $0x3cc] sm:$0xf] %v566_v21  ;;  %569 = vst [vmem:[#allocation2 + $0x3d0] sm:$0xf] %v568_v22 }
  0x88   :  { %571 = vst [vmem:[#allocation2 + $0x3d4] sm:$0xf] %v570_v23  ;;  %v572_v24 = vld [vmem:[%s11953_s9 + $0x3cc] sm:$0xf]  ;;  %v578_v26 = vld [vmem:[%s11953_s9 + $0x3f0] sm:$0xf] }
  0x89   :  { %573 = vst [vmem:[#allocation2 + $0x3d8] sm:$0xf] %v572_v24  ;;  %575 = vst [vmem:[#allocation2 + $0x3dc] sm:$0xff] %v574_v25   ;;  %v580_v27 = vld [vmem:[%s11953_s9 + $0x3e4] sm:$0xf] }
  0x8a   :  { %579 = vst [vmem:[#allocation2 + $0x3e4] sm:$0xf] %v578_v26  ;;  %v582_v28 = vld [vmem:[%s11953_s9 + $0x3f4] sm:$0xf]  ;;  %v584_v29 = vld [vmem:[%s11953_s9 + $0x3e8] sm:$0xf] }
  0x8b   :  { %581 = vst [vmem:[#allocation2 + $0x3e8] sm:$0xf] %v580_v27  ;;  %583 = vst [vmem:[#allocation2 + $0x3ec] sm:$0xf] %v582_v28  ;;  %v586_v30 = vld [vmem:[%s11953_s9 + $0x3f8] sm:$0xf] }
  0x8c   :  { %585 = vst [vmem:[#allocation2 + $0x3f0] sm:$0xf] %v584_v29  ;;  %v588_v31 = vld [vmem:[%s11953_s9 + $0x3ec] sm:$0xf]  ;;  %v590_v32 = vld [vmem:[%s11953_s9 + $0x3fc] sm:$0xf] }
  0x8d   :  { %587 = vst [vmem:[#allocation2 + $0x3f4] sm:$0xf] %v586_v30  ;;  %589 = vst [vmem:[#allocation2 + $0x3f8] sm:$0xf] %v588_v31 }
  0x8e   :  { %591 = vst [vmem:[#allocation2 + $0x3fc] sm:$0xf] %v590_v32 }
  0x8f   :  { %1134 = vsyncadd [#allocation5], 16384  ;;  %v1153_v33 = vld [vmem:[%s11954_s10] sm:$0xf]  ;;  %v1155_v34 = vld [vmem:[%s11954_s10 + $0x10] sm:$0xf] }
  0x90   :  { %1154 = vst [vmem:[#allocation3] sm:$0xf] %v1153_v33  ;;  %1156 = vst [vmem:[#allocation3 + $0x4] sm:$0xf] %v1155_v34  ;;  %v1157_v35 = vld [vmem:[%s11954_s10 + $0x4] sm:$0xf] }
  0x91   :  { %v1159_v36 = vld [vmem:[%s11954_s10 + $0x14] sm:$0xf]  ;;  %v1161_v37 = vld [vmem:[%s11954_s10 + $0x8] sm:$0xf]  ;;  %1158 = vst [vmem:[#allocation3 + $0x8] sm:$0xf] %v1157_v35 }
  0x92   :  { %1160 = vst [vmem:[#allocation3 + $0xc] sm:$0xf] %v1159_v36  ;;  %1162 = vst [vmem:[#allocation3 + $0x10] sm:$0xf] %v1161_v37  ;;  %v1163_v38 = vld [vmem:[%s11954_s10 + $0x18] sm:$0xf] }
  0x93   :  { %v1165_v39 = vld [vmem:[%s11954_s10 + $0xc] sm:$0xf]  ;;  %v1167_v40 = vld [vmem:[%s11954_s10 + $0x1c] sm:$0xff]   ;;  %1164 = vst [vmem:[#allocation3 + $0x14] sm:$0xf] %v1163_v38 }
  0x94   :  { %1166 = vst [vmem:[#allocation3 + $0x18] sm:$0xf] %v1165_v39  ;;  %1168 = vst [vmem:[#allocation3 + $0x1c] sm:$0xff] %v1167_v40   ;;  %v1171_v41 = vld [vmem:[%s11954_s10 + $0x30] sm:$0xf]  ;;  %v1183_v47 = vld [vmem:[%s11954_s10 + $0x3c] sm:$0xff]  }
  0x95   :  { %v1173_v42 = vld [vmem:[%s11954_s10 + $0x24] sm:$0xf]  ;;  %v1175_v43 = vld [vmem:[%s11954_s10 + $0x34] sm:$0xf]  ;;  %1172 = vst [vmem:[#allocation3 + $0x24] sm:$0xf] %v1171_v41 }
  0x96   :  { %1174 = vst [vmem:[#allocation3 + $0x28] sm:$0xf] %v1173_v42  ;;  %1176 = vst [vmem:[#allocation3 + $0x2c] sm:$0xf] %v1175_v43  ;;  %v1177_v44 = vld [vmem:[%s11954_s10 + $0x28] sm:$0xf] }
  0x97   :  { %v1179_v45 = vld [vmem:[%s11954_s10 + $0x38] sm:$0xf]  ;;  %v1181_v46 = vld [vmem:[%s11954_s10 + $0x2c] sm:$0xf]  ;;  %1178 = vst [vmem:[#allocation3 + $0x30] sm:$0xf] %v1177_v44 }
  0x98   :  { %1180 = vst [vmem:[#allocation3 + $0x34] sm:$0xf] %v1179_v45  ;;  %1182 = vst [vmem:[#allocation3 + $0x38] sm:$0xf] %v1181_v46  ;;  %v1187_v48 = vld [vmem:[%s11954_s10 + $0x50] sm:$0xf] }
  0x99   :  { %v1189_v49 = vld [vmem:[%s11954_s10 + $0x44] sm:$0xf]  ;;  %1184 = vst [vmem:[#allocation3 + $0x3c] sm:$0xff] %v1183_v47   ;;  %1188 = vst [vmem:[#allocation3 + $0x44] sm:$0xf] %v1187_v48  ;;  %v1199_v54 = vld [vmem:[%s11954_s10 + $0x5c] sm:$0xff]  }
  0x9a   :  { %1190 = vst [vmem:[#allocation3 + $0x48] sm:$0xf] %v1189_v49  ;;  %v1191_v50 = vld [vmem:[%s11954_s10 + $0x54] sm:$0xf]  ;;  %v1193_v51 = vld [vmem:[%s11954_s10 + $0x48] sm:$0xf] }
  0x9b   :  { %v1195_v52 = vld [vmem:[%s11954_s10 + $0x58] sm:$0xf]  ;;  %1192 = vst [vmem:[#allocation3 + $0x4c] sm:$0xf] %v1191_v50  ;;  %1194 = vst [vmem:[#allocation3 + $0x50] sm:$0xf] %v1193_v51 }
  0x9c   :  { %1196 = vst [vmem:[#allocation3 + $0x54] sm:$0xf] %v1195_v52  ;;  %v1197_v53 = vld [vmem:[%s11954_s10 + $0x4c] sm:$0xf]  ;;  %v1203_v55 = vld [vmem:[%s11954_s10 + $0x70] sm:$0xf] }
  0x9d   :  { %1198 = vst [vmem:[#allocation3 + $0x58] sm:$0xf] %v1197_v53  ;;  %1200 = vst [vmem:[#allocation3 + $0x5c] sm:$0xff] %v1199_v54   ;;  %v1205_v56 = vld [vmem:[%s11954_s10 + $0x64] sm:$0xf]  ;;  %v1215_v61 = vld [vmem:[%s11954_s10 + $0x7c] sm:$0xff]  }
  0x9e   :  { %1204 = vst [vmem:[#allocation3 + $0x64] sm:$0xf] %v1203_v55  ;;  %v1207_v57 = vld [vmem:[%s11954_s10 + $0x74] sm:$0xf]  ;;  %v1209_v58 = vld [vmem:[%s11954_s10 + $0x68] sm:$0xf] }
  0x9f   :  { %1206 = vst [vmem:[#allocation3 + $0x68] sm:$0xf] %v1205_v56  ;;  %1208 = vst [vmem:[#allocation3 + $0x6c] sm:$0xf] %v1207_v57  ;;  %v1211_v59 = vld [vmem:[%s11954_s10 + $0x78] sm:$0xf] }
  0xa0   :  { %1210 = vst [vmem:[#allocation3 + $0x70] sm:$0xf] %v1209_v58  ;;  %v1213_v60 = vld [vmem:[%s11954_s10 + $0x6c] sm:$0xf]  ;;  %1212 = vst [vmem:[#allocation3 + $0x74] sm:$0xf] %v1211_v59 }
  0xa1   :  { %1214 = vst [vmem:[#allocation3 + $0x78] sm:$0xf] %v1213_v60  ;;  %1216 = vst [vmem:[#allocation3 + $0x7c] sm:$0xff] %v1215_v61   ;;  %v1219_v62 = vld [vmem:[%s11954_s10 + $0x90] sm:$0xf]  ;;  %v1231_v4 = vld [vmem:[%s11954_s10 + $0x9c] sm:$0xff]  }
  0xa2   :  { %v1221_v63 = vld [vmem:[%s11954_s10 + $0x84] sm:$0xf]  ;;  %v1223_v0 = vld [vmem:[%s11954_s10 + $0x94] sm:$0xf]  ;;  %1220 = vst [vmem:[#allocation3 + $0x84] sm:$0xf] %v1219_v62 }
  0xa3   :  { %1222 = vst [vmem:[#allocation3 + $0x88] sm:$0xf] %v1221_v63  ;;  %1224 = vst [vmem:[#allocation3 + $0x8c] sm:$0xf] %v1223_v0  ;;  %v1225_v1 = vld [vmem:[%s11954_s10 + $0x88] sm:$0xf] }
  0xa4   :  { %v1227_v2 = vld [vmem:[%s11954_s10 + $0x98] sm:$0xf]  ;;  %v1229_v3 = vld [vmem:[%s11954_s10 + $0x8c] sm:$0xf]  ;;  %1226 = vst [vmem:[#allocation3 + $0x90] sm:$0xf] %v1225_v1 }
  0xa5   :  { %1228 = vst [vmem:[#allocation3 + $0x94] sm:$0xf] %v1227_v2  ;;  %1230 = vst [vmem:[#allocation3 + $0x98] sm:$0xf] %v1229_v3  ;;  %v1235_v5 = vld [vmem:[%s11954_s10 + $0xb0] sm:$0xf] }
  0xa6   :  { %v1237_v6 = vld [vmem:[%s11954_s10 + $0xa4] sm:$0xf]  ;;  %1232 = vst [vmem:[#allocation3 + $0x9c] sm:$0xff] %v1231_v4   ;;  %1236 = vst [vmem:[#allocation3 + $0xa4] sm:$0xf] %v1235_v5  ;;  %v1247_v11 = vld [vmem:[%s11954_s10 + $0xbc] sm:$0xff]  }
  0xa7   :  { %1238 = vst [vmem:[#allocation3 + $0xa8] sm:$0xf] %v1237_v6  ;;  %v1239_v7 = vld [vmem:[%s11954_s10 + $0xb4] sm:$0xf]  ;;  %v1241_v8 = vld [vmem:[%s11954_s10 + $0xa8] sm:$0xf] }
  0xa8   :  { %v1243_v9 = vld [vmem:[%s11954_s10 + $0xb8] sm:$0xf]  ;;  %1240 = vst [vmem:[#allocation3 + $0xac] sm:$0xf] %v1239_v7  ;;  %1242 = vst [vmem:[#allocation3 + $0xb0] sm:$0xf] %v1241_v8 }
  0xa9   :  { %1244 = vst [vmem:[#allocation3 + $0xb4] sm:$0xf] %v1243_v9  ;;  %v1245_v10 = vld [vmem:[%s11954_s10 + $0xac] sm:$0xf]  ;;  %v1251_v12 = vld [vmem:[%s11954_s10 + $0xd0] sm:$0xf] }
  0xaa   :  { %1246 = vst [vmem:[#allocation3 + $0xb8] sm:$0xf] %v1245_v10  ;;  %1248 = vst [vmem:[#allocation3 + $0xbc] sm:$0xff] %v1247_v11   ;;  %v1253_v13 = vld [vmem:[%s11954_s10 + $0xc4] sm:$0xf]  ;;  %v1263_v18 = vld [vmem:[%s11954_s10 + $0xdc] sm:$0xff]  }
  0xab   :  { %1252 = vst [vmem:[#allocation3 + $0xc4] sm:$0xf] %v1251_v12  ;;  %v1255_v14 = vld [vmem:[%s11954_s10 + $0xd4] sm:$0xf]  ;;  %v1257_v15 = vld [vmem:[%s11954_s10 + $0xc8] sm:$0xf] }
  0xac   :  { %1254 = vst [vmem:[#allocation3 + $0xc8] sm:$0xf] %v1253_v13  ;;  %1256 = vst [vmem:[#allocation3 + $0xcc] sm:$0xf] %v1255_v14  ;;  %v1259_v16 = vld [vmem:[%s11954_s10 + $0xd8] sm:$0xf] }
  0xad   :  { %1258 = vst [vmem:[#allocation3 + $0xd0] sm:$0xf] %v1257_v15  ;;  %v1261_v17 = vld [vmem:[%s11954_s10 + $0xcc] sm:$0xf]  ;;  %1260 = vst [vmem:[#allocation3 + $0xd4] sm:$0xf] %v1259_v16 }
  0xae   :  { %1262 = vst [vmem:[#allocation3 + $0xd8] sm:$0xf] %v1261_v17  ;;  %1264 = vst [vmem:[#allocation3 + $0xdc] sm:$0xff] %v1263_v18   ;;  %v1267_v19 = vld [vmem:[%s11954_s10 + $0xf0] sm:$0xf]  ;;  %v1279_v25 = vld [vmem:[%s11954_s10 + $0xfc] sm:$0xff]  }
  0xaf   :  { %v1269_v20 = vld [vmem:[%s11954_s10 + $0xe4] sm:$0xf]  ;;  %v1271_v21 = vld [vmem:[%s11954_s10 + $0xf4] sm:$0xf]  ;;  %1268 = vst [vmem:[#allocation3 + $0xe4] sm:$0xf] %v1267_v19 }
  0xb0   :  { %1270 = vst [vmem:[#allocation3 + $0xe8] sm:$0xf] %v1269_v20  ;;  %1272 = vst [vmem:[#allocation3 + $0xec] sm:$0xf] %v1271_v21  ;;  %v1273_v22 = vld [vmem:[%s11954_s10 + $0xe8] sm:$0xf] }
  0xb1   :  { %v1275_v23 = vld [vmem:[%s11954_s10 + $0xf8] sm:$0xf]  ;;  %v1277_v24 = vld [vmem:[%s11954_s10 + $0xec] sm:$0xf]  ;;  %1274 = vst [vmem:[#allocation3 + $0xf0] sm:$0xf] %v1273_v22 }
  0xb2   :  { %1276 = vst [vmem:[#allocation3 + $0xf4] sm:$0xf] %v1275_v23  ;;  %1278 = vst [vmem:[#allocation3 + $0xf8] sm:$0xf] %v1277_v24  ;;  %v1283_v26 = vld [vmem:[%s11954_s10 + $0x110] sm:$0xf] }
  0xb3   :  { %v1285_v27 = vld [vmem:[%s11954_s10 + $0x104] sm:$0xf]  ;;  %1280 = vst [vmem:[#allocation3 + $0xfc] sm:$0xff] %v1279_v25   ;;  %1284 = vst [vmem:[#allocation3 + $0x104] sm:$0xf] %v1283_v26  ;;  %v1295_v32 = vld [vmem:[%s11954_s10 + $0x11c] sm:$0xff]  }
  0xb4   :  { %1286 = vst [vmem:[#allocation3 + $0x108] sm:$0xf] %v1285_v27  ;;  %v1287_v28 = vld [vmem:[%s11954_s10 + $0x114] sm:$0xf]  ;;  %v1289_v29 = vld [vmem:[%s11954_s10 + $0x108] sm:$0xf] }
  0xb5   :  { %v1291_v30 = vld [vmem:[%s11954_s10 + $0x118] sm:$0xf]  ;;  %1288 = vst [vmem:[#allocation3 + $0x10c] sm:$0xf] %v1287_v28  ;;  %1290 = vst [vmem:[#allocation3 + $0x110] sm:$0xf] %v1289_v29 }
  0xb6   :  { %1292 = vst [vmem:[#allocation3 + $0x114] sm:$0xf] %v1291_v30  ;;  %v1293_v31 = vld [vmem:[%s11954_s10 + $0x10c] sm:$0xf]  ;;  %v1299_v33 = vld [vmem:[%s11954_s10 + $0x130] sm:$0xf] }
  0xb7   :  { %1294 = vst [vmem:[#allocation3 + $0x118] sm:$0xf] %v1293_v31  ;;  %1296 = vst [vmem:[#allocation3 + $0x11c] sm:$0xff] %v1295_v32   ;;  %v1301_v34 = vld [vmem:[%s11954_s10 + $0x124] sm:$0xf]  ;;  %v1311_v39 = vld [vmem:[%s11954_s10 + $0x13c] sm:$0xff]  }
  0xb8   :  { %1300 = vst [vmem:[#allocation3 + $0x124] sm:$0xf] %v1299_v33  ;;  %v1303_v35 = vld [vmem:[%s11954_s10 + $0x134] sm:$0xf]  ;;  %v1305_v36 = vld [vmem:[%s11954_s10 + $0x128] sm:$0xf] }
  0xb9   :  { %1302 = vst [vmem:[#allocation3 + $0x128] sm:$0xf] %v1301_v34  ;;  %1304 = vst [vmem:[#allocation3 + $0x12c] sm:$0xf] %v1303_v35  ;;  %v1307_v37 = vld [vmem:[%s11954_s10 + $0x138] sm:$0xf] }
  0xba   :  { %1306 = vst [vmem:[#allocation3 + $0x130] sm:$0xf] %v1305_v36  ;;  %v1309_v38 = vld [vmem:[%s11954_s10 + $0x12c] sm:$0xf]  ;;  %1308 = vst [vmem:[#allocation3 + $0x134] sm:$0xf] %v1307_v37 }
  0xbb   :  { %1310 = vst [vmem:[#allocation3 + $0x138] sm:$0xf] %v1309_v38  ;;  %1312 = vst [vmem:[#allocation3 + $0x13c] sm:$0xff] %v1311_v39   ;;  %v1315_v40 = vld [vmem:[%s11954_s10 + $0x150] sm:$0xf]  ;;  %v1327_v46 = vld [vmem:[%s11954_s10 + $0x15c] sm:$0xff]  }
  0xbc   :  { %v1317_v41 = vld [vmem:[%s11954_s10 + $0x144] sm:$0xf]  ;;  %v1319_v42 = vld [vmem:[%s11954_s10 + $0x154] sm:$0xf]  ;;  %1316 = vst [vmem:[#allocation3 + $0x144] sm:$0xf] %v1315_v40 }
  0xbd   :  { %1318 = vst [vmem:[#allocation3 + $0x148] sm:$0xf] %v1317_v41  ;;  %1320 = vst [vmem:[#allocation3 + $0x14c] sm:$0xf] %v1319_v42  ;;  %v1321_v43 = vld [vmem:[%s11954_s10 + $0x148] sm:$0xf] }
  0xbe   :  { %v1323_v44 = vld [vmem:[%s11954_s10 + $0x158] sm:$0xf]  ;;  %v1325_v45 = vld [vmem:[%s11954_s10 + $0x14c] sm:$0xf]  ;;  %1322 = vst [vmem:[#allocation3 + $0x150] sm:$0xf] %v1321_v43 }
  0xbf   :  { %1324 = vst [vmem:[#allocation3 + $0x154] sm:$0xf] %v1323_v44  ;;  %1326 = vst [vmem:[#allocation3 + $0x158] sm:$0xf] %v1325_v45  ;;  %v1331_v47 = vld [vmem:[%s11954_s10 + $0x170] sm:$0xf] }
  0xc0   :  { %v1333_v48 = vld [vmem:[%s11954_s10 + $0x164] sm:$0xf]  ;;  %1328 = vst [vmem:[#allocation3 + $0x15c] sm:$0xff] %v1327_v46   ;;  %1332 = vst [vmem:[#allocation3 + $0x164] sm:$0xf] %v1331_v47  ;;  %v1343_v53 = vld [vmem:[%s11954_s10 + $0x17c] sm:$0xff]  }
  0xc1   :  { %1334 = vst [vmem:[#allocation3 + $0x168] sm:$0xf] %v1333_v48  ;;  %v1335_v49 = vld [vmem:[%s11954_s10 + $0x174] sm:$0xf]  ;;  %v1337_v50 = vld [vmem:[%s11954_s10 + $0x168] sm:$0xf] }
  0xc2   :  { %v1339_v51 = vld [vmem:[%s11954_s10 + $0x178] sm:$0xf]  ;;  %1336 = vst [vmem:[#allocation3 + $0x16c] sm:$0xf] %v1335_v49  ;;  %1338 = vst [vmem:[#allocation3 + $0x170] sm:$0xf] %v1337_v50 }
  0xc3   :  { %1340 = vst [vmem:[#allocation3 + $0x174] sm:$0xf] %v1339_v51  ;;  %v1341_v52 = vld [vmem:[%s11954_s10 + $0x16c] sm:$0xf]  ;;  %v1347_v54 = vld [vmem:[%s11954_s10 + $0x190] sm:$0xf] }
  0xc4   :  { %1342 = vst [vmem:[#allocation3 + $0x178] sm:$0xf] %v1341_v52  ;;  %1344 = vst [vmem:[#allocation3 + $0x17c] sm:$0xff] %v1343_v53   ;;  %v1349_v55 = vld [vmem:[%s11954_s10 + $0x184] sm:$0xf]  ;;  %v1359_v60 = vld [vmem:[%s11954_s10 + $0x19c] sm:$0xff]  }
  0xc5   :  { %1348 = vst [vmem:[#allocation3 + $0x184] sm:$0xf] %v1347_v54  ;;  %v1351_v56 = vld [vmem:[%s11954_s10 + $0x194] sm:$0xf]  ;;  %v1353_v57 = vld [vmem:[%s11954_s10 + $0x188] sm:$0xf] }
  0xc6   :  { %1350 = vst [vmem:[#allocation3 + $0x188] sm:$0xf] %v1349_v55  ;;  %1352 = vst [vmem:[#allocation3 + $0x18c] sm:$0xf] %v1351_v56  ;;  %v1355_v58 = vld [vmem:[%s11954_s10 + $0x198] sm:$0xf] }
  0xc7   :  { %1354 = vst [vmem:[#allocation3 + $0x190] sm:$0xf] %v1353_v57  ;;  %v1357_v59 = vld [vmem:[%s11954_s10 + $0x18c] sm:$0xf]  ;;  %1356 = vst [vmem:[#allocation3 + $0x194] sm:$0xf] %v1355_v58 }
  0xc8   :  { %1358 = vst [vmem:[#allocation3 + $0x198] sm:$0xf] %v1357_v59  ;;  %1360 = vst [vmem:[#allocation3 + $0x19c] sm:$0xff] %v1359_v60   ;;  %v1363_v61 = vld [vmem:[%s11954_s10 + $0x1b0] sm:$0xf]  ;;  %v1375_v3 = vld [vmem:[%s11954_s10 + $0x1bc] sm:$0xff]  }
  0xc9   :  { %v1365_v62 = vld [vmem:[%s11954_s10 + $0x1a4] sm:$0xf]  ;;  %v1367_v63 = vld [vmem:[%s11954_s10 + $0x1b4] sm:$0xf]  ;;  %1364 = vst [vmem:[#allocation3 + $0x1a4] sm:$0xf] %v1363_v61 }
  0xca   :  { %1366 = vst [vmem:[#allocation3 + $0x1a8] sm:$0xf] %v1365_v62  ;;  %1368 = vst [vmem:[#allocation3 + $0x1ac] sm:$0xf] %v1367_v63  ;;  %v1369_v0 = vld [vmem:[%s11954_s10 + $0x1a8] sm:$0xf] }
  0xcb   :  { %v1371_v1 = vld [vmem:[%s11954_s10 + $0x1b8] sm:$0xf]  ;;  %v1373_v2 = vld [vmem:[%s11954_s10 + $0x1ac] sm:$0xf]  ;;  %1370 = vst [vmem:[#allocation3 + $0x1b0] sm:$0xf] %v1369_v0 }
  0xcc   :  { %1372 = vst [vmem:[#allocation3 + $0x1b4] sm:$0xf] %v1371_v1  ;;  %1374 = vst [vmem:[#allocation3 + $0x1b8] sm:$0xf] %v1373_v2  ;;  %v1379_v4 = vld [vmem:[%s11954_s10 + $0x1d0] sm:$0xf] }
  0xcd   :  { %v1381_v5 = vld [vmem:[%s11954_s10 + $0x1c4] sm:$0xf]  ;;  %1376 = vst [vmem:[#allocation3 + $0x1bc] sm:$0xff] %v1375_v3   ;;  %1380 = vst [vmem:[#allocation3 + $0x1c4] sm:$0xf] %v1379_v4  ;;  %v1391_v10 = vld [vmem:[%s11954_s10 + $0x1dc] sm:$0xff]  }
  0xce   :  { %1382 = vst [vmem:[#allocation3 + $0x1c8] sm:$0xf] %v1381_v5  ;;  %v1383_v6 = vld [vmem:[%s11954_s10 + $0x1d4] sm:$0xf]  ;;  %v1385_v7 = vld [vmem:[%s11954_s10 + $0x1c8] sm:$0xf] }
  0xcf   :  { %v1387_v8 = vld [vmem:[%s11954_s10 + $0x1d8] sm:$0xf]  ;;  %1384 = vst [vmem:[#allocation3 + $0x1cc] sm:$0xf] %v1383_v6  ;;  %1386 = vst [vmem:[#allocation3 + $0x1d0] sm:$0xf] %v1385_v7 }
  0xd0   :  { %1388 = vst [vmem:[#allocation3 + $0x1d4] sm:$0xf] %v1387_v8  ;;  %v1389_v9 = vld [vmem:[%s11954_s10 + $0x1cc] sm:$0xf]  ;;  %v1395_v11 = vld [vmem:[%s11954_s10 + $0x1f0] sm:$0xf] }
  0xd1   :  { %1390 = vst [vmem:[#allocation3 + $0x1d8] sm:$0xf] %v1389_v9  ;;  %1392 = vst [vmem:[#allocation3 + $0x1dc] sm:$0xff] %v1391_v10   ;;  %v1397_v12 = vld [vmem:[%s11954_s10 + $0x1e4] sm:$0xf] }
  0xd2   :  { %1396 = vst [vmem:[#allocation3 + $0x1e4] sm:$0xf] %v1395_v11  ;;  %v1399_v13 = vld [vmem:[%s11954_s10 + $0x1f4] sm:$0xf]  ;;  %v1401_v14 = vld [vmem:[%s11954_s10 + $0x1e8] sm:$0xf] }
  0xd3   :  { %1398 = vst [vmem:[#allocation3 + $0x1e8] sm:$0xf] %v1397_v12  ;;  %1400 = vst [vmem:[#allocation3 + $0x1ec] sm:$0xf] %v1399_v13  ;;  %v1403_v15 = vld [vmem:[%s11954_s10 + $0x1f8] sm:$0xf] }
  0xd4   :  { %1402 = vst [vmem:[#allocation3 + $0x1f0] sm:$0xf] %v1401_v14  ;;  %v1405_v16 = vld [vmem:[%s11954_s10 + $0x1ec] sm:$0xf]  ;;  %v1407_v17 = vld [vmem:[%s11954_s10 + $0x1fc] sm:$0xf] }
  0xd5   :  { %1404 = vst [vmem:[#allocation3 + $0x1f4] sm:$0xf] %v1403_v15  ;;  %1406 = vst [vmem:[#allocation3 + $0x1f8] sm:$0xf] %v1405_v16 }
  0xd6   :  { %1408 = vst [vmem:[#allocation3 + $0x1fc] sm:$0xf] %v1407_v17 }
  0xd7   :  { %1695 = vsyncadd [#allocation5 + $0x1], 8192  ;;  %v8902_v18 = vld [vmem:[%s11955_s11] sm:$0xff]  ;;  %v8907_v19 = vld [vmem:[%s11955_s11 + $0x8] sm:$0xff]  ;;  %s12187_s26 = sld [smem:[#allocation116_spill]]  ;;  %v11974_v36 = vmov 0  }
  0xd8   :  { %12171 = vst [vmem:[#allocation12_spill] sm:$0xff] %v8902_v18  ;;  %12172 = vst [vmem:[#allocation13_spill] sm:$0xff] %v8907_v19  ;;  %v8912_v20 = vld [vmem:[%s11955_s11 + $0x10] sm:$0xff]  ;;  %v8917_v21 = vld [vmem:[%s11955_s11 + $0x18] sm:$0xff]  ;;  %7074 = vset.pattern.permute.xlu1 %v11974_v36  ;;  %7073 = vset.pattern.permute.xlu0 %v11974_v36 }
  0xd9   :  { %12173 = vst [vmem:[#allocation14_spill] sm:$0xff] %v8912_v20  ;;  %12174 = vst [vmem:[#allocation15_spill] sm:$0xff] %v8917_v21  ;;  %v8922_v22 = vld [vmem:[%s11955_s11 + $0x20] sm:$0xff]  ;;  %v8927_v23 = vld [vmem:[%s11955_s11 + $0x28] sm:$0xff] }
  0xda   :  { %12175 = vst [vmem:[#allocation16_spill] sm:$0xff] %v8922_v22  ;;  %12176 = vst [vmem:[#allocation17_spill] sm:$0xff] %v8927_v23  ;;  %v8932_v24 = vld [vmem:[%s11955_s11 + $0x30] sm:$0xff]  ;;  %v8937_v25 = vld [vmem:[%s11955_s11 + $0x38] sm:$0xff] }
  0xdb   :  { %12177 = vst [vmem:[#allocation18_spill] sm:$0xff] %v8932_v24  ;;  %12178 = vst [vmem:[#allocation19_spill] sm:$0xff] %v8937_v25  ;;  %v8942_v26 = vld [vmem:[%s11955_s11 + $0x40] sm:$0xff]  ;;  %v8947_v27 = vld [vmem:[%s11955_s11 + $0x48] sm:$0xff] }
  0xdc   :  { %12179 = vst [vmem:[#allocation20_spill] sm:$0xff] %v8942_v26  ;;  %12180 = vst [vmem:[#allocation21_spill] sm:$0xff] %v8947_v27  ;;  %v8952_v28 = vld [vmem:[%s11955_s11 + $0x50] sm:$0xff]  ;;  %v8957_v29 = vld [vmem:[%s11955_s11 + $0x58] sm:$0xff] }
  0xdd   :  { %12181 = vst [vmem:[#allocation22_spill] sm:$0xff] %v8952_v28  ;;  %12182 = vst [vmem:[#allocation23_spill] sm:$0xff] %v8957_v29  ;;  %v8962_v30 = vld [vmem:[%s11955_s11 + $0x60] sm:$0xff]  ;;  %v8967_v31 = vld [vmem:[%s11955_s11 + $0x68] sm:$0xff] }
  0xde   :  { %12183 = vst [vmem:[#allocation24_spill] sm:$0xff] %v8962_v30  ;;  %12184 = vst [vmem:[#allocation25_spill] sm:$0xff] %v8967_v31  ;;  %v8972_v32 = vld [vmem:[%s11955_s11 + $0x70] sm:$0xff]  ;;  %v8977_v33 = vld [vmem:[%s11955_s11 + $0x78] sm:$0xff] }
  0xdf   :  { %12185 = vst [vmem:[#allocation26_spill] sm:$0xff] %v8972_v32  ;;  %12186 = vst [vmem:[#allocation27_spill] sm:$0xff] %v8977_v33  ;;  %v1775_v34 = vld [vmem:[%s12187_s26 + $0x30] sm:$0xff]  ;;  %v1769_v35 = vld [vmem:[%s12187_s26] sm:$0xff] }
  0xe0   :  { %1798 = vperm.xlu0 %7073, %v1775_v34   ;;  %1780 = vperm.xlu1 %7074, %v1769_v35   ;;  %v1776_v37 = vld [vmem:[%s12187_s26 + $0x38] sm:$0xff]  ;;  %v1770_v38 = vld [vmem:[%s12187_s26 + $0x8] sm:$0xff] }
  0xe1   :  { %1768 = vsyncadd [#allocation5 + $0x2], 2048  ;;  %s12188_s4 = sld [smem:[#allocation117_spill]]  ;;  %vm1878_vm0 = vcmask 1043456   ;;  %1923 = vmatprep.mubr.bf16.mxu0 %v11974_v36  ;;  %1953 = vmatprep.mubr.bf16.mxu1 %v11974_v36  ;;  %v1771_v42 = vld [vmem:[%s12187_s26 + $0x10] sm:$0xff]  ;;  %v1772_v43 = vld [vmem:[%s12187_s26 + $0x18] sm:$0xff]  ;;  %v11973_v51 = vlaneseq }
  0xe2   :  { %v1773_v46 = vld [vmem:[%s12187_s26 + $0x20] sm:$0xff]  ;;  %v1774_v47 = vld [vmem:[%s12187_s26 + $0x28] sm:$0xff]  ;;  %s12189_s11 = sld [smem:[#allocation118_spill]]  ;;  %v11971_v56 = vmov 0.0   ;;  %vm1865_vm5 = vcmask 64512   ;;  %s12208_s0 = sld [smem:[#allocation120_spill]] }
  0xe3   :  { %v1778_v52 = vand.u32 127, %v11973_v51  ;;  %v12218_v24 = vmov 0   ;;  %s12221_s9 = sld [smem:[#allocation121_spill]] }
  0xe4   :  { %1801 = vperm.xlu0 %7073, %v1776_v37   ;;  %1783 = vperm.xlu1 %7074, %v1770_v38  }
  0xe7   :  { %v1831_v39 = vld [vmem:[%s12188_s4] sm:$0xff]  ;;  %v1832_v45 = vld [vmem:[%s12188_s4 + $0x8] sm:$0xff]  ;;  %s12190_s4 = sld [smem:[#allocation119_spill]] }
  0xe8   :  { %v6886_v40 = vcombine.high %v1831_v39, %v1831_v39  ;;  %v6885_v41 = vcombine.low %v1831_v39, %v1831_v39  ;;  %v6888_v48 = vcombine.high %v1832_v45, %v1832_v45  ;;  %1786 = vperm.xlu0 %7073, %v1771_v42   ;;  %1789 = vperm.xlu1 %7074, %v1772_v43   ;;  %v2037_v49 = vld [vmem:[%s12189_s11] sm:$0xff]  ;;  %v2038_v60 = vld [vmem:[%s12189_s11 + $0x8] sm:$0xff] }
  0xe9   :  { %v6900_v50 = vcombine.high %v2037_v49, %v2037_v49  ;;  %v6887_v55 = vcombine.low %v1832_v45, %v1832_v45  ;;  %v6899_v61 = vcombine.low %v2037_v49, %v2037_v49  ;;  %v6902_v4 = vcombine.high %v2038_v60, %v2038_v60  ;;  %v9373_v51 = vld [vmem:[%s12208_s0 + $0xa0] ss:$16 sps:$4 sm:$0xff]   ;;  %v9378_v25 = vld [vmem:[%s12208_s0 + $0x28] ss:$16 sps:$4 sm:$0xff]   ;;  %v9390_v33 = vld [vmem:[%s12208_s0 + $0x4c] ss:$16 sps:$4 sm:$0xff]  }
  0xea   :  { %v1880_v44 = vsel %vm1878_vm0, %v6885_v41, 0  ;;  %7068 = vmatprep.subr.msk.bf16.mxu1 %vm1878_vm0, %v6886_v40  ;;  %6889 = vmatprep.subr.msk.bf16.mxu0 %vm1878_vm0, %v6886_v40  ;;  %v6901_v9 = vcombine.low %v2038_v60, %v2038_v60  ;;  %v9398_v32 = vld [vmem:[%s12208_s0 + $0xc0] ss:$16 sps:$4 sm:$0xff]   ;;  %v9403_v23 = vld [vmem:[%s12208_s0 + $0x48] ss:$16 sps:$4 sm:$0xff]  }
  0xeb   :  { %7069 = vmatpush1.bf16.msra.mxu1 %v1880_v44  ;;  %1892 = vmatpush1.bf16.msra.mxu0 %v1880_v44  ;;  %v1886_v3 = vsel %vm1878_vm0, %v6887_v55, 0  ;;  %v2072_v7 = vsel %vm1878_vm0, %v6899_v61, 0  ;;  %v9410_v31 = vld [vmem:[%s12208_s0 + $0xe4] ss:$16 sps:$4 sm:$0xff]   ;;  %v9415_v22 = vld [vmem:[%s12208_s0 + $0x6c] ss:$16 sps:$4 sm:$0xff]  }
  0xec   :  { %6894 = vmatprep.subr.msk.bf16.mxu1 %vm1878_vm0, %v6888_v48  ;;  %1792 = vperm.xlu0 %7073, %v1773_v46   ;;  %v2078_v15 = vsel %vm1878_vm0, %v6901_v9, 0  ;;  %v9422_v30 = vld [vmem:[%s12208_s0 + $0xe0] ss:$16 sps:$4 sm:$0xff]   ;;  %v9427_v21 = vld [vmem:[%s12208_s0 + $0x68] ss:$16 sps:$4 sm:$0xff]  }
  0xed   :  { %1795 = vperm.xlu1 %7074, %v1774_v47   ;;  %6903 = vmatprep.subr.msk.bf16.mxu0 %vm1878_vm0, %v6900_v50  ;;  %v9042_v8 = vld [vmem:[%s12190_s4 + $0x4] ss:$16 sps:$4 sm:$0xff]   ;;  %v9056_v16 = vld [vmem:[%s12190_s4 + $0xc] ss:$16 sps:$4 sm:$0xff]   ;;  %v9078_v37 = vld [vmem:[%s12190_s4] ss:$16 sps:$4 sm:$0xff]  }
  0xee   :  { %v9083_v38 = vld [vmem:[%s12190_s4 + $0x24] ss:$16 sps:$4 sm:$0xff]   ;;  %v9093_v39 = vld [vmem:[%s12190_s4 + $0x20] ss:$16 sps:$4 sm:$0xff]   ;;  %v9142_v46 = vld [vmem:[%s12190_s4 + $0x8] ss:$16 sps:$4 sm:$0xff]  }
  0xef   :  { %12191 = vst [vmem:[#allocation28_spill] sm:$0xff] %v9083_v38  ;;  %v9101_v40 = vld [vmem:[%s12190_s4 + $0x44] ss:$16 sps:$4 sm:$0xff]   ;;  %v9107_v41 = vld [vmem:[%s12190_s4 + $0x40] ss:$16 sps:$4 sm:$0xff]  }
  0xf0   :  { %12192 = vst [vmem:[#allocation29_spill] sm:$0xff] %v9107_v41  ;;  %v9113_v42 = vld [vmem:[%s12190_s4 + $0x64] ss:$16 sps:$4 sm:$0xff]   ;;  %v9123_v43 = vld [vmem:[%s12190_s4 + $0x60] ss:$16 sps:$4 sm:$0xff]  }
  0xf1   :  { %12193 = vst [vmem:[#allocation30_spill] sm:$0xff] %v9113_v42  ;;  %12194 = vst [vmem:[#allocation31_spill] sm:$0xff] %v9123_v43  ;;  %v9131_v44 = vld [vmem:[%s12190_s4 + $0x84] ss:$16 sps:$4 sm:$0xff]   ;;  %v9137_v45 = vld [vmem:[%s12190_s4 + $0x80] ss:$16 sps:$4 sm:$0xff]  }
  0xf2   :  { %12195 = vst [vmem:[#allocation32_spill] sm:$0xff] %v9131_v44  ;;  %12196 = vst [vmem:[#allocation33_spill] sm:$0xff] %v9137_v45  ;;  %v9148_v47 = vld [vmem:[%s12190_s4 + $0xa4] ss:$16 sps:$4 sm:$0xff]   ;;  %v9153_v48 = vld [vmem:[%s12190_s4 + $0x2c] ss:$16 sps:$4 sm:$0xff]  }
  0xf3   :  { %12197 = vst [vmem:[#allocation34_spill] sm:$0xff] %v9148_v47  ;;  %v9164_v49 = vld [vmem:[%s12190_s4 + $0xa0] ss:$16 sps:$4 sm:$0xff]   ;;  %v9169_v50 = vld [vmem:[%s12190_s4 + $0x28] ss:$16 sps:$4 sm:$0xff]  }
  0xf4   :  { %12198 = vst [vmem:[#allocation35_spill] sm:$0xff] %v9164_v49  ;;  %v9195_v55 = vld [vmem:[%s12190_s4 + $0x48] ss:$16 sps:$4 sm:$0xff]   ;;  %v9230_v61 = vld [vmem:[%s12190_s4 + $0x8c] ss:$16 sps:$4 sm:$0xff]  }
  0xf5   :  { %12202 = vst [vmem:[#allocation39_spill] sm:$0xff] %v9195_v55  ;;  %v9223_v60 = vld [vmem:[%s12190_s4 + $0x68] ss:$16 sps:$4 sm:$0xff]   ;;  %12207 = vst [vmem:[#allocation44_spill] sm:$0xff] %v9230_v61  ;;  %v9434_v29 = vld [vmem:[%s12208_s0 + $0x8c] ss:$16 sps:$4 sm:$0xff]  }
  0xf6   :  { %12206 = vst [vmem:[#allocation43_spill] sm:$0xff] %v9223_v60  ;;  %v9297_v9 = vld [vmem:[%s12190_s4 + $0xc8] ss:$16 sps:$4 sm:$0xff]   ;;  %v9447_v28 = vld [vmem:[%s12208_s0 + $0xac] ss:$16 sps:$4 sm:$0xff]  }
  0xf7   :  { %12214 = vst [vmem:[#allocation50_spill] sm:$0xff] %v9297_v9  ;;  %v9441_v20 = vld [vmem:[%s12208_s0 + $0x88] ss:$16 sps:$4 sm:$0xff]   ;;  %v9462_v27 = vld [vmem:[%s12208_s0 + $0xcc] ss:$16 sps:$4 sm:$0xff]  }
  0xf8   :  { %v9455_v19 = vld [vmem:[%s12208_s0 + $0xa8] ss:$16 sps:$4 sm:$0xff]   ;;  %v9477_v26 = vld [vmem:[%s12208_s0 + $0xec] ss:$16 sps:$4 sm:$0xff]  }
  0xf9   :  { %v9470_v18 = vld [vmem:[%s12208_s0 + $0xc8] ss:$16 sps:$4 sm:$0xff]  }
 0x15f   :  { %v1799_v53 = vpop.permute.xlu0 %1798  ;;  %v1781_v54 = vpop.permute.xlu1 %1780 }
 0x160   :  { %vm1803_vm1 = vcmp.eq.s32.totalorder %v1781_v54, %v1778_v52  ;;  %vm1809_vm2 = vcmp.eq.s32.totalorder %v1799_v53, %v1778_v52  ;;  %v9181_v53 = vld [vmem:[%s12190_s4 + $0x4c] ss:$16 sps:$4 sm:$0xff]   ;;  %v9190_v54 = vld [vmem:[%s12190_s4 + $0xc0] ss:$16 sps:$4 sm:$0xff]  }
 0x161   :  { %v6877_v57 = vsel %vm1803_vm1, 1.0, %v11971_v56  ;;  %v6883_v62 = vsel %vm1809_vm2, 1.0, %v11971_v56  ;;  %12200 = vst [vmem:[#allocation37_spill] sm:$0xff] %v9181_v53  ;;  %12201 = vst [vmem:[#allocation38_spill] sm:$0xff] %v9190_v54 }
 0x163   :  { %v1802_v58 = vpop.permute.xlu0 %1801  ;;  %v1784_v59 = vpop.permute.xlu1 %1783 }
 0x164   :  { %vm1810_vm3 = vcmp.eq.s32.totalorder %v1802_v58, %v1778_v52  ;;  %vm1804_vm4 = vcmp.eq.s32.totalorder %v1784_v59, %v1778_v52  ;;  %v9207_v58 = vld [vmem:[%s12190_s4 + $0x6c] ss:$16 sps:$4 sm:$0xff]   ;;  %v9218_v59 = vld [vmem:[%s12190_s4 + $0xe0] ss:$16 sps:$4 sm:$0xff]  }
 0x165   :  { %v6884_v63 = vsel %vm1810_vm3, 1.0, %v11971_v56  ;;  %v6878_v0 = vsel %vm1804_vm4, 1.0, %v11971_v56  ;;  %12204 = vst [vmem:[#allocation41_spill] sm:$0xff] %v9207_v58  ;;  %12205 = vst [vmem:[#allocation42_spill] sm:$0xff] %v9218_v59 }
 0x166   :  { %v9029_v1 = vpack.c.bf16 %v6884_v63, %v6883_v62  ;;  %v9031_v2 = vpack.c.bf16 %v6878_v0, %v6877_v57  ;;  %v9202_v57 = vld [vmem:[%s12190_s4 + $0xe4] ss:$16 sps:$4 sm:$0xff]   ;;  %v9244_v63 = vld [vmem:[%s12190_s4 + $0x88] ss:$16 sps:$4 sm:$0xff]   ;;  %v9249_v0 = vld [vmem:[%s12208_s0] ss:$16 sps:$4 sm:$0xff]  }
 0x167   :  { %v1787_v5 = vpop.permute.xlu0 %1786  ;;  %v1790_v6 = vpop.permute.xlu1 %1789  ;;  %12203 = vst [vmem:[#allocation40_spill] sm:$0xff] %v9202_v57  ;;  %v9235_v62 = vld [vmem:[%s12208_s0 + $0x4] ss:$16 sps:$4 sm:$0xff]   ;;  %12210 = vst [vmem:[#allocation46_spill] sm:$0xff] %v9244_v63 }
 0x168   :  { %vm1805_vm6 = vcmp.eq.s32.totalorder %v1787_v5, %v1778_v52  ;;  %vm1806_vm7 = vcmp.eq.s32.totalorder %v1790_v6, %v1778_v52  ;;  %6890 = vmatmul.mubr.msk.bf16.vlgmr.msra.gmra.mrb[0].mxu0 %vm1865_vm5, %v9031_v2  ;;  %6893 = vmatmul.mubr.msk.bf16.vlgmr.msra.gmra.mrb[0].mxu1 %vm1865_vm5, %v9029_v1  ;;  %12209 = vst [vmem:[#allocation45_spill] sm:$0xff] %v9235_v62  ;;  %v9276_v5 = vld [vmem:[%s12208_s0 + $0x20] ss:$16 sps:$4 sm:$0xff]   ;;  %v9283_v6 = vld [vmem:[%s12190_s4 + $0xcc] ss:$16 sps:$4 sm:$0xff]  }
 0x169   :  { %1965 = vmatpush1.bf16.msra.mxu1 %v1886_v3  ;;  %1933 = vmatprep.mubr.bf16.mxu0 %v11974_v36  ;;  %v6879_v10 = vsel %vm1805_vm6, 1.0, %v11971_v56  ;;  %v6880_v11 = vsel %vm1806_vm7, 1.0, %v11971_v56  ;;  %v9261_v3 = vld [vmem:[%s12208_s0 + $0x24] ss:$16 sps:$4 sm:$0xff]   ;;  %12213 = vst [vmem:[#allocation49_spill] sm:$0xff] %v9283_v6 }
 0x16a   :  { %1996 = vmatprep.mubr.bf16.mxu1 %v11974_v36  ;;  %6908 = vmatprep.subr.msk.bf16.mxu1 %vm1878_vm0, %v6902_v4  ;;  %v9050_v14 = vpack.c.bf16 %v6880_v11, %v6879_v10  ;;  %v9271_v4 = vld [vmem:[%s12190_s4 + $0xa8] ss:$16 sps:$4 sm:$0xff]   ;;  %v9302_v10 = vld [vmem:[%s12208_s0 + $0x40] ss:$16 sps:$4 sm:$0xff]   ;;  %v9309_v11 = vld [vmem:[%s12190_s4 + $0xec] ss:$16 sps:$4 sm:$0xff]  }
 0x16b   :  { %2084 = vmatpush1.bf16.msra.mxu0 %v2072_v7  ;;  %v1793_v12 = vpop.permute.xlu0 %1792  ;;  %12212 = vst [vmem:[#allocation48_spill] sm:$0xff] %v9271_v4  ;;  %v9288_v7 = vld [vmem:[%s12208_s0 + $0x44] ss:$16 sps:$4 sm:$0xff]   ;;  %12215 = vst [vmem:[#allocation51_spill] sm:$0xff] %v9309_v11 }
 0x16c   :  { %2453 = vmatprep.subr.bf16.mxu0 %v9042_v8  ;;  %v1796_v13 = vpop.permute.xlu1 %1795  ;;  %vm1807_vm8 = vcmp.eq.s32.totalorder %v1793_v12, %v1778_v52  ;;  %v9314_v12 = vld [vmem:[%s12208_s0 + $0x64] ss:$16 sps:$4 sm:$0xff]  }
 0x16d   :  { %vm1808_vm9 = vcmp.eq.s32.totalorder %v1796_v13, %v1778_v52  ;;  %v6881_v17 = vsel %vm1807_vm8, 1.0, %v11971_v56  ;;  %v9176_v52 = vld [vmem:[%s12190_s4 + $0xc4] ss:$16 sps:$4 sm:$0xff]   ;;  %v9323_v13 = vld [vmem:[%s12190_s4 + $0xe8] ss:$16 sps:$4 sm:$0xff]  }
 0x16e   :  { %v6882_v34 = vsel %vm1808_vm9, 1.0, %v11971_v56  ;;  %12199 = vst [vmem:[#allocation36_spill] sm:$0xff] %v9176_v52  ;;  %12216 = vst [vmem:[#allocation52_spill] sm:$0xff] %v9323_v13  ;;  %v9365_v56 = vld [vmem:[%s12208_s0 + $0x2c] ss:$16 sps:$4 sm:$0xff]  }
 0x16f   :  { %v9067_v35 = vpack.c.bf16 %v6882_v34, %v6881_v17  ;;  %v9348_v17 = vld [vmem:[%s12208_s0 + $0x80] ss:$16 sps:$4 sm:$0xff]   ;;  %v9353_v34 = vld [vmem:[%s12208_s0 + $0x8] ss:$16 sps:$4 sm:$0xff]  }
 0x170   :  { %6891 = vmatmul.mubr.msk.bf16.gmra.mrb[4].mxu0 %vm1865_vm5, %v9050_v14  ;;  %6895 = vmatmul.mubr.msk.bf16.vlgmr.msra.gmra.mrb[4].mxu1 %vm1865_vm5, %v9031_v2 }
 0x171   :  { %2157 = vmatpush1.bf16.msra.mxu1 %v2078_v15  ;;  %1943 = vmatprep.mubr.bf16.mxu0 %v11974_v36  ;;  %v9340_v15 = vld [vmem:[%s12208_s0 + $0xc] ss:$16 sps:$4 sm:$0xff]  }
 0x172   :  { %2006 = vmatprep.mubr.bf16.mxu1 %v11974_v36  ;;  %2494 = vmatprep.subr.bf16.mxu1 %v9056_v16  ;;  %12217 = vst [vmem:[#allocation53_spill] sm:$0xff] %v9340_v15 }
 0x178   :  { %6892 = vmatmul.mubr.msk.bf16.gmra.mrb[8].mxu0 %vm1865_vm5, %v9067_v35  ;;  %6896 = vmatmul.mubr.msk.bf16.gmra.mrb[8].mxu1 %vm1865_vm5, %v9050_v14 }
 0x179   :  { %2016 = vmatprep.mubr.bf16.mxu1 %v11974_v36  ;;  %2115 = vmatprep.mubr.bf16.mxu0 %v11974_v36 }
 0x180   :  { %6897 = vmatmul.mubr.msk.bf16.gmra.mrb[12].mxu1 %vm1865_vm5, %v9067_v35  ;;  %6904 = vmatmul.mubr.msk.bf16.vlgmr.msra.gmra.mrb[12].mxu0 %vm1865_vm5, %v9031_v2 }
 0x181   :  { %2454 = vmatpush1.bf16.msra.mxu0 %v9078_v37  ;;  %2026 = vmatprep.mubr.bf16.mxu1 %v11974_v36 }
 0x182   :  { %2455 = vmatprep.subr.bf16.mxu0 %v9083_v38  ;;  %2125 = vmatprep.mubr.bf16.mxu0 %v11974_v36 }
 0x185   :  { %2456 = vmatpush1.bf16.msra.mxu0 %v9093_v39 }
 0x186   :  { %2457 = vmatprep.subr.bf16.mxu0 %v9101_v40 }
 0x188   :  { %6898 = vmatmul.mubr.msk.bf16.gmra.mrb[16].mxu1 %vm1865_vm5, %v9029_v1  ;;  %6905 = vmatmul.mubr.msk.bf16.gmra.mrb[16].mxu0 %vm1865_vm5, %v9050_v14 }
 0x189   :  { %2458 = vmatpush1.bf16.msra.mxu0 %v9107_v41  ;;  %2135 = vmatprep.mubr.bf16.mxu0 %v11974_v36 }
 0x18a   :  { %2459 = vmatprep.subr.bf16.mxu0 %v9113_v42  ;;  %2188 = vmatprep.mubr.bf16.mxu1 %v11974_v36 }
 0x18d   :  { %2460 = vmatpush1.bf16.msra.mxu0 %v9123_v43 }
 0x18e   :  { %2461 = vmatprep.subr.bf16.mxu0 %v9131_v44 }
 0x190   :  { %6906 = vmatmul.mubr.msk.bf16.gmra.mrb[20].mxu0 %vm1865_vm5, %v9067_v35  ;;  %6909 = vmatmul.mubr.msk.bf16.vlgmr.msra.gmra.mrb[20].mxu1 %vm1865_vm5, %v9031_v2  ;;  %v9256_v2 = vld [vmem:[%s12190_s4 + $0xac] ss:$16 sps:$4 sm:$0xff]  }
 0x191   :  { %2462 = vmatpush1.bf16.msra.mxu0 %v9137_v45  ;;  %2495 = vmatpush1.bf16.msra.mxu1 %v9142_v46  ;;  %12211 = vst [vmem:[#allocation47_spill] sm:$0xff] %v9256_v2 }
 0x192   :  { %2463 = vmatprep.subr.bf16.mxu0 %v9148_v47  ;;  %2496 = vmatprep.subr.bf16.mxu1 %v9153_v48 }
 0x193   :  { %2145 = vmatprep.mubr.bf16.mxu0 %v11974_v36  ;;  %2198 = vmatprep.mubr.bf16.mxu1 %v11974_v36 }
 0x195   :  { %2464 = vmatpush1.bf16.msra.mxu0 %v9164_v49  ;;  %2497 = vmatpush1.bf16.msra.mxu1 %v9169_v50 }
 0x196   :  { %2465 = vmatprep.subr.bf16.mxu0 %v9176_v52  ;;  %2498 = vmatprep.subr.bf16.mxu1 %v9181_v53 }
 0x198   :  { %6907 = vmatmul.mubr.msk.bf16.gmra.mrb[24].mxu0 %vm1865_vm5, %v9029_v1  ;;  %6910 = vmatmul.mubr.msk.bf16.gmra.mrb[24].mxu1 %vm1865_vm5, %v9050_v14  ;;  %v9328_v14 = vld [vmem:[%s12208_s0 + $0x60] ss:$16 sps:$4 sm:$0xff]  }
 0x199   :  { %2466 = vmatpush1.bf16.msra.mxu0 %v9190_v54  ;;  %2499 = vmatpush1.bf16.msra.mxu1 %v9195_v55 }
 0x19a   :  { %2467 = vmatprep.subr.bf16.mxu0 %v9202_v57  ;;  %2500 = vmatprep.subr.bf16.mxu1 %v9207_v58 }
 0x19b   :  { %2208 = vmatprep.mubr.bf16.mxu1 %v11974_v36  ;;  %2485 = vmatprep.mubr.bf16.mxu0 %v11974_v36 }
 0x19d   :  { %2468 = vmatpush1.bf16.msra.mxu0 %v9218_v59  ;;  %2501 = vmatpush1.bf16.msra.mxu1 %v9223_v60 }
 0x19e   :  { %2502 = vmatprep.subr.bf16.mxu1 %v9230_v61  ;;  %2717 = vmatprep.subr.bf16.mxu0 %v9235_v62 }
 0x1a0   :  { %6911 = vmatmul.mubr.msk.bf16.gmra.mrb[28].mxu1 %vm1865_vm5, %v9067_v35  ;;  %2486 = vmatmul.mubr.bf16.vlgmr.msra.gmra.mrb[28].mxu0 %v11974_v36  ;;  %v9360_v35 = vld [vmem:[%s12208_s0 + $0xa4] ss:$16 sps:$4 sm:$0xff]  }
 0x1a1   :  { %2503 = vmatpush1.bf16.msra.mxu1 %v9244_v63  ;;  %2718 = vmatpush1.bf16.msra.mxu0 %v9249_v0 }
 0x1a2   :  { %2504 = vmatprep.subr.bf16.mxu1 %v9256_v2  ;;  %2719 = vmatprep.subr.bf16.mxu0 %v9261_v3 }
 0x1a3   :  { %2218 = vmatprep.mubr.bf16.mxu1 %v11974_v36  ;;  %2749 = vmatprep.mubr.bf16.mxu0 %v11974_v36 }
 0x1a5   :  { %2505 = vmatpush1.bf16.msra.mxu1 %v9271_v4  ;;  %2720 = vmatpush1.bf16.msra.mxu0 %v9276_v5 }
 0x1a6   :  { %2506 = vmatprep.subr.bf16.mxu1 %v9283_v6  ;;  %2721 = vmatprep.subr.bf16.mxu0 %v9288_v7 }
 0x1a8   :  { %6912 = vmatmul.mubr.msk.bf16.gmra.mrb[32].mxu1 %vm1865_vm5, %v9029_v1  ;;  %v9335_v1 = vld [vmem:[%s12208_s0 + $0x84] ss:$16 sps:$4 sm:$0xff]  }
 0x1a9   :  { %2507 = vmatpush1.bf16.msra.mxu1 %v9297_v9  ;;  %2722 = vmatpush1.bf16.msra.mxu0 %v9302_v10 }
 0x1aa   :  { %2508 = vmatprep.subr.bf16.mxu1 %v9309_v11  ;;  %2723 = vmatprep.subr.bf16.mxu0 %v9314_v12 }
 0x1ab   :  { %2526 = vmatprep.mubr.bf16.mxu1 %v11974_v36 }
 0x1ad   :  { %2509 = vmatpush1.bf16.msra.mxu1 %v9323_v13  ;;  %2724 = vmatpush1.bf16.msra.mxu0 %v9328_v14 }
 0x1ae   :  { %2725 = vmatprep.subr.bf16.mxu0 %v9335_v1  ;;  %2758 = vmatprep.subr.bf16.mxu1 %v9340_v15 }
 0x1b0   :  { %2527 = vmatmul.mubr.bf16.vlgmr.msra.gmra.mrb[36].mxu1 %v11974_v36  ;;  %v9385_v36 = vld [vmem:[%s12208_s0 + $0xc4] ss:$16 sps:$4 sm:$0xff]  }
 0x1b1   :  { %2726 = vmatpush1.bf16.msra.mxu0 %v9348_v17  ;;  %2759 = vmatpush1.bf16.msra.mxu1 %v9353_v34 }
 0x1b2   :  { %2727 = vmatprep.subr.bf16.mxu0 %v9360_v35  ;;  %2760 = vmatprep.subr.bf16.mxu1 %v9365_v56 }
 0x1b3   :  { %2790 = vmatprep.mubr.bf16.mxu1 %v12218_v24 }
 0x1b5   :  { %2728 = vmatpush1.bf16.msra.mxu0 %v9373_v51  ;;  %2761 = vmatpush1.bf16.msra.mxu1 %v9378_v25 }
 0x1b6   :  { %2729 = vmatprep.subr.bf16.mxu0 %v9385_v36  ;;  %2762 = vmatprep.subr.bf16.mxu1 %v9390_v33 }
 0x1b9   :  { %2730 = vmatpush1.bf16.msra.mxu0 %v9398_v32  ;;  %2763 = vmatpush1.bf16.msra.mxu1 %v9403_v23 }
 0x1ba   :  { %2731 = vmatprep.subr.bf16.mxu0 %v9410_v31  ;;  %2764 = vmatprep.subr.bf16.mxu1 %v9415_v22 }
 0x1bd   :  { %2732 = vmatpush1.bf16.msra.mxu0 %v9422_v30  ;;  %2765 = vmatpush1.bf16.msra.mxu1 %v9427_v21 }
 0x1be   :  { %2766 = vmatprep.subr.bf16.mxu1 %v9434_v29  ;;  %2822 = vmatprep.subr.bf16.mxu0 %v9042_v8 }
 0x1c0   :  { %2750 = vmatmul.mubr.bf16.vlgmr.msra.gmra.mrb[32].mxu0 %v12218_v24 }
 0x1c1   :  { %2767 = vmatpush1.bf16.msra.mxu1 %v9441_v20  ;;  %2823 = vmatpush1.bf16.msra.mxu0 %v9078_v37 }
 0x1c2   :  { %2768 = vmatprep.subr.bf16.mxu1 %v9447_v28  ;;  %2824 = vmatprep.subr.bf16.mxu0 %v9083_v38  ;;  %v9484_v38 = vld [vmem:[%s12208_s0 + $0xe8] ss:$16 sps:$4 sm:$0xff]  }
 0x1c3   :  { %2854 = vmatprep.mubr.bf16.mxu0 %v12218_v24 }
 0x1c5   :  { %2769 = vmatpush1.bf16.msra.mxu1 %v9455_v19  ;;  %2825 = vmatpush1.bf16.msra.mxu0 %v9093_v39 }
 0x1c6   :  { %2770 = vmatprep.subr.bf16.mxu1 %v9462_v27  ;;  %2826 = vmatprep.subr.bf16.mxu0 %v9101_v40 }
 0x1c9   :  { %2771 = vmatpush1.bf16.msra.mxu1 %v9470_v18  ;;  %2827 = vmatpush1.bf16.msra.mxu0 %v9107_v41 }
 0x1ca   :  { %2772 = vmatprep.subr.bf16.mxu1 %v9477_v26  ;;  %2828 = vmatprep.subr.bf16.mxu0 %v9113_v42 }
 0x1cd   :  { %2773 = vmatpush1.bf16.msra.mxu1 %v9484_v38  ;;  %2829 = vmatpush1.bf16.msra.mxu0 %v9123_v43 }
 0x1ce   :  { %2863 = vmatprep.subr.bf16.mxu1 %v9056_v16  ;;  %2830 = vmatprep.subr.bf16.mxu0 %v9131_v44 }
 0x1d0   :  { %2791 = vmatmul.mubr.bf16.vlgmr.msra.gmra.mrb[40].mxu1 %v12218_v24 }
 0x1d1   :  { %2864 = vmatpush1.bf16.msra.mxu1 %v9142_v46  ;;  %2831 = vmatpush1.bf16.msra.mxu0 %v9137_v45 }
 0x1d2   :  { %2865 = vmatprep.subr.bf16.mxu1 %v9153_v48  ;;  %2832 = vmatprep.subr.bf16.mxu0 %v9148_v47 }
 0x1d3   :  { %2895 = vmatprep.mubr.bf16.mxu1 %v12218_v24 }
 0x1d5   :  { %2866 = vmatpush1.bf16.msra.mxu1 %v9169_v50  ;;  %2833 = vmatpush1.bf16.msra.mxu0 %v9164_v49 }
 0x1d6   :  { %2867 = vmatprep.subr.bf16.mxu1 %v9181_v53  ;;  %2834 = vmatprep.subr.bf16.mxu0 %v9176_v52 }
 0x1d9   :  { %2868 = vmatpush1.bf16.msra.mxu1 %v9195_v55  ;;  %2835 = vmatpush1.bf16.msra.mxu0 %v9190_v54 }
 0x1da   :  { %2869 = vmatprep.subr.bf16.mxu1 %v9207_v58  ;;  %2836 = vmatprep.subr.bf16.mxu0 %v9202_v57 }
 0x1dd   :  { %2870 = vmatpush1.bf16.msra.mxu1 %v9223_v60  ;;  %2837 = vmatpush1.bf16.msra.mxu0 %v9218_v59  ;;  %v12219_v59 = vlaneseq }
 0x1de   :  { %2871 = vmatprep.subr.bf16.mxu1 %v9230_v61  ;;  %2927 = vmatprep.subr.bf16.mxu0 %v9235_v62  ;;  %v1833_v62 = vld [vmem:[%s12221_s9] sm:$0xf] }
 0x1df   :  { %v1836_v57 = vshrl.u32 %v12219_v59, 7 }
 0x1e1   :  { %2872 = vmatpush1.bf16.msra.mxu1 %v9244_v63  ;;  %v9520_v54 = vsub.s32 0, %v1836_v57  ;;  %v9525_v52 = vsub.s32 1, %v1836_v57  ;;  %v9539_v44 = vsub.s32 3, %v1836_v57 }
 0x1e2   :  { %2873 = vmatprep.subr.bf16.mxu1 %v9256_v2  ;;  %v9533_v2 = vsub.s32 2, %v1836_v57 }
 0x1e3   :  { %12220 = vst [vmem:[#allocation54_spill] sm:$0xff] %v9520_v54  ;;  %12222 = vst [vmem:[#allocation55_spill] sm:$0xff] %v9525_v52 }
 0x1e4   :  { %12224 = vst [vmem:[#allocation57_spill] sm:$0xff] %v9533_v2  ;;  %12226 = vst [vmem:[#allocation59_spill] sm:$0xff] %v9539_v44  ;;  %v9550_v42 = vrot.slane %v1833_v62, %v9533_v2 }
 0x1e5   :  { %2874 = vmatpush1.bf16.msra.mxu1 %v9271_v4 }
 0x1e6   :  { %2875 = vmatprep.subr.bf16.mxu1 %v9283_v6  ;;  %v1838_v6 = vrot.slane %v1833_v62, %v9520_v54 }
 0x1e9   :  { %2876 = vmatpush1.bf16.msra.mxu1 %v9297_v9  ;;  %v1842_v9 = vrot.slane %v1833_v62, %v9525_v52 }
 0x1ea   :  { %2877 = vmatprep.subr.bf16.mxu1 %v9309_v11 }
 0x1ed   :  { %2878 = vmatpush1.bf16.msra.mxu1 %v9323_v13 }
 0x1ee   :  { %2968 = vmatprep.subr.bf16.mxu1 %v9340_v15 }
 0x23b   :  { %v1955_v4 = vpop.f32.mrb[0].mxu1  ;;  %v1925_v11 = vpop.f32.mrb[0].mxu0 }
 0x23c   :  { %v9529_v49 = vadd.f32 %v1955_v4, %v1838_v6  ;;  %v9531_v13 = vadd.f32 %v1925_v11, %v1838_v6  ;;  %v1957_v15 = vpop.f32.mrb[1].mxu1  ;;  %v1927_v59 = vpop.f32.mrb[1].mxu0 }
 0x23d   :  { %v9535_v47 = vadd.f32 %v1957_v15, %v1842_v9  ;;  %v9537_v63 = vadd.f32 %v1927_v59, %v1842_v9  ;;  %v1959_v45 = vpop.f32.mrb[2].mxu1  ;;  %v1929_v61 = vpop.f32.mrb[2].mxu0  ;;  %v9553_v15 = vrot.slane %v1833_v62, %v9539_v44 }
 0x23e   :  { %12223 = vst [vmem:[#allocation56_spill] sm:$0xff] %v9529_v49  ;;  %v9541_v60 = vadd.f32 %v1959_v45, %v1838_v6  ;;  %v9543_v43 = vadd.f32 %v1929_v61, %v1838_v6  ;;  %v1961_v4 = vpop.f32.mrb[3].mxu1  ;;  %v1931_v49 = vpop.f32.mrb[3].mxu0 }
 0x23f   :  { %12225 = vst [vmem:[#allocation58_spill] sm:$0xff] %v9535_v47  ;;  %v9545_v11 = vadd.f32 %v1961_v4, %v1842_v9  ;;  %v9547_v58 = vadd.f32 %v1931_v49, %v1842_v9 }
 0x240   :  { %12227 = vst [vmem:[#allocation60_spill] sm:$0xff] %v9541_v60  ;;  %12228 = vst [vmem:[#allocation61_spill] sm:$0xff] %v9543_v43 }
 0x241   :  { %12229 = vst [vmem:[#allocation62_spill] sm:$0xff] %v9545_v11  ;;  %12230 = vst [vmem:[#allocation63_spill] sm:$0xff] %v9547_v58 }
 0x243   :  { %v1935_v59 = vpop.f32.mrb[4].mxu0  ;;  %v1998_v47 = vpop.f32.mrb[4].mxu1 }
 0x244   :  { %v9555_v57 = vadd.f32 %v1935_v59, %v1838_v6  ;;  %v9558_v45 = vadd.f32 %v1998_v47, %v9550_v42  ;;  %v1937_v61 = vpop.f32.mrb[5].mxu0  ;;  %v2000_v60 = vpop.f32.mrb[5].mxu1 }
 0x245   :  { %v9560_v43 = vadd.f32 %v1937_v61, %v1842_v9  ;;  %v9563_v49 = vadd.f32 %v2000_v60, %v9553_v15  ;;  %v1939_v4 = vpop.f32.mrb[6].mxu0  ;;  %v2002_v11 = vpop.f32.mrb[6].mxu1 }
 0x246   :  { %12231 = vst [vmem:[#allocation64_spill] sm:$0xff] %v9555_v57  ;;  %v9565_v58 = vadd.f32 %v1939_v4, %v1838_v6  ;;  %v9568_v62 = vadd.f32 %v2002_v11, %v9550_v42  ;;  %v1941_v55 = vpop.f32.mrb[7].mxu0  ;;  %v2004_v59 = vpop.f32.mrb[7].mxu1 }
 0x247   :  { %12232 = vst [vmem:[#allocation65_spill] sm:$0xff] %v9560_v43  ;;  %v9570_v57 = vadd.f32 %v1941_v55, %v1842_v9  ;;  %v9573_v47 = vadd.f32 %v2004_v59, %v9553_v15  ;;  %v2039_v59 = vld [vmem:[%s11950_s6] sm:$0xf] }
 0x248   :  { %12233 = vst [vmem:[#allocation66_spill] sm:$0xff] %v9565_v58  ;;  %12234 = vst [vmem:[#allocation67_spill] sm:$0xff] %v9568_v62 }
 0x249   :  { %12235 = vst [vmem:[#allocation68_spill] sm:$0xff] %v9570_v57  ;;  %12236 = vst [vmem:[#allocation69_spill] sm:$0xff] %v9573_v47 }
 0x24b   :  { %v1945_v41 = vpop.f32.mrb[8].mxu0  ;;  %v2008_v61 = vpop.f32.mrb[8].mxu1 }
 0x24c   :  { %v9575_v43 = vadd.f32 %v1945_v41, %v1838_v6  ;;  %v9578_v60 = vadd.f32 %v2008_v61, %v9550_v42  ;;  %v1947_v53 = vpop.f32.mrb[9].mxu0  ;;  %v2010_v4 = vpop.f32.mrb[9].mxu1 }
 0x24d   :  { %v9580_v58 = vadd.f32 %v1947_v53, %v1842_v9  ;;  %v9583_v11 = vadd.f32 %v2010_v4, %v9553_v15  ;;  %v1949_v62 = vpop.f32.mrb[10].mxu0  ;;  %v2012_v55 = vpop.f32.mrb[10].mxu1  ;;  %v2044_v4 = vrot.slane %v2039_v59, %v9520_v54 }
 0x24e   :  { %12237 = vst [vmem:[#allocation70_spill] sm:$0xff] %v9575_v43  ;;  %12238 = vst [vmem:[#allocation71_spill] sm:$0xff] %v9578_v60  ;;  %v9588_v57 = vadd.f32 %v1949_v62, %v1838_v6  ;;  %v9591_v41 = vadd.f32 %v2012_v55, %v9550_v42  ;;  %v1951_v61 = vpop.f32.mrb[11].mxu0  ;;  %v2014_v43 = vpop.f32.mrb[11].mxu1 }
 0x24f   :  { %12239 = vst [vmem:[#allocation72_spill] sm:$0xff] %v9580_v58  ;;  %12240 = vst [vmem:[#allocation73_spill] sm:$0xff] %v9583_v11  ;;  %v9593_v60 = vadd.f32 %v1951_v61, %v1842_v9  ;;  %v9596_v53 = vadd.f32 %v2014_v43, %v9553_v15  ;;  %v9600_v58 = vrot.slane %v2039_v59, %v9525_v52 }
 0x250   :  { %12241 = vst [vmem:[#allocation74_spill] sm:$0xff] %v9588_v57  ;;  %12242 = vst [vmem:[#allocation75_spill] sm:$0xff] %v9591_v41 }
 0x251   :  { %12243 = vst [vmem:[#allocation76_spill] sm:$0xff] %v9593_v60  ;;  %12244 = vst [vmem:[#allocation77_spill] sm:$0xff] %v9596_v53 }
 0x253   :  { %v2018_v11 = vpop.f32.mrb[12].mxu1  ;;  %v2117_v47 = vpop.f32.mrb[12].mxu0 }
 0x254   :  { %v9603_v6 = vadd.f32 %v2018_v11, %v9550_v42  ;;  %v9605_v62 = vadd.f32 %v2117_v47, %v2044_v4  ;;  %v2020_v55 = vpop.f32.mrb[13].mxu1  ;;  %v2119_v57 = vpop.f32.mrb[13].mxu0 }
 0x255   :  { %v9608_v9 = vadd.f32 %v2020_v55, %v9553_v15  ;;  %v9611_v43 = vadd.f32 %v2119_v57, %v9600_v58  ;;  %v2022_v61 = vpop.f32.mrb[14].mxu1  ;;  %v2121_v54 = vpop.f32.mrb[14].mxu0 }
 0x256   :  { %12245 = vst [vmem:[#allocation78_spill] sm:$0xff] %v9603_v6  ;;  %12246 = vst [vmem:[#allocation79_spill] sm:$0xff] %v9605_v62  ;;  %v9614_v52 = vadd.f32 %v2022_v61, %v9550_v42  ;;  %v9616_v60 = vadd.f32 %v2121_v54, %v2044_v4  ;;  %v2024_v53 = vpop.f32.mrb[15].mxu1  ;;  %v2123_v11 = vpop.f32.mrb[15].mxu0 }
 0x257   :  { %12247 = vst [vmem:[#allocation80_spill] sm:$0xff] %v9608_v9  ;;  %12248 = vst [vmem:[#allocation81_spill] sm:$0xff] %v9611_v43  ;;  %v9619_v47 = vadd.f32 %v2024_v53, %v9553_v15  ;;  %v9622_v62 = vadd.f32 %v2123_v11, %v9600_v58 }
 0x258   :  { %12249 = vst [vmem:[#allocation82_spill] sm:$0xff] %v9614_v52  ;;  %12250 = vst [vmem:[#allocation83_spill] sm:$0xff] %v9616_v60 }
 0x259   :  { %12251 = vst [vmem:[#allocation84_spill] sm:$0xff] %v9619_v47  ;;  %12252 = vst [vmem:[#allocation85_spill] sm:$0xff] %v9622_v62 }
 0x25b   :  { %v2028_v55 = vpop.f32.mrb[16].mxu1  ;;  %v2127_v9 = vpop.f32.mrb[16].mxu0 }
 0x25c   :  { %v9625_v57 = vadd.f32 %v2028_v55, %v9550_v42  ;;  %v9627_v43 = vadd.f32 %v2127_v9, %v2044_v4  ;;  %v2030_v6 = vpop.f32.mrb[17].mxu1  ;;  %v2129_v61 = vpop.f32.mrb[17].mxu0 }
 0x25d   :  { %v9630_v54 = vadd.f32 %v2030_v6, %v9553_v15  ;;  %v9633_v60 = vadd.f32 %v2129_v61, %v9600_v58  ;;  %v2032_v53 = vpop.f32.mrb[18].mxu1  ;;  %v2131_v47 = vpop.f32.mrb[18].mxu0  ;;  %v2052_v6 = vrot.slane %v2039_v59, %v9533_v2  ;;  %v2056_v61 = vrot.slane %v2039_v59, %v9539_v44 }
 0x25e   :  { %12253 = vst [vmem:[#allocation86_spill] sm:$0xff] %v9625_v57  ;;  %12254 = vst [vmem:[#allocation87_spill] sm:$0xff] %v9627_v43  ;;  %v9636_v11 = vadd.f32 %v2032_v53, %v9550_v42  ;;  %v9638_v62 = vadd.f32 %v2131_v47, %v2044_v4  ;;  %v2034_v52 = vpop.f32.mrb[19].mxu1  ;;  %v2133_v55 = vpop.f32.mrb[19].mxu0 }
 0x25f   :  { %12255 = vst [vmem:[#allocation88_spill] sm:$0xff] %v9630_v54  ;;  %12256 = vst [vmem:[#allocation89_spill] sm:$0xff] %v9633_v60  ;;  %v9641_v9 = vadd.f32 %v2034_v52, %v9553_v15  ;;  %v9644_v57 = vadd.f32 %v2133_v55, %v9600_v58 }
 0x260   :  { %12257 = vst [vmem:[#allocation90_spill] sm:$0xff] %v9636_v11  ;;  %12258 = vst [vmem:[#allocation91_spill] sm:$0xff] %v9638_v62 }
 0x261   :  { %12259 = vst [vmem:[#allocation92_spill] sm:$0xff] %v9641_v9  ;;  %12260 = vst [vmem:[#allocation93_spill] sm:$0xff] %v9644_v57 }
 0x263   :  { %v2137_v54 = vpop.f32.mrb[20].mxu0  ;;  %v2190_v60 = vpop.f32.mrb[20].mxu1 }
 0x264   :  { %v9648_v43 = vadd.f32 %v2137_v54, %v2044_v4  ;;  %v9650_v42 = vadd.f32 %v2190_v60, %v2052_v6  ;;  %v2139_v47 = vpop.f32.mrb[21].mxu0  ;;  %v2192_v53 = vpop.f32.mrb[21].mxu1 }
 0x265   :  { %v9653_v11 = vadd.f32 %v2139_v47, %v9600_v58  ;;  %v9655_v52 = vadd.f32 %v2192_v53, %v2056_v61  ;;  %v2141_v15 = vpop.f32.mrb[22].mxu0  ;;  %v2194_v55 = vpop.f32.mrb[22].mxu1 }
 0x266   :  { %12261 = vst [vmem:[#allocation94_spill] sm:$0xff] %v9648_v43  ;;  %12262 = vst [vmem:[#allocation95_spill] sm:$0xff] %v9650_v42  ;;  %v9657_v9 = vadd.f32 %v2141_v15, %v2044_v4  ;;  %v9659_v2 = vadd.f32 %v2194_v55, %v2052_v6  ;;  %v2143_v59 = vpop.f32.mrb[23].mxu0  ;;  %v2196_v44 = vpop.f32.mrb[23].mxu1 }
 0x267   :  { %12263 = vst [vmem:[#allocation96_spill] sm:$0xff] %v9653_v11  ;;  %12264 = vst [vmem:[#allocation97_spill] sm:$0xff] %v9655_v52  ;;  %v9662_v54 = vadd.f32 %v2143_v59, %v9600_v58  ;;  %v9664_v60 = vadd.f32 %v2196_v44, %v2056_v61 }
 0x268   :  { %12265 = vst [vmem:[#allocation98_spill] sm:$0xff] %v9657_v9  ;;  %12266 = vst [vmem:[#allocation99_spill] sm:$0xff] %v9659_v2 }
 0x269   :  { %12267 = vst [vmem:[#allocation100_spill] sm:$0xff] %v9662_v54  ;;  %12268 = vst [vmem:[#allocation101_spill] sm:$0xff] %v9664_v60 }
 0x26b   :  { %v2147_v42 = vpop.f32.mrb[24].mxu0  ;;  %v2200_v57 = vpop.f32.mrb[24].mxu1 }
 0x26c   :  { %v9666_v62 = vadd.f32 %v2147_v42, %v2044_v4  ;;  %v9668_v47 = vadd.f32 %v2200_v57, %v2052_v6  ;;  %v2149_v53 = vpop.f32.mrb[25].mxu0  ;;  %v2202_v52 = vpop.f32.mrb[25].mxu1 }
 0x26d   :  { %v9671_v15 = vadd.f32 %v2149_v53, %v9600_v58  ;;  %v9673_v55 = vadd.f32 %v2202_v52, %v2056_v61  ;;  %v2151_v2 = vpop.f32.mrb[26].mxu0  ;;  %v2204_v11 = vpop.f32.mrb[26].mxu1 }
 0x26e   :  { %12269 = vst [vmem:[#allocation102_spill] sm:$0xff] %v9668_v47  ;;  %v2152_v43 = vadd.f32 %v2151_v2, %v2044_v4  ;;  %v9675_v59 = vadd.f32 %v2204_v11, %v2052_v6  ;;  %v2153_v44 = vpop.f32.mrb[27].mxu0  ;;  %v2206_v60 = vpop.f32.mrb[27].mxu1 }
 0x26f   :  { %12270 = vst [vmem:[#allocation103_spill] sm:$0xff] %v9671_v15  ;;  %12271 = vst [vmem:[#allocation104_spill] sm:$0xff] %v9673_v55  ;;  %v2154_v41 = vadd.f32 %v2153_v44, %v9600_v58  ;;  %v9678_v42 = vadd.f32 %v2206_v60, %v2056_v61 }
 0x270   :  { %12272 = vst [vmem:[#allocation105_spill] sm:$0xff] %v9675_v59 }
 0x271   :  { %12273 = vst [vmem:[#allocation106_spill] sm:$0xff] %v9678_v42 }
 0x273   :  { %v2210_v57 = vpop.f32.mrb[28].mxu1  ;;  %v2487_v47 = vpop.f32.mrb[28].mxu0 }
 0x274   :  { %v9680_v54 = vadd.f32 %v2210_v57, %v2052_v6  ;;  %v2535_v53 = vadd.f32 %v2487_v47, %v9531_v13  ;;  %v2212_v9 = vpop.f32.mrb[29].mxu1  ;;  %v2489_v52 = vpop.f32.mrb[29].mxu0 }
 0x275   :  { %v9683_v55 = vadd.f32 %v2212_v9, %v2056_v61  ;;  %v2536_v2 = vadd.f32 %v2489_v52, %v9537_v63  ;;  %v2214_v4 = vpop.f32.mrb[30].mxu1  ;;  %v2491_v11 = vpop.f32.mrb[30].mxu0 }
 0x276   :  { %12274 = vst [vmem:[#allocation107_spill] sm:$0xff] %v9680_v54  ;;  %v9686_v59 = vadd.f32 %v2214_v4, %v2052_v6  ;;  %v2216_v15 = vpop.f32.mrb[31].mxu1  ;;  %v2492_v58 = vpop.f32.mrb[31].mxu0  ;;  %v2539_v42 = vmul.f32 0.5, %v2535_v53 }
 0x277   :  { %12275 = vst [vmem:[#allocation108_spill] sm:$0xff] %v9683_v55  ;;  %v9688_v60 = vadd.f32 %v2216_v15, %v2056_v61  ;;  %v2540_v44 = vmul.f32 0.5, %v2536_v2 }
 0x278   :  { %12276 = vst [vmem:[#allocation109_spill] sm:$0xff] %v9686_v59 }
 0x279   :  { %12277 = vst [vmem:[#allocation110_spill] sm:$0xff] %v9688_v60  ;;  %7178 = vtanh.f32 %v2540_v44 }
 0x27a   :  { %7180 = vtanh.f32 %v2539_v42 }
 0x27b   :  { %v2220_v57 = vpop.f32.mrb[32].mxu1 }
 0x27c   :  { %v9690_v54 = vadd.f32 %v2220_v57, %v2052_v6  ;;  %v2222_v13 = vpop.f32.mrb[33].mxu1 }
 0x27d   :  { %v9692_v47 = vadd.f32 %v2222_v13, %v2056_v61  ;;  %v2224_v9 = vpop.f32.mrb[34].mxu1 }
 0x27e   :  { %12278 = vst [vmem:[#allocation111_spill] sm:$0xff] %v9690_v54  ;;  %v2225_v55 = vadd.f32 %v2224_v9, %v2052_v6  ;;  %v2226_v63 = vpop.f32.mrb[35].mxu1 }
 0x27f   :  { %12279 = vst [vmem:[#allocation112_spill] sm:$0xff] %v9692_v47  ;;  %v2227_v52 = vadd.f32 %v2226_v63, %v2056_v61 }
 0x283   :  { %v2528_v4 = vpop.f32.mrb[36].mxu1  ;;  %v7179_v60 = vpop.eup %7178 }
 0x284   :  { %v2537_v11 = vadd.f32 %v2528_v4, %v9558_v45  ;;  %v2530_v58 = vpop.f32.mrb[37].mxu1  ;;  %v7181_v57 = vpop.eup %7180  ;;  %v2546_v59 = vmul.f32 0.5, %v7179_v60 }
 0x285   :  { %v2538_v15 = vadd.f32 %v2530_v58, %v9563_v49  ;;  %v2532_v2 = vpop.f32.mrb[38].mxu1  ;;  %v2545_v13 = vmul.f32 0.5, %v7181_v57 }
 0x286   :  { %v2533_v53 = vpop.f32.mrb[39].mxu1  ;;  %v2541_v44 = vmul.f32 0.5, %v2537_v11  ;;  %v2549_v47 = vadd.f32 0.5, %v2546_v59 }
 0x287   :  { %7182 = vtanh.f32 %v2538_v15  ;;  %v2548_v6 = vadd.f32 0.5, %v2545_v13 }
 0x288   :  { %7184 = vtanh.f32 %v2541_v44  ;;  %v2552_v42 = vmul.f32 0.0, %v2549_v47 }
 0x291   :  { %v7183_v9 = vpop.eup %7182 }
 0x292   :  { %v2553_v61 = vmul.f32 %v7183_v9, %v2548_v6  ;;  %v7185_v2 = vpop.eup %7184 }
 0x293   :  { %v2751_v63 = vpop.f32.mrb[32].mxu0  ;;  %v2547_v11 = vmul.f32 0.5, %v7185_v2 }
 0x294   :  { %v9696_v54 = vadd.f32 %v2553_v61, %v2552_v42  ;;  %v2799_v45 = vadd.f32 %v2751_v63, %v2152_v43  ;;  %v2753_v4 = vpop.f32.mrb[33].mxu0 }
 0x295   :  { %v2800_v49 = vadd.f32 %v2753_v4, %v2154_v41  ;;  %v2755_v58 = vpop.f32.mrb[34].mxu0  ;;  %v2550_v59 = vadd.f32 0.5, %v2547_v11 }
 0x296   :  { %7186 = vtanh.f32 %v9696_v54  ;;  %v2756_v15 = vpop.f32.mrb[35].mxu0  ;;  %v2803_v53 = vmul.f32 0.5, %v2799_v45 }
 0x297   :  { %v2804_v60 = vmul.f32 0.5, %v2800_v49 }
 0x299   :  { %7188 = vtanh.f32 %v2804_v60 }
 0x29a   :  { %7190 = vtanh.f32 %v2803_v53 }
 0x2a0   :  { %v7187_v57 = vpop.eup %7186 }
 0x2a1   :  { %v9699_v47 = vmul.f32 %v7187_v57, %v2550_v59 }
 0x2a3   :  { %v2792_v44 = vpop.f32.mrb[40].mxu1  ;;  %v2821_v43 = vpack.c.bf16 %v9699_v47, %v9699_v47  ;;  %v7189_v61 = vpop.eup %7188 }
 0x2a4   :  { %v2801_v13 = vadd.f32 %v2792_v44, %v2225_v55  ;;  %v2794_v41 = vpop.f32.mrb[41].mxu1  ;;  %v7191_v55 = vpop.eup %7190 }
 0x2a5   :  { %v2802_v6 = vadd.f32 %v2794_v41, %v2227_v52  ;;  %v2796_v9 = vpop.f32.mrb[42].mxu1  ;;  %2855 = vmatmul.mubr.bf16.vlgmr.msra.gmra.mrb[36].mxu0 %v2821_v43  ;;  %2896 = vmatmul.mubr.bf16.vlgmr.msra.gmra.mrb[44].mxu1 %v2821_v43  ;;  %v2810_v52 = vmul.f32 0.5, %v7189_v61  ;;  %v2809_v45 = vmul.f32 0.5, %v7191_v55  ;;  %v12285_v41 = vld [vmem:[#allocation41_spill] sm:$0xff]  ;;  %v12293_v61 = vld [vmem:[#allocation47_spill] sm:$0xff] }
 0x2a6   :  { %v2797_v42 = vpop.f32.mrb[43].mxu1  ;;  %2928 = vmatpush1.bf16.msra.mxu0 %v9249_v0  ;;  %2969 = vmatpush1.bf16.msra.mxu1 %v9353_v34  ;;  %v2805_v63 = vmul.f32 0.5, %v2801_v13  ;;  %v12280_v13 = vld [vmem:[#allocation28_spill] sm:$0xff]  ;;  %v12294_v55 = vld [vmem:[#allocation35_spill] sm:$0xff] }
 0x2a7   :  { %7192 = vtanh.f32 %v2802_v6  ;;  %2929 = vmatprep.subr.bf16.mxu0 %v9261_v3  ;;  %2970 = vmatprep.subr.bf16.mxu1 %v9365_v56  ;;  %v2813_v4 = vadd.f32 0.5, %v2810_v52  ;;  %v2812_v49 = vadd.f32 0.5, %v2809_v45  ;;  %v12287_v6 = vld [vmem:[#allocation43_spill] sm:$0xff]  ;;  %v12288_v9 = vld [vmem:[#allocation32_spill] sm:$0xff]  ;;  %v12292_v42 = vld [vmem:[#allocation34_spill] sm:$0xff] }
 0x2a8   :  { %2959 = vmatprep.mubr.bf16.mxu0 %v12218_v24  ;;  %3000 = vmatprep.mubr.bf16.mxu1 %v12218_v24  ;;  %7194 = vtanh.f32 %v2805_v63  ;;  %v12295_v52 = vld [vmem:[#allocation48_spill] sm:$0xff]  ;;  %v12297_v45 = vld [vmem:[#allocation49_spill] sm:$0xff] }
 0x2a9   :  { %v2816_v15 = vmul.f32 0.0, %v2813_v4  ;;  %v12296_v63 = vld [vmem:[#allocation36_spill] sm:$0xff]  ;;  %v12298_v4 = vld [vmem:[#allocation38_spill] sm:$0xff] }
 0x2aa   :  { %2930 = vmatpush1.bf16.msra.mxu0 %v9276_v5  ;;  %2971 = vmatpush1.bf16.msra.mxu1 %v9378_v25 }
 0x2ab   :  { %2931 = vmatprep.subr.bf16.mxu0 %v9288_v7  ;;  %2972 = vmatprep.subr.bf16.mxu1 %v9390_v33 }
 0x2ae   :  { %2932 = vmatpush1.bf16.msra.mxu0 %v9302_v10  ;;  %2973 = vmatpush1.bf16.msra.mxu1 %v9403_v23 }
 0x2af   :  { %2933 = vmatprep.subr.bf16.mxu0 %v9314_v12  ;;  %2974 = vmatprep.subr.bf16.mxu1 %v9415_v22 }
 0x2b1   :  { %v7193_v58 = vpop.eup %7192 }
 0x2b2   :  { %v2817_v2 = vmul.f32 %v7193_v58, %v2812_v49  ;;  %2934 = vmatpush1.bf16.msra.mxu0 %v9328_v14  ;;  %2975 = vmatpush1.bf16.msra.mxu1 %v9427_v21  ;;  %v7195_v11 = vpop.eup %7194  ;;  %v12299_v49 = vld [vmem:[#allocation50_spill] sm:$0xff]  ;;  %v12300_v58 = vld [vmem:[#allocation40_spill] sm:$0xff] }
 0x2b3   :  { %2935 = vmatprep.subr.bf16.mxu0 %v9335_v1  ;;  %2976 = vmatprep.subr.bf16.mxu1 %v9434_v29  ;;  %v2811_v53 = vmul.f32 0.5, %v7195_v11  ;;  %v12303_v11 = vld [vmem:[#allocation52_spill] sm:$0xff] }
 0x2b4   :  { %v9721_v60 = vadd.f32 %v2817_v2, %v2816_v15  ;;  %v12301_v15 = vld [vmem:[#allocation51_spill] sm:$0xff]  ;;  %v12302_v2 = vld [vmem:[#allocation42_spill] sm:$0xff] }
 0x2b5   :  { %v2814_v59 = vadd.f32 0.5, %v2811_v53  ;;  %v12304_v53 = vld [vmem:[#allocation45_spill] sm:$0xff] }
 0x2b6   :  { %7196 = vtanh.f32 %v9721_v60  ;;  %2936 = vmatpush1.bf16.msra.mxu0 %v9348_v17  ;;  %2977 = vmatpush1.bf16.msra.mxu1 %v9441_v20 }
 0x2b7   :  { %2937 = vmatprep.subr.bf16.mxu0 %v9360_v35  ;;  %2978 = vmatprep.subr.bf16.mxu1 %v9447_v28 }
 0x2ba   :  { %2938 = vmatpush1.bf16.msra.mxu0 %v9373_v51  ;;  %2979 = vmatpush1.bf16.msra.mxu1 %v9455_v19 }
 0x2bb   :  { %2939 = vmatprep.subr.bf16.mxu0 %v9385_v36  ;;  %2980 = vmatprep.subr.bf16.mxu1 %v9462_v27 }
 0x2be   :  { %2940 = vmatpush1.bf16.msra.mxu0 %v9398_v32  ;;  %2981 = vmatpush1.bf16.msra.mxu1 %v9470_v18 }
 0x2bf   :  { %2941 = vmatprep.subr.bf16.mxu0 %v9410_v31  ;;  %2982 = vmatprep.subr.bf16.mxu1 %v9477_v26 }
 0x2c0   :  { %v7197_v57 = vpop.eup %7196 }
 0x2c1   :  { %v9736_v44 = vmul.f32 %v7197_v57, %v2814_v59  ;;  %v12305_v59 = vld [vmem:[#allocation53_spill] sm:$0xff] }
 0x2c2   :  { %2942 = vmatpush1.bf16.msra.mxu0 %v9422_v30  ;;  %2983 = vmatpush1.bf16.msra.mxu1 %v9484_v38 }
 0x2c3   :  { %v2926_v43 = vpack.c.bf16 %v9736_v44, %v9736_v44  ;;  %3032 = vmatprep.subr.bf16.mxu0 %v9042_v8  ;;  %3073 = vmatprep.subr.bf16.mxu1 %v9056_v16  ;;  %v12281_v8 = vld [vmem:[#allocation37_spill] sm:$0xff] }
 0x2c4   :  { %v12282_v16 = vld [vmem:[#allocation29_spill] sm:$0xff] }
 0x2c5   :  { %2960 = vmatmul.mubr.bf16.vlgmr.msra.gmra.mrb[40].mxu0 %v2926_v43  ;;  %3001 = vmatmul.mubr.bf16.vlgmr.msra.gmra.mrb[48].mxu1 %v2926_v43 }
 0x2c6   :  { %3033 = vmatpush1.bf16.msra.mxu0 %v9078_v37  ;;  %3074 = vmatpush1.bf16.msra.mxu1 %v9142_v46  ;;  %v12283_v37 = vld [vmem:[#allocation39_spill] sm:$0xff]  ;;  %v12284_v46 = vld [vmem:[#allocation30_spill] sm:$0xff] }
 0x2c7   :  { %3034 = vmatprep.subr.bf16.mxu0 %v12280_v13  ;;  %3075 = vmatprep.subr.bf16.mxu1 %v9153_v48  ;;  %v12286_v48 = vld [vmem:[#allocation31_spill] sm:$0xff]  ;;  %v12306_v13 = vld [vmem:[#allocation61_spill] sm:$0xff] }
 0x2c8   :  { %3064 = vmatprep.mubr.bf16.mxu0 %v12218_v24  ;;  %3105 = vmatprep.mubr.bf16.mxu1 %v12218_v24 }
 0x2ca   :  { %3035 = vmatpush1.bf16.msra.mxu0 %v9093_v39  ;;  %3076 = vmatpush1.bf16.msra.mxu1 %v9169_v50  ;;  %v12289_v39 = vld [vmem:[#allocation44_spill] sm:$0xff]  ;;  %v12290_v50 = vld [vmem:[#allocation33_spill] sm:$0xff] }
 0x2cb   :  { %3036 = vmatprep.subr.bf16.mxu0 %v9101_v40  ;;  %3077 = vmatprep.subr.bf16.mxu1 %v12281_v8  ;;  %v12291_v40 = vld [vmem:[#allocation46_spill] sm:$0xff] }
 0x2ce   :  { %3037 = vmatpush1.bf16.msra.mxu0 %v12282_v16  ;;  %3078 = vmatpush1.bf16.msra.mxu1 %v12283_v37  ;;  %v12307_v16 = vld [vmem:[#allocation67_spill] sm:$0xff] }
 0x2cf   :  { %3038 = vmatprep.subr.bf16.mxu0 %v12284_v46  ;;  %3079 = vmatprep.subr.bf16.mxu1 %v12285_v41 }
 0x2d2   :  { %3039 = vmatpush1.bf16.msra.mxu0 %v12286_v48  ;;  %3080 = vmatpush1.bf16.msra.mxu1 %v12287_v6  ;;  %v12308_v48 = vld [vmem:[#allocation63_spill] sm:$0xff] }
 0x2d3   :  { %3040 = vmatprep.subr.bf16.mxu0 %v12288_v9  ;;  %3081 = vmatprep.subr.bf16.mxu1 %v12289_v39  ;;  %v12309_v9 = vld [vmem:[#allocation69_spill] sm:$0xff] }
 0x2d6   :  { %3041 = vmatpush1.bf16.msra.mxu0 %v12290_v50  ;;  %3082 = vmatpush1.bf16.msra.mxu1 %v12291_v40 }
 0x2d7   :  { %3042 = vmatprep.subr.bf16.mxu0 %v12292_v42  ;;  %3083 = vmatprep.subr.bf16.mxu1 %v12293_v61 }
 0x2da   :  { %3043 = vmatpush1.bf16.msra.mxu0 %v12294_v55  ;;  %3084 = vmatpush1.bf16.msra.mxu1 %v12295_v52 }
 0x2db   :  { %3044 = vmatprep.subr.bf16.mxu0 %v12296_v63  ;;  %3085 = vmatprep.subr.bf16.mxu1 %v12297_v45 }
 0x2de   :  { %3045 = vmatpush1.bf16.msra.mxu0 %v12298_v4  ;;  %3086 = vmatpush1.bf16.msra.mxu1 %v12299_v49 }
 0x2df   :  { %3046 = vmatprep.subr.bf16.mxu0 %v12300_v58  ;;  %3087 = vmatprep.subr.bf16.mxu1 %v12301_v15 }
 0x2e2   :  { %3047 = vmatpush1.bf16.msra.mxu0 %v12302_v2  ;;  %3088 = vmatpush1.bf16.msra.mxu1 %v12303_v11 }
 0x2e3   :  { %3137 = vmatprep.subr.bf16.mxu0 %v12304_v53  ;;  %3178 = vmatprep.subr.bf16.mxu1 %v12305_v59 }
 0x378   :  { %v2856_v57 = vpop.f32.mrb[36].mxu0  ;;  %v2897_v43 = vpop.f32.mrb[44].mxu1 }
 0x379   :  { %v2904_v8 = vadd.f32 %v2856_v57, %v12306_v13  ;;  %v2906_v37 = vadd.f32 %v2897_v43, %v12307_v16  ;;  %v2858_v46 = vpop.f32.mrb[37].mxu0  ;;  %v2899_v41 = vpop.f32.mrb[45].mxu1 }
 0x37a   :  { %v2905_v6 = vadd.f32 %v2858_v46, %v12308_v48  ;;  %v2907_v39 = vadd.f32 %v2899_v41, %v12309_v9  ;;  %v2860_v50 = vpop.f32.mrb[38].mxu0  ;;  %v2901_v40 = vpop.f32.mrb[46].mxu1  ;;  %v12310_v46 = vld [vmem:[#allocation111_spill] sm:$0xff] }
 0x37b   :  { %v2908_v42 = vmul.f32 0.5, %v2904_v8  ;;  %v2861_v61 = vpop.f32.mrb[39].mxu0  ;;  %v2902_v55 = vpop.f32.mrb[47].mxu1  ;;  %v2910_v63 = vmul.f32 0.5, %v2906_v37  ;;  %v12311_v9 = vld [vmem:[#allocation103_spill] sm:$0xff]  ;;  %v12312_v50 = vld [vmem:[#allocation112_spill] sm:$0xff] }
 0x37c   :  { %v2909_v52 = vmul.f32 0.5, %v2905_v6 }
 0x37d   :  { %7198 = vtanh.f32 %v2908_v42 }
 0x37e   :  { %7200 = vtanh.f32 %v2909_v52 }
 0x37f   :  { %7202 = vtanh.f32 %v2907_v39 }
 0x380   :  { %7204 = vtanh.f32 %v2910_v63 }
 0x387   :  { %v7199_v45 = vpop.eup %7198 }
 0x388   :  { %v2914_v4 = vmul.f32 0.5, %v7199_v45  ;;  %v7201_v49 = vpop.eup %7200 }
 0x389   :  { %v2915_v15 = vmul.f32 0.5, %v7201_v49  ;;  %v7203_v2 = vpop.eup %7202 }
 0x38a   :  { %v2917_v58 = vadd.f32 0.5, %v2914_v4  ;;  %v7205_v43 = vpop.eup %7204 }
 0x38b   :  { %v2918_v11 = vadd.f32 0.5, %v2915_v15  ;;  %v2916_v13 = vmul.f32 0.5, %v7205_v43  ;;  %v9957_v43 = vld [vmem:[%s12190_s4 + $0xa4] ss:$16 sps:$4 sm:$0xff]  }
 0x38c   :  { %v2922_v53 = vmul.f32 %v7203_v2, %v2917_v58  ;;  %12325 = vst [vmem:[#allocation34_spill] sm:$0xff] %v9957_v43 }
 0x38d   :  { %v2921_v59 = vmul.f32 %v2918_v11, %v9696_v54  ;;  %v2919_v61 = vadd.f32 0.5, %v2916_v13  ;;  %v9939_v11 = vld [vmem:[%s12190_s4 + $0x8c] ss:$16 sps:$4 sm:$0xff]  }
 0x38e   :  { %12322 = vst [vmem:[#allocation44_spill] sm:$0xff] %v9939_v11  ;;  %v9963_v13 = vld [vmem:[%s12190_s4 + $0xac] ss:$16 sps:$4 sm:$0xff]  }
 0x38f   :  { %v9783_v57 = vadd.f32 %v2922_v53, %v2921_v59  ;;  %v9945_v53 = vld [vmem:[%s12190_s4 + $0x80] ss:$16 sps:$4 sm:$0xff]   ;;  %v9951_v59 = vld [vmem:[%s12190_s4 + $0x88] ss:$16 sps:$4 sm:$0xff]   ;;  %12326 = vst [vmem:[#allocation47_spill] sm:$0xff] %v9963_v13 }
 0x390   :  { %12323 = vst [vmem:[#allocation33_spill] sm:$0xff] %v9945_v53  ;;  %12324 = vst [vmem:[#allocation46_spill] sm:$0xff] %v9951_v59 }
 0x391   :  { %7206 = vtanh.f32 %v9783_v57 }
 0x398   :  { %v2961_v8 = vpop.f32.mrb[40].mxu0  ;;  %v3002_v16 = vpop.f32.mrb[48].mxu1 }
 0x399   :  { %v3009_v37 = vadd.f32 %v2961_v8, %v9666_v62  ;;  %v3011_v41 = vadd.f32 %v3002_v16, %v12310_v46  ;;  %v2963_v48 = vpop.f32.mrb[41].mxu0  ;;  %v3004_v6 = vpop.f32.mrb[49].mxu1  ;;  %v9969_v8 = vld [vmem:[%s12190_s4 + $0xa0] ss:$16 sps:$4 sm:$0xff]   ;;  %v9975_v16 = vld [vmem:[%s12190_s4 + $0xa8] ss:$16 sps:$4 sm:$0xff]  }
 0x39a   :  { %v3010_v39 = vadd.f32 %v2963_v48, %v12311_v9  ;;  %v3012_v40 = vadd.f32 %v3004_v6, %v12312_v50  ;;  %v2965_v42 = vpop.f32.mrb[42].mxu0  ;;  %v3006_v54 = vpop.f32.mrb[50].mxu1  ;;  %12327 = vst [vmem:[#allocation35_spill] sm:$0xff] %v9969_v8  ;;  %12328 = vst [vmem:[#allocation48_spill] sm:$0xff] %v9975_v16  ;;  %v9987_v46 = vld [vmem:[%s12190_s4 + $0xcc] ss:$16 sps:$4 sm:$0xff]  }
 0x39b   :  { %v3013_v55 = vmul.f32 0.5, %v3009_v37  ;;  %v2966_v52 = vpop.f32.mrb[43].mxu0  ;;  %v3007_v63 = vpop.f32.mrb[51].mxu1  ;;  %v3015_v15 = vmul.f32 0.5, %v3011_v41  ;;  %v9981_v37 = vld [vmem:[%s12190_s4 + $0xc4] ss:$16 sps:$4 sm:$0xff]  }
 0x39c   :  { %v7207_v45 = vpop.eup %7206  ;;  %v3014_v4 = vmul.f32 0.5, %v3010_v39  ;;  %12329 = vst [vmem:[#allocation36_spill] sm:$0xff] %v9981_v37  ;;  %12330 = vst [vmem:[#allocation49_spill] sm:$0xff] %v9987_v46  ;;  %v9993_v41 = vld [vmem:[%s12190_s4 + $0xc0] ss:$16 sps:$4 sm:$0xff]   ;;  %v12340_v63 = vld [vmem:[#allocation71_spill] sm:$0xff] }
 0x39d   :  { %7208 = vtanh.f32 %v3013_v55  ;;  %v2925_v49 = vmul.f32 %v7207_v45, %v2919_v61  ;;  %12331 = vst [vmem:[#allocation38_spill] sm:$0xff] %v9993_v41  ;;  %v9999_v48 = vld [vmem:[%s12190_s4 + $0xc8] ss:$16 sps:$4 sm:$0xff]   ;;  %v10005_v6 = vld [vmem:[%s12190_s4 + $0xe4] ss:$16 sps:$4 sm:$0xff]  }
 0x39e   :  { %7210 = vtanh.f32 %v3014_v4  ;;  %12332 = vst [vmem:[#allocation50_spill] sm:$0xff] %v9999_v48  ;;  %12333 = vst [vmem:[#allocation40_spill] sm:$0xff] %v10005_v6  ;;  %v10011_v9 = vld [vmem:[%s12190_s4 + $0xec] ss:$16 sps:$4 sm:$0xff]   ;;  %v10017_v39 = vld [vmem:[%s12190_s4 + $0xe0] ss:$16 sps:$4 sm:$0xff]  }
 0x39f   :  { %v3031_v62 = vpack.c.bf16 %v2925_v49, %v2925_v49  ;;  %v9791_v58 = vpack.c.bf16 %v2925_v49, %v9699_v47  ;;  %7212 = vtanh.f32 %v3012_v40  ;;  %12334 = vst [vmem:[#allocation51_spill] sm:$0xff] %v10011_v9  ;;  %12335 = vst [vmem:[#allocation42_spill] sm:$0xff] %v10017_v39  ;;  %v10023_v50 = vld [vmem:[%s12190_s4 + $0xe8] ss:$16 sps:$4 sm:$0xff]   ;;  %v10029_v40 = vld [vmem:[%s12208_s0 + $0x4] ss:$16 sps:$4 sm:$0xff]  }
 0x3a0   :  { %7214 = vtanh.f32 %v3015_v15  ;;  %12336 = vst [vmem:[#allocation52_spill] sm:$0xff] %v10023_v50  ;;  %12337 = vst [vmem:[#allocation45_spill] sm:$0xff] %v10029_v40  ;;  %v10035_v42 = vld [vmem:[%s12208_s0 + $0xc] ss:$16 sps:$4 sm:$0xff]   ;;  %v12339_v55 = vld [vmem:[#allocation64_spill] sm:$0xff] }
 0x3a1   :  { %12313 = vst [vmem:[#allocation28_spill] sm:$0xff] %v9791_v58  ;;  %3065 = vmatmul.mubr.bf16.vlgmr.msra.gmra.mrb[44].mxu0 %v3031_v62  ;;  %3106 = vmatmul.mubr.bf16.vlgmr.msra.gmra.mrb[52].mxu1 %v3031_v62  ;;  %12338 = vst [vmem:[#allocation53_spill] sm:$0xff] %v10035_v42  ;;  %v12341_v62 = vld [vmem:[#allocation65_spill] sm:$0xff] }
 0x3a2   :  { %3138 = vmatpush1.bf16.msra.mxu0 %v9249_v0  ;;  %3179 = vmatpush1.bf16.msra.mxu1 %v9353_v34  ;;  %v10201_v58 = vld [vmem:[%s12208_s0 + $0xcc] ss:$16 sps:$4 sm:$0xff]  }
 0x3a3   :  { %3139 = vmatprep.subr.bf16.mxu0 %v9261_v3  ;;  %3180 = vmatprep.subr.bf16.mxu1 %v9365_v56  ;;  %12351 = vst [vmem:[#allocation111_spill] sm:$0xff] %v10201_v58 }
 0x3a4   :  { %3169 = vmatprep.mubr.bf16.mxu0 %v12218_v24  ;;  %3210 = vmatprep.mubr.bf16.mxu1 %v12218_v24 }
 0x3a6   :  { %3140 = vmatpush1.bf16.msra.mxu0 %v9276_v5  ;;  %3181 = vmatpush1.bf16.msra.mxu1 %v9378_v25 }
 0x3a7   :  { %v7209_v47 = vpop.eup %7208  ;;  %3141 = vmatprep.subr.bf16.mxu0 %v9288_v7  ;;  %3182 = vmatprep.subr.bf16.mxu1 %v9390_v33 }
 0x3a8   :  { %v3019_v0 = vmul.f32 0.5, %v7209_v47  ;;  %v7211_v34 = vpop.eup %7210  ;;  %v12342_v47 = vld [vmem:[#allocation73_spill] sm:$0xff] }
 0x3a9   :  { %v3020_v3 = vmul.f32 0.5, %v7211_v34  ;;  %v7213_v56 = vpop.eup %7212 }
 0x3aa   :  { %v3022_v2 = vadd.f32 0.5, %v3019_v0  ;;  %3142 = vmatpush1.bf16.msra.mxu0 %v9302_v10  ;;  %3183 = vmatpush1.bf16.msra.mxu1 %v9403_v23  ;;  %v9891_v10 = vld [vmem:[%s12190_s4 + $0x4c] ss:$16 sps:$4 sm:$0xff]  }
 0x3ab   :  { %3143 = vmatprep.subr.bf16.mxu0 %v9314_v12  ;;  %3184 = vmatprep.subr.bf16.mxu1 %v9415_v22  ;;  %v3023_v25 = vadd.f32 0.5, %v3020_v3  ;;  %v7215_v22 = vpop.eup %7214  ;;  %v9897_v12 = vld [vmem:[%s12190_s4 + $0x40] ss:$16 sps:$4 sm:$0xff]  }
 0x3ac   :  { %v3027_v5 = vmul.f32 %v7213_v56, %v3022_v2  ;;  %12315 = vst [vmem:[#allocation29_spill] sm:$0xff] %v9897_v12 }
 0x3ad   :  { %v3026_v7 = vmul.f32 %v3023_v25, %v9721_v60  ;;  %v9927_v60 = vld [vmem:[%s12190_s4 + $0x68] ss:$16 sps:$4 sm:$0xff]  }
 0x3ae   :  { %3144 = vmatpush1.bf16.msra.mxu0 %v9328_v14  ;;  %3185 = vmatpush1.bf16.msra.mxu1 %v9427_v21  ;;  %v3021_v21 = vmul.f32 0.5, %v7215_v22  ;;  %v9903_v14 = vld [vmem:[%s12190_s4 + $0x48] ss:$16 sps:$4 sm:$0xff]   ;;  %12320 = vst [vmem:[#allocation43_spill] sm:$0xff] %v9927_v60 }
 0x3af   :  { %3145 = vmatprep.subr.bf16.mxu0 %v9335_v1  ;;  %3186 = vmatprep.subr.bf16.mxu1 %v9434_v29  ;;  %v9812_v33 = vadd.f32 %v3027_v5, %v3026_v7  ;;  %12316 = vst [vmem:[#allocation39_spill] sm:$0xff] %v9903_v14  ;;  %v9909_v1 = vld [vmem:[%s12190_s4 + $0x64] ss:$16 sps:$4 sm:$0xff]  }
 0x3b0   :  { %v3024_v23 = vadd.f32 0.5, %v3021_v21  ;;  %12317 = vst [vmem:[#allocation30_spill] sm:$0xff] %v9909_v1 }
 0x3b1   :  { %7216 = vtanh.f32 %v9812_v33 }
 0x3b2   :  { %3146 = vmatpush1.bf16.msra.mxu0 %v9348_v17  ;;  %3187 = vmatpush1.bf16.msra.mxu1 %v9441_v20  ;;  %v9915_v17 = vld [vmem:[%s12190_s4 + $0x6c] ss:$16 sps:$4 sm:$0xff]  }
 0x3b3   :  { %3147 = vmatprep.subr.bf16.mxu0 %v9360_v35  ;;  %3188 = vmatprep.subr.bf16.mxu1 %v9447_v28  ;;  %12318 = vst [vmem:[#allocation41_spill] sm:$0xff] %v9915_v17  ;;  %v9921_v35 = vld [vmem:[%s12190_s4 + $0x60] ss:$16 sps:$4 sm:$0xff]  }
 0x3b4   :  { %12319 = vst [vmem:[#allocation31_spill] sm:$0xff] %v9921_v35 }
 0x3b6   :  { %3148 = vmatpush1.bf16.msra.mxu0 %v9373_v51  ;;  %3189 = vmatpush1.bf16.msra.mxu1 %v9455_v19  ;;  %v9879_v51 = vld [vmem:[%s12190_s4 + $0x28] ss:$16 sps:$4 sm:$0xff]  }
 0x3b7   :  { %3149 = vmatprep.subr.bf16.mxu0 %v9385_v36  ;;  %3190 = vmatprep.subr.bf16.mxu1 %v9462_v27  ;;  %v9835_v27 = vld [vmem:[%s12190_s4 + $0x4] ss:$16 sps:$4 sm:$0xff]   ;;  %v9873_v36 = vld [vmem:[%s12190_s4 + $0x20] ss:$16 sps:$4 sm:$0xff]  }
 0x3ba   :  { %3150 = vmatpush1.bf16.msra.mxu0 %v9398_v32  ;;  %3191 = vmatpush1.bf16.msra.mxu1 %v9470_v18  ;;  %v9841_v18 = vld [vmem:[%s12190_s4 + $0xc] ss:$16 sps:$4 sm:$0xff]  }
 0x3bb   :  { %3151 = vmatprep.subr.bf16.mxu0 %v9410_v31  ;;  %3192 = vmatprep.subr.bf16.mxu1 %v9477_v26  ;;  %v7217_v20 = vpop.eup %7216  ;;  %v9847_v26 = vld [vmem:[%s12190_s4] ss:$16 sps:$4 sm:$0xff]   ;;  %v9859_v31 = vld [vmem:[%s12190_s4 + $0x24] ss:$16 sps:$4 sm:$0xff]   ;;  %v9865_v32 = vld [vmem:[%s12190_s4 + $0x2c] ss:$16 sps:$4 sm:$0xff]  }
 0x3bc   :  { %v3030_v28 = vmul.f32 %v7217_v20, %v3024_v23 }
 0x3be   :  { %3152 = vmatpush1.bf16.msra.mxu0 %v9422_v30  ;;  %3193 = vmatpush1.bf16.msra.mxu1 %v9484_v38  ;;  %v3136_v19 = vpack.c.bf16 %v3030_v28, %v3030_v28  ;;  %v9830_v29 = vpack.c.bf16 %v9736_v44, %v3030_v28  ;;  %v9853_v30 = vld [vmem:[%s12190_s4 + $0x8] ss:$16 sps:$4 sm:$0xff]   ;;  %v9885_v38 = vld [vmem:[%s12190_s4 + $0x44] ss:$16 sps:$4 sm:$0xff]  }
 0x3bf   :  { %3242 = vmatprep.subr.bf16.mxu0 %v9835_v27  ;;  %3283 = vmatprep.subr.bf16.mxu1 %v9841_v18  ;;  %v9933_v44 = vld [vmem:[%s12190_s4 + $0x84] ss:$16 sps:$4 sm:$0xff]  }
 0x3c0   :  { %12314 = vst [vmem:[#allocation37_spill] sm:$0xff] %v9830_v29  ;;  %12321 = vst [vmem:[#allocation32_spill] sm:$0xff] %v9933_v44  ;;  %v10195_v29 = vld [vmem:[%s12208_s0 + $0xc4] ss:$16 sps:$4 sm:$0xff]  }
 0x3c1   :  { %3170 = vmatmul.mubr.bf16.vlgmr.msra.gmra.mrb[48].mxu0 %v3136_v19  ;;  %3211 = vmatmul.mubr.bf16.vlgmr.msra.gmra.mrb[56].mxu1 %v3136_v19  ;;  %12350 = vst [vmem:[#allocation69_spill] sm:$0xff] %v10195_v29 }
 0x3c2   :  { %3243 = vmatpush1.bf16.msra.mxu0 %v9847_v26  ;;  %3284 = vmatpush1.bf16.msra.mxu1 %v9853_v30 }
 0x3c3   :  { %3244 = vmatprep.subr.bf16.mxu0 %v9859_v31  ;;  %3285 = vmatprep.subr.bf16.mxu1 %v9865_v32 }
 0x3c4   :  { %3274 = vmatprep.mubr.bf16.mxu0 %v12218_v24  ;;  %3315 = vmatprep.mubr.bf16.mxu1 %v12218_v24 }
 0x3c6   :  { %3245 = vmatpush1.bf16.msra.mxu0 %v9873_v36  ;;  %3286 = vmatpush1.bf16.msra.mxu1 %v9879_v51 }
 0x3c7   :  { %3246 = vmatprep.subr.bf16.mxu0 %v9885_v38  ;;  %3287 = vmatprep.subr.bf16.mxu1 %v9891_v10 }
 0x3ca   :  { %3247 = vmatpush1.bf16.msra.mxu0 %v9897_v12  ;;  %3288 = vmatpush1.bf16.msra.mxu1 %v9903_v14 }
 0x3cb   :  { %3248 = vmatprep.subr.bf16.mxu0 %v9909_v1  ;;  %3289 = vmatprep.subr.bf16.mxu1 %v9915_v17 }
 0x3ce   :  { %3249 = vmatpush1.bf16.msra.mxu0 %v9921_v35  ;;  %3290 = vmatpush1.bf16.msra.mxu1 %v9927_v60 }
 0x3cf   :  { %3250 = vmatprep.subr.bf16.mxu0 %v9933_v44  ;;  %3291 = vmatprep.subr.bf16.mxu1 %v9939_v11 }
 0x3d2   :  { %3251 = vmatpush1.bf16.msra.mxu0 %v9945_v53  ;;  %3292 = vmatpush1.bf16.msra.mxu1 %v9951_v59 }
 0x3d3   :  { %3252 = vmatprep.subr.bf16.mxu0 %v9957_v43  ;;  %3293 = vmatprep.subr.bf16.mxu1 %v9963_v13 }
 0x3d6   :  { %3253 = vmatpush1.bf16.msra.mxu0 %v9969_v8  ;;  %3294 = vmatpush1.bf16.msra.mxu1 %v9975_v16 }
 0x3d7   :  { %3254 = vmatprep.subr.bf16.mxu0 %v9981_v37  ;;  %3295 = vmatprep.subr.bf16.mxu1 %v9987_v46 }
 0x3da   :  { %3255 = vmatpush1.bf16.msra.mxu0 %v9993_v41  ;;  %3296 = vmatpush1.bf16.msra.mxu1 %v9999_v48 }
 0x3db   :  { %3256 = vmatprep.subr.bf16.mxu0 %v10005_v6  ;;  %3297 = vmatprep.subr.bf16.mxu1 %v10011_v9 }
 0x3de   :  { %3257 = vmatpush1.bf16.msra.mxu0 %v10017_v39  ;;  %3298 = vmatpush1.bf16.msra.mxu1 %v10023_v50 }
 0x3df   :  { %3347 = vmatprep.subr.bf16.mxu0 %v10029_v40  ;;  %3388 = vmatprep.subr.bf16.mxu1 %v10035_v42 }
 0x474   :  { %v3066_v54 = vpop.f32.mrb[44].mxu0  ;;  %v3107_v61 = vpop.f32.mrb[52].mxu1 }
 0x475   :  { %v3114_v52 = vadd.f32 %v3066_v54, %v12339_v55  ;;  %v3116_v45 = vadd.f32 %v3107_v61, %v12340_v63  ;;  %v3068_v4 = vpop.f32.mrb[45].mxu0  ;;  %v3109_v49 = vpop.f32.mrb[53].mxu1 }
 0x476   :  { %v3115_v15 = vadd.f32 %v3068_v4, %v12341_v62  ;;  %v3117_v0 = vadd.f32 %v3109_v49, %v12342_v47  ;;  %v3070_v34 = vpop.f32.mrb[46].mxu0  ;;  %v3111_v2 = vpop.f32.mrb[54].mxu1  ;;  %v12344_v47 = vld [vmem:[#allocation109_spill] sm:$0xff] }
 0x477   :  { %v3118_v3 = vmul.f32 0.5, %v3114_v52  ;;  %v3071_v56 = vpop.f32.mrb[47].mxu0  ;;  %v3112_v25 = vpop.f32.mrb[55].mxu1  ;;  %v3120_v7 = vmul.f32 0.5, %v3116_v45  ;;  %v12343_v45 = vld [vmem:[#allocation98_spill] sm:$0xff] }
 0x478   :  { %v3119_v5 = vmul.f32 0.5, %v3115_v15  ;;  %v12346_v25 = vld [vmem:[#allocation110_spill] sm:$0xff] }
 0x479   :  { %7218 = vtanh.f32 %v3118_v3  ;;  %v12345_v3 = vld [vmem:[#allocation100_spill] sm:$0xff] }
 0x47a   :  { %7220 = vtanh.f32 %v3119_v5 }
 0x47b   :  { %7222 = vtanh.f32 %v3117_v0 }
 0x47c   :  { %7224 = vtanh.f32 %v3120_v7 }
 0x483   :  { %v7219_v22 = vpop.eup %7218 }
 0x484   :  { %v3124_v21 = vmul.f32 0.5, %v7219_v22  ;;  %v7221_v23 = vpop.eup %7220 }
 0x485   :  { %v3125_v28 = vmul.f32 0.5, %v7221_v23  ;;  %v7223_v19 = vpop.eup %7222 }
 0x486   :  { %v3127_v20 = vadd.f32 0.5, %v3124_v21  ;;  %v7225_v52 = vpop.eup %7224 }
 0x487   :  { %v3128_v54 = vadd.f32 0.5, %v3125_v28  ;;  %v3126_v4 = vmul.f32 0.5, %v7225_v52  ;;  %v10063_v52 = vld [vmem:[%s12208_s0 + $0x8] ss:$16 sps:$4 sm:$0xff]  }
 0x488   :  { %v3132_v61 = vmul.f32 %v7223_v19, %v3127_v20 }
 0x489   :  { %v3131_v55 = vmul.f32 %v3128_v54, %v9783_v57  ;;  %v3129_v22 = vadd.f32 0.5, %v3126_v4  ;;  %v10069_v4 = vld [vmem:[%s12208_s0 + $0x24] ss:$16 sps:$4 sm:$0xff]  }
 0x48b   :  { %v10043_v63 = vadd.f32 %v3132_v61, %v3131_v55  ;;  %v10057_v55 = vld [vmem:[%s12208_s0] ss:$16 sps:$4 sm:$0xff]  }
 0x48d   :  { %7226 = vtanh.f32 %v10043_v63 }
 0x494   :  { %v3171_v49 = vpop.f32.mrb[48].mxu0  ;;  %v3212_v62 = vpop.f32.mrb[56].mxu1 }
 0x495   :  { %v3219_v15 = vadd.f32 %v3171_v49, %v12343_v45  ;;  %v3221_v0 = vadd.f32 %v3212_v62, %v12344_v47  ;;  %v3173_v34 = vpop.f32.mrb[49].mxu0  ;;  %v3214_v2 = vpop.f32.mrb[57].mxu1  ;;  %v10075_v49 = vld [vmem:[%s12208_s0 + $0x2c] ss:$16 sps:$4 sm:$0xff]   ;;  %v10083_v45 = vld [vmem:[%s12208_s0 + $0x20] ss:$16 sps:$4 sm:$0xff]  }
 0x496   :  { %v3220_v56 = vadd.f32 %v3173_v34, %v12345_v3  ;;  %v3222_v5 = vadd.f32 %v3214_v2, %v12346_v25  ;;  %v3175_v7 = vpop.f32.mrb[50].mxu0  ;;  %v3216_v57 = vpop.f32.mrb[58].mxu1  ;;  %v10095_v34 = vld [vmem:[%s12208_s0 + $0x44] ss:$16 sps:$4 sm:$0xff]  }
 0x497   :  { %v3223_v21 = vmul.f32 0.5, %v3219_v15  ;;  %v3176_v23 = vpop.f32.mrb[51].mxu0  ;;  %v3217_v20 = vpop.f32.mrb[59].mxu1  ;;  %v3225_v62 = vmul.f32 0.5, %v3221_v0  ;;  %v10089_v15 = vld [vmem:[%s12208_s0 + $0x28] ss:$16 sps:$4 sm:$0xff]  }
 0x498   :  { %v7227_v28 = vpop.eup %7226  ;;  %v3224_v19 = vmul.f32 0.5, %v3220_v56  ;;  %v10101_v0 = vld [vmem:[%s12208_s0 + $0x4c] ss:$16 sps:$4 sm:$0xff]   ;;  %v10113_v7 = vld [vmem:[%s12208_s0 + $0x48] ss:$16 sps:$4 sm:$0xff]  }
 0x499   :  { %7228 = vtanh.f32 %v3223_v21  ;;  %v10050_v54 = vmul.f32 %v7227_v28, %v3129_v22  ;;  %v10119_v22 = vld [vmem:[%s12208_s0 + $0x64] ss:$16 sps:$4 sm:$0xff]   ;;  %v10125_v21 = vld [vmem:[%s12208_s0 + $0x6c] ss:$16 sps:$4 sm:$0xff]  }
 0x49a   :  { %7230 = vtanh.f32 %v3224_v19  ;;  %v10132_v19 = vld [vmem:[%s12208_s0 + $0x60] ss:$16 sps:$4 sm:$0xff]  }
 0x49b   :  { %v3241_v61 = vpack.c.bf16 %v10050_v54, %v10050_v54  ;;  %7232 = vtanh.f32 %v3222_v5  ;;  %v10107_v5 = vld [vmem:[%s12208_s0 + $0x40] ss:$16 sps:$4 sm:$0xff]  }
 0x49c   :  { %7234 = vtanh.f32 %v3225_v62  ;;  %v10144_v62 = vld [vmem:[%s12208_s0 + $0x84] ss:$16 sps:$4 sm:$0xff]  }
 0x49d   :  { %3275 = vmatmul.mubr.bf16.vlgmr.msra.gmra.mrb[52].mxu0 %v3241_v61  ;;  %3316 = vmatmul.mubr.bf16.vlgmr.msra.gmra.mrb[60].mxu1 %v3241_v61  ;;  %v10138_v61 = vld [vmem:[%s12208_s0 + $0x68] ss:$16 sps:$4 sm:$0xff]  }
 0x49e   :  { %3348 = vmatpush1.bf16.msra.mxu0 %v10057_v55  ;;  %3389 = vmatpush1.bf16.msra.mxu1 %v10063_v52 }
 0x49f   :  { %3349 = vmatprep.subr.bf16.mxu0 %v10069_v4  ;;  %3390 = vmatprep.subr.bf16.mxu1 %v10075_v49 }
 0x4a0   :  { %3379 = vmatprep.mubr.bf16.mxu0 %v12218_v24  ;;  %3420 = vmatprep.mubr.bf16.mxu1 %v12218_v24 }
 0x4a2   :  { %3350 = vmatpush1.bf16.msra.mxu0 %v10083_v45  ;;  %3391 = vmatpush1.bf16.msra.mxu1 %v10089_v15 }
 0x4a3   :  { %v7229_v47 = vpop.eup %7228  ;;  %3351 = vmatprep.subr.bf16.mxu0 %v10095_v34  ;;  %3392 = vmatprep.subr.bf16.mxu1 %v10101_v0 }
 0x4a4   :  { %v3229_v2 = vmul.f32 0.5, %v7229_v47  ;;  %v7231_v3 = vpop.eup %7230 }
 0x4a5   :  { %v3230_v25 = vmul.f32 0.5, %v7231_v3  ;;  %v7233_v57 = vpop.eup %7232  ;;  %v10165_v3 = vld [vmem:[%s12208_s0 + $0x88] ss:$16 sps:$4 sm:$0xff]  }
 0x4a6   :  { %v3232_v56 = vadd.f32 0.5, %v3229_v2  ;;  %3352 = vmatpush1.bf16.msra.mxu0 %v10107_v5  ;;  %3393 = vmatpush1.bf16.msra.mxu1 %v10113_v7  ;;  %v10159_v2 = vld [vmem:[%s12208_s0 + $0x80] ss:$16 sps:$4 sm:$0xff]  }
 0x4a7   :  { %3353 = vmatprep.subr.bf16.mxu0 %v10119_v22  ;;  %3394 = vmatprep.subr.bf16.mxu1 %v10125_v21  ;;  %v3233_v23 = vadd.f32 0.5, %v3230_v25  ;;  %v10177_v25 = vld [vmem:[%s12208_s0 + $0xac] ss:$16 sps:$4 sm:$0xff]  }
 0x4a8   :  { %v3237_v20 = vmul.f32 %v7233_v57, %v3232_v56  ;;  %v10171_v56 = vld [vmem:[%s12208_s0 + $0xa4] ss:$16 sps:$4 sm:$0xff]   ;;  %12347 = vst [vmem:[#allocation61_spill] sm:$0xff] %v10177_v25  ;;  %v7235_v57 = vpop.eup %7234 }
 0x4a9   :  { %v3236_v28 = vmul.f32 %v3233_v23, %v9812_v33  ;;  %v10150_v33 = vld [vmem:[%s12208_s0 + $0x8c] ss:$16 sps:$4 sm:$0xff]   ;;  %v10183_v23 = vld [vmem:[%s12208_s0 + $0xa0] ss:$16 sps:$4 sm:$0xff]  }
 0x4aa   :  { %3354 = vmatpush1.bf16.msra.mxu0 %v10132_v19  ;;  %3395 = vmatpush1.bf16.msra.mxu1 %v10138_v61  ;;  %12348 = vst [vmem:[#allocation67_spill] sm:$0xff] %v10183_v23 }
 0x4ab   :  { %3355 = vmatprep.subr.bf16.mxu0 %v10144_v62  ;;  %3396 = vmatprep.subr.bf16.mxu1 %v10150_v33  ;;  %v10153_v47 = vadd.f32 %v3237_v20, %v3236_v28  ;;  %v10189_v20 = vld [vmem:[%s12208_s0 + $0xa8] ss:$16 sps:$4 sm:$0xff]   ;;  %v3231_v28 = vmul.f32 0.5, %v7235_v57 }
 0x4ac   :  { %12349 = vst [vmem:[#allocation63_spill] sm:$0xff] %v10189_v20  ;;  %v10213_v57 = vld [vmem:[%s12208_s0 + $0xc8] ss:$16 sps:$4 sm:$0xff]  }
 0x4ad   :  { %7236 = vtanh.f32 %v10153_v47 }
 0x4ae   :  { %3356 = vmatpush1.bf16.msra.mxu0 %v10159_v2  ;;  %3397 = vmatpush1.bf16.msra.mxu1 %v10165_v3 }
 0x4af   :  { %3357 = vmatprep.subr.bf16.mxu0 %v10171_v56  ;;  %3398 = vmatprep.subr.bf16.mxu1 %v10177_v25 }
 0x4b2   :  { %3358 = vmatpush1.bf16.msra.mxu0 %v10183_v23  ;;  %3399 = vmatpush1.bf16.msra.mxu1 %v10189_v20  ;;  %v10207_v23 = vld [vmem:[%s12208_s0 + $0xc0] ss:$16 sps:$4 sm:$0xff]   ;;  %v10219_v20 = vld [vmem:[%s12208_s0 + $0xe4] ss:$16 sps:$4 sm:$0xff]  }
 0x4b3   :  { %3359 = vmatprep.subr.bf16.mxu0 %v10195_v29  ;;  %3400 = vmatprep.subr.bf16.mxu1 %v10201_v58  ;;  %12352 = vst [vmem:[#allocation103_spill] sm:$0xff] %v10207_v23  ;;  %v3234_v29 = vadd.f32 0.5, %v3231_v28  ;;  %12353 = vst [vmem:[#allocation112_spill] sm:$0xff] %v10219_v20  ;;  %v10225_v58 = vld [vmem:[%s12208_s0 + $0xec] ss:$16 sps:$4 sm:$0xff]  }
 0x4b4   :  { %12354 = vst [vmem:[#allocation64_spill] sm:$0xff] %v10225_v58  ;;  %v10233_v28 = vld [vmem:[%s12208_s0 + $0xe0] ss:$16 sps:$4 sm:$0xff]  }
 0x4b6   :  { %3360 = vmatpush1.bf16.msra.mxu0 %v10207_v23  ;;  %3401 = vmatpush1.bf16.msra.mxu1 %v10213_v57 }
 0x4b7   :  { %3361 = vmatprep.subr.bf16.mxu0 %v10219_v20  ;;  %3402 = vmatprep.subr.bf16.mxu1 %v10225_v58  ;;  %v7237_v23 = vpop.eup %7236  ;;  %v10239_v20 = vld [vmem:[%s12208_s0 + $0xe8] ss:$16 sps:$4 sm:$0xff]  }
 0x4b8   :  { %v10228_v25 = vmul.f32 %v7237_v23, %v3234_v29  ;;  %v12355_v23 = vld [vmem:[#allocation66_spill] sm:$0xff] }
 0x4ba   :  { %3362 = vmatpush1.bf16.msra.mxu0 %v10233_v28  ;;  %3403 = vmatpush1.bf16.msra.mxu1 %v10239_v20  ;;  %v3346_v58 = vpack.c.bf16 %v10228_v25, %v10228_v25 }
 0x4bb   :  { %3452 = vmatprep.subr.bf16.mxu0 %v9835_v27  ;;  %3493 = vmatprep.subr.bf16.mxu1 %v9841_v18 }
 0x4bd   :  { %3380 = vmatmul.mubr.bf16.vlgmr.msra.gmra.mrb[56].mxu0 %v3346_v58  ;;  %3421 = vmatmul.mubr.bf16.vlgmr.msra.gmra.mrb[64].mxu1 %v3346_v58 }
 0x4be   :  { %3453 = vmatpush1.bf16.msra.mxu0 %v9847_v26  ;;  %3494 = vmatpush1.bf16.msra.mxu1 %v9853_v30 }
 0x4bf   :  { %3454 = vmatprep.subr.bf16.mxu0 %v9859_v31  ;;  %3495 = vmatprep.subr.bf16.mxu1 %v9865_v32 }
 0x4c0   :  { %3484 = vmatprep.mubr.bf16.mxu0 %v12218_v24  ;;  %3525 = vmatprep.mubr.bf16.mxu1 %v12218_v24 }
 0x4c2   :  { %3455 = vmatpush1.bf16.msra.mxu0 %v9873_v36  ;;  %3496 = vmatpush1.bf16.msra.mxu1 %v9879_v51 }
 0x4c3   :  { %3456 = vmatprep.subr.bf16.mxu0 %v9885_v38  ;;  %3497 = vmatprep.subr.bf16.mxu1 %v9891_v10 }
 0x4c6   :  { %3457 = vmatpush1.bf16.msra.mxu0 %v9897_v12  ;;  %3498 = vmatpush1.bf16.msra.mxu1 %v9903_v14 }
 0x4c7   :  { %3458 = vmatprep.subr.bf16.mxu0 %v9909_v1  ;;  %3499 = vmatprep.subr.bf16.mxu1 %v9915_v17 }
 0x4ca   :  { %3459 = vmatpush1.bf16.msra.mxu0 %v9921_v35  ;;  %3500 = vmatpush1.bf16.msra.mxu1 %v9927_v60 }
 0x4cb   :  { %3460 = vmatprep.subr.bf16.mxu0 %v9933_v44  ;;  %3501 = vmatprep.subr.bf16.mxu1 %v9939_v11 }
 0x4ce   :  { %3461 = vmatpush1.bf16.msra.mxu0 %v9945_v53  ;;  %3502 = vmatpush1.bf16.msra.mxu1 %v9951_v59 }
 0x4cf   :  { %3462 = vmatprep.subr.bf16.mxu0 %v9957_v43  ;;  %3503 = vmatprep.subr.bf16.mxu1 %v9963_v13  ;;  %v12358_v13 = vld [vmem:[#allocation77_spill] sm:$0xff] }
 0x4d2   :  { %3463 = vmatpush1.bf16.msra.mxu0 %v9969_v8  ;;  %3504 = vmatpush1.bf16.msra.mxu1 %v9975_v16  ;;  %v12357_v8 = vld [vmem:[#allocation68_spill] sm:$0xff] }
 0x4d3   :  { %3464 = vmatprep.subr.bf16.mxu0 %v9981_v37  ;;  %3505 = vmatprep.subr.bf16.mxu1 %v9987_v46  ;;  %v12356_v37 = vld [vmem:[#allocation75_spill] sm:$0xff] }
 0x4d6   :  { %3465 = vmatpush1.bf16.msra.mxu0 %v9993_v41  ;;  %3506 = vmatpush1.bf16.msra.mxu1 %v9999_v48 }
 0x4d7   :  { %3466 = vmatprep.subr.bf16.mxu0 %v10005_v6  ;;  %3507 = vmatprep.subr.bf16.mxu1 %v10011_v9 }
 0x4da   :  { %3467 = vmatpush1.bf16.msra.mxu0 %v10017_v39  ;;  %3508 = vmatpush1.bf16.msra.mxu1 %v10023_v50 }
 0x4db   :  { %3557 = vmatprep.subr.bf16.mxu0 %v10029_v40  ;;  %3598 = vmatprep.subr.bf16.mxu1 %v10035_v42 }
 0x570   :  { %v3276_v58 = vpop.f32.mrb[52].mxu0  ;;  %v3317_v29 = vpop.f32.mrb[60].mxu1 }
 0x571   :  { %v3324_v46 = vadd.f32 %v3276_v58, %v12355_v23  ;;  %v3326_v41 = vadd.f32 %v3317_v29, %v12356_v37  ;;  %v3278_v16 = vpop.f32.mrb[53].mxu0  ;;  %v3319_v48 = vpop.f32.mrb[61].mxu1 }
 0x572   :  { %v3325_v6 = vadd.f32 %v3278_v16, %v12357_v8  ;;  %v3327_v9 = vadd.f32 %v3319_v48, %v12358_v13  ;;  %v3280_v43 = vpop.f32.mrb[54].mxu0  ;;  %v3321_v39 = vpop.f32.mrb[62].mxu1 }
 0x573   :  { %v3328_v59 = vmul.f32 0.5, %v3324_v46  ;;  %v3281_v50 = vpop.f32.mrb[55].mxu0  ;;  %v3322_v53 = vpop.f32.mrb[63].mxu1  ;;  %v3330_v42 = vmul.f32 0.5, %v3326_v41  ;;  %v12360_v41 = vld [vmem:[#allocation94_spill] sm:$0xff] }
 0x574   :  { %v3329_v40 = vmul.f32 0.5, %v3325_v6 }
 0x575   :  { %7238 = vtanh.f32 %v3328_v59 }
 0x576   :  { %7240 = vtanh.f32 %v3329_v40  ;;  %v12362_v40 = vld [vmem:[#allocation96_spill] sm:$0xff] }
 0x577   :  { %7242 = vtanh.f32 %v3327_v9 }
 0x578   :  { %7244 = vtanh.f32 %v3330_v42 }
 0x57f   :  { %v7239_v11 = vpop.eup %7238 }
 0x580   :  { %v3334_v58 = vmul.f32 0.5, %v7239_v11  ;;  %v7241_v23 = vpop.eup %7240  ;;  %v12361_v11 = vld [vmem:[#allocation107_spill] sm:$0xff] }
 0x581   :  { %v3335_v29 = vmul.f32 0.5, %v7241_v23  ;;  %v7243_v44 = vpop.eup %7242 }
 0x582   :  { %v3337_v37 = vadd.f32 0.5, %v3334_v58  ;;  %v7245_v53 = vpop.eup %7244  ;;  %v12363_v58 = vld [vmem:[#allocation108_spill] sm:$0xff] }
 0x583   :  { %v3338_v8 = vadd.f32 0.5, %v3335_v29  ;;  %v3336_v59 = vmul.f32 0.5, %v7245_v53 }
 0x584   :  { %v3342_v16 = vmul.f32 %v7243_v44, %v3337_v37 }
 0x585   :  { %v3341_v43 = vmul.f32 %v3338_v8, %v10043_v63  ;;  %v3339_v37 = vadd.f32 0.5, %v3336_v59 }
 0x587   :  { %v10285_v13 = vadd.f32 %v3342_v16, %v3341_v43 }
 0x589   :  { %12359 = vst [vmem:[#allocation71_spill] sm:$0xff] %v10285_v13  ;;  %7246 = vtanh.f32 %v10285_v13 }
 0x590   :  { %v3381_v46 = vpop.f32.mrb[56].mxu0  ;;  %v3422_v48 = vpop.f32.mrb[64].mxu1 }
 0x591   :  { %v3429_v6 = vadd.f32 %v3381_v46, %v12360_v41  ;;  %v3431_v9 = vadd.f32 %v3422_v48, %v12361_v11  ;;  %v3383_v39 = vpop.f32.mrb[57].mxu0  ;;  %v3424_v50 = vpop.f32.mrb[65].mxu1 }
 0x592   :  { %v3430_v42 = vadd.f32 %v3383_v39, %v12362_v40  ;;  %v3432_v44 = vadd.f32 %v3424_v50, %v12363_v58  ;;  %v3385_v23 = vpop.f32.mrb[58].mxu0  ;;  %v3426_v63 = vpop.f32.mrb[66].mxu1  ;;  %v12365_v58 = vld [vmem:[#allocation61_spill] sm:$0xff] }
 0x593   :  { %v3433_v29 = vmul.f32 0.5, %v3429_v6  ;;  %v3386_v8 = vpop.f32.mrb[59].mxu0  ;;  %v3427_v16 = vpop.f32.mrb[67].mxu1  ;;  %v3435_v59 = vmul.f32 0.5, %v3431_v9  ;;  %v12367_v23 = vld [vmem:[#allocation63_spill] sm:$0xff] }
 0x594   :  { %v7247_v43 = vpop.eup %7246  ;;  %v3434_v53 = vmul.f32 0.5, %v3430_v42  ;;  %v12370_v8 = vld [vmem:[#allocation103_spill] sm:$0xff] }
 0x595   :  { %7248 = vtanh.f32 %v3433_v29  ;;  %v3345_v13 = vmul.f32 %v7247_v43, %v3339_v37  ;;  %v12368_v37 = vld [vmem:[#allocation69_spill] sm:$0xff]  ;;  %v12369_v29 = vld [vmem:[#allocation111_spill] sm:$0xff]  ;;  %v12371_v43 = vld [vmem:[#allocation112_spill] sm:$0xff] }
 0x596   :  { %7250 = vtanh.f32 %v3434_v53  ;;  %v12372_v53 = vld [vmem:[#allocation64_spill] sm:$0xff] }
 0x597   :  { %v3451_v46 = vpack.c.bf16 %v3345_v13, %v3345_v13  ;;  %v10293_v48 = vpack.c.bf16 %v3345_v13, %v10050_v54  ;;  %7252 = vtanh.f32 %v3432_v44  ;;  %v12366_v44 = vld [vmem:[#allocation67_spill] sm:$0xff] }
 0x598   :  { %7254 = vtanh.f32 %v3435_v59 }
 0x599   :  { %12364 = vst [vmem:[#allocation65_spill] sm:$0xff] %v10293_v48  ;;  %3485 = vmatmul.mubr.bf16.vlgmr.msra.gmra.mrb[60].mxu0 %v3451_v46  ;;  %3526 = vmatmul.mubr.bf16.vlgmr.msra.gmra.mrb[68].mxu1 %v3451_v46  ;;  %v12389_v48 = vld [vmem:[#allocation52_spill] sm:$0xff] }
 0x59a   :  { %3558 = vmatpush1.bf16.msra.mxu0 %v10057_v55  ;;  %3599 = vmatpush1.bf16.msra.mxu1 %v10063_v52 }
 0x59b   :  { %3559 = vmatprep.subr.bf16.mxu0 %v10069_v4  ;;  %3600 = vmatprep.subr.bf16.mxu1 %v10075_v49 }
 0x59c   :  { %3589 = vmatprep.mubr.bf16.mxu0 %v12218_v24  ;;  %3630 = vmatprep.mubr.bf16.mxu1 %v12218_v24 }
 0x59e   :  { %3560 = vmatpush1.bf16.msra.mxu0 %v10083_v45  ;;  %3601 = vmatpush1.bf16.msra.mxu1 %v10089_v15 }
 0x59f   :  { %v7249_v54 = vpop.eup %7248  ;;  %3561 = vmatprep.subr.bf16.mxu0 %v10095_v34  ;;  %3602 = vmatprep.subr.bf16.mxu1 %v10101_v0 }
 0x5a0   :  { %v3439_v13 = vmul.f32 0.5, %v7249_v54  ;;  %v7251_v41 = vpop.eup %7250 }
 0x5a1   :  { %v3440_v11 = vmul.f32 0.5, %v7251_v41  ;;  %v7253_v39 = vpop.eup %7252  ;;  %v12375_v41 = vld [vmem:[#allocation44_spill] sm:$0xff] }
 0x5a2   :  { %v3442_v6 = vadd.f32 0.5, %v3439_v13  ;;  %3562 = vmatpush1.bf16.msra.mxu0 %v10107_v5  ;;  %3603 = vmatpush1.bf16.msra.mxu1 %v10113_v7 }
 0x5a3   :  { %3563 = vmatprep.subr.bf16.mxu0 %v10119_v22  ;;  %3604 = vmatprep.subr.bf16.mxu1 %v10125_v21  ;;  %v3443_v9 = vadd.f32 0.5, %v3440_v11  ;;  %v12377_v11 = vld [vmem:[#allocation46_spill] sm:$0xff] }
 0x5a4   :  { %v3447_v50 = vmul.f32 %v7253_v39, %v3442_v6  ;;  %v12376_v6 = vld [vmem:[#allocation33_spill] sm:$0xff]  ;;  %v12378_v39 = vld [vmem:[#allocation34_spill] sm:$0xff] }
 0x5a5   :  { %v3446_v40 = vmul.f32 %v3443_v9, %v10153_v47  ;;  %v7255_v47 = vpop.eup %7254  ;;  %v12379_v9 = vld [vmem:[#allocation47_spill] sm:$0xff] }
 0x5a6   :  { %3564 = vmatpush1.bf16.msra.mxu0 %v10132_v19  ;;  %3605 = vmatpush1.bf16.msra.mxu1 %v10138_v61  ;;  %v3441_v63 = vmul.f32 0.5, %v7255_v47  ;;  %v12382_v47 = vld [vmem:[#allocation36_spill] sm:$0xff] }
 0x5a7   :  { %3565 = vmatprep.subr.bf16.mxu0 %v10144_v62  ;;  %3606 = vmatprep.subr.bf16.mxu1 %v10150_v33  ;;  %v10314_v42 = vadd.f32 %v3447_v50, %v3446_v40  ;;  %v12380_v50 = vld [vmem:[#allocation35_spill] sm:$0xff]  ;;  %v12381_v40 = vld [vmem:[#allocation48_spill] sm:$0xff] }
 0x5a8   :  { %v3444_v16 = vadd.f32 0.5, %v3441_v63  ;;  %v12383_v63 = vld [vmem:[#allocation49_spill] sm:$0xff] }
 0x5a9   :  { %7256 = vtanh.f32 %v10314_v42 }
 0x5aa   :  { %3566 = vmatpush1.bf16.msra.mxu0 %v10159_v2  ;;  %3607 = vmatpush1.bf16.msra.mxu1 %v10165_v3 }
 0x5ab   :  { %3567 = vmatprep.subr.bf16.mxu0 %v10171_v56  ;;  %3608 = vmatprep.subr.bf16.mxu1 %v12365_v58 }
 0x5ae   :  { %3568 = vmatpush1.bf16.msra.mxu0 %v12366_v44  ;;  %3609 = vmatpush1.bf16.msra.mxu1 %v12367_v23 }
 0x5af   :  { %3569 = vmatprep.subr.bf16.mxu0 %v12368_v37  ;;  %3610 = vmatprep.subr.bf16.mxu1 %v12369_v29 }
 0x5b2   :  { %3570 = vmatpush1.bf16.msra.mxu0 %v12370_v8  ;;  %3611 = vmatpush1.bf16.msra.mxu1 %v10213_v57 }
 0x5b3   :  { %3571 = vmatprep.subr.bf16.mxu0 %v12371_v43  ;;  %3612 = vmatprep.subr.bf16.mxu1 %v12372_v53  ;;  %v7257_v46 = vpop.eup %7256 }
 0x5b4   :  { %v3450_v59 = vmul.f32 %v7257_v46, %v3444_v16  ;;  %v12384_v16 = vld [vmem:[#allocation38_spill] sm:$0xff] }
 0x5b5   :  { %v12385_v46 = vld [vmem:[#allocation50_spill] sm:$0xff] }
 0x5b6   :  { %3572 = vmatpush1.bf16.msra.mxu0 %v10233_v28  ;;  %3613 = vmatpush1.bf16.msra.mxu1 %v10239_v20  ;;  %v3556_v54 = vpack.c.bf16 %v3450_v59, %v3450_v59  ;;  %v10332_v13 = vpack.c.bf16 %v10228_v25, %v3450_v59  ;;  %v12374_v25 = vld [vmem:[#allocation32_spill] sm:$0xff] }
 0x5b7   :  { %3662 = vmatprep.subr.bf16.mxu0 %v9835_v27  ;;  %3703 = vmatprep.subr.bf16.mxu1 %v9841_v18  ;;  %v12386_v59 = vld [vmem:[#allocation40_spill] sm:$0xff] }
 0x5b8   :  { %12373 = vst [vmem:[#allocation73_spill] sm:$0xff] %v10332_v13  ;;  %v12388_v13 = vld [vmem:[#allocation42_spill] sm:$0xff] }
 0x5b9   :  { %3590 = vmatmul.mubr.bf16.vlgmr.msra.gmra.mrb[64].mxu0 %v3556_v54  ;;  %3631 = vmatmul.mubr.bf16.vlgmr.msra.gmra.mrb[72].mxu1 %v3556_v54  ;;  %v12387_v54 = vld [vmem:[#allocation51_spill] sm:$0xff] }
 0x5ba   :  { %3663 = vmatpush1.bf16.msra.mxu0 %v9847_v26  ;;  %3704 = vmatpush1.bf16.msra.mxu1 %v9853_v30 }
 0x5bb   :  { %3664 = vmatprep.subr.bf16.mxu0 %v9859_v31  ;;  %3705 = vmatprep.subr.bf16.mxu1 %v9865_v32 }
 0x5bc   :  { %3694 = vmatprep.mubr.bf16.mxu0 %v12218_v24  ;;  %3735 = vmatprep.mubr.bf16.mxu1 %v12218_v24 }
 0x5be   :  { %3665 = vmatpush1.bf16.msra.mxu0 %v9873_v36  ;;  %3706 = vmatpush1.bf16.msra.mxu1 %v9879_v51 }
 0x5bf   :  { %3666 = vmatprep.subr.bf16.mxu0 %v9885_v38  ;;  %3707 = vmatprep.subr.bf16.mxu1 %v9891_v10 }
 0x5c2   :  { %3667 = vmatpush1.bf16.msra.mxu0 %v9897_v12  ;;  %3708 = vmatpush1.bf16.msra.mxu1 %v9903_v14 }
 0x5c3   :  { %3668 = vmatprep.subr.bf16.mxu0 %v9909_v1  ;;  %3709 = vmatprep.subr.bf16.mxu1 %v9915_v17 }
 0x5c6   :  { %3669 = vmatpush1.bf16.msra.mxu0 %v9921_v35  ;;  %3710 = vmatpush1.bf16.msra.mxu1 %v9927_v60 }
 0x5c7   :  { %3670 = vmatprep.subr.bf16.mxu0 %v12374_v25  ;;  %3711 = vmatprep.subr.bf16.mxu1 %v12375_v41  ;;  %v12394_v41 = vld [vmem:[#allocation72_spill] sm:$0xff] }
 0x5c8   :  { %v12395_v25 = vld [vmem:[#allocation80_spill] sm:$0xff] }
 0x5ca   :  { %3671 = vmatpush1.bf16.msra.mxu0 %v12376_v6  ;;  %3712 = vmatpush1.bf16.msra.mxu1 %v12377_v11  ;;  %v12393_v11 = vld [vmem:[#allocation78_spill] sm:$0xff] }
 0x5cb   :  { %3672 = vmatprep.subr.bf16.mxu0 %v12378_v39  ;;  %3713 = vmatprep.subr.bf16.mxu1 %v12379_v9  ;;  %v12390_v9 = vld [vmem:[#allocation45_spill] sm:$0xff]  ;;  %v12392_v39 = vld [vmem:[#allocation70_spill] sm:$0xff] }
 0x5ce   :  { %3673 = vmatpush1.bf16.msra.mxu0 %v12380_v50  ;;  %3714 = vmatpush1.bf16.msra.mxu1 %v12381_v40  ;;  %v12391_v50 = vld [vmem:[#allocation53_spill] sm:$0xff] }
 0x5cf   :  { %3674 = vmatprep.subr.bf16.mxu0 %v12382_v47  ;;  %3715 = vmatprep.subr.bf16.mxu1 %v12383_v63 }
 0x5d2   :  { %3675 = vmatpush1.bf16.msra.mxu0 %v12384_v16  ;;  %3716 = vmatpush1.bf16.msra.mxu1 %v12385_v46 }
 0x5d3   :  { %3676 = vmatprep.subr.bf16.mxu0 %v12386_v59  ;;  %3717 = vmatprep.subr.bf16.mxu1 %v12387_v54 }
 0x5d6   :  { %3677 = vmatpush1.bf16.msra.mxu0 %v12388_v13  ;;  %3718 = vmatpush1.bf16.msra.mxu1 %v12389_v48 }
 0x5d7   :  { %3767 = vmatprep.subr.bf16.mxu0 %v12390_v9  ;;  %3808 = vmatprep.subr.bf16.mxu1 %v12391_v50 }
 0x66c   :  { %v3486_v40 = vpop.f32.mrb[60].mxu0  ;;  %v3527_v47 = vpop.f32.mrb[68].mxu1 }
 0x66d   :  { %v3534_v63 = vadd.f32 %v3486_v40, %v12392_v39  ;;  %v3536_v16 = vadd.f32 %v3527_v47, %v12393_v11  ;;  %v3488_v6 = vpop.f32.mrb[61].mxu0  ;;  %v3529_v46 = vpop.f32.mrb[69].mxu1 }
 0x66e   :  { %v3535_v59 = vadd.f32 %v3488_v6, %v12394_v41  ;;  %v3537_v54 = vadd.f32 %v3529_v46, %v12395_v25  ;;  %v3490_v60 = vpop.f32.mrb[62].mxu0  ;;  %v3531_v13 = vpop.f32.mrb[70].mxu1  ;;  %v12396_v25 = vld [vmem:[#allocation71_spill] sm:$0xff] }
 0x66f   :  { %v3538_v35 = vmul.f32 0.5, %v3534_v63  ;;  %v3491_v48 = vpop.f32.mrb[63].mxu0  ;;  %v3532_v17 = vpop.f32.mrb[71].mxu1  ;;  %v3540_v50 = vmul.f32 0.5, %v3536_v16  ;;  %v12398_v63 = vld [vmem:[#allocation91_spill] sm:$0xff] }
 0x670   :  { %v3539_v9 = vmul.f32 0.5, %v3535_v59 }
 0x671   :  { %7258 = vtanh.f32 %v3538_v35 }
 0x672   :  { %7260 = vtanh.f32 %v3539_v9 }
 0x673   :  { %7262 = vtanh.f32 %v3537_v54  ;;  %v12400_v54 = vld [vmem:[#allocation93_spill] sm:$0xff] }
 0x674   :  { %7264 = vtanh.f32 %v3540_v50 }
 0x67b   :  { %v7259_v1 = vpop.eup %7258 }
 0x67c   :  { %v3544_v39 = vmul.f32 0.5, %v7259_v1  ;;  %v7261_v40 = vpop.eup %7260  ;;  %v12399_v1 = vld [vmem:[#allocation105_spill] sm:$0xff] }
 0x67d   :  { %v3545_v47 = vmul.f32 0.5, %v7261_v40  ;;  %v7263_v14 = vpop.eup %7262  ;;  %v12401_v40 = vld [vmem:[#allocation106_spill] sm:$0xff] }
 0x67e   :  { %v3547_v11 = vadd.f32 0.5, %v3544_v39  ;;  %v7265_v17 = vpop.eup %7264 }
 0x67f   :  { %v3548_v41 = vadd.f32 0.5, %v3545_v47  ;;  %v3546_v35 = vmul.f32 0.5, %v7265_v17 }
 0x680   :  { %v3552_v6 = vmul.f32 %v7263_v14, %v3547_v11 }
 0x681   :  { %v3551_v60 = vmul.f32 %v3548_v41, %v12396_v25  ;;  %v3549_v41 = vadd.f32 0.5, %v3546_v35 }
 0x683   :  { %v10375_v13 = vadd.f32 %v3552_v6, %v3551_v60 }
 0x685   :  { %12397 = vst [vmem:[#allocation98_spill] sm:$0xff] %v10375_v13  ;;  %7266 = vtanh.f32 %v10375_v13 }
 0x68c   :  { %v3591_v48 = vpop.f32.mrb[64].mxu0  ;;  %v3632_v9 = vpop.f32.mrb[72].mxu1 }
 0x68d   :  { %v3639_v16 = vadd.f32 %v3591_v48, %v12398_v63  ;;  %v3641_v46 = vadd.f32 %v3632_v9, %v12399_v1  ;;  %v3593_v59 = vpop.f32.mrb[65].mxu0  ;;  %v3634_v50 = vpop.f32.mrb[73].mxu1 }
 0x68e   :  { %v3640_v39 = vadd.f32 %v3593_v59, %v12400_v54  ;;  %v3642_v14 = vadd.f32 %v3634_v50, %v12401_v40  ;;  %v3595_v11 = vpop.f32.mrb[66].mxu0  ;;  %v3636_v47 = vpop.f32.mrb[74].mxu1 }
 0x68f   :  { %v3643_v6 = vmul.f32 0.5, %v3639_v16  ;;  %v3596_v25 = vpop.f32.mrb[67].mxu0  ;;  %v3637_v60 = vpop.f32.mrb[75].mxu1 }
 0x690   :  { %v7267_v13 = vpop.eup %7266  ;;  %v3644_v17 = vmul.f32 0.5, %v3640_v39  ;;  %v12413_v25 = vld [vmem:[#allocation47_spill] sm:$0xff] }
 0x691   :  { %7268 = vtanh.f32 %v3643_v6  ;;  %v10382_v12 = vmul.f32 %v7267_v13, %v3549_v41  ;;  %v3645_v13 = vmul.f32 0.5, %v3641_v46  ;;  %v12408_v6 = vld [vmem:[#allocation32_spill] sm:$0xff]  ;;  %v12414_v60 = vld [vmem:[#allocation35_spill] sm:$0xff] }
 0x692   :  { %7270 = vtanh.f32 %v3644_v17  ;;  %v12415_v17 = vld [vmem:[#allocation48_spill] sm:$0xff] }
 0x693   :  { %v3661_v48 = vpack.c.bf16 %v10382_v12, %v10382_v12  ;;  %7272 = vtanh.f32 %v3642_v14 }
 0x694   :  { %7274 = vtanh.f32 %v3645_v13  ;;  %v12417_v13 = vld [vmem:[#allocation49_spill] sm:$0xff] }
 0x695   :  { %3695 = vmatmul.mubr.bf16.vlgmr.msra.gmra.mrb[68].mxu0 %v3661_v48  ;;  %3736 = vmatmul.mubr.bf16.vlgmr.msra.gmra.mrb[76].mxu1 %v3661_v48  ;;  %v12416_v48 = vld [vmem:[#allocation36_spill] sm:$0xff] }
 0x696   :  { %3768 = vmatpush1.bf16.msra.mxu0 %v10057_v55  ;;  %3809 = vmatpush1.bf16.msra.mxu1 %v10063_v52 }
 0x697   :  { %3769 = vmatprep.subr.bf16.mxu0 %v10069_v4  ;;  %3810 = vmatprep.subr.bf16.mxu1 %v10075_v49 }
 0x698   :  { %3799 = vmatprep.mubr.bf16.mxu0 %v12218_v24  ;;  %3840 = vmatprep.mubr.bf16.mxu1 %v12218_v24 }
 0x69a   :  { %3770 = vmatpush1.bf16.msra.mxu0 %v10083_v45  ;;  %3811 = vmatpush1.bf16.msra.mxu1 %v10089_v15 }
 0x69b   :  { %v7269_v35 = vpop.eup %7268  ;;  %3771 = vmatprep.subr.bf16.mxu0 %v10095_v34  ;;  %3812 = vmatprep.subr.bf16.mxu1 %v10101_v0 }
 0x69c   :  { %v3649_v9 = vmul.f32 0.5, %v7269_v35  ;;  %v7271_v63 = vpop.eup %7270  ;;  %v12418_v35 = vld [vmem:[#allocation38_spill] sm:$0xff] }
 0x69d   :  { %v3650_v1 = vmul.f32 0.5, %v7271_v63  ;;  %v7273_v59 = vpop.eup %7272  ;;  %v12420_v63 = vld [vmem:[#allocation40_spill] sm:$0xff] }
 0x69e   :  { %v3652_v16 = vadd.f32 0.5, %v3649_v9  ;;  %3772 = vmatpush1.bf16.msra.mxu0 %v10107_v5  ;;  %3813 = vmatpush1.bf16.msra.mxu1 %v10113_v7  ;;  %v12419_v9 = vld [vmem:[#allocation50_spill] sm:$0xff] }
 0x69f   :  { %3773 = vmatprep.subr.bf16.mxu0 %v10119_v22  ;;  %3814 = vmatprep.subr.bf16.mxu1 %v10125_v21  ;;  %v3653_v46 = vadd.f32 0.5, %v3650_v1  ;;  %v12422_v1 = vld [vmem:[#allocation42_spill] sm:$0xff] }
 0x6a0   :  { %v3657_v50 = vmul.f32 %v7273_v59, %v3652_v16  ;;  %v12421_v16 = vld [vmem:[#allocation51_spill] sm:$0xff]  ;;  %v12423_v59 = vld [vmem:[#allocation52_spill] sm:$0xff] }
 0x6a1   :  { %v3656_v54 = vmul.f32 %v3653_v46, %v10314_v42  ;;  %v7275_v42 = vpop.eup %7274  ;;  %v12424_v46 = vld [vmem:[#allocation45_spill] sm:$0xff] }
 0x6a2   :  { %3774 = vmatpush1.bf16.msra.mxu0 %v10132_v19  ;;  %3815 = vmatpush1.bf16.msra.mxu1 %v10138_v61  ;;  %v3651_v40 = vmul.f32 0.5, %v7275_v42 }
 0x6a3   :  { %3775 = vmatprep.subr.bf16.mxu0 %v10144_v62  ;;  %3816 = vmatprep.subr.bf16.mxu1 %v10150_v33  ;;  %v10405_v39 = vadd.f32 %v3657_v50, %v3656_v54  ;;  %v12425_v50 = vld [vmem:[#allocation53_spill] sm:$0xff] }
 0x6a4   :  { %v3654_v14 = vadd.f32 0.5, %v3651_v40  ;;  %v12426_v40 = vld [vmem:[#allocation74_spill] sm:$0xff] }
 0x6a5   :  { %7276 = vtanh.f32 %v10405_v39 }
 0x6a6   :  { %3776 = vmatpush1.bf16.msra.mxu0 %v10159_v2  ;;  %3817 = vmatpush1.bf16.msra.mxu1 %v10165_v3 }
 0x6a7   :  { %3777 = vmatprep.subr.bf16.mxu0 %v10171_v56  ;;  %3818 = vmatprep.subr.bf16.mxu1 %v12365_v58 }
 0x6aa   :  { %3778 = vmatpush1.bf16.msra.mxu0 %v12366_v44  ;;  %3819 = vmatpush1.bf16.msra.mxu1 %v12367_v23 }
 0x6ab   :  { %3779 = vmatprep.subr.bf16.mxu0 %v12368_v37  ;;  %3820 = vmatprep.subr.bf16.mxu1 %v12369_v29 }
 0x6ae   :  { %3780 = vmatpush1.bf16.msra.mxu0 %v12370_v8  ;;  %3821 = vmatpush1.bf16.msra.mxu1 %v10213_v57 }
 0x6af   :  { %3781 = vmatprep.subr.bf16.mxu0 %v12371_v43  ;;  %3822 = vmatprep.subr.bf16.mxu1 %v12372_v53  ;;  %v7277_v11 = vpop.eup %7276 }
 0x6b0   :  { %v10420_v47 = vmul.f32 %v7277_v11, %v3654_v14  ;;  %v12427_v11 = vld [vmem:[#allocation82_spill] sm:$0xff] }
 0x6b2   :  { %3782 = vmatpush1.bf16.msra.mxu0 %v10233_v28  ;;  %3823 = vmatpush1.bf16.msra.mxu1 %v10239_v20  ;;  %v3766_v41 = vpack.c.bf16 %v10420_v47, %v10420_v47 }
 0x6b3   :  { %3872 = vmatprep.subr.bf16.mxu0 %v9835_v27  ;;  %3913 = vmatprep.subr.bf16.mxu1 %v9841_v18  ;;  %v12402_v27 = vld [vmem:[#allocation29_spill] sm:$0xff]  ;;  %v12403_v18 = vld [vmem:[#allocation39_spill] sm:$0xff] }
 0x6b5   :  { %3800 = vmatmul.mubr.bf16.vlgmr.msra.gmra.mrb[72].mxu0 %v3766_v41  ;;  %3841 = vmatmul.mubr.bf16.vlgmr.msra.gmra.mrb[80].mxu1 %v3766_v41 }
 0x6b6   :  { %3873 = vmatpush1.bf16.msra.mxu0 %v9847_v26  ;;  %3914 = vmatpush1.bf16.msra.mxu1 %v9853_v30  ;;  %v12404_v26 = vld [vmem:[#allocation30_spill] sm:$0xff]  ;;  %v12405_v30 = vld [vmem:[#allocation41_spill] sm:$0xff] }
 0x6b7   :  { %3874 = vmatprep.subr.bf16.mxu0 %v9859_v31  ;;  %3915 = vmatprep.subr.bf16.mxu1 %v9865_v32  ;;  %v12406_v31 = vld [vmem:[#allocation31_spill] sm:$0xff] }
 0x6b8   :  { %3904 = vmatprep.mubr.bf16.mxu0 %v12218_v24  ;;  %3945 = vmatprep.mubr.bf16.mxu1 %v12218_v24  ;;  %v12407_v32 = vld [vmem:[#allocation43_spill] sm:$0xff] }
 0x6ba   :  { %3875 = vmatpush1.bf16.msra.mxu0 %v9873_v36  ;;  %3916 = vmatpush1.bf16.msra.mxu1 %v9879_v51  ;;  %v12409_v36 = vld [vmem:[#allocation44_spill] sm:$0xff]  ;;  %v12410_v51 = vld [vmem:[#allocation33_spill] sm:$0xff] }
 0x6bb   :  { %3876 = vmatprep.subr.bf16.mxu0 %v9885_v38  ;;  %3917 = vmatprep.subr.bf16.mxu1 %v9891_v10  ;;  %v12411_v38 = vld [vmem:[#allocation46_spill] sm:$0xff] }
 0x6bc   :  { %v12412_v10 = vld [vmem:[#allocation34_spill] sm:$0xff] }
 0x6be   :  { %3877 = vmatpush1.bf16.msra.mxu0 %v12402_v27  ;;  %3918 = vmatpush1.bf16.msra.mxu1 %v12403_v18 }
 0x6bf   :  { %3878 = vmatprep.subr.bf16.mxu0 %v12404_v26  ;;  %3919 = vmatprep.subr.bf16.mxu1 %v12405_v30  ;;  %v12428_v26 = vld [vmem:[#allocation76_spill] sm:$0xff] }
 0x6c2   :  { %3879 = vmatpush1.bf16.msra.mxu0 %v12406_v31  ;;  %3920 = vmatpush1.bf16.msra.mxu1 %v12407_v32  ;;  %v12429_v31 = vld [vmem:[#allocation84_spill] sm:$0xff] }
 0x6c3   :  { %3880 = vmatprep.subr.bf16.mxu0 %v12408_v6  ;;  %3921 = vmatprep.subr.bf16.mxu1 %v12409_v36 }
 0x6c6   :  { %3881 = vmatpush1.bf16.msra.mxu0 %v12410_v51  ;;  %3922 = vmatpush1.bf16.msra.mxu1 %v12411_v38 }
 0x6c7   :  { %3882 = vmatprep.subr.bf16.mxu0 %v12412_v10  ;;  %3923 = vmatprep.subr.bf16.mxu1 %v12413_v25 }
 0x6ca   :  { %3883 = vmatpush1.bf16.msra.mxu0 %v12414_v60  ;;  %3924 = vmatpush1.bf16.msra.mxu1 %v12415_v17 }
 0x6cb   :  { %3884 = vmatprep.subr.bf16.mxu0 %v12416_v48  ;;  %3925 = vmatprep.subr.bf16.mxu1 %v12417_v13 }
 0x6ce   :  { %3885 = vmatpush1.bf16.msra.mxu0 %v12418_v35  ;;  %3926 = vmatpush1.bf16.msra.mxu1 %v12419_v9 }
 0x6cf   :  { %3886 = vmatprep.subr.bf16.mxu0 %v12420_v63  ;;  %3927 = vmatprep.subr.bf16.mxu1 %v12421_v16 }
 0x6d2   :  { %3887 = vmatpush1.bf16.msra.mxu0 %v12422_v1  ;;  %3928 = vmatpush1.bf16.msra.mxu1 %v12423_v59  ;;  %v12430_v59 = vld [vmem:[#allocation98_spill] sm:$0xff] }
 0x6d3   :  { %3977 = vmatprep.subr.bf16.mxu0 %v12424_v46  ;;  %4018 = vmatprep.subr.bf16.mxu1 %v12425_v50 }
 0x768   :  { %v3696_v54 = vpop.f32.mrb[68].mxu0  ;;  %v3737_v42 = vpop.f32.mrb[76].mxu1 }
 0x769   :  { %v3744_v14 = vadd.f32 %v3696_v54, %v12426_v40  ;;  %v3746_v41 = vadd.f32 %v3737_v42, %v12427_v11  ;;  %v3698_v27 = vpop.f32.mrb[69].mxu0  ;;  %v3739_v18 = vpop.f32.mrb[77].mxu1  ;;  %v12431_v11 = vld [vmem:[#allocation87_spill] sm:$0xff] }
 0x76a   :  { %v3745_v30 = vadd.f32 %v3698_v27, %v12428_v26  ;;  %v3747_v32 = vadd.f32 %v3739_v18, %v12429_v31  ;;  %v3700_v6 = vpop.f32.mrb[70].mxu0  ;;  %v3741_v36 = vpop.f32.mrb[78].mxu1  ;;  %v12432_v27 = vld [vmem:[#allocation102_spill] sm:$0xff]  ;;  %v12433_v31 = vld [vmem:[#allocation89_spill] sm:$0xff] }
 0x76b   :  { %v3748_v51 = vmul.f32 0.5, %v3744_v14  ;;  %v3701_v38 = vpop.f32.mrb[71].mxu0  ;;  %v3742_v10 = vpop.f32.mrb[79].mxu1  ;;  %v3750_v60 = vmul.f32 0.5, %v3746_v41  ;;  %v12434_v6 = vld [vmem:[#allocation104_spill] sm:$0xff] }
 0x76c   :  { %v3749_v25 = vmul.f32 0.5, %v3745_v30 }
 0x76d   :  { %7278 = vtanh.f32 %v3748_v51 }
 0x76e   :  { %7280 = vtanh.f32 %v3749_v25 }
 0x76f   :  { %7282 = vtanh.f32 %v3747_v32 }
 0x770   :  { %7284 = vtanh.f32 %v3750_v60 }
 0x777   :  { %v7279_v17 = vpop.eup %7278 }
 0x778   :  { %v3754_v48 = vmul.f32 0.5, %v7279_v17  ;;  %v7281_v13 = vpop.eup %7280 }
 0x779   :  { %v3755_v9 = vmul.f32 0.5, %v7281_v13  ;;  %v7283_v63 = vpop.eup %7282 }
 0x77a   :  { %v3757_v35 = vadd.f32 0.5, %v3754_v48  ;;  %v7285_v54 = vpop.eup %7284 }
 0x77b   :  { %v3758_v16 = vadd.f32 0.5, %v3755_v9  ;;  %v3756_v42 = vmul.f32 0.5, %v7285_v54  ;;  %v7421_v54 = vld [vmem:[%s12190_s4 + $0x88] ss:$16 sps:$4 sm:$0xff]  }
 0x77c   :  { %v3762_v1 = vmul.f32 %v7283_v63, %v3757_v35 }
 0x77d   :  { %v3761_v46 = vmul.f32 %v3758_v16, %v12430_v59  ;;  %v3759_v10 = vadd.f32 0.5, %v3756_v42  ;;  %v7419_v59 = vld [vmem:[%s12190_s4 + $0x8c] ss:$16 sps:$4 sm:$0xff]   ;;  %v7422_v42 = vld [vmem:[%s12190_s4 + $0xa4] ss:$16 sps:$4 sm:$0xff]  }
 0x77f   :  { %v10467_v50 = vadd.f32 %v3762_v1, %v3761_v46  ;;  %v7420_v46 = vld [vmem:[%s12190_s4 + $0x80] ss:$16 sps:$4 sm:$0xff]  }
 0x781   :  { %7286 = vtanh.f32 %v10467_v50 }
 0x788   :  { %v3801_v40 = vpop.f32.mrb[72].mxu0  ;;  %v3842_v14 = vpop.f32.mrb[80].mxu1 }
 0x789   :  { %v3849_v41 = vadd.f32 %v3801_v40, %v12431_v11  ;;  %v3851_v18 = vadd.f32 %v3842_v14, %v12432_v27  ;;  %v3803_v26 = vpop.f32.mrb[73].mxu0  ;;  %v3844_v30 = vpop.f32.mrb[81].mxu1  ;;  %v7423_v40 = vld [vmem:[%s12190_s4 + $0xac] ss:$16 sps:$4 sm:$0xff]   ;;  %v7424_v14 = vld [vmem:[%s12190_s4 + $0xa0] ss:$16 sps:$4 sm:$0xff]  }
 0x78a   :  { %v3850_v32 = vadd.f32 %v3803_v26, %v12433_v31  ;;  %v3852_v36 = vadd.f32 %v3844_v30, %v12434_v6  ;;  %v3805_v51 = vpop.f32.mrb[74].mxu0  ;;  %v3846_v38 = vpop.f32.mrb[82].mxu1  ;;  %v7425_v11 = vld [vmem:[%s12190_s4 + $0xa8] ss:$16 sps:$4 sm:$0xff]   ;;  %v7427_v27 = vld [vmem:[%s12190_s4 + $0xcc] ss:$16 sps:$4 sm:$0xff]  }
 0x78b   :  { %v3853_v25 = vmul.f32 0.5, %v3849_v41  ;;  %v3806_v60 = vpop.f32.mrb[75].mxu0  ;;  %v3847_v17 = vpop.f32.mrb[83].mxu1  ;;  %v3855_v16 = vmul.f32 0.5, %v3851_v18  ;;  %v7426_v41 = vld [vmem:[%s12190_s4 + $0xc4] ss:$16 sps:$4 sm:$0xff]  }
 0x78c   :  { %v7287_v48 = vpop.eup %7286  ;;  %v3854_v13 = vmul.f32 0.5, %v3850_v32  ;;  %v7428_v18 = vld [vmem:[%s12190_s4 + $0xc0] ss:$16 sps:$4 sm:$0xff]   ;;  %v7429_v26 = vld [vmem:[%s12190_s4 + $0xc8] ss:$16 sps:$4 sm:$0xff]  }
 0x78d   :  { %7288 = vtanh.f32 %v3853_v25  ;;  %v3765_v35 = vmul.f32 %v7287_v48, %v3759_v10  ;;  %v7430_v30 = vld [vmem:[%s12190_s4 + $0xe4] ss:$16 sps:$4 sm:$0xff]   ;;  %v7431_v31 = vld [vmem:[%s12190_s4 + $0xec] ss:$16 sps:$4 sm:$0xff]   ;;  %v7432_v32 = vld [vmem:[%s12190_s4 + $0xe0] ss:$16 sps:$4 sm:$0xff]  }
 0x78e   :  { %7290 = vtanh.f32 %v3854_v13  ;;  %v7433_v6 = vld [vmem:[%s12190_s4 + $0xe8] ss:$16 sps:$4 sm:$0xff]   ;;  %v7435_v51 = vld [vmem:[%s12208_s0 + $0xc] ss:$16 sps:$4 sm:$0xff]   ;;  %v12435_v25 = vld [vmem:[#allocation56_spill] sm:$0xff] }
 0x78f   :  { %v3871_v9 = vpack.c.bf16 %v3765_v35, %v3765_v35  ;;  %v10475_v63 = vpack.c.bf16 %v3765_v35, %v10382_v12  ;;  %7292 = vtanh.f32 %v3852_v36  ;;  %v7434_v36 = vld [vmem:[%s12208_s0 + $0x4] ss:$16 sps:$4 sm:$0xff]  }
 0x790   :  { %7294 = vtanh.f32 %v3855_v16  ;;  %v12436_v17 = vld [vmem:[#allocation86_spill] sm:$0xff] }
 0x791   :  { %3905 = vmatmul.mubr.bf16.vlgmr.msra.gmra.mrb[76].mxu0 %v3871_v9  ;;  %3946 = vmatmul.mubr.bf16.vlgmr.msra.gmra.mrb[84].mxu1 %v3871_v9  ;;  %v12437_v9 = vld [vmem:[#allocation58_spill] sm:$0xff] }
 0x792   :  { %3978 = vmatpush1.bf16.msra.mxu0 %v10057_v55  ;;  %4019 = vmatpush1.bf16.msra.mxu1 %v10063_v52 }
 0x793   :  { %3979 = vmatprep.subr.bf16.mxu0 %v10069_v4  ;;  %4020 = vmatprep.subr.bf16.mxu1 %v10075_v49 }
 0x794   :  { %4009 = vmatprep.mubr.bf16.mxu0 %v12218_v24  ;;  %4050 = vmatprep.mubr.bf16.mxu1 %v12218_v24 }
 0x796   :  { %3980 = vmatpush1.bf16.msra.mxu0 %v10083_v45  ;;  %4021 = vmatpush1.bf16.msra.mxu1 %v10089_v15 }
 0x797   :  { %v7289_v12 = vpop.eup %7288  ;;  %3981 = vmatprep.subr.bf16.mxu0 %v10095_v34  ;;  %4022 = vmatprep.subr.bf16.mxu1 %v10101_v0 }
 0x798   :  { %v3859_v55 = vmul.f32 0.5, %v7289_v12  ;;  %v7291_v52 = vpop.eup %7290  ;;  %v12438_v12 = vld [vmem:[#allocation88_spill] sm:$0xff] }
 0x799   :  { %v3860_v4 = vmul.f32 0.5, %v7291_v52  ;;  %v7293_v49 = vpop.eup %7292 }
 0x79a   :  { %v3862_v1 = vadd.f32 0.5, %v3859_v55  ;;  %3982 = vmatpush1.bf16.msra.mxu0 %v10107_v5  ;;  %4023 = vmatpush1.bf16.msra.mxu1 %v10113_v7  ;;  %v7295_v5 = vpop.eup %7294 }
 0x79b   :  { %3983 = vmatprep.subr.bf16.mxu0 %v10119_v22  ;;  %4024 = vmatprep.subr.bf16.mxu1 %v10125_v21  ;;  %v3863_v45 = vadd.f32 0.5, %v3860_v4  ;;  %v3861_v7 = vmul.f32 0.5, %v7295_v5 }
 0x79c   :  { %v3867_v15 = vmul.f32 %v7293_v49, %v3862_v1 }
 0x79d   :  { %v3866_v34 = vmul.f32 %v3863_v45, %v10405_v39  ;;  %v3864_v22 = vadd.f32 0.5, %v3861_v7  ;;  %v7417_v39 = vld [vmem:[%s12190_s4 + $0x68] ss:$16 sps:$4 sm:$0xff]  }
 0x79e   :  { %3984 = vmatpush1.bf16.msra.mxu0 %v10132_v19  ;;  %4025 = vmatpush1.bf16.msra.mxu1 %v10138_v61 }
 0x79f   :  { %3985 = vmatprep.subr.bf16.mxu0 %v10144_v62  ;;  %4026 = vmatprep.subr.bf16.mxu1 %v10150_v33  ;;  %v10496_v0 = vadd.f32 %v3867_v15, %v3866_v34  ;;  %v7402_v33 = vld [vmem:[%s12190_s4 + $0x4] ss:$16 sps:$4 sm:$0xff]  }
 0x7a1   :  { %7296 = vtanh.f32 %v10496_v0 }
 0x7a2   :  { %3986 = vmatpush1.bf16.msra.mxu0 %v10159_v2  ;;  %4027 = vmatpush1.bf16.msra.mxu1 %v10165_v3  ;;  %v7403_v2 = vld [vmem:[%s12190_s4 + $0xc] ss:$16 sps:$4 sm:$0xff]   ;;  %v7404_v3 = vld [vmem:[%s12190_s4] ss:$16 sps:$4 sm:$0xff]  }
 0x7a3   :  { %3987 = vmatprep.subr.bf16.mxu0 %v10171_v56  ;;  %4028 = vmatprep.subr.bf16.mxu1 %v12365_v58  ;;  %v7405_v56 = vld [vmem:[%s12190_s4 + $0x8] ss:$16 sps:$4 sm:$0xff]  }
 0x7a4   :  { %v7409_v58 = vld [vmem:[%s12190_s4 + $0x28] ss:$16 sps:$4 sm:$0xff]  }
 0x7a6   :  { %3988 = vmatpush1.bf16.msra.mxu0 %v12366_v44  ;;  %4029 = vmatpush1.bf16.msra.mxu1 %v12367_v23  ;;  %v7410_v44 = vld [vmem:[%s12190_s4 + $0x44] ss:$16 sps:$4 sm:$0xff]   ;;  %v7411_v23 = vld [vmem:[%s12190_s4 + $0x4c] ss:$16 sps:$4 sm:$0xff]  }
 0x7a7   :  { %3989 = vmatprep.subr.bf16.mxu0 %v12368_v37  ;;  %4030 = vmatprep.subr.bf16.mxu1 %v12369_v29  ;;  %v7412_v37 = vld [vmem:[%s12190_s4 + $0x40] ss:$16 sps:$4 sm:$0xff]   ;;  %v7413_v29 = vld [vmem:[%s12190_s4 + $0x48] ss:$16 sps:$4 sm:$0xff]  }
 0x7aa   :  { %3990 = vmatpush1.bf16.msra.mxu0 %v12370_v8  ;;  %4031 = vmatpush1.bf16.msra.mxu1 %v10213_v57  ;;  %v7407_v57 = vld [vmem:[%s12190_s4 + $0x2c] ss:$16 sps:$4 sm:$0xff]   ;;  %v7414_v8 = vld [vmem:[%s12190_s4 + $0x64] ss:$16 sps:$4 sm:$0xff]  }
 0x7ab   :  { %3991 = vmatprep.subr.bf16.mxu0 %v12371_v43  ;;  %4032 = vmatprep.subr.bf16.mxu1 %v12372_v53  ;;  %v7297_v21 = vpop.eup %7296  ;;  %v7415_v43 = vld [vmem:[%s12190_s4 + $0x6c] ss:$16 sps:$4 sm:$0xff]   ;;  %v7416_v53 = vld [vmem:[%s12190_s4 + $0x60] ss:$16 sps:$4 sm:$0xff]  }
 0x7ac   :  { %v3870_v19 = vmul.f32 %v7297_v21, %v3864_v22 }
 0x7ae   :  { %3992 = vmatpush1.bf16.msra.mxu0 %v10233_v28  ;;  %4033 = vmatpush1.bf16.msra.mxu1 %v10239_v20  ;;  %v3976_v61 = vpack.c.bf16 %v3870_v19, %v3870_v19  ;;  %v10514_v62 = vpack.c.bf16 %v10420_v47, %v3870_v19  ;;  %v7406_v20 = vld [vmem:[%s12190_s4 + $0x24] ss:$16 sps:$4 sm:$0xff]   ;;  %v7408_v28 = vld [vmem:[%s12190_s4 + $0x20] ss:$16 sps:$4 sm:$0xff]  }
 0x7af   :  { %4082 = vmatprep.subr.bf16.mxu0 %v7402_v33  ;;  %4123 = vmatprep.subr.bf16.mxu1 %v7403_v2  ;;  %v7418_v47 = vld [vmem:[%s12190_s4 + $0x84] ss:$16 sps:$4 sm:$0xff]  }
 0x7b1   :  { %4010 = vmatmul.mubr.bf16.vlgmr.msra.gmra.mrb[80].mxu0 %v3976_v61  ;;  %4051 = vmatmul.mubr.bf16.vlgmr.msra.gmra.mrb[88].mxu1 %v3976_v61 }
 0x7b2   :  { %4083 = vmatpush1.bf16.msra.mxu0 %v7404_v3  ;;  %4124 = vmatpush1.bf16.msra.mxu1 %v7405_v56 }
 0x7b3   :  { %4084 = vmatprep.subr.bf16.mxu0 %v7406_v20  ;;  %4125 = vmatprep.subr.bf16.mxu1 %v7407_v57 }
 0x7b4   :  { %4114 = vmatprep.mubr.bf16.mxu0 %v12218_v24  ;;  %4155 = vmatprep.mubr.bf16.mxu1 %v12218_v24 }
 0x7b6   :  { %4085 = vmatpush1.bf16.msra.mxu0 %v7408_v28  ;;  %4126 = vmatpush1.bf16.msra.mxu1 %v7409_v58 }
 0x7b7   :  { %4086 = vmatprep.subr.bf16.mxu0 %v7410_v44  ;;  %4127 = vmatprep.subr.bf16.mxu1 %v7411_v23  ;;  %v12439_v44 = vld [vmem:[#allocation83_spill] sm:$0xff] }
 0x7ba   :  { %4087 = vmatpush1.bf16.msra.mxu0 %v7412_v37  ;;  %4128 = vmatpush1.bf16.msra.mxu1 %v7413_v29  ;;  %v12440_v37 = vld [vmem:[#allocation99_spill] sm:$0xff] }
 0x7bb   :  { %4088 = vmatprep.subr.bf16.mxu0 %v7414_v8  ;;  %4129 = vmatprep.subr.bf16.mxu1 %v7415_v43 }
 0x7be   :  { %4089 = vmatpush1.bf16.msra.mxu0 %v7416_v53  ;;  %4130 = vmatpush1.bf16.msra.mxu1 %v7417_v39  ;;  %v12441_v53 = vld [vmem:[#allocation85_spill] sm:$0xff] }
 0x7bf   :  { %4090 = vmatprep.subr.bf16.mxu0 %v7418_v47  ;;  %4131 = vmatprep.subr.bf16.mxu1 %v7419_v59  ;;  %v12442_v47 = vld [vmem:[#allocation101_spill] sm:$0xff] }
 0x7c2   :  { %4091 = vmatpush1.bf16.msra.mxu0 %v7420_v46  ;;  %4132 = vmatpush1.bf16.msra.mxu1 %v7421_v54 }
 0x7c3   :  { %4092 = vmatprep.subr.bf16.mxu0 %v7422_v42  ;;  %4133 = vmatprep.subr.bf16.mxu1 %v7423_v40 }
 0x7c6   :  { %4093 = vmatpush1.bf16.msra.mxu0 %v7424_v14  ;;  %4134 = vmatpush1.bf16.msra.mxu1 %v7425_v11 }
 0x7c7   :  { %4094 = vmatprep.subr.bf16.mxu0 %v7426_v41  ;;  %4135 = vmatprep.subr.bf16.mxu1 %v7427_v27 }
 0x7ca   :  { %4095 = vmatpush1.bf16.msra.mxu0 %v7428_v18  ;;  %4136 = vmatpush1.bf16.msra.mxu1 %v7429_v26  ;;  %v7436_v26 = vld [vmem:[%s12208_s0] ss:$16 sps:$4 sm:$0xff]  }
 0x7cb   :  { %4096 = vmatprep.subr.bf16.mxu0 %v7430_v30  ;;  %4137 = vmatprep.subr.bf16.mxu1 %v7431_v31  ;;  %v7437_v30 = vld [vmem:[%s12208_s0 + $0x8] ss:$16 sps:$4 sm:$0xff]   ;;  %v7438_v31 = vld [vmem:[%s12208_s0 + $0x24] ss:$16 sps:$4 sm:$0xff]  }
 0x7ce   :  { %4097 = vmatpush1.bf16.msra.mxu0 %v7432_v32  ;;  %4138 = vmatpush1.bf16.msra.mxu1 %v7433_v6  ;;  %v7439_v32 = vld [vmem:[%s12208_s0 + $0x2c] ss:$16 sps:$4 sm:$0xff]  }
 0x7cf   :  { %4187 = vmatprep.subr.bf16.mxu0 %v7434_v36  ;;  %4228 = vmatprep.subr.bf16.mxu1 %v7435_v51  ;;  %v7440_v36 = vld [vmem:[%s12208_s0 + $0x20] ss:$16 sps:$4 sm:$0xff]   ;;  %v7441_v51 = vld [vmem:[%s12208_s0 + $0x28] ss:$16 sps:$4 sm:$0xff]  }
 0x864   :  { %v3906_v38 = vpop.f32.mrb[76].mxu0  ;;  %v3947_v10 = vpop.f32.mrb[84].mxu1 }
 0x865   :  { %v3954_v60 = vadd.f32 %v3906_v38, %v12435_v25  ;;  %v3956_v48 = vadd.f32 %v3947_v10, %v12436_v17  ;;  %v3908_v13 = vpop.f32.mrb[77].mxu0  ;;  %v3949_v35 = vpop.f32.mrb[85].mxu1  ;;  %v7442_v10 = vld [vmem:[%s12208_s0 + $0x44] ss:$16 sps:$4 sm:$0xff]   ;;  %v7443_v25 = vld [vmem:[%s12208_s0 + $0x4c] ss:$16 sps:$4 sm:$0xff]  }
 0x866   :  { %v3955_v16 = vadd.f32 %v3908_v13, %v12437_v9  ;;  %v3957_v55 = vadd.f32 %v3949_v35, %v12438_v12  ;;  %v3910_v52 = vpop.f32.mrb[78].mxu0  ;;  %v3951_v1 = vpop.f32.mrb[86].mxu1  ;;  %v7444_v35 = vld [vmem:[%s12208_s0 + $0x40] ss:$16 sps:$4 sm:$0xff]   ;;  %v7445_v9 = vld [vmem:[%s12208_s0 + $0x48] ss:$16 sps:$4 sm:$0xff]  }
 0x867   :  { %v3958_v4 = vmul.f32 0.5, %v3954_v60  ;;  %v3911_v49 = vpop.f32.mrb[79].mxu0  ;;  %v3952_v45 = vpop.f32.mrb[87].mxu1  ;;  %v3960_v34 = vmul.f32 0.5, %v3956_v48  ;;  %v7446_v12 = vld [vmem:[%s12208_s0 + $0x64] ss:$16 sps:$4 sm:$0xff]  }
 0x868   :  { %v3959_v15 = vmul.f32 0.5, %v3955_v16  ;;  %v7448_v49 = vld [vmem:[%s12208_s0 + $0x60] ss:$16 sps:$4 sm:$0xff]   ;;  %v7449_v45 = vld [vmem:[%s12208_s0 + $0x68] ss:$16 sps:$4 sm:$0xff]  }
 0x869   :  { %7298 = vtanh.f32 %v3958_v4 }
 0x86a   :  { %7300 = vtanh.f32 %v3959_v15  ;;  %v7450_v15 = vld [vmem:[%s12208_s0 + $0x84] ss:$16 sps:$4 sm:$0xff]  }
 0x86b   :  { %7302 = vtanh.f32 %v3957_v55  ;;  %v7447_v55 = vld [vmem:[%s12208_s0 + $0x6c] ss:$16 sps:$4 sm:$0xff]  }
 0x86c   :  { %7304 = vtanh.f32 %v3960_v34  ;;  %v7451_v34 = vld [vmem:[%s12208_s0 + $0x8c] ss:$16 sps:$4 sm:$0xff]  }
 0x873   :  { %v7299_v5 = vpop.eup %7298 }
 0x874   :  { %v3964_v7 = vmul.f32 0.5, %v7299_v5  ;;  %v7301_v22 = vpop.eup %7300  ;;  %v7452_v5 = vld [vmem:[%s12208_s0 + $0x80] ss:$16 sps:$4 sm:$0xff]  }
 0x875   :  { %v3965_v19 = vmul.f32 0.5, %v7301_v22  ;;  %v7303_v61 = vpop.eup %7302  ;;  %v7454_v22 = vld [vmem:[%s12208_s0 + $0xa4] ss:$16 sps:$4 sm:$0xff]  }
 0x876   :  { %v3967_v21 = vadd.f32 0.5, %v3964_v7  ;;  %v7305_v20 = vpop.eup %7304  ;;  %v7453_v7 = vld [vmem:[%s12208_s0 + $0x88] ss:$16 sps:$4 sm:$0xff]  }
 0x877   :  { %v3968_v33 = vadd.f32 0.5, %v3965_v19  ;;  %v3966_v57 = vmul.f32 0.5, %v7305_v20  ;;  %v7459_v20 = vld [vmem:[%s12208_s0 + $0xcc] ss:$16 sps:$4 sm:$0xff]  }
 0x878   :  { %v3972_v2 = vmul.f32 %v7303_v61, %v3967_v21  ;;  %v7455_v21 = vld [vmem:[%s12208_s0 + $0xac] ss:$16 sps:$4 sm:$0xff]   ;;  %v7456_v61 = vld [vmem:[%s12208_s0 + $0xa0] ss:$16 sps:$4 sm:$0xff]  }
 0x879   :  { %v3971_v3 = vmul.f32 %v3968_v33, %v10467_v50  ;;  %v3969_v54 = vadd.f32 0.5, %v3966_v57  ;;  %v7457_v33 = vld [vmem:[%s12208_s0 + $0xa8] ss:$16 sps:$4 sm:$0xff]   ;;  %v7460_v57 = vld [vmem:[%s12208_s0 + $0xc0] ss:$16 sps:$4 sm:$0xff]  }
 0x87b   :  { %v10625_v56 = vadd.f32 %v3972_v2, %v3971_v3  ;;  %v7458_v3 = vld [vmem:[%s12208_s0 + $0xc4] ss:$16 sps:$4 sm:$0xff]  }
 0x87d   :  { %7306 = vtanh.f32 %v10625_v56 }
 0x884   :  { %v4011_v28 = vpop.f32.mrb[80].mxu0  ;;  %v4052_v58 = vpop.f32.mrb[88].mxu1 }
 0x885   :  { %v4059_v23 = vadd.f32 %v4011_v28, %v12439_v44  ;;  %v4061_v29 = vadd.f32 %v4052_v58, %v12440_v37  ;;  %v4013_v8 = vpop.f32.mrb[81].mxu0  ;;  %v4054_v43 = vpop.f32.mrb[89].mxu1  ;;  %v7461_v28 = vld [vmem:[%s12208_s0 + $0xc8] ss:$16 sps:$4 sm:$0xff]   ;;  %v7462_v44 = vld [vmem:[%s12208_s0 + $0xe4] ss:$16 sps:$4 sm:$0xff]  }
 0x886   :  { %v4060_v39 = vadd.f32 %v4013_v8, %v12441_v53  ;;  %v4062_v59 = vadd.f32 %v4054_v43, %v12442_v47  ;;  %v4015_v46 = vpop.f32.mrb[82].mxu0  ;;  %v4056_v50 = vpop.f32.mrb[90].mxu1  ;;  %v7464_v8 = vld [vmem:[%s12208_s0 + $0xe0] ss:$16 sps:$4 sm:$0xff]   ;;  %v7465_v43 = vld [vmem:[%s12208_s0 + $0xe8] ss:$16 sps:$4 sm:$0xff]  }
 0x887   :  { %v4063_v42 = vmul.f32 0.5, %v4059_v23  ;;  %v4016_v40 = vpop.f32.mrb[83].mxu0  ;;  %v4057_v14 = vpop.f32.mrb[91].mxu1  ;;  %v4065_v6 = vmul.f32 0.5, %v4061_v29  ;;  %v7463_v23 = vld [vmem:[%s12208_s0 + $0xec] ss:$16 sps:$4 sm:$0xff]  }
 0x888   :  { %v7307_v11 = vpop.eup %7306  ;;  %v4064_v41 = vmul.f32 0.5, %v4060_v39  ;;  %v12444_v50 = vld [vmem:[#allocation90_spill] sm:$0xff] }
 0x889   :  { %7308 = vtanh.f32 %v4063_v42  ;;  %v10632_v27 = vmul.f32 %v7307_v11, %v3969_v54  ;;  %v12445_v14 = vld [vmem:[#allocation62_spill] sm:$0xff] }
 0x88a   :  { %7310 = vtanh.f32 %v4064_v41  ;;  %v12446_v41 = vld [vmem:[#allocation92_spill] sm:$0xff] }
 0x88b   :  { %v4081_v18 = vpack.c.bf16 %v10632_v27, %v10632_v27  ;;  %7312 = vtanh.f32 %v4062_v59  ;;  %v12443_v59 = vld [vmem:[#allocation60_spill] sm:$0xff] }
 0x88c   :  { %7314 = vtanh.f32 %v4065_v6 }
 0x88d   :  { %4115 = vmatmul.mubr.bf16.vlgmr.msra.gmra.mrb[84].mxu0 %v4081_v18  ;;  %4156 = vmatmul.mubr.bf16.vlgmr.msra.gmra.mrb[92].mxu1 %v4081_v18 }
 0x88e   :  { %4188 = vmatpush1.bf16.msra.mxu0 %v7436_v26  ;;  %4229 = vmatpush1.bf16.msra.mxu1 %v7437_v30 }
 0x88f   :  { %4189 = vmatprep.subr.bf16.mxu0 %v7438_v31  ;;  %4230 = vmatprep.subr.bf16.mxu1 %v7439_v32 }
 0x890   :  { %4219 = vmatprep.mubr.bf16.mxu0 %v12218_v24  ;;  %4260 = vmatprep.mubr.bf16.mxu1 %v12218_v24 }
 0x892   :  { %4190 = vmatpush1.bf16.msra.mxu0 %v7440_v36  ;;  %4231 = vmatpush1.bf16.msra.mxu1 %v7441_v51 }
 0x893   :  { %v7309_v38 = vpop.eup %7308  ;;  %4191 = vmatprep.subr.bf16.mxu0 %v7442_v10  ;;  %4232 = vmatprep.subr.bf16.mxu1 %v7443_v25 }
 0x894   :  { %v4069_v60 = vmul.f32 0.5, %v7309_v38  ;;  %v7311_v17 = vpop.eup %7310 }
 0x895   :  { %v4070_v13 = vmul.f32 0.5, %v7311_v17  ;;  %v7313_v16 = vpop.eup %7312 }
 0x896   :  { %v4072_v48 = vadd.f32 0.5, %v4069_v60  ;;  %4192 = vmatpush1.bf16.msra.mxu0 %v7444_v35  ;;  %4233 = vmatpush1.bf16.msra.mxu1 %v7445_v9  ;;  %v7315_v19 = vpop.eup %7314 }
 0x897   :  { %4193 = vmatprep.subr.bf16.mxu0 %v7446_v12  ;;  %4234 = vmatprep.subr.bf16.mxu1 %v7447_v55  ;;  %v4073_v52 = vadd.f32 0.5, %v4070_v13  ;;  %v4071_v2 = vmul.f32 0.5, %v7315_v19 }
 0x898   :  { %v4077_v1 = vmul.f32 %v7313_v16, %v4072_v48 }
 0x899   :  { %v4076_v4 = vmul.f32 %v4073_v52, %v10496_v0  ;;  %v4074_v58 = vadd.f32 0.5, %v4071_v2 }
 0x89a   :  { %4194 = vmatpush1.bf16.msra.mxu0 %v7448_v49  ;;  %4235 = vmatpush1.bf16.msra.mxu1 %v7449_v45  ;;  %v12448_v45 = vld [vmem:[#allocation95_spill] sm:$0xff] }
 0x89b   :  { %4195 = vmatprep.subr.bf16.mxu0 %v7450_v15  ;;  %4236 = vmatprep.subr.bf16.mxu1 %v7451_v34  ;;  %v10687_v0 = vadd.f32 %v4077_v1, %v4076_v4  ;;  %v12447_v4 = vld [vmem:[#allocation79_spill] sm:$0xff] }
 0x89d   :  { %7316 = vtanh.f32 %v10687_v0 }
 0x89e   :  { %4196 = vmatpush1.bf16.msra.mxu0 %v7452_v5  ;;  %4237 = vmatpush1.bf16.msra.mxu1 %v7453_v7  ;;  %v12449_v7 = vld [vmem:[#allocation81_spill] sm:$0xff] }
 0x89f   :  { %4197 = vmatprep.subr.bf16.mxu0 %v7454_v22  ;;  %4238 = vmatprep.subr.bf16.mxu1 %v7455_v21  ;;  %v12450_v21 = vld [vmem:[#allocation97_spill] sm:$0xff] }
 0x8a2   :  { %4198 = vmatpush1.bf16.msra.mxu0 %v7456_v61  ;;  %4239 = vmatpush1.bf16.msra.mxu1 %v7457_v33 }
 0x8a3   :  { %4199 = vmatprep.subr.bf16.mxu0 %v7458_v3  ;;  %4240 = vmatprep.subr.bf16.mxu1 %v7459_v20 }
 0x8a6   :  { %4200 = vmatpush1.bf16.msra.mxu0 %v7460_v57  ;;  %4241 = vmatpush1.bf16.msra.mxu1 %v7461_v28 }
 0x8a7   :  { %4201 = vmatprep.subr.bf16.mxu0 %v7462_v44  ;;  %4242 = vmatprep.subr.bf16.mxu1 %v7463_v23  ;;  %v7317_v37 = vpop.eup %7316 }
 0x8a8   :  { %v10726_v29 = vmul.f32 %v7317_v37, %v4074_v58 }
 0x8aa   :  { %4202 = vmatpush1.bf16.msra.mxu0 %v7464_v8  ;;  %4243 = vmatpush1.bf16.msra.mxu1 %v7465_v43  ;;  %v4186_v53 = vpack.c.bf16 %v10726_v29, %v10726_v29 }
 0x8ad   :  { %4220 = vmatmul.mubr.bf16.vlgmr.msra.gmra.mrb[88].mxu0 %v4186_v53  ;;  %4261 = vmatmul.mubr.bf16.vlgmr.msra.gmra.mrb[96].mxu1 %v4186_v53 }
 0x960   :  { %v4116_v39 = vpop.f32.mrb[84].mxu0  ;;  %v4157_v47 = vpop.f32.mrb[92].mxu1 }
 0x961   :  { %v4164_v46 = vadd.f32 %v4116_v39, %v12443_v59  ;;  %v4166_v54 = vadd.f32 %v4157_v47, %v12444_v50  ;;  %v4118_v42 = vpop.f32.mrb[85].mxu0  ;;  %v4159_v40 = vpop.f32.mrb[93].mxu1 }
 0x962   :  { %v4165_v11 = vadd.f32 %v4118_v42, %v12445_v14  ;;  %v4167_v18 = vadd.f32 %v4159_v40, %v12446_v41  ;;  %v4120_v26 = vpop.f32.mrb[86].mxu0  ;;  %v4161_v30 = vpop.f32.mrb[94].mxu1 }
 0x963   :  { %v4168_v31 = vmul.f32 0.5, %v4164_v46  ;;  %v4121_v32 = vpop.f32.mrb[87].mxu0  ;;  %v4162_v6 = vpop.f32.mrb[95].mxu1  ;;  %v4170_v51 = vmul.f32 0.5, %v4166_v54 }
 0x964   :  { %v4169_v36 = vmul.f32 0.5, %v4165_v11 }
 0x965   :  { %7318 = vtanh.f32 %v4168_v31 }
 0x966   :  { %7320 = vtanh.f32 %v4169_v36 }
 0x967   :  { %7322 = vtanh.f32 %v4167_v18 }
 0x968   :  { %7324 = vtanh.f32 %v4170_v51 }
 0x96f   :  { %v7319_v38 = vpop.eup %7318 }
 0x970   :  { %v4174_v10 = vmul.f32 0.5, %v7319_v38  ;;  %v7321_v25 = vpop.eup %7320 }
 0x971   :  { %v4175_v17 = vmul.f32 0.5, %v7321_v25  ;;  %v7323_v48 = vpop.eup %7322 }
 0x972   :  { %v4177_v60 = vadd.f32 0.5, %v4174_v10  ;;  %v7325_v12 = vpop.eup %7324 }
 0x973   :  { %v4178_v13 = vadd.f32 0.5, %v4175_v17  ;;  %v4176_v55 = vmul.f32 0.5, %v7325_v12 }
 0x974   :  { %v4182_v35 = vmul.f32 %v7323_v48, %v4177_v60 }
 0x975   :  { %v4181_v9 = vmul.f32 %v4178_v13, %v10625_v56  ;;  %v4179_v2 = vadd.f32 0.5, %v4176_v55 }
 0x977   :  { %v4183_v16 = vadd.f32 %v4182_v35, %v4181_v9 }
 0x979   :  { %7326 = vtanh.f32 %v4183_v16 }
 0x980   :  { %v4221_v52 = vpop.f32.mrb[88].mxu0  ;;  %v4262_v1 = vpop.f32.mrb[96].mxu1 }
 0x981   :  { %v4269_v49 = vadd.f32 %v4221_v52, %v12447_v4  ;;  %v4271_v15 = vadd.f32 %v4262_v1, %v12448_v45  ;;  %v4223_v34 = vpop.f32.mrb[89].mxu0  ;;  %v4264_v5 = vpop.f32.mrb[97].mxu1 }
 0x982   :  { %v4270_v22 = vadd.f32 %v4223_v34, %v12449_v7  ;;  %v4272_v19 = vadd.f32 %v4264_v5, %v12450_v21  ;;  %v4225_v61 = vpop.f32.mrb[90].mxu0  ;;  %v4266_v33 = vpop.f32.mrb[98].mxu1 }
 0x983   :  { %v4273_v56 = vmul.f32 0.5, %v4269_v49  ;;  %v4226_v3 = vpop.f32.mrb[91].mxu0  ;;  %v4267_v20 = vpop.f32.mrb[99].mxu1  ;;  %v4275_v23 = vmul.f32 0.5, %v4271_v15 }
 0x984   :  { %v7327_v57 = vpop.eup %7326  ;;  %v4274_v28 = vmul.f32 0.5, %v4270_v22 }
 0x985   :  { %v4185_v58 = vmul.f32 %v7327_v57, %v4179_v2  ;;  %7328 = vtanh.f32 %v4273_v56 }
 0x986   :  { %7330 = vtanh.f32 %v4274_v28 }
 0x987   :  { %v10746_v44 = vpack.c.bf16 %v4185_v58, %v10632_v27  ;;  %7332 = vtanh.f32 %v4272_v19 }
 0x988   :  { %7334 = vtanh.f32 %v4275_v23 }
 0x98f   :  { %v7329_v37 = vpop.eup %7328 }
 0x990   :  { %v4279_v8 = vmul.f32 0.5, %v7329_v37  ;;  %v7331_v43 = vpop.eup %7330 }
 0x991   :  { %v4280_v39 = vmul.f32 0.5, %v7331_v43  ;;  %v7333_v47 = vpop.eup %7332 }
 0x992   :  { %v4282_v53 = vadd.f32 0.5, %v4279_v8  ;;  %v7335_v42 = vpop.eup %7334 }
 0x993   :  { %v4283_v59 = vadd.f32 0.5, %v4280_v39  ;;  %v4281_v40 = vmul.f32 0.5, %v7335_v42 }
 0x994   :  { %v4287_v46 = vmul.f32 %v7333_v47, %v4282_v53 }
 0x995   :  { %v4286_v50 = vmul.f32 %v4283_v59, %v10687_v0  ;;  %v4284_v27 = vadd.f32 0.5, %v4281_v40 }
 0x997   :  { %v4288_v54 = vadd.f32 %v4287_v46, %v4286_v50 }
 0x999   :  { %7336 = vtanh.f32 %v4288_v54 }
 0x9a3   :  { %v7337_v14 = vpop.eup %7336 }
 0x9a4   :  { %v4290_v11 = vmul.f32 %v7337_v14, %v4284_v27 }
 0x9a6   :  { %v10750_v41 = vpack.c.bf16 %v10726_v29, %v4290_v11 }
 0x9a7   :  { %7766 = dma.done.wait [#allocation5], 16384 }
 0x9a8   :  { %7767 = vsyncadd [#allocation5], 4294950912 }
 0x9a9   :  { %7768 = dma.done.wait [#allocation5 + $0x1], 8192 }
 0x9aa   :  { %7769 = vsyncadd [#allocation5 + $0x1], 4294959104 }
 0x9ab   :  { %7770 = dma.done.wait [#allocation5 + $0x2], 2048 }
 0x9ac   :  { %7771 = vsyncadd [#allocation5 + $0x2], 4294965248  ;;  %4430 = vmatprep.mubr.bf16.mxu0 %v10750_v41  ;;  %4503 = vmatprep.mubr.bf16.mxu1 %v10750_v41  ;;  %v4313_v0 = vld [vmem:[#allocation2 + $0x8] sm:$0xff]  ;;  %v4315_v18 = vld [vmem:[#allocation2 + $0x18] sm:$0xff]  ;;  %vm7774_vm10 = vmmov 0   ;;  %vm6771_vm11 = vcmask 523264  }
 0x9ad   :  { %v4312_v26 = vld [vmem:[#allocation2] sm:$0xff]  ;;  %4398 = vmatprep.subr.bf16.mxu0 %v4313_v0  ;;  %4471 = vmatprep.subr.bf16.mxu1 %v4315_v18  ;;  %v4314_v30 = vld [vmem:[#allocation2 + $0x10] sm:$0xff]  ;;  %v4317_v31 = vld [vmem:[#allocation2 + $0x28] sm:$0xff] }
 0x9ae   :  { %v4319_v32 = vld [vmem:[#allocation2 + $0x38] sm:$0xff]  ;;  %4399 = vmatpush1.bf16.msra.mxu0 %v4312_v26  ;;  %4472 = vmatpush1.bf16.msra.mxu1 %v4314_v30  ;;  %v4316_v29 = vld [vmem:[#allocation2 + $0x20] sm:$0xff]  ;;  %v4318_v6 = vld [vmem:[#allocation2 + $0x30] sm:$0xff] }
 0x9af   :  { %4400 = vmatprep.subr.bf16.mxu0 %v4317_v31  ;;  %4473 = vmatprep.subr.bf16.mxu1 %v4319_v32  ;;  %v4321_v36 = vld [vmem:[#allocation2 + $0x48] sm:$0xff]  ;;  %v4323_v51 = vld [vmem:[#allocation2 + $0x58] sm:$0xff]  ;;  %v4320_v38 = vld [vmem:[#allocation2 + $0x40] sm:$0xff] }
 0x9b0   :  { %v4322_v10 = vld [vmem:[#allocation2 + $0x50] sm:$0xff]  ;;  %v4325_v25 = vld [vmem:[#allocation2 + $0x68] sm:$0xff]  ;;  %v4327_v60 = vld [vmem:[#allocation2 + $0x78] sm:$0xff] }
 0x9b1   :  { %v4324_v17 = vld [vmem:[#allocation2 + $0x60] sm:$0xff]  ;;  %v4326_v48 = vld [vmem:[#allocation2 + $0x70] sm:$0xff]  ;;  %v4329_v13 = vld [vmem:[#allocation2 + $0x88] sm:$0xff] }
 0x9b2   :  { %4401 = vmatpush1.bf16.msra.mxu0 %v4316_v29  ;;  %4474 = vmatpush1.bf16.msra.mxu1 %v4318_v6  ;;  %v4331_v35 = vld [vmem:[#allocation2 + $0x98] sm:$0xff]  ;;  %v4328_v9 = vld [vmem:[#allocation2 + $0x80] sm:$0xff]  ;;  %v4330_v16 = vld [vmem:[#allocation2 + $0x90] sm:$0xff] }
 0x9b3   :  { %4402 = vmatprep.subr.bf16.mxu0 %v4321_v36  ;;  %4475 = vmatprep.subr.bf16.mxu1 %v4323_v51  ;;  %v4333_v12 = vld [vmem:[#allocation2 + $0xa8] sm:$0xff]  ;;  %v4335_v55 = vld [vmem:[#allocation2 + $0xb8] sm:$0xff]  ;;  %v4332_v52 = vld [vmem:[#allocation2 + $0xa0] sm:$0xff] }
 0x9b4   :  { %v4334_v1 = vld [vmem:[#allocation2 + $0xb0] sm:$0xff]  ;;  %v4337_v4 = vld [vmem:[#allocation2 + $0xc8] sm:$0xff]  ;;  %v4339_v49 = vld [vmem:[#allocation2 + $0xd8] sm:$0xff] }
 0x9b5   :  { %v4336_v45 = vld [vmem:[#allocation2 + $0xc0] sm:$0xff]  ;;  %v4338_v15 = vld [vmem:[#allocation2 + $0xd0] sm:$0xff]  ;;  %v4341_v34 = vld [vmem:[#allocation2 + $0xe8] sm:$0xff] }
 0x9b6   :  { %4403 = vmatpush1.bf16.msra.mxu0 %v4320_v38  ;;  %4476 = vmatpush1.bf16.msra.mxu1 %v4322_v10  ;;  %v4343_v5 = vld [vmem:[#allocation2 + $0xf8] sm:$0xff]  ;;  %v4340_v7 = vld [vmem:[#allocation2 + $0xe0] sm:$0xff]  ;;  %v4342_v22 = vld [vmem:[#allocation2 + $0xf0] sm:$0xff] }
 0x9b7   :  { %4404 = vmatprep.subr.bf16.mxu0 %v4325_v25  ;;  %4477 = vmatprep.subr.bf16.mxu1 %v4327_v60  ;;  %v4345_v21 = vld [vmem:[#allocation2 + $0x108] sm:$0xff]  ;;  %v4347_v19 = vld [vmem:[#allocation2 + $0x118] sm:$0xff]  ;;  %v4344_v61 = vld [vmem:[#allocation2 + $0x100] sm:$0xff] }
 0x9b8   :  { %v4346_v33 = vld [vmem:[#allocation2 + $0x110] sm:$0xff]  ;;  %v4349_v2 = vld [vmem:[#allocation2 + $0x128] sm:$0xff]  ;;  %v4351_v56 = vld [vmem:[#allocation2 + $0x138] sm:$0xff] }
 0x9b9   :  { %v4348_v3 = vld [vmem:[#allocation2 + $0x120] sm:$0xff]  ;;  %v4350_v20 = vld [vmem:[#allocation2 + $0x130] sm:$0xff]  ;;  %v4353_v57 = vld [vmem:[#allocation2 + $0x148] sm:$0xff] }
 0x9ba   :  { %4405 = vmatpush1.bf16.msra.mxu0 %v4324_v17  ;;  %4478 = vmatpush1.bf16.msra.mxu1 %v4326_v48  ;;  %v4355_v28 = vld [vmem:[#allocation2 + $0x158] sm:$0xff]  ;;  %v4352_v58 = vld [vmem:[#allocation2 + $0x140] sm:$0xff]  ;;  %v4354_v23 = vld [vmem:[#allocation2 + $0x150] sm:$0xff] }
 0x9bb   :  { %4406 = vmatprep.subr.bf16.mxu0 %v4329_v13  ;;  %4479 = vmatprep.subr.bf16.mxu1 %v4331_v35  ;;  %v4357_v37 = vld [vmem:[#allocation2 + $0x168] sm:$0xff]  ;;  %v4359_v8 = vld [vmem:[#allocation2 + $0x178] sm:$0xff]  ;;  %v4356_v43 = vld [vmem:[#allocation2 + $0x160] sm:$0xff] }
 0x9bc   :  { %v4358_v53 = vld [vmem:[#allocation2 + $0x170] sm:$0xff]  ;;  %v4361_v39 = vld [vmem:[#allocation2 + $0x188] sm:$0xff]  ;;  %v4363_v47 = vld [vmem:[#allocation2 + $0x198] sm:$0xff] }
 0x9bd   :  { %v4360_v59 = vld [vmem:[#allocation2 + $0x180] sm:$0xff]  ;;  %v4362_v46 = vld [vmem:[#allocation2 + $0x190] sm:$0xff]  ;;  %v4365_v50 = vld [vmem:[#allocation2 + $0x1a8] sm:$0xff] }
 0x9be   :  { %4407 = vmatpush1.bf16.msra.mxu0 %v4328_v9  ;;  %4480 = vmatpush1.bf16.msra.mxu1 %v4330_v16  ;;  %v4367_v54 = vld [vmem:[#allocation2 + $0x1b8] sm:$0xff]  ;;  %v4364_v42 = vld [vmem:[#allocation2 + $0x1a0] sm:$0xff]  ;;  %v4366_v40 = vld [vmem:[#allocation2 + $0x1b0] sm:$0xff] }
 0x9bf   :  { %4408 = vmatprep.subr.bf16.mxu0 %v4333_v12  ;;  %4481 = vmatprep.subr.bf16.mxu1 %v4335_v55  ;;  %v4369_v27 = vld [vmem:[#allocation2 + $0x1c8] sm:$0xff]  ;;  %v4371_v14 = vld [vmem:[#allocation2 + $0x1d8] sm:$0xff]  ;;  %v4368_v11 = vld [vmem:[#allocation2 + $0x1c0] sm:$0xff] }
 0x9c0   :  { %v4370_v0 = vld [vmem:[#allocation2 + $0x1d0] sm:$0xff]  ;;  %v4373_v18 = vld [vmem:[#allocation2 + $0x1e8] sm:$0xff]  ;;  %v4375_v26 = vld [vmem:[#allocation2 + $0x1f8] sm:$0xff] }
 0x9c1   :  { %v4372_v30 = vld [vmem:[#allocation2 + $0x1e0] sm:$0xff]  ;;  %v4374_v31 = vld [vmem:[#allocation2 + $0x1f0] sm:$0xff]  ;;  %v4546_v32 = vld [vmem:[#allocation2 + $0x208] sm:$0xff] }
 0x9c2   :  { %4409 = vmatpush1.bf16.msra.mxu0 %v4332_v52  ;;  %4482 = vmatpush1.bf16.msra.mxu1 %v4334_v1  ;;  %v4548_v29 = vld [vmem:[#allocation2 + $0x218] sm:$0xff]  ;;  %v4545_v6 = vld [vmem:[#allocation2 + $0x200] sm:$0xff]  ;;  %v4547_v36 = vld [vmem:[#allocation2 + $0x210] sm:$0xff] }
 0x9c3   :  { %4410 = vmatprep.subr.bf16.mxu0 %v4337_v4  ;;  %4483 = vmatprep.subr.bf16.mxu1 %v4339_v49  ;;  %v4550_v51 = vld [vmem:[#allocation2 + $0x228] sm:$0xff]  ;;  %v4552_v38 = vld [vmem:[#allocation2 + $0x238] sm:$0xff]  ;;  %v12451_v10 = vld [vmem:[#allocation28_spill] sm:$0xff] }
 0x9c4   :  { %v4549_v25 = vld [vmem:[#allocation2 + $0x220] sm:$0xff]  ;;  %v4551_v60 = vld [vmem:[#allocation2 + $0x230] sm:$0xff]  ;;  %v4554_v17 = vld [vmem:[#allocation2 + $0x248] sm:$0xff] }
 0x9c5   :  { %v4556_v48 = vld [vmem:[#allocation2 + $0x258] sm:$0xff]  ;;  %v4553_v13 = vld [vmem:[#allocation2 + $0x240] sm:$0xff]  ;;  %v4555_v35 = vld [vmem:[#allocation2 + $0x250] sm:$0xff] }
 0x9c6   :  { %4411 = vmatpush1.bf16.msra.mxu0 %v4336_v45  ;;  %4484 = vmatpush1.bf16.msra.mxu1 %v4338_v15  ;;  %v4558_v9 = vld [vmem:[#allocation2 + $0x268] sm:$0xff]  ;;  %v4560_v16 = vld [vmem:[#allocation2 + $0x278] sm:$0xff]  ;;  %v4557_v55 = vld [vmem:[#allocation2 + $0x260] sm:$0xff] }
 0x9c7   :  { %4412 = vmatprep.subr.bf16.mxu0 %v4341_v34  ;;  %4485 = vmatprep.subr.bf16.mxu1 %v4343_v5  ;;  %v12452_v12 = vld [vmem:[#allocation65_spill] sm:$0xff]  ;;  %v4559_v52 = vld [vmem:[#allocation2 + $0x270] sm:$0xff]  ;;  %v4564_v4 = vld [vmem:[#allocation2 + $0x298] sm:$0xff] }
 0x9c8   :  { %v4562_v1 = vld [vmem:[#allocation2 + $0x288] sm:$0xff]  ;;  %v4561_v45 = vld [vmem:[#allocation2 + $0x280] sm:$0xff]  ;;  %v4563_v15 = vld [vmem:[#allocation2 + $0x290] sm:$0xff] }
 0x9c9   :  { %v12453_v49 = vld [vmem:[#allocation73_spill] sm:$0xff]  ;;  %v4568_v5 = vld [vmem:[#allocation2 + $0x2b8] sm:$0xff] }
 0x9ca   :  { %4413 = vmatpush1.bf16.msra.mxu0 %v4340_v7  ;;  %4486 = vmatpush1.bf16.msra.mxu1 %v4342_v22  ;;  %v4566_v34 = vld [vmem:[#allocation2 + $0x2a8] sm:$0xff]  ;;  %v4565_v7 = vld [vmem:[#allocation2 + $0x2a0] sm:$0xff]  ;;  %v4567_v22 = vld [vmem:[#allocation2 + $0x2b0] sm:$0xff] }
 0x9cb   :  { %4414 = vmatprep.subr.bf16.mxu0 %v4345_v21  ;;  %4487 = vmatprep.subr.bf16.mxu1 %v4347_v19  ;;  %v4570_v21 = vld [vmem:[#allocation2 + $0x2c8] sm:$0xff]  ;;  %v4572_v19 = vld [vmem:[#allocation2 + $0x2d8] sm:$0xff] }
 0x9ce   :  { %4415 = vmatpush1.bf16.msra.mxu0 %v4344_v61  ;;  %4488 = vmatpush1.bf16.msra.mxu1 %v4346_v33  ;;  %v12454_v61 = vld [vmem:[#allocation37_spill] sm:$0xff]  ;;  %v4569_v33 = vld [vmem:[#allocation2 + $0x2c0] sm:$0xff] }
 0x9cf   :  { %4416 = vmatprep.subr.bf16.mxu0 %v4349_v2  ;;  %4489 = vmatprep.subr.bf16.mxu1 %v4351_v56  ;;  %v4571_v2 = vld [vmem:[#allocation2 + $0x2d0] sm:$0xff]  ;;  %v4574_v56 = vld [vmem:[#allocation2 + $0x2e8] sm:$0xff] }
 0x9d2   :  { %4417 = vmatpush1.bf16.msra.mxu0 %v4348_v3  ;;  %4490 = vmatpush1.bf16.msra.mxu1 %v4350_v20  ;;  %v4576_v3 = vld [vmem:[#allocation2 + $0x2f8] sm:$0xff]  ;;  %v4573_v20 = vld [vmem:[#allocation2 + $0x2e0] sm:$0xff] }
 0x9d3   :  { %4418 = vmatprep.subr.bf16.mxu0 %v4353_v57  ;;  %4491 = vmatprep.subr.bf16.mxu1 %v4355_v28  ;;  %v4575_v57 = vld [vmem:[#allocation2 + $0x2f0] sm:$0xff]  ;;  %v4578_v28 = vld [vmem:[#allocation2 + $0x308] sm:$0xff] }
 0x9d6   :  { %4419 = vmatpush1.bf16.msra.mxu0 %v4352_v58  ;;  %4492 = vmatpush1.bf16.msra.mxu1 %v4354_v23  ;;  %v4580_v58 = vld [vmem:[#allocation2 + $0x318] sm:$0xff]  ;;  %v4577_v23 = vld [vmem:[#allocation2 + $0x300] sm:$0xff] }
 0x9d7   :  { %4420 = vmatprep.subr.bf16.mxu0 %v4357_v37  ;;  %4493 = vmatprep.subr.bf16.mxu1 %v4359_v8  ;;  %v4579_v37 = vld [vmem:[#allocation2 + $0x310] sm:$0xff]  ;;  %v4582_v8 = vld [vmem:[#allocation2 + $0x328] sm:$0xff] }
 0x9da   :  { %4421 = vmatpush1.bf16.msra.mxu0 %v4356_v43  ;;  %4494 = vmatpush1.bf16.msra.mxu1 %v4358_v53  ;;  %v4584_v43 = vld [vmem:[#allocation2 + $0x338] sm:$0xff]  ;;  %v4581_v53 = vld [vmem:[#allocation2 + $0x320] sm:$0xff] }
 0x9db   :  { %4422 = vmatprep.subr.bf16.mxu0 %v4361_v39  ;;  %4495 = vmatprep.subr.bf16.mxu1 %v4363_v47  ;;  %v4583_v39 = vld [vmem:[#allocation2 + $0x330] sm:$0xff]  ;;  %v4586_v47 = vld [vmem:[#allocation2 + $0x348] sm:$0xff] }
 0x9de   :  { %4423 = vmatpush1.bf16.msra.mxu0 %v4360_v59  ;;  %4496 = vmatpush1.bf16.msra.mxu1 %v4362_v46  ;;  %v4588_v59 = vld [vmem:[#allocation2 + $0x358] sm:$0xff]  ;;  %v4587_v46 = vld [vmem:[#allocation2 + $0x350] sm:$0xff] }
 0x9df   :  { %4424 = vmatprep.subr.bf16.mxu0 %v4365_v50  ;;  %4497 = vmatprep.subr.bf16.mxu1 %v4367_v54  ;;  %v4590_v50 = vld [vmem:[#allocation2 + $0x368] sm:$0xff]  ;;  %v4592_v54 = vld [vmem:[#allocation2 + $0x378] sm:$0xff] }
 0x9e2   :  { %4425 = vmatpush1.bf16.msra.mxu0 %v4364_v42  ;;  %4498 = vmatpush1.bf16.msra.mxu1 %v4366_v40  ;;  %v4589_v42 = vld [vmem:[#allocation2 + $0x360] sm:$0xff]  ;;  %v4591_v40 = vld [vmem:[#allocation2 + $0x370] sm:$0xff] }
 0x9e3   :  { %4426 = vmatprep.subr.bf16.mxu0 %v4369_v27  ;;  %4499 = vmatprep.subr.bf16.mxu1 %v4371_v14  ;;  %v4594_v27 = vld [vmem:[#allocation2 + $0x388] sm:$0xff]  ;;  %v4596_v14 = vld [vmem:[#allocation2 + $0x398] sm:$0xff] }
 0x9e6   :  { %4427 = vmatpush1.bf16.msra.mxu0 %v4368_v11  ;;  %4500 = vmatpush1.bf16.msra.mxu1 %v4370_v0  ;;  %v4593_v11 = vld [vmem:[#allocation2 + $0x380] sm:$0xff]  ;;  %v4595_v0 = vld [vmem:[#allocation2 + $0x390] sm:$0xff] }
 0x9e7   :  { %4428 = vmatprep.subr.bf16.mxu0 %v4373_v18  ;;  %4501 = vmatprep.subr.bf16.mxu1 %v4375_v26  ;;  %v4598_v18 = vld [vmem:[#allocation2 + $0x3a8] sm:$0xff]  ;;  %v4600_v26 = vld [vmem:[#allocation2 + $0x3b8] sm:$0xff] }
 0x9ea   :  { %4429 = vmatpush1.bf16.msra.mxu0 %v4372_v30  ;;  %4502 = vmatpush1.bf16.msra.mxu1 %v4374_v31  ;;  %v4597_v30 = vld [vmem:[#allocation2 + $0x3a0] sm:$0xff]  ;;  %v4599_v31 = vld [vmem:[#allocation2 + $0x3b0] sm:$0xff] }
 0x9eb   :  { %4631 = vmatprep.subr.bf16.mxu0 %v4546_v32  ;;  %4704 = vmatprep.subr.bf16.mxu1 %v4548_v29  ;;  %v4602_v32 = vld [vmem:[#allocation2 + $0x3c8] sm:$0xff]  ;;  %v4604_v29 = vld [vmem:[#allocation2 + $0x3d8] sm:$0xff] }
 0x9ed   :  { %4431 = vmatmul.mubr.bf16.vlgmr.msra.gmra.mrb[92].mxu0 %v12451_v10  ;;  %4504 = vmatmul.mubr.bf16.vlgmr.msra.gmra.mrb[100].mxu1 %v12451_v10 }
 0x9ee   :  { %4632 = vmatpush1.bf16.msra.mxu0 %v4545_v6  ;;  %4705 = vmatpush1.bf16.msra.mxu1 %v4547_v36  ;;  %v4601_v6 = vld [vmem:[#allocation2 + $0x3c0] sm:$0xff]  ;;  %v4603_v36 = vld [vmem:[#allocation2 + $0x3d0] sm:$0xff] }
 0x9ef   :  { %4633 = vmatprep.subr.bf16.mxu0 %v4550_v51  ;;  %4706 = vmatprep.subr.bf16.mxu1 %v4552_v38  ;;  %v4606_v51 = vld [vmem:[#allocation2 + $0x3e8] sm:$0xff]  ;;  %v4608_v38 = vld [vmem:[#allocation2 + $0x3f8] sm:$0xff] }
 0x9f0   :  { %4440 = vmatprep.mubr.bf16.mxu0 %v10514_v62  ;;  %4513 = vmatprep.mubr.bf16.mxu1 %v10514_v62 }
 0x9f2   :  { %4634 = vmatpush1.bf16.msra.mxu0 %v4549_v25  ;;  %4707 = vmatpush1.bf16.msra.mxu1 %v4551_v60  ;;  %v4605_v25 = vld [vmem:[#allocation2 + $0x3e0] sm:$0xff]  ;;  %v4607_v60 = vld [vmem:[#allocation2 + $0x3f0] sm:$0xff] }
 0x9f3   :  { %4635 = vmatprep.subr.bf16.mxu0 %v4554_v17  ;;  %4708 = vmatprep.subr.bf16.mxu1 %v4556_v48  ;;  %v10770_v17 = vld [vmem:[#allocation3 + $0x8] sm:$0xff]  ;;  %v10772_v48 = vld [vmem:[#allocation3 + $0x18] sm:$0xff] }
 0x9f5   :  { %4441 = vmatmul.mubr.bf16.gmra.mrb[96].mxu0 %v12452_v12  ;;  %4514 = vmatmul.mubr.bf16.gmra.mrb[104].mxu1 %v12452_v12 }
 0x9f6   :  { %4636 = vmatpush1.bf16.msra.mxu0 %v4553_v13  ;;  %4709 = vmatpush1.bf16.msra.mxu1 %v4555_v35  ;;  %v10776_v13 = vld [vmem:[#allocation3] sm:$0xff]  ;;  %v10778_v35 = vld [vmem:[#allocation3 + $0x10] sm:$0xff] }
 0x9f7   :  { %4637 = vmatprep.subr.bf16.mxu0 %v4558_v9  ;;  %4710 = vmatprep.subr.bf16.mxu1 %v4560_v16  ;;  %12455 = vst [vmem:[#allocation109_spill] sm:$0xff] %v10778_v35  ;;  %v10780_v9 = vld [vmem:[#allocation3 + $0x28] sm:$0xff]  ;;  %v10782_v16 = vld [vmem:[#allocation3 + $0x38] sm:$0xff] }
 0x9f8   :  { %4450 = vmatprep.mubr.bf16.mxu0 %v12453_v49  ;;  %4523 = vmatprep.mubr.bf16.mxu1 %v12453_v49  ;;  %12456 = vst [vmem:[#allocation100_spill] sm:$0xff] %v10780_v9  ;;  %12457 = vst [vmem:[#allocation110_spill] sm:$0xff] %v10782_v16 }
 0x9fa   :  { %4638 = vmatpush1.bf16.msra.mxu0 %v4557_v55  ;;  %4711 = vmatpush1.bf16.msra.mxu1 %v4559_v52  ;;  %v10790_v55 = vld [vmem:[#allocation3 + $0x20] sm:$0xff]  ;;  %v10792_v52 = vld [vmem:[#allocation3 + $0x30] sm:$0xff] }
 0x9fb   :  { %4639 = vmatprep.subr.bf16.mxu0 %v4562_v1  ;;  %4712 = vmatprep.subr.bf16.mxu1 %v4564_v4  ;;  %12458 = vst [vmem:[#allocation66_spill] sm:$0xff] %v10790_v55  ;;  %12459 = vst [vmem:[#allocation75_spill] sm:$0xff] %v10792_v52  ;;  %v10796_v1 = vld [vmem:[#allocation3 + $0x48] sm:$0xff]  ;;  %v10798_v4 = vld [vmem:[#allocation3 + $0x58] sm:$0xff] }
 0x9fc   :  { %12460 = vst [vmem:[#allocation68_spill] sm:$0xff] %v10796_v1  ;;  %12461 = vst [vmem:[#allocation77_spill] sm:$0xff] %v10798_v4 }
 0x9fd   :  { %4451 = vmatmul.mubr.bf16.gmra.mrb[100].mxu0 %v10475_v63  ;;  %4524 = vmatmul.mubr.bf16.gmra.mrb[108].mxu1 %v10475_v63 }
 0x9fe   :  { %4640 = vmatpush1.bf16.msra.mxu0 %v4561_v45  ;;  %4713 = vmatpush1.bf16.msra.mxu1 %v4563_v15  ;;  %v10806_v45 = vld [vmem:[#allocation3 + $0x50] sm:$0xff]  ;;  %v10808_v15 = vld [vmem:[#allocation3 + $0x68] sm:$0xff] }
 0x9ff   :  { %4641 = vmatprep.subr.bf16.mxu0 %v4566_v34  ;;  %4714 = vmatprep.subr.bf16.mxu1 %v4568_v5  ;;  %12463 = vst [vmem:[#allocation107_spill] sm:$0xff] %v10806_v45  ;;  %12464 = vst [vmem:[#allocation96_spill] sm:$0xff] %v10808_v15  ;;  %v10810_v34 = vld [vmem:[#allocation3 + $0x78] sm:$0xff]  ;;  %v10820_v5 = vld [vmem:[#allocation3 + $0x70] sm:$0xff] }
 0xa00   :  { %4460 = vmatprep.mubr.bf16.mxu0 %v12454_v61  ;;  %4533 = vmatprep.mubr.bf16.mxu1 %v12454_v61  ;;  %12465 = vst [vmem:[#allocation108_spill] sm:$0xff] %v10810_v34  ;;  %12467 = vst [vmem:[#allocation67_spill] sm:$0xff] %v10820_v5 }
 0xa02   :  { %4642 = vmatpush1.bf16.msra.mxu0 %v4565_v7  ;;  %4715 = vmatpush1.bf16.msra.mxu1 %v4567_v22  ;;  %v10824_v7 = vld [vmem:[#allocation3 + $0x88] sm:$0xff]  ;;  %v10826_v22 = vld [vmem:[#allocation3 + $0x98] sm:$0xff] }
 0xa03   :  { %4643 = vmatprep.subr.bf16.mxu0 %v4570_v21  ;;  %4716 = vmatprep.subr.bf16.mxu1 %v4572_v19  ;;  %12468 = vst [vmem:[#allocation63_spill] sm:$0xff] %v10824_v7  ;;  %12469 = vst [vmem:[#allocation69_spill] sm:$0xff] %v10826_v22  ;;  %v10834_v21 = vld [vmem:[#allocation3 + $0x90] sm:$0xff]  ;;  %v10836_v19 = vld [vmem:[#allocation3 + $0xa8] sm:$0xff] }
 0xa04   :  { %12471 = vst [vmem:[#allocation103_spill] sm:$0xff] %v10834_v21  ;;  %12472 = vst [vmem:[#allocation112_spill] sm:$0xff] %v10836_v19 }
 0xa05   :  { %4461 = vmatmul.mubr.bf16.gmra.mrb[104].mxu0 %v10746_v44  ;;  %4534 = vmatmul.mubr.bf16.gmra.mrb[112].mxu1 %v10746_v44 }
 0xa06   :  { %4644 = vmatpush1.bf16.msra.mxu0 %v4569_v33  ;;  %4717 = vmatpush1.bf16.msra.mxu1 %v4571_v2  ;;  %v10838_v33 = vld [vmem:[#allocation3 + $0xb8] sm:$0xff]  ;;  %v10848_v2 = vld [vmem:[#allocation3 + $0xb0] sm:$0xff] }
 0xa07   :  { %4645 = vmatprep.subr.bf16.mxu0 %v4574_v56  ;;  %4718 = vmatprep.subr.bf16.mxu1 %v4576_v3  ;;  %12473 = vst [vmem:[#allocation64_spill] sm:$0xff] %v10838_v33  ;;  %12475 = vst [vmem:[#allocation78_spill] sm:$0xff] %v10848_v2  ;;  %v10852_v56 = vld [vmem:[#allocation3 + $0xc8] sm:$0xff]  ;;  %v10854_v3 = vld [vmem:[#allocation3 + $0xd8] sm:$0xff] }
 0xa08   :  { %4663 = vmatprep.mubr.bf16.mxu0 %v10750_v41  ;;  %4736 = vmatprep.mubr.bf16.mxu1 %v10750_v41  ;;  %v4585_v41 = vld [vmem:[#allocation2 + $0x340] sm:$0xff]  ;;  %12476 = vst [vmem:[#allocation72_spill] sm:$0xff] %v10852_v56  ;;  %12477 = vst [vmem:[#allocation80_spill] sm:$0xff] %v10854_v3 }
 0xa0a   :  { %4646 = vmatpush1.bf16.msra.mxu0 %v4573_v20  ;;  %4719 = vmatpush1.bf16.msra.mxu1 %v4575_v57  ;;  %v10862_v20 = vld [vmem:[#allocation3 + $0xd0] sm:$0xff]  ;;  %v10864_v57 = vld [vmem:[#allocation3 + $0xe8] sm:$0xff] }
 0xa0b   :  { %4647 = vmatprep.subr.bf16.mxu0 %v4578_v28  ;;  %4720 = vmatprep.subr.bf16.mxu1 %v4580_v58  ;;  %12479 = vst [vmem:[#allocation91_spill] sm:$0xff] %v10862_v20  ;;  %12480 = vst [vmem:[#allocation105_spill] sm:$0xff] %v10864_v57  ;;  %v10866_v28 = vld [vmem:[#allocation3 + $0xf8] sm:$0xff]  ;;  %v10876_v58 = vld [vmem:[#allocation3 + $0xf0] sm:$0xff] }
 0xa0c   :  { %12481 = vst [vmem:[#allocation93_spill] sm:$0xff] %v10866_v28  ;;  %12483 = vst [vmem:[#allocation29_spill] sm:$0xff] %v10876_v58 }
 0xa0e   :  { %4648 = vmatpush1.bf16.msra.mxu0 %v4577_v23  ;;  %4721 = vmatpush1.bf16.msra.mxu1 %v4579_v37  ;;  %v10880_v23 = vld [vmem:[#allocation3 + $0x108] sm:$0xff]  ;;  %v10882_v37 = vld [vmem:[#allocation3 + $0x118] sm:$0xff] }
 0xa0f   :  { %4649 = vmatprep.subr.bf16.mxu0 %v4582_v8  ;;  %4722 = vmatprep.subr.bf16.mxu1 %v4584_v43  ;;  %12484 = vst [vmem:[#allocation39_spill] sm:$0xff] %v10880_v23  ;;  %12485 = vst [vmem:[#allocation30_spill] sm:$0xff] %v10882_v37  ;;  %v10890_v8 = vld [vmem:[#allocation3 + $0x110] sm:$0xff]  ;;  %v10892_v43 = vld [vmem:[#allocation3 + $0x128] sm:$0xff] }
 0xa12   :  { %4650 = vmatpush1.bf16.msra.mxu0 %v4581_v53  ;;  %4723 = vmatpush1.bf16.msra.mxu1 %v4583_v39  ;;  %v10894_v53 = vld [vmem:[#allocation3 + $0x138] sm:$0xff]  ;;  %v10902_v39 = vld [vmem:[#allocation3 + $0x120] sm:$0xff] }
 0xa13   :  { %4651 = vmatprep.subr.bf16.mxu0 %v4586_v47  ;;  %4724 = vmatprep.subr.bf16.mxu1 %v4588_v59  ;;  %v10904_v47 = vld [vmem:[#allocation3 + $0x130] sm:$0xff]  ;;  %v10906_v59 = vld [vmem:[#allocation3 + $0x148] sm:$0xff] }
 0xa16   :  { %4652 = vmatpush1.bf16.msra.mxu0 %v4585_v41  ;;  %4725 = vmatpush1.bf16.msra.mxu1 %v4587_v46  ;;  %v10908_v41 = vld [vmem:[#allocation3 + $0x158] sm:$0xff]  ;;  %v10916_v46 = vld [vmem:[#allocation3 + $0x140] sm:$0xff] }
 0xa17   :  { %4653 = vmatprep.subr.bf16.mxu0 %v4590_v50  ;;  %4726 = vmatprep.subr.bf16.mxu1 %v4592_v54  ;;  %v10918_v50 = vld [vmem:[#allocation3 + $0x150] sm:$0xff]  ;;  %v10920_v54 = vld [vmem:[#allocation3 + $0x168] sm:$0xff] }
 0xa1a   :  { %4654 = vmatpush1.bf16.msra.mxu0 %v4589_v42  ;;  %4727 = vmatpush1.bf16.msra.mxu1 %v4591_v40  ;;  %v10922_v42 = vld [vmem:[#allocation3 + $0x178] sm:$0xff]  ;;  %v10928_v40 = vld [vmem:[#allocation3 + $0x160] sm:$0xff] }
 0xa1b   :  { %4655 = vmatprep.subr.bf16.mxu0 %v4594_v27  ;;  %4728 = vmatprep.subr.bf16.mxu1 %v4596_v14  ;;  %v10930_v27 = vld [vmem:[#allocation3 + $0x170] sm:$0xff]  ;;  %v10932_v14 = vld [vmem:[#allocation3 + $0x188] sm:$0xff] }
 0xa1e   :  { %4656 = vmatpush1.bf16.msra.mxu0 %v4593_v11  ;;  %4729 = vmatpush1.bf16.msra.mxu1 %v4595_v0  ;;  %v10934_v11 = vld [vmem:[#allocation3 + $0x198] sm:$0xff]  ;;  %v10940_v0 = vld [vmem:[#allocation3 + $0x180] sm:$0xff] }
 0xa1f   :  { %4657 = vmatprep.subr.bf16.mxu0 %v4598_v18  ;;  %4730 = vmatprep.subr.bf16.mxu1 %v4600_v26  ;;  %v10942_v18 = vld [vmem:[#allocation3 + $0x190] sm:$0xff]  ;;  %v10944_v26 = vld [vmem:[#allocation3 + $0x1a8] sm:$0xff] }
 0xa22   :  { %4658 = vmatpush1.bf16.msra.mxu0 %v4597_v30  ;;  %4731 = vmatpush1.bf16.msra.mxu1 %v4599_v31  ;;  %v10946_v30 = vld [vmem:[#allocation3 + $0x1b8] sm:$0xff]  ;;  %v10952_v31 = vld [vmem:[#allocation3 + $0x1a0] sm:$0xff] }
 0xa23   :  { %4659 = vmatprep.subr.bf16.mxu0 %v4602_v32  ;;  %4732 = vmatprep.subr.bf16.mxu1 %v4604_v29  ;;  %v10954_v32 = vld [vmem:[#allocation3 + $0x1b0] sm:$0xff]  ;;  %v10956_v29 = vld [vmem:[#allocation3 + $0x1c8] sm:$0xff] }
 0xa24   :  { %12486 = vst [vmem:[#allocation41_spill] sm:$0xff] %v10956_v29 }
 0xa26   :  { %4660 = vmatpush1.bf16.msra.mxu0 %v4601_v6  ;;  %4733 = vmatpush1.bf16.msra.mxu1 %v4603_v36  ;;  %v10958_v6 = vld [vmem:[#allocation3 + $0x1d8] sm:$0xff]  ;;  %v10964_v36 = vld [vmem:[#allocation3 + $0x1c0] sm:$0xff] }
 0xa27   :  { %4661 = vmatprep.subr.bf16.mxu0 %v4606_v51  ;;  %4734 = vmatprep.subr.bf16.mxu1 %v4608_v38  ;;  %v10966_v51 = vld [vmem:[#allocation3 + $0x1d0] sm:$0xff]  ;;  %v10968_v38 = vld [vmem:[#allocation3 + $0x1e8] sm:$0xff] }
 0xa2a   :  { %4662 = vmatpush1.bf16.msra.mxu0 %v4605_v25  ;;  %4735 = vmatpush1.bf16.msra.mxu1 %v4607_v60  ;;  %v10970_v25 = vld [vmem:[#allocation3 + $0x1f8] sm:$0xff]  ;;  %v10976_v60 = vld [vmem:[#allocation3 + $0x1e0] sm:$0xff] }
 0xa2b   :  { %4842 = vmatprep.subr.bf16.mxu0 %v10770_v17  ;;  %4883 = vmatprep.subr.bf16.mxu1 %v10772_v48 }
 0xa2d   :  { %4664 = vmatmul.mubr.bf16.vlgmr.msra.gmra.mrb[108].mxu0 %v12451_v10  ;;  %4737 = vmatmul.mubr.bf16.vlgmr.msra.gmra.mrb[116].mxu1 %v12451_v10  ;;  %v10804_v10 = vld [vmem:[#allocation3 + $0x40] sm:$0xff] }
 0xa2e   :  { %4843 = vmatpush1.bf16.msra.mxu0 %v10776_v13  ;;  %4884 = vmatpush1.bf16.msra.mxu1 %v10778_v35  ;;  %12462 = vst [vmem:[#allocation94_spill] sm:$0xff] %v10804_v10 }
 0xa2f   :  { %4844 = vmatprep.subr.bf16.mxu0 %v10780_v9  ;;  %4885 = vmatprep.subr.bf16.mxu1 %v10782_v16 }
 0xa30   :  { %4673 = vmatprep.mubr.bf16.mxu0 %v10514_v62  ;;  %4746 = vmatprep.mubr.bf16.mxu1 %v10514_v62  ;;  %v10818_v62 = vld [vmem:[#allocation3 + $0x60] sm:$0xff] }
 0xa31   :  { %12466 = vst [vmem:[#allocation61_spill] sm:$0xff] %v10818_v62 }
 0xa32   :  { %4845 = vmatpush1.bf16.msra.mxu0 %v10790_v55  ;;  %4886 = vmatpush1.bf16.msra.mxu1 %v10792_v52 }
 0xa33   :  { %4846 = vmatprep.subr.bf16.mxu0 %v10796_v1  ;;  %4887 = vmatprep.subr.bf16.mxu1 %v10798_v4 }
 0xa35   :  { %4674 = vmatmul.mubr.bf16.gmra.mrb[112].mxu0 %v12452_v12  ;;  %4747 = vmatmul.mubr.bf16.gmra.mrb[120].mxu1 %v12452_v12  ;;  %v10832_v12 = vld [vmem:[#allocation3 + $0x80] sm:$0xff] }
 0xa36   :  { %4847 = vmatpush1.bf16.msra.mxu0 %v10804_v10  ;;  %4888 = vmatpush1.bf16.msra.mxu1 %v10806_v45  ;;  %12470 = vst [vmem:[#allocation111_spill] sm:$0xff] %v10832_v12 }
 0xa37   :  { %4848 = vmatprep.subr.bf16.mxu0 %v10808_v15  ;;  %4889 = vmatprep.subr.bf16.mxu1 %v10810_v34 }
 0xa38   :  { %4683 = vmatprep.mubr.bf16.mxu0 %v12453_v49  ;;  %4756 = vmatprep.mubr.bf16.mxu1 %v12453_v49  ;;  %v10846_v49 = vld [vmem:[#allocation3 + $0xa0] sm:$0xff] }
 0xa39   :  { %12474 = vst [vmem:[#allocation70_spill] sm:$0xff] %v10846_v49 }
 0xa3a   :  { %4849 = vmatpush1.bf16.msra.mxu0 %v10818_v62  ;;  %4890 = vmatpush1.bf16.msra.mxu1 %v10820_v5 }
 0xa3b   :  { %4850 = vmatprep.subr.bf16.mxu0 %v10824_v7  ;;  %4891 = vmatprep.subr.bf16.mxu1 %v10826_v22 }
 0xa3d   :  { %4684 = vmatmul.mubr.bf16.gmra.mrb[116].mxu0 %v10475_v63  ;;  %4757 = vmatmul.mubr.bf16.gmra.mrb[124].mxu1 %v10475_v63  ;;  %v10860_v63 = vld [vmem:[#allocation3 + $0xc0] sm:$0xff] }
 0xa3e   :  { %4851 = vmatpush1.bf16.msra.mxu0 %v10832_v12  ;;  %4892 = vmatpush1.bf16.msra.mxu1 %v10834_v21  ;;  %12478 = vst [vmem:[#allocation71_spill] sm:$0xff] %v10860_v63 }
 0xa3f   :  { %4852 = vmatprep.subr.bf16.mxu0 %v10836_v19  ;;  %4893 = vmatprep.subr.bf16.mxu1 %v10838_v33 }
 0xa40   :  { %4693 = vmatprep.mubr.bf16.mxu0 %v12454_v61  ;;  %4766 = vmatprep.mubr.bf16.mxu1 %v12454_v61  ;;  %v10874_v61 = vld [vmem:[#allocation3 + $0xe0] sm:$0xff] }
 0xa41   :  { %12482 = vst [vmem:[#allocation106_spill] sm:$0xff] %v10874_v61 }
 0xa42   :  { %4853 = vmatpush1.bf16.msra.mxu0 %v10846_v49  ;;  %4894 = vmatpush1.bf16.msra.mxu1 %v10848_v2 }
 0xa43   :  { %4854 = vmatprep.subr.bf16.mxu0 %v10852_v56  ;;  %4895 = vmatprep.subr.bf16.mxu1 %v10854_v3 }
 0xa45   :  { %4694 = vmatmul.mubr.bf16.gmra.mrb[120].mxu0 %v10746_v44  ;;  %4767 = vmatmul.mubr.bf16.gmra.mrb[128].mxu1 %v10746_v44  ;;  %v10888_v44 = vld [vmem:[#allocation3 + $0x100] sm:$0xff] }
 0xa46   :  { %4855 = vmatpush1.bf16.msra.mxu0 %v10860_v63  ;;  %4896 = vmatpush1.bf16.msra.mxu1 %v10862_v20 }
 0xa47   :  { %4856 = vmatprep.subr.bf16.mxu0 %v10864_v57  ;;  %4897 = vmatprep.subr.bf16.mxu1 %v10866_v28 }
 0xa48   :  { %4874 = vmatprep.mubr.bf16.mxu0 %v12218_v24  ;;  %4915 = vmatprep.mubr.bf16.mxu1 %v12218_v24 }
 0xa4a   :  { %4857 = vmatpush1.bf16.msra.mxu0 %v10874_v61  ;;  %4898 = vmatpush1.bf16.msra.mxu1 %v10876_v58 }
 0xa4b   :  { %4946 = vmatprep.subr.bf16.mxu0 %v10880_v23  ;;  %4987 = vmatprep.subr.bf16.mxu1 %v10882_v37 }
 0xa4d   :  { %4875 = vmatmul.mubr.bf16.vlgmr.msra.gmra.mrb[124].mxu0 %v12218_v24  ;;  %4916 = vmatmul.mubr.bf16.vlgmr.msra.gmra.mrb[132].mxu1 %v12218_v24 }
 0xa4e   :  { %4947 = vmatpush1.bf16.msra.mxu0 %v10888_v44  ;;  %4988 = vmatpush1.bf16.msra.mxu1 %v10890_v8 }
 0xa4f   :  { %4948 = vmatprep.subr.bf16.mxu0 %v10892_v43  ;;  %4989 = vmatprep.subr.bf16.mxu1 %v10894_v53 }
 0xa50   :  { %4978 = vmatprep.mubr.bf16.mxu0 %v12218_v24  ;;  %5019 = vmatprep.mubr.bf16.mxu1 %v12218_v24 }
 0xa52   :  { %4949 = vmatpush1.bf16.msra.mxu0 %v10902_v39  ;;  %4990 = vmatpush1.bf16.msra.mxu1 %v10904_v47 }
 0xa53   :  { %4950 = vmatprep.subr.bf16.mxu0 %v10906_v59  ;;  %4991 = vmatprep.subr.bf16.mxu1 %v10908_v41 }
 0xa56   :  { %4951 = vmatpush1.bf16.msra.mxu0 %v10916_v46  ;;  %4992 = vmatpush1.bf16.msra.mxu1 %v10918_v50 }
 0xa57   :  { %4952 = vmatprep.subr.bf16.mxu0 %v10920_v54  ;;  %4993 = vmatprep.subr.bf16.mxu1 %v10922_v42 }
 0xa5a   :  { %4953 = vmatpush1.bf16.msra.mxu0 %v10928_v40  ;;  %4994 = vmatpush1.bf16.msra.mxu1 %v10930_v27 }
 0xa5b   :  { %4954 = vmatprep.subr.bf16.mxu0 %v10932_v14  ;;  %4995 = vmatprep.subr.bf16.mxu1 %v10934_v11 }
 0xa5e   :  { %4955 = vmatpush1.bf16.msra.mxu0 %v10940_v0  ;;  %4996 = vmatpush1.bf16.msra.mxu1 %v10942_v18 }
 0xa5f   :  { %4956 = vmatprep.subr.bf16.mxu0 %v10944_v26  ;;  %4997 = vmatprep.subr.bf16.mxu1 %v10946_v30 }
 0xa62   :  { %4957 = vmatpush1.bf16.msra.mxu0 %v10952_v31  ;;  %4998 = vmatpush1.bf16.msra.mxu1 %v10954_v32 }
 0xa63   :  { %4958 = vmatprep.subr.bf16.mxu0 %v10956_v29  ;;  %4999 = vmatprep.subr.bf16.mxu1 %v10958_v6  ;;  %v10978_v29 = vld [vmem:[#allocation3 + $0x1f0] sm:$0xff] }
 0xa66   :  { %4959 = vmatpush1.bf16.msra.mxu0 %v10964_v36  ;;  %5000 = vmatpush1.bf16.msra.mxu1 %v10966_v51 }
 0xa67   :  { %4960 = vmatprep.subr.bf16.mxu0 %v10968_v38  ;;  %5001 = vmatprep.subr.bf16.mxu1 %v10970_v25 }
 0xa6a   :  { %4961 = vmatpush1.bf16.msra.mxu0 %v10976_v60  ;;  %5002 = vmatpush1.bf16.msra.mxu1 %v10978_v29 }
 0xa6b   :  { %5051 = vmatprep.subr.bf16.mxu0 %v10770_v17  ;;  %5092 = vmatprep.subr.bf16.mxu1 %v10772_v48 }
 0xa6d   :  { %4979 = vmatmul.mubr.bf16.vlgmr.msra.gmra.mrb[128].mxu0 %v12218_v24  ;;  %5020 = vmatmul.mubr.bf16.vlgmr.msra.gmra.mrb[136].mxu1 %v12218_v24 }
 0xa6e   :  { %5052 = vmatpush1.bf16.msra.mxu0 %v10776_v13  ;;  %5093 = vmatpush1.bf16.msra.mxu1 %v10778_v35 }
 0xa6f   :  { %5053 = vmatprep.subr.bf16.mxu0 %v10780_v9  ;;  %5094 = vmatprep.subr.bf16.mxu1 %v10782_v16 }
 0xa70   :  { %5083 = vmatprep.mubr.bf16.mxu0 %v12218_v24  ;;  %5124 = vmatprep.mubr.bf16.mxu1 %v12218_v24 }
 0xa72   :  { %5054 = vmatpush1.bf16.msra.mxu0 %v10790_v55  ;;  %5095 = vmatpush1.bf16.msra.mxu1 %v10792_v52 }
 0xa73   :  { %5055 = vmatprep.subr.bf16.mxu0 %v10796_v1  ;;  %5096 = vmatprep.subr.bf16.mxu1 %v10798_v4 }
 0xa76   :  { %5056 = vmatpush1.bf16.msra.mxu0 %v10804_v10  ;;  %5097 = vmatpush1.bf16.msra.mxu1 %v10806_v45 }
 0xa77   :  { %5057 = vmatprep.subr.bf16.mxu0 %v10808_v15  ;;  %5098 = vmatprep.subr.bf16.mxu1 %v10810_v34 }
 0xa7a   :  { %5058 = vmatpush1.bf16.msra.mxu0 %v10818_v62  ;;  %5099 = vmatpush1.bf16.msra.mxu1 %v10820_v5 }
 0xa7b   :  { %5059 = vmatprep.subr.bf16.mxu0 %v10824_v7  ;;  %5100 = vmatprep.subr.bf16.mxu1 %v10826_v22 }
 0xa7e   :  { %5060 = vmatpush1.bf16.msra.mxu0 %v10832_v12  ;;  %5101 = vmatpush1.bf16.msra.mxu1 %v10834_v21 }
 0xa7f   :  { %5061 = vmatprep.subr.bf16.mxu0 %v10836_v19  ;;  %5102 = vmatprep.subr.bf16.mxu1 %v10838_v33 }
 0xa82   :  { %5062 = vmatpush1.bf16.msra.mxu0 %v10846_v49  ;;  %5103 = vmatpush1.bf16.msra.mxu1 %v10848_v2  ;;  %v12490_v49 = vld [vmem:[#allocation55_spill] sm:$0xff] }
 0xa83   :  { %5063 = vmatprep.subr.bf16.mxu0 %v10852_v56  ;;  %5104 = vmatprep.subr.bf16.mxu1 %v10854_v3  ;;  %v4376_v3 = vld [vmem:[%s11951_s7] sm:$0xf]  ;;  %v12487_v56 = vld [vmem:[#allocation54_spill] sm:$0xff] }
 0xa84   :  { %v11041_v33 = vrot.slane %v4376_v3, %v12490_v49 }
 0xa86   :  { %5064 = vmatpush1.bf16.msra.mxu0 %v10860_v63  ;;  %5105 = vmatpush1.bf16.msra.mxu1 %v10862_v20  ;;  %v11024_v63 = vrot.slane %v4376_v3, %v12487_v56  ;;  %v12488_v20 = vld [vmem:[#allocation57_spill] sm:$0xff] }
 0xa87   :  { %5065 = vmatprep.subr.bf16.mxu0 %v10864_v57  ;;  %5106 = vmatprep.subr.bf16.mxu1 %v10866_v28  ;;  %v11027_v2 = vrot.slane %v4376_v3, %v12488_v20 }
 0xa8a   :  { %5066 = vmatpush1.bf16.msra.mxu0 %v10874_v61  ;;  %5107 = vmatpush1.bf16.msra.mxu1 %v10876_v58  ;;  %v12489_v61 = vld [vmem:[#allocation59_spill] sm:$0xff] }
 0xa8b   :  { %5156 = vmatprep.subr.bf16.mxu0 %v10880_v23  ;;  %5197 = vmatprep.subr.bf16.mxu1 %v10882_v37  ;;  %v11034_v58 = vrot.slane %v4376_v3, %v12489_v61 }
 0xac0   :  { %v11029_v57 = vpop.f32.mrb[92].mxu0  ;;  %v11031_v28 = vpop.f32.mrb[100].mxu1 }
 0xac1   :  { %v11036_v23 = vpop.f32.mrb[93].mxu0  ;;  %v11038_v37 = vpop.f32.mrb[101].mxu1  ;;  %v4433_v4 = vadd.f32 %v11029_v57, %v11024_v63 }
 0xac2   :  { %v4436_v19 = vpop.f32.mrb[94].mxu0  ;;  %v4509_v21 = vpop.f32.mrb[102].mxu1 }
 0xac3   :  { %v11044_v12 = vadd.f32 %v4436_v19, %v11024_v63  ;;  %v4438_v22 = vpop.f32.mrb[95].mxu0  ;;  %v11047_v7 = vadd.f32 %v4509_v21, %v11027_v2  ;;  %v4511_v5 = vpop.f32.mrb[103].mxu1 }
 0xac4   :  { %v11050_v62 = vadd.f32 %v4438_v22, %v11041_v33  ;;  %v11053_v34 = vadd.f32 %v4511_v5, %v11034_v58 }
 0xac5   :  { %12491 = vst [vmem:[#allocation31_spill] sm:$0xff] %v11044_v12  ;;  %12492 = vst [vmem:[#allocation43_spill] sm:$0xff] %v11047_v7 }
 0xac6   :  { %12493 = vst [vmem:[#allocation32_spill] sm:$0xff] %v11050_v62  ;;  %12494 = vst [vmem:[#allocation44_spill] sm:$0xff] %v11053_v34 }
 0xac8   :  { %v4442_v15 = vpop.f32.mrb[96].mxu0  ;;  %v4515_v45 = vpop.f32.mrb[104].mxu1 }
 0xac9   :  { %v11056_v3 = vadd.f32 %v4442_v15, %v11024_v63  ;;  %v4444_v10 = vpop.f32.mrb[97].mxu0  ;;  %v11059_v19 = vadd.f32 %v4515_v45, %v11027_v2  ;;  %v4517_v12 = vpop.f32.mrb[105].mxu1 }
 0xaca   :  { %v11062_v21 = vadd.f32 %v4444_v10, %v11041_v33  ;;  %v4446_v7 = vpop.f32.mrb[98].mxu0  ;;  %v11065_v22 = vadd.f32 %v4517_v12, %v11034_v58  ;;  %v4519_v62 = vpop.f32.mrb[106].mxu1 }
 0xacb   :  { %12495 = vst [vmem:[#allocation33_spill] sm:$0xff] %v11056_v3  ;;  %12496 = vst [vmem:[#allocation46_spill] sm:$0xff] %v11059_v19  ;;  %v11068_v5 = vadd.f32 %v4446_v7, %v11024_v63  ;;  %v4448_v34 = vpop.f32.mrb[99].mxu0  ;;  %v11071_v15 = vadd.f32 %v4519_v62, %v11027_v2  ;;  %v4521_v3 = vpop.f32.mrb[107].mxu1 }
 0xacc   :  { %12497 = vst [vmem:[#allocation34_spill] sm:$0xff] %v11062_v21  ;;  %12498 = vst [vmem:[#allocation47_spill] sm:$0xff] %v11065_v22  ;;  %v11074_v45 = vadd.f32 %v4448_v34, %v11041_v33  ;;  %v11077_v19 = vadd.f32 %v4521_v3, %v11034_v58 }
 0xacd   :  { %12499 = vst [vmem:[#allocation35_spill] sm:$0xff] %v11068_v5  ;;  %12500 = vst [vmem:[#allocation48_spill] sm:$0xff] %v11071_v15 }
 0xace   :  { %12501 = vst [vmem:[#allocation36_spill] sm:$0xff] %v11074_v45  ;;  %12502 = vst [vmem:[#allocation49_spill] sm:$0xff] %v11077_v19 }
 0xad0   :  { %v4452_v10 = vpop.f32.mrb[100].mxu0  ;;  %v4525_v21 = vpop.f32.mrb[108].mxu1 }
 0xad1   :  { %v11080_v12 = vadd.f32 %v4452_v10, %v11024_v63  ;;  %v4454_v22 = vpop.f32.mrb[101].mxu0  ;;  %v11083_v7 = vadd.f32 %v4525_v21, %v11027_v2  ;;  %v4527_v5 = vpop.f32.mrb[109].mxu1 }
 0xad2   :  { %v11086_v62 = vadd.f32 %v4454_v22, %v11041_v33  ;;  %v4456_v15 = vpop.f32.mrb[102].mxu0  ;;  %v11089_v34 = vadd.f32 %v4527_v5, %v11034_v58  ;;  %v4529_v45 = vpop.f32.mrb[110].mxu1 }
 0xad3   :  { %12503 = vst [vmem:[#allocation38_spill] sm:$0xff] %v11080_v12  ;;  %12504 = vst [vmem:[#allocation50_spill] sm:$0xff] %v11083_v7  ;;  %v11092_v3 = vadd.f32 %v4456_v15, %v11024_v63  ;;  %v4458_v19 = vpop.f32.mrb[103].mxu0  ;;  %v11095_v10 = vadd.f32 %v4529_v45, %v11027_v2  ;;  %v4531_v12 = vpop.f32.mrb[111].mxu1 }
 0xad4   :  { %12505 = vst [vmem:[#allocation40_spill] sm:$0xff] %v11086_v62  ;;  %12506 = vst [vmem:[#allocation51_spill] sm:$0xff] %v11089_v34  ;;  %v11098_v21 = vadd.f32 %v4458_v19, %v11041_v33  ;;  %v11101_v7 = vadd.f32 %v4531_v12, %v11034_v58 }
 0xad5   :  { %12507 = vst [vmem:[#allocation42_spill] sm:$0xff] %v11092_v3  ;;  %12508 = vst [vmem:[#allocation52_spill] sm:$0xff] %v11095_v10 }
 0xad6   :  { %12509 = vst [vmem:[#allocation45_spill] sm:$0xff] %v11098_v21  ;;  %12510 = vst [vmem:[#allocation53_spill] sm:$0xff] %v11101_v7 }
 0xad8   :  { %v4462_v22 = vpop.f32.mrb[104].mxu0  ;;  %v4535_v62 = vpop.f32.mrb[112].mxu1 }
 0xad9   :  { %v11104_v5 = vadd.f32 %v4462_v22, %v11024_v63  ;;  %v4464_v34 = vpop.f32.mrb[105].mxu0  ;;  %v11107_v15 = vadd.f32 %v4535_v62, %v11027_v2  ;;  %v4537_v3 = vpop.f32.mrb[113].mxu1 }
 0xada   :  { %v11110_v45 = vadd.f32 %v4464_v34, %v11041_v33  ;;  %v4466_v10 = vpop.f32.mrb[106].mxu0  ;;  %v11113_v19 = vadd.f32 %v4537_v3, %v11034_v58  ;;  %v4539_v21 = vpop.f32.mrb[114].mxu1  ;;  %v4609_v34 = vld [vmem:[%s11952_s8] sm:$0xf] }
 0xadb   :  { %12511 = vst [vmem:[#allocation74_spill] sm:$0xff] %v11104_v5  ;;  %12512 = vst [vmem:[#allocation82_spill] sm:$0xff] %v11107_v15  ;;  %v11116_v12 = vadd.f32 %v4466_v10, %v11024_v63  ;;  %v4468_v7 = vpop.f32.mrb[107].mxu0  ;;  %v11119_v22 = vadd.f32 %v4539_v21, %v11027_v2  ;;  %v4541_v5 = vpop.f32.mrb[115].mxu1  ;;  %v11131_v3 = vrot.slane %v4609_v34, %v12487_v56 }
 0xadc   :  { %12513 = vst [vmem:[#allocation76_spill] sm:$0xff] %v11110_v45  ;;  %12514 = vst [vmem:[#allocation84_spill] sm:$0xff] %v11113_v19  ;;  %v11122_v62 = vadd.f32 %v4468_v7, %v11041_v33  ;;  %v11125_v15 = vadd.f32 %v4541_v5, %v11034_v58  ;;  %v11134_v10 = vrot.slane %v4609_v34, %v12488_v20 }
 0xadd   :  { %12515 = vst [vmem:[#allocation98_spill] sm:$0xff] %v11116_v12  ;;  %12516 = vst [vmem:[#allocation87_spill] sm:$0xff] %v11119_v22  ;;  %v11137_v21 = vrot.slane %v4609_v34, %v12490_v49  ;;  %v11140_v22 = vrot.slane %v4609_v34, %v12489_v61 }
 0xade   :  { %12517 = vst [vmem:[#allocation102_spill] sm:$0xff] %v11122_v62  ;;  %12518 = vst [vmem:[#allocation89_spill] sm:$0xff] %v11125_v15 }
 0xb00   :  { %v4665_v7 = vpop.f32.mrb[108].mxu0  ;;  %v4738_v62 = vpop.f32.mrb[116].mxu1 }
 0xb01   :  { %v11143_v5 = vadd.f32 %v4665_v7, %v11131_v3  ;;  %v4667_v15 = vpop.f32.mrb[109].mxu0  ;;  %v11146_v12 = vadd.f32 %v4738_v62, %v11134_v10  ;;  %v4740_v56 = vpop.f32.mrb[117].mxu1 }
 0xb02   :  { %v11149_v19 = vadd.f32 %v4667_v15, %v11137_v21  ;;  %v4669_v20 = vpop.f32.mrb[110].mxu0  ;;  %v11152_v49 = vadd.f32 %v4740_v56, %v11140_v22  ;;  %v4742_v45 = vpop.f32.mrb[118].mxu1 }
 0xb03   :  { %12519 = vst [vmem:[#allocation104_spill] sm:$0xff] %v11143_v5  ;;  %12520 = vst [vmem:[#allocation56_spill] sm:$0xff] %v11146_v12  ;;  %v11155_v61 = vadd.f32 %v4669_v20, %v11131_v3  ;;  %v4671_v34 = vpop.f32.mrb[111].mxu0  ;;  %v11158_v7 = vadd.f32 %v4742_v45, %v11134_v10  ;;  %v4744_v5 = vpop.f32.mrb[119].mxu1 }
 0xb04   :  { %12521 = vst [vmem:[#allocation86_spill] sm:$0xff] %v11149_v19  ;;  %12522 = vst [vmem:[#allocation58_spill] sm:$0xff] %v11152_v49  ;;  %v11161_v62 = vadd.f32 %v4671_v34, %v11137_v21  ;;  %v11164_v12 = vadd.f32 %v4744_v5, %v11140_v22 }
 0xb05   :  { %12523 = vst [vmem:[#allocation88_spill] sm:$0xff] %v11155_v61  ;;  %12524 = vst [vmem:[#allocation83_spill] sm:$0xff] %v11158_v7 }
 0xb06   :  { %12525 = vst [vmem:[#allocation99_spill] sm:$0xff] %v11161_v62  ;;  %12526 = vst [vmem:[#allocation85_spill] sm:$0xff] %v11164_v12 }
 0xb08   :  { %v4675_v15 = vpop.f32.mrb[112].mxu0  ;;  %v4748_v19 = vpop.f32.mrb[120].mxu1 }
 0xb09   :  { %v11167_v56 = vadd.f32 %v4675_v15, %v11131_v3  ;;  %v4677_v49 = vpop.f32.mrb[113].mxu0  ;;  %v11170_v20 = vadd.f32 %v4748_v19, %v11134_v10  ;;  %v4750_v61 = vpop.f32.mrb[121].mxu1 }
 0xb0a   :  { %v11173_v45 = vadd.f32 %v4677_v49, %v11137_v21  ;;  %v4679_v7 = vpop.f32.mrb[114].mxu0  ;;  %v11176_v34 = vadd.f32 %v4750_v61, %v11140_v22  ;;  %v4752_v62 = vpop.f32.mrb[122].mxu1 }
 0xb0b   :  { %12527 = vst [vmem:[#allocation101_spill] sm:$0xff] %v11167_v56  ;;  %12528 = vst [vmem:[#allocation60_spill] sm:$0xff] %v11170_v20  ;;  %v11179_v5 = vadd.f32 %v4679_v7, %v11131_v3  ;;  %v4681_v12 = vpop.f32.mrb[115].mxu0  ;;  %v11182_v15 = vadd.f32 %v4752_v62, %v11134_v10  ;;  %v4754_v56 = vpop.f32.mrb[123].mxu1 }
 0xb0c   :  { %12529 = vst [vmem:[#allocation90_spill] sm:$0xff] %v11173_v45  ;;  %12530 = vst [vmem:[#allocation62_spill] sm:$0xff] %v11176_v34  ;;  %v11185_v19 = vadd.f32 %v4681_v12, %v11137_v21  ;;  %v11188_v20 = vadd.f32 %v4754_v56, %v11140_v22 }
 0xb0d   :  { %12531 = vst [vmem:[#allocation92_spill] sm:$0xff] %v11179_v5  ;;  %12532 = vst [vmem:[#allocation79_spill] sm:$0xff] %v11182_v15 }
 0xb0e   :  { %12533 = vst [vmem:[#allocation95_spill] sm:$0xff] %v11185_v19  ;;  %12534 = vst [vmem:[#allocation81_spill] sm:$0xff] %v11188_v20 }
 0xb10   :  { %v4685_v49 = vpop.f32.mrb[116].mxu0  ;;  %v4758_v45 = vpop.f32.mrb[124].mxu1 }
 0xb11   :  { %v11191_v61 = vadd.f32 %v4685_v49, %v11131_v3  ;;  %v4687_v34 = vpop.f32.mrb[117].mxu0  ;;  %v11194_v7 = vadd.f32 %v4758_v45, %v11134_v10  ;;  %v4760_v5 = vpop.f32.mrb[125].mxu1 }
 0xb12   :  { %v11197_v62 = vadd.f32 %v4687_v34, %v11137_v21  ;;  %v4689_v15 = vpop.f32.mrb[118].mxu0  ;;  %v11200_v12 = vadd.f32 %v4760_v5, %v11140_v22  ;;  %v4762_v19 = vpop.f32.mrb[126].mxu1 }
 0xb13   :  { %12535 = vst [vmem:[#allocation97_spill] sm:$0xff] %v11191_v61  ;;  %12536 = vst [vmem:[#allocation28_spill] sm:$0xff] %v11194_v7  ;;  %v11203_v56 = vadd.f32 %v4689_v15, %v11131_v3  ;;  %v4691_v20 = vpop.f32.mrb[119].mxu0  ;;  %v11206_v49 = vadd.f32 %v4762_v19, %v11134_v10  ;;  %v4764_v61 = vpop.f32.mrb[127].mxu1 }
 0xb14   :  { %12537 = vst [vmem:[#allocation65_spill] sm:$0xff] %v11197_v62  ;;  %12538 = vst [vmem:[#allocation73_spill] sm:$0xff] %v11200_v12  ;;  %v11209_v45 = vadd.f32 %v4691_v20, %v11137_v21  ;;  %v11212_v7 = vadd.f32 %v4764_v61, %v11140_v22 }
 0xb15   :  { %12539 = vst [vmem:[#allocation37_spill] sm:$0xff] %v11203_v56  ;;  %12540 = vst [vmem:[#allocation54_spill] sm:$0xff] %v11206_v49 }
 0xb16   :  { %12541 = vst [vmem:[#allocation57_spill] sm:$0xff] %v11209_v45  ;;  %12542 = vst [vmem:[#allocation59_spill] sm:$0xff] %v11212_v7 }
 0xb18   :  { %v4695_v34 = vpop.f32.mrb[120].mxu0  ;;  %v4768_v62 = vpop.f32.mrb[128].mxu1 }
 0xb19   :  { %v11215_v5 = vadd.f32 %v4695_v34, %v11131_v3  ;;  %v4697_v12 = vpop.f32.mrb[121].mxu0  ;;  %v11218_v15 = vadd.f32 %v4768_v62, %v11134_v10  ;;  %v4770_v56 = vpop.f32.mrb[129].mxu1  ;;  %v4506_v34 = vadd.f32 %v11031_v28, %v11027_v2  ;;  %v4435_v62 = vadd.f32 %v11036_v23, %v11041_v33 }
 0xb1a   :  { %v11221_v19 = vadd.f32 %v4697_v12, %v11137_v21  ;;  %v4699_v49 = vpop.f32.mrb[122].mxu0  ;;  %v11224_v20 = vadd.f32 %v4770_v56, %v11140_v22  ;;  %v4772_v45 = vpop.f32.mrb[130].mxu1  ;;  %v4508_v12 = vadd.f32 %v11038_v37, %v11034_v58 }
 0xb1b   :  { %12543 = vst [vmem:[#allocation55_spill] sm:$0xff] %v11215_v5  ;;  %12544 = vst [vmem:[#allocation113_spill] sm:$0xff] %v11218_v15  ;;  %v4701_v61 = vpop.f32.mrb[123].mxu0  ;;  %v4774_v7 = vpop.f32.mrb[131].mxu1 }
 0xb1c   :  { %12545 = vst [vmem:[#allocation114_spill] sm:$0xff] %v11221_v19  ;;  %12546 = vst [vmem:[#allocation115_spill] sm:$0xff] %v11224_v20 }
 0xb20   :  { %v4876_v19 = vpop.f32.mrb[124].mxu0  ;;  %v4917_v15 = vpop.f32.mrb[132].mxu1 }
 0xb21   :  { %v4924_v5 = vadd.f32 %v4876_v19, %v4433_v4  ;;  %v4926_v56 = vadd.f32 %v4917_v15, %v4506_v34  ;;  %v4878_v20 = vpop.f32.mrb[125].mxu0  ;;  %v4919_v1 = vpop.f32.mrb[133].mxu1  ;;  %v4775_v34 = vadd.f32 %v4774_v7, %v11140_v22 }
 0xb22   :  { %v4925_v52 = vadd.f32 %v4878_v20, %v4435_v62  ;;  %v4927_v55 = vadd.f32 %v4919_v1, %v4508_v12  ;;  %v4880_v16 = vpop.f32.mrb[126].mxu0  ;;  %v4921_v9 = vpop.f32.mrb[134].mxu1 }
 0xb23   :  { %v4928_v63 = vmul.f32 0.5, %v4924_v5  ;;  %v4881_v57 = vpop.f32.mrb[127].mxu0  ;;  %v4922_v35 = vpop.f32.mrb[135].mxu1  ;;  %v4930_v33 = vmul.f32 0.5, %v4926_v56  ;;  %v4700_v9 = vadd.f32 %v4699_v49, %v11131_v3  ;;  %v4702_v5 = vadd.f32 %v4701_v61, %v11137_v21 }
 0xb24   :  { %v4929_v2 = vmul.f32 0.5, %v4925_v52 }
 0xb25   :  { %7478 = vtanh.f32 %v4928_v63 }
 0xb26   :  { %7480 = vtanh.f32 %v4929_v2 }
 0xb27   :  { %7482 = vtanh.f32 %v4927_v55  ;;  %v4773_v55 = vadd.f32 %v4772_v45, %v11134_v10 }
 0xb28   :  { %7484 = vtanh.f32 %v4930_v33 }
 0xb2f   :  { %v7479_v28 = vpop.eup %7478 }
 0xb30   :  { %v4934_v58 = vmul.f32 0.5, %v7479_v28  ;;  %v7481_v23 = vpop.eup %7480 }
 0xb31   :  { %v4935_v4 = vmul.f32 0.5, %v7481_v23  ;;  %v7483_v15 = vpop.eup %7482 }
 0xb32   :  { %v4937_v37 = vadd.f32 0.5, %v4934_v58  ;;  %v7485_v35 = vpop.eup %7484 }
 0xb33   :  { %v4938_v19 = vadd.f32 0.5, %v4935_v4  ;;  %v4936_v52 = vmul.f32 0.5, %v7485_v35 }
 0xb34   :  { %v4942_v20 = vmul.f32 %v7483_v15, %v4937_v37 }
 0xb35   :  { %v4941_v1 = vmul.f32 0.0, %v4938_v19  ;;  %v4939_v37 = vadd.f32 0.5, %v4936_v52 }
 0xb37   :  { %v11234_v16 = vadd.f32 %v4942_v20, %v4941_v1 }
 0xb39   :  { %7486 = vtanh.f32 %v11234_v16 }
 0xb40   :  { %v4980_v62 = vpop.f32.mrb[128].mxu0  ;;  %v5021_v12 = vpop.f32.mrb[136].mxu1 }
 0xb41   :  { %v5028_v56 = vadd.f32 %v4980_v62, %v4700_v9  ;;  %v5030_v63 = vadd.f32 %v5021_v12, %v4773_v55  ;;  %v4982_v57 = vpop.f32.mrb[129].mxu0  ;;  %v5023_v2 = vpop.f32.mrb[137].mxu1  ;;  %v12547_v12 = vld [vmem:[#allocation41_spill] sm:$0xff] }
 0xb42   :  { %v5029_v33 = vadd.f32 %v4982_v57, %v4702_v5  ;;  %v5031_v28 = vadd.f32 %v5023_v2, %v4775_v34  ;;  %v4984_v58 = vpop.f32.mrb[130].mxu0  ;;  %v5025_v23 = vpop.f32.mrb[138].mxu1 }
 0xb43   :  { %v5032_v4 = vmul.f32 0.5, %v5028_v56  ;;  %v4985_v3 = vpop.f32.mrb[131].mxu0  ;;  %v5026_v49 = vpop.f32.mrb[139].mxu1  ;;  %v5034_v7 = vmul.f32 0.5, %v5030_v63  ;;  %v12550_v58 = vld [vmem:[#allocation110_spill] sm:$0xff] }
 0xb44   :  { %v7487_v10 = vpop.eup %7486  ;;  %v5033_v45 = vmul.f32 0.5, %v5029_v33  ;;  %v12548_v33 = vld [vmem:[#allocation109_spill] sm:$0xff]  ;;  %v12551_v23 = vld [vmem:[#allocation66_spill] sm:$0xff]  ;;  %v12557_v3 = vld [vmem:[#allocation96_spill] sm:$0xff] }
 0xb45   :  { %7488 = vtanh.f32 %v5032_v4  ;;  %v4945_v21 = vmul.f32 %v7487_v10, %v4939_v37  ;;  %v12552_v37 = vld [vmem:[#allocation75_spill] sm:$0xff]  ;;  %v12555_v4 = vld [vmem:[#allocation94_spill] sm:$0xff]  ;;  %v12558_v49 = vld [vmem:[#allocation108_spill] sm:$0xff] }
 0xb46   :  { %7490 = vtanh.f32 %v5033_v45  ;;  %v12559_v10 = vld [vmem:[#allocation61_spill] sm:$0xff]  ;;  %v12560_v45 = vld [vmem:[#allocation67_spill] sm:$0xff] }
 0xb47   :  { %v5050_v22 = vpack.c.bf16 %v4945_v21, %v4945_v21  ;;  %7492 = vtanh.f32 %v5031_v28  ;;  %v12549_v28 = vld [vmem:[#allocation100_spill] sm:$0xff]  ;;  %v12561_v21 = vld [vmem:[#allocation63_spill] sm:$0xff] }
 0xb48   :  { %7494 = vtanh.f32 %v5034_v7  ;;  %v12563_v7 = vld [vmem:[#allocation111_spill] sm:$0xff] }
 0xb49   :  { %5084 = vmatmul.mubr.bf16.vlgmr.msra.gmra.mrb[132].mxu0 %v5050_v22  ;;  %5125 = vmatmul.mubr.bf16.vlgmr.msra.gmra.mrb[140].mxu1 %v5050_v22  ;;  %v12562_v22 = vld [vmem:[#allocation69_spill] sm:$0xff] }
 0xb4a   :  { %5157 = vmatpush1.bf16.msra.mxu0 %v10888_v44  ;;  %5198 = vmatpush1.bf16.msra.mxu1 %v10890_v8 }
 0xb4b   :  { %5158 = vmatprep.subr.bf16.mxu0 %v10892_v43  ;;  %5199 = vmatprep.subr.bf16.mxu1 %v10894_v53 }
 0xb4c   :  { %5188 = vmatprep.mubr.bf16.mxu0 %v12218_v24  ;;  %5229 = vmatprep.mubr.bf16.mxu1 %v12218_v24 }
 0xb4e   :  { %5159 = vmatpush1.bf16.msra.mxu0 %v10902_v39  ;;  %5200 = vmatpush1.bf16.msra.mxu1 %v10904_v47 }
 0xb4f   :  { %v7489_v61 = vpop.eup %7488  ;;  %5160 = vmatprep.subr.bf16.mxu0 %v10906_v59  ;;  %5201 = vmatprep.subr.bf16.mxu1 %v10908_v41 }
 0xb50   :  { %v5038_v15 = vmul.f32 0.5, %v7489_v61  ;;  %v7491_v19 = vpop.eup %7490  ;;  %v12564_v61 = vld [vmem:[#allocation103_spill] sm:$0xff] }
 0xb51   :  { %v5039_v1 = vmul.f32 0.5, %v7491_v19  ;;  %v7493_v35 = vpop.eup %7492  ;;  %v12566_v19 = vld [vmem:[#allocation64_spill] sm:$0xff] }
 0xb52   :  { %v5041_v20 = vadd.f32 0.5, %v5038_v15  ;;  %5161 = vmatpush1.bf16.msra.mxu0 %v10916_v46  ;;  %5202 = vmatpush1.bf16.msra.mxu1 %v10918_v50  ;;  %v7495_v34 = vpop.eup %7494  ;;  %v12565_v15 = vld [vmem:[#allocation112_spill] sm:$0xff] }
 0xb53   :  { %5162 = vmatprep.subr.bf16.mxu0 %v10920_v54  ;;  %5203 = vmatprep.subr.bf16.mxu1 %v10922_v42  ;;  %v5042_v9 = vadd.f32 0.5, %v5039_v1  ;;  %v5040_v62 = vmul.f32 0.5, %v7495_v34  ;;  %v12568_v1 = vld [vmem:[#allocation78_spill] sm:$0xff]  ;;  %v12573_v34 = vld [vmem:[#allocation105_spill] sm:$0xff] }
 0xb54   :  { %v5046_v55 = vmul.f32 %v7493_v35, %v5041_v20  ;;  %v12567_v20 = vld [vmem:[#allocation70_spill] sm:$0xff]  ;;  %v12569_v35 = vld [vmem:[#allocation72_spill] sm:$0xff] }
 0xb55   :  { %v5045_v52 = vmul.f32 0.0, %v5042_v9  ;;  %v5043_v56 = vadd.f32 0.5, %v5040_v62  ;;  %v12570_v9 = vld [vmem:[#allocation80_spill] sm:$0xff]  ;;  %v12574_v62 = vld [vmem:[#allocation93_spill] sm:$0xff] }
 0xb56   :  { %5163 = vmatpush1.bf16.msra.mxu0 %v10928_v40  ;;  %5204 = vmatpush1.bf16.msra.mxu1 %v10930_v27 }
 0xb57   :  { %5164 = vmatprep.subr.bf16.mxu0 %v10932_v14  ;;  %5205 = vmatprep.subr.bf16.mxu1 %v10934_v11  ;;  %v11259_v5 = vadd.f32 %v5046_v55, %v5045_v52  ;;  %v12571_v55 = vld [vmem:[#allocation71_spill] sm:$0xff] }
 0xb58   :  { %v12572_v52 = vld [vmem:[#allocation91_spill] sm:$0xff] }
 0xb59   :  { %7496 = vtanh.f32 %v11259_v5 }
 0xb5a   :  { %5165 = vmatpush1.bf16.msra.mxu0 %v10940_v0  ;;  %5206 = vmatpush1.bf16.msra.mxu1 %v10942_v18 }
 0xb5b   :  { %5166 = vmatprep.subr.bf16.mxu0 %v10944_v26  ;;  %5207 = vmatprep.subr.bf16.mxu1 %v10946_v30 }
 0xb5e   :  { %5167 = vmatpush1.bf16.msra.mxu0 %v10952_v31  ;;  %5208 = vmatpush1.bf16.msra.mxu1 %v10954_v32 }
 0xb5f   :  { %5168 = vmatprep.subr.bf16.mxu0 %v12547_v12  ;;  %5209 = vmatprep.subr.bf16.mxu1 %v10958_v6 }
 0xb62   :  { %5169 = vmatpush1.bf16.msra.mxu0 %v10964_v36  ;;  %5210 = vmatpush1.bf16.msra.mxu1 %v10966_v51 }
 0xb63   :  { %5170 = vmatprep.subr.bf16.mxu0 %v10968_v38  ;;  %5211 = vmatprep.subr.bf16.mxu1 %v10970_v25  ;;  %v7497_v63 = vpop.eup %7496 }
 0xb64   :  { %v5049_v57 = vmul.f32 %v7497_v63, %v5043_v56  ;;  %v12575_v56 = vld [vmem:[#allocation106_spill] sm:$0xff]  ;;  %v12576_v63 = vld [vmem:[#allocation29_spill] sm:$0xff] }
 0xb66   :  { %5171 = vmatpush1.bf16.msra.mxu0 %v10976_v60  ;;  %5212 = vmatpush1.bf16.msra.mxu1 %v10978_v29  ;;  %v5155_v2 = vpack.c.bf16 %v5049_v57, %v5049_v57  ;;  %v12577_v57 = vld [vmem:[#allocation39_spill] sm:$0xff] }
 0xb67   :  { %5261 = vmatprep.subr.bf16.mxu0 %v10770_v17  ;;  %5302 = vmatprep.subr.bf16.mxu1 %v10772_v48  ;;  %v12553_v17 = vld [vmem:[#allocation68_spill] sm:$0xff]  ;;  %v12554_v48 = vld [vmem:[#allocation77_spill] sm:$0xff] }
 0xb69   :  { %5189 = vmatmul.mubr.bf16.vlgmr.msra.gmra.mrb[136].mxu0 %v5155_v2  ;;  %5230 = vmatmul.mubr.bf16.vlgmr.msra.gmra.mrb[144].mxu1 %v5155_v2  ;;  %v12578_v2 = vld [vmem:[#allocation30_spill] sm:$0xff] }
 0xb6a   :  { %5262 = vmatpush1.bf16.msra.mxu0 %v10776_v13  ;;  %5303 = vmatpush1.bf16.msra.mxu1 %v12548_v33  ;;  %v12556_v13 = vld [vmem:[#allocation107_spill] sm:$0xff] }
 0xb6b   :  { %5263 = vmatprep.subr.bf16.mxu0 %v12549_v28  ;;  %5304 = vmatprep.subr.bf16.mxu1 %v12550_v58  ;;  %v12579_v58 = vld [vmem:[#allocation31_spill] sm:$0xff] }
 0xb6c   :  { %5293 = vmatprep.mubr.bf16.mxu0 %v12218_v24  ;;  %5334 = vmatprep.mubr.bf16.mxu1 %v12218_v24 }
 0xb6e   :  { %5264 = vmatpush1.bf16.msra.mxu0 %v12551_v23  ;;  %5305 = vmatpush1.bf16.msra.mxu1 %v12552_v37  ;;  %v12580_v37 = vld [vmem:[#allocation43_spill] sm:$0xff] }
 0xb6f   :  { %5265 = vmatprep.subr.bf16.mxu0 %v12553_v17  ;;  %5306 = vmatprep.subr.bf16.mxu1 %v12554_v48 }
 0xb72   :  { %5266 = vmatpush1.bf16.msra.mxu0 %v12555_v4  ;;  %5307 = vmatpush1.bf16.msra.mxu1 %v12556_v13  ;;  %v12581_v13 = vld [vmem:[#allocation32_spill] sm:$0xff] }
 0xb73   :  { %5267 = vmatprep.subr.bf16.mxu0 %v12557_v3  ;;  %5308 = vmatprep.subr.bf16.mxu1 %v12558_v49  ;;  %v12582_v49 = vld [vmem:[#allocation44_spill] sm:$0xff] }
 0xb76   :  { %5268 = vmatpush1.bf16.msra.mxu0 %v12559_v10  ;;  %5309 = vmatpush1.bf16.msra.mxu1 %v12560_v45 }
 0xb77   :  { %5269 = vmatprep.subr.bf16.mxu0 %v12561_v21  ;;  %5310 = vmatprep.subr.bf16.mxu1 %v12562_v22 }
 0xb7a   :  { %5270 = vmatpush1.bf16.msra.mxu0 %v12563_v7  ;;  %5311 = vmatpush1.bf16.msra.mxu1 %v12564_v61 }
 0xb7b   :  { %5271 = vmatprep.subr.bf16.mxu0 %v12565_v15  ;;  %5312 = vmatprep.subr.bf16.mxu1 %v12566_v19 }
 0xb7e   :  { %5272 = vmatpush1.bf16.msra.mxu0 %v12567_v20  ;;  %5313 = vmatpush1.bf16.msra.mxu1 %v12568_v1 }
 0xb7f   :  { %5273 = vmatprep.subr.bf16.mxu0 %v12569_v35  ;;  %5314 = vmatprep.subr.bf16.mxu1 %v12570_v9 }
 0xb82   :  { %5274 = vmatpush1.bf16.msra.mxu0 %v12571_v55  ;;  %5315 = vmatpush1.bf16.msra.mxu1 %v12572_v52 }
 0xb83   :  { %5275 = vmatprep.subr.bf16.mxu0 %v12573_v34  ;;  %5316 = vmatprep.subr.bf16.mxu1 %v12574_v62 }
 0xb86   :  { %5276 = vmatpush1.bf16.msra.mxu0 %v12575_v56  ;;  %5317 = vmatpush1.bf16.msra.mxu1 %v12576_v63 }
 0xb87   :  { %5366 = vmatprep.subr.bf16.mxu0 %v12577_v57  ;;  %5407 = vmatprep.subr.bf16.mxu1 %v12578_v2 }
 0xc1c   :  { %v5085_v33 = vpop.f32.mrb[132].mxu0  ;;  %v5126_v28 = vpop.f32.mrb[140].mxu1 }
 0xc1d   :  { %v5133_v23 = vadd.f32 %v5085_v33, %v12579_v58  ;;  %v5135_v17 = vadd.f32 %v5126_v28, %v12580_v37  ;;  %v5087_v48 = vpop.f32.mrb[133].mxu0  ;;  %v5128_v4 = vpop.f32.mrb[141].mxu1  ;;  %v12583_v58 = vld [vmem:[#allocation55_spill] sm:$0xff]  ;;  %v12584_v37 = vld [vmem:[#allocation113_spill] sm:$0xff] }
 0xc1e   :  { %v5134_v3 = vadd.f32 %v5087_v48, %v12581_v13  ;;  %v5136_v10 = vadd.f32 %v5128_v4, %v12582_v49  ;;  %v5089_v45 = vpop.f32.mrb[134].mxu0  ;;  %v5130_v21 = vpop.f32.mrb[142].mxu1  ;;  %v12585_v13 = vld [vmem:[#allocation114_spill] sm:$0xff]  ;;  %v12586_v49 = vld [vmem:[#allocation115_spill] sm:$0xff] }
 0xc1f   :  { %v5137_v22 = vmul.f32 0.5, %v5133_v23  ;;  %v5090_v7 = vpop.f32.mrb[135].mxu0  ;;  %v5131_v61 = vpop.f32.mrb[143].mxu1  ;;  %v5139_v19 = vmul.f32 0.5, %v5135_v17 }
 0xc20   :  { %v5138_v15 = vmul.f32 0.5, %v5134_v3 }
 0xc21   :  { %7498 = vtanh.f32 %v5137_v22 }
 0xc22   :  { %7500 = vtanh.f32 %v5138_v15 }
 0xc23   :  { %7502 = vtanh.f32 %v5136_v10 }
 0xc24   :  { %7504 = vtanh.f32 %v5139_v19 }
 0xc2b   :  { %v7499_v20 = vpop.eup %7498 }
 0xc2c   :  { %v5143_v1 = vmul.f32 0.5, %v7499_v20  ;;  %v7501_v35 = vpop.eup %7500 }
 0xc2d   :  { %v5144_v55 = vmul.f32 0.5, %v7501_v35  ;;  %v7503_v52 = vpop.eup %7502 }
 0xc2e   :  { %v5146_v9 = vadd.f32 0.5, %v5143_v1  ;;  %v7505_v57 = vpop.eup %7504 }
 0xc2f   :  { %v5147_v34 = vadd.f32 0.5, %v5144_v55  ;;  %v5145_v2 = vmul.f32 0.5, %v7505_v57  ;;  %v11425_v57 = vld [vmem:[#allocation3 + $0xb8] sm:$0xff] }
 0xc30   :  { %v5151_v62 = vmul.f32 %v7503_v52, %v5146_v9  ;;  %v11413_v52 = vld [vmem:[#allocation3 + $0x98] sm:$0xff]  ;;  %12598 = vst [vmem:[#allocation108_spill] sm:$0xff] %v11425_v57 }
 0xc31   :  { %v5150_v56 = vmul.f32 %v5147_v34, %v11234_v16  ;;  %v5148_v21 = vadd.f32 0.5, %v5145_v2  ;;  %12594 = vst [vmem:[#allocation77_spill] sm:$0xff] %v11413_v52  ;;  %v11416_v34 = vld [vmem:[#allocation3 + $0x80] sm:$0xff] }
 0xc32   :  { %12595 = vst [vmem:[#allocation94_spill] sm:$0xff] %v11416_v34  ;;  %v11428_v2 = vld [vmem:[#allocation3 + $0xa0] sm:$0xff] }
 0xc33   :  { %v11317_v63 = vadd.f32 %v5151_v62, %v5150_v56  ;;  %v11419_v62 = vld [vmem:[#allocation3 + $0x90] sm:$0xff]  ;;  %v11422_v56 = vld [vmem:[#allocation3 + $0xa8] sm:$0xff]  ;;  %12599 = vst [vmem:[#allocation61_spill] sm:$0xff] %v11428_v2 }
 0xc34   :  { %12596 = vst [vmem:[#allocation107_spill] sm:$0xff] %v11419_v62  ;;  %12597 = vst [vmem:[#allocation96_spill] sm:$0xff] %v11422_v56 }
 0xc35   :  { %7506 = vtanh.f32 %v11317_v63 }
 0xc3c   :  { %v5190_v33 = vpop.f32.mrb[136].mxu0  ;;  %v5231_v28 = vpop.f32.mrb[144].mxu1 }
 0xc3d   :  { %v5238_v23 = vadd.f32 %v5190_v33, %v12583_v58  ;;  %v5240_v17 = vadd.f32 %v5231_v28, %v12584_v37  ;;  %v5192_v48 = vpop.f32.mrb[137].mxu0  ;;  %v5233_v4 = vpop.f32.mrb[145].mxu1  ;;  %v11431_v33 = vld [vmem:[#allocation3 + $0xb0] sm:$0xff]  ;;  %v11434_v28 = vld [vmem:[#allocation3 + $0xc8] sm:$0xff]  ;;  %v11437_v58 = vld [vmem:[#allocation3 + $0xd8] sm:$0xff] }
 0xc3e   :  { %v5239_v3 = vadd.f32 %v5192_v48, %v12585_v13  ;;  %v5241_v10 = vadd.f32 %v5233_v4, %v12586_v49  ;;  %v5194_v45 = vpop.f32.mrb[138].mxu0  ;;  %v5235_v16 = vpop.f32.mrb[146].mxu1  ;;  %12600 = vst [vmem:[#allocation67_spill] sm:$0xff] %v11431_v33  ;;  %12601 = vst [vmem:[#allocation63_spill] sm:$0xff] %v11434_v28  ;;  %v11443_v37 = vld [vmem:[#allocation3 + $0xd0] sm:$0xff]  ;;  %v11449_v48 = vld [vmem:[#allocation3 + $0xf8] sm:$0xff] }
 0xc3f   :  { %v5242_v22 = vmul.f32 0.5, %v5238_v23  ;;  %v5195_v7 = vpop.f32.mrb[139].mxu0  ;;  %v5236_v61 = vpop.f32.mrb[147].mxu1  ;;  %v5244_v35 = vmul.f32 0.5, %v5240_v17  ;;  %12602 = vst [vmem:[#allocation69_spill] sm:$0xff] %v11437_v58  ;;  %v11440_v23 = vld [vmem:[#allocation3 + $0xc0] sm:$0xff] }
 0xc40   :  { %v7507_v15 = vpop.eup %7506  ;;  %v5243_v19 = vmul.f32 0.5, %v5239_v3  ;;  %12603 = vst [vmem:[#allocation111_spill] sm:$0xff] %v11440_v23  ;;  %12604 = vst [vmem:[#allocation103_spill] sm:$0xff] %v11443_v37  ;;  %v11446_v17 = vld [vmem:[#allocation3 + $0xe8] sm:$0xff]  ;;  %v11452_v4 = vld [vmem:[#allocation3 + $0xe0] sm:$0xff] }
 0xc41   :  { %7508 = vtanh.f32 %v5242_v22  ;;  %v5154_v20 = vmul.f32 %v7507_v15, %v5148_v21  ;;  %12605 = vst [vmem:[#allocation112_spill] sm:$0xff] %v11446_v17  ;;  %12606 = vst [vmem:[#allocation64_spill] sm:$0xff] %v11449_v48  ;;  %v11455_v13 = vld [vmem:[#allocation3 + $0xf0] sm:$0xff]  ;;  %v11458_v3 = vld [vmem:[#allocation3 + $0x108] sm:$0xff] }
 0xc42   :  { %7510 = vtanh.f32 %v5243_v19  ;;  %12607 = vst [vmem:[#allocation70_spill] sm:$0xff] %v11452_v4  ;;  %12608 = vst [vmem:[#allocation78_spill] sm:$0xff] %v11455_v13  ;;  %v11461_v49 = vld [vmem:[#allocation3 + $0x118] sm:$0xff]  ;;  %v12611_v16 = vld [vmem:[#allocation33_spill] sm:$0xff] }
 0xc43   :  { %v5260_v1 = vpack.c.bf16 %v5154_v20, %v5154_v20  ;;  %7512 = vtanh.f32 %v5241_v10  ;;  %12609 = vst [vmem:[#allocation72_spill] sm:$0xff] %v11458_v3  ;;  %12610 = vst [vmem:[#allocation80_spill] sm:$0xff] %v11461_v49  ;;  %v12612_v22 = vld [vmem:[#allocation46_spill] sm:$0xff] }
 0xc44   :  { %7514 = vtanh.f32 %v5244_v35  ;;  %v12613_v19 = vld [vmem:[#allocation34_spill] sm:$0xff] }
 0xc45   :  { %5294 = vmatmul.mubr.bf16.vlgmr.msra.gmra.mrb[140].mxu0 %v5260_v1  ;;  %5335 = vmatmul.mubr.bf16.vlgmr.msra.gmra.mrb[148].mxu1 %v5260_v1  ;;  %v12614_v1 = vld [vmem:[#allocation47_spill] sm:$0xff] }
 0xc46   :  { %5367 = vmatpush1.bf16.msra.mxu0 %v10888_v44  ;;  %5408 = vmatpush1.bf16.msra.mxu1 %v10890_v8 }
 0xc47   :  { %5368 = vmatprep.subr.bf16.mxu0 %v10892_v43  ;;  %5409 = vmatprep.subr.bf16.mxu1 %v10894_v53 }
 0xc48   :  { %5398 = vmatprep.mubr.bf16.mxu0 %v12218_v24  ;;  %5439 = vmatprep.mubr.bf16.mxu1 %v12218_v24 }
 0xc4a   :  { %5369 = vmatpush1.bf16.msra.mxu0 %v10902_v39  ;;  %5410 = vmatpush1.bf16.msra.mxu1 %v10904_v47 }
 0xc4b   :  { %v7509_v9 = vpop.eup %7508  ;;  %5370 = vmatprep.subr.bf16.mxu0 %v10906_v59  ;;  %5411 = vmatprep.subr.bf16.mxu1 %v10908_v41 }
 0xc4c   :  { %v5248_v44 = vmul.f32 0.5, %v7509_v9  ;;  %v7511_v8 = vpop.eup %7510 }
 0xc4d   :  { %v5249_v43 = vmul.f32 0.5, %v7511_v8  ;;  %v7513_v53 = vpop.eup %7512 }
 0xc4e   :  { %v5251_v55 = vadd.f32 0.5, %v5248_v44  ;;  %5371 = vmatpush1.bf16.msra.mxu0 %v10916_v46  ;;  %5412 = vmatpush1.bf16.msra.mxu1 %v10918_v50  ;;  %v7515_v46 = vpop.eup %7514 }
 0xc4f   :  { %5372 = vmatprep.subr.bf16.mxu0 %v10920_v54  ;;  %5413 = vmatprep.subr.bf16.mxu1 %v10922_v42  ;;  %v5252_v39 = vadd.f32 0.5, %v5249_v43  ;;  %v5250_v50 = vmul.f32 0.5, %v7515_v46 }
 0xc50   :  { %v5256_v47 = vmul.f32 %v7513_v53, %v5251_v55 }
 0xc51   :  { %v5255_v59 = vmul.f32 %v5252_v39, %v11259_v5  ;;  %v5253_v54 = vadd.f32 0.5, %v5250_v50  ;;  %v11407_v5 = vld [vmem:[#allocation3 + $0x70] sm:$0xff] }
 0xc52   :  { %5373 = vmatpush1.bf16.msra.mxu0 %v10928_v40  ;;  %5414 = vmatpush1.bf16.msra.mxu1 %v10930_v27  ;;  %12592 = vst [vmem:[#allocation75_spill] sm:$0xff] %v11407_v5 }
 0xc53   :  { %5374 = vmatprep.subr.bf16.mxu0 %v10932_v14  ;;  %5415 = vmatprep.subr.bf16.mxu1 %v10934_v11  ;;  %v11343_v41 = vadd.f32 %v5256_v47, %v5255_v59  ;;  %v11360_v14 = vld [vmem:[#allocation3 + $0x8] sm:$0xff]  ;;  %v11363_v11 = vld [vmem:[#allocation3 + $0x18] sm:$0xff] }
 0xc55   :  { %7516 = vtanh.f32 %v11343_v41 }
 0xc56   :  { %5375 = vmatpush1.bf16.msra.mxu0 %v10940_v0  ;;  %5416 = vmatpush1.bf16.msra.mxu1 %v10942_v18  ;;  %v11366_v0 = vld [vmem:[#allocation3] sm:$0xff]  ;;  %v11369_v18 = vld [vmem:[#allocation3 + $0x10] sm:$0xff] }
 0xc57   :  { %5376 = vmatprep.subr.bf16.mxu0 %v10944_v26  ;;  %5417 = vmatprep.subr.bf16.mxu1 %v10946_v30  ;;  %v11372_v26 = vld [vmem:[#allocation3 + $0x28] sm:$0xff]  ;;  %v11375_v30 = vld [vmem:[#allocation3 + $0x38] sm:$0xff] }
 0xc5a   :  { %5377 = vmatpush1.bf16.msra.mxu0 %v10952_v31  ;;  %5418 = vmatpush1.bf16.msra.mxu1 %v10954_v32  ;;  %v11380_v31 = vld [vmem:[#allocation3 + $0x20] sm:$0xff]  ;;  %v11383_v32 = vld [vmem:[#allocation3 + $0x30] sm:$0xff] }
 0xc5b   :  { %5378 = vmatprep.subr.bf16.mxu0 %v12547_v12  ;;  %5419 = vmatprep.subr.bf16.mxu1 %v10958_v6  ;;  %v11389_v6 = vld [vmem:[#allocation3 + $0x58] sm:$0xff]  ;;  %v11410_v12 = vld [vmem:[#allocation3 + $0x88] sm:$0xff] }
 0xc5c   :  { %12593 = vst [vmem:[#allocation68_spill] sm:$0xff] %v11410_v12 }
 0xc5e   :  { %5379 = vmatpush1.bf16.msra.mxu0 %v10964_v36  ;;  %5420 = vmatpush1.bf16.msra.mxu1 %v10966_v51  ;;  %v11392_v36 = vld [vmem:[#allocation3 + $0x40] sm:$0xff]  ;;  %v11395_v51 = vld [vmem:[#allocation3 + $0x50] sm:$0xff] }
 0xc5f   :  { %5380 = vmatprep.subr.bf16.mxu0 %v10968_v38  ;;  %5421 = vmatprep.subr.bf16.mxu1 %v10970_v25  ;;  %v7517_v42 = vpop.eup %7516  ;;  %12587 = vst [vmem:[#allocation41_spill] sm:$0xff] %v11392_v36  ;;  %12588 = vst [vmem:[#allocation109_spill] sm:$0xff] %v11395_v51  ;;  %v11398_v38 = vld [vmem:[#allocation3 + $0x68] sm:$0xff]  ;;  %v11401_v25 = vld [vmem:[#allocation3 + $0x78] sm:$0xff] }
 0xc60   :  { %v5259_v40 = vmul.f32 %v7517_v42, %v5253_v54  ;;  %12589 = vst [vmem:[#allocation100_spill] sm:$0xff] %v11398_v38  ;;  %12590 = vst [vmem:[#allocation110_spill] sm:$0xff] %v11401_v25 }
 0xc62   :  { %5381 = vmatpush1.bf16.msra.mxu0 %v10976_v60  ;;  %5422 = vmatpush1.bf16.msra.mxu1 %v10978_v29  ;;  %v5365_v27 = vpack.c.bf16 %v5259_v40, %v5259_v40  ;;  %v11386_v29 = vld [vmem:[#allocation3 + $0x48] sm:$0xff]  ;;  %v11404_v60 = vld [vmem:[#allocation3 + $0x60] sm:$0xff] }
 0xc63   :  { %5471 = vmatprep.subr.bf16.mxu0 %v11360_v14  ;;  %5512 = vmatprep.subr.bf16.mxu1 %v11363_v11  ;;  %12591 = vst [vmem:[#allocation66_spill] sm:$0xff] %v11404_v60 }
 0xc65   :  { %5399 = vmatmul.mubr.bf16.vlgmr.msra.gmra.mrb[144].mxu0 %v5365_v27  ;;  %5440 = vmatmul.mubr.bf16.vlgmr.msra.gmra.mrb[152].mxu1 %v5365_v27 }
 0xc66   :  { %5472 = vmatpush1.bf16.msra.mxu0 %v11366_v0  ;;  %5513 = vmatpush1.bf16.msra.mxu1 %v11369_v18 }
 0xc67   :  { %5473 = vmatprep.subr.bf16.mxu0 %v11372_v26  ;;  %5514 = vmatprep.subr.bf16.mxu1 %v11375_v30 }
 0xc68   :  { %5503 = vmatprep.mubr.bf16.mxu0 %v12218_v24  ;;  %5544 = vmatprep.mubr.bf16.mxu1 %v12218_v24 }
 0xc6a   :  { %5474 = vmatpush1.bf16.msra.mxu0 %v11380_v31  ;;  %5515 = vmatpush1.bf16.msra.mxu1 %v11383_v32 }
 0xc6b   :  { %5475 = vmatprep.subr.bf16.mxu0 %v11386_v29  ;;  %5516 = vmatprep.subr.bf16.mxu1 %v11389_v6 }
 0xc6e   :  { %5476 = vmatpush1.bf16.msra.mxu0 %v11392_v36  ;;  %5517 = vmatpush1.bf16.msra.mxu1 %v11395_v51 }
 0xc6f   :  { %5477 = vmatprep.subr.bf16.mxu0 %v11398_v38  ;;  %5518 = vmatprep.subr.bf16.mxu1 %v11401_v25 }
 0xc72   :  { %5478 = vmatpush1.bf16.msra.mxu0 %v11404_v60  ;;  %5519 = vmatpush1.bf16.msra.mxu1 %v11407_v5 }
 0xc73   :  { %5479 = vmatprep.subr.bf16.mxu0 %v11410_v12  ;;  %5520 = vmatprep.subr.bf16.mxu1 %v11413_v52 }
 0xc76   :  { %5480 = vmatpush1.bf16.msra.mxu0 %v11416_v34  ;;  %5521 = vmatpush1.bf16.msra.mxu1 %v11419_v62 }
 0xc77   :  { %5481 = vmatprep.subr.bf16.mxu0 %v11422_v56  ;;  %5522 = vmatprep.subr.bf16.mxu1 %v11425_v57 }
 0xc7a   :  { %5482 = vmatpush1.bf16.msra.mxu0 %v11428_v2  ;;  %5523 = vmatpush1.bf16.msra.mxu1 %v11431_v33 }
 0xc7b   :  { %5483 = vmatprep.subr.bf16.mxu0 %v11434_v28  ;;  %5524 = vmatprep.subr.bf16.mxu1 %v11437_v58 }
 0xc7e   :  { %5484 = vmatpush1.bf16.msra.mxu0 %v11440_v23  ;;  %5525 = vmatpush1.bf16.msra.mxu1 %v11443_v37 }
 0xc7f   :  { %5485 = vmatprep.subr.bf16.mxu0 %v11446_v17  ;;  %5526 = vmatprep.subr.bf16.mxu1 %v11449_v48 }
 0xc82   :  { %5486 = vmatpush1.bf16.msra.mxu0 %v11452_v4  ;;  %5527 = vmatpush1.bf16.msra.mxu1 %v11455_v13 }
 0xc83   :  { %5576 = vmatprep.subr.bf16.mxu0 %v11458_v3  ;;  %5617 = vmatprep.subr.bf16.mxu1 %v11461_v49 }
 0xd18   :  { %v5295_v10 = vpop.f32.mrb[140].mxu0  ;;  %v5336_v45 = vpop.f32.mrb[148].mxu1 }
 0xd19   :  { %v5343_v21 = vadd.f32 %v5295_v10, %v12611_v16  ;;  %v5345_v7 = vadd.f32 %v5336_v45, %v12612_v22  ;;  %v5297_v61 = vpop.f32.mrb[141].mxu0  ;;  %v5338_v15 = vpop.f32.mrb[149].mxu1 }
 0xd1a   :  { %v5344_v20 = vadd.f32 %v5297_v61, %v12613_v19  ;;  %v5346_v35 = vadd.f32 %v5338_v15, %v12614_v1  ;;  %v5299_v9 = vpop.f32.mrb[142].mxu0  ;;  %v5340_v44 = vpop.f32.mrb[150].mxu1  ;;  %v12616_v19 = vld [vmem:[#allocation54_spill] sm:$0xff] }
 0xd1b   :  { %v5347_v8 = vmul.f32 0.5, %v5343_v21  ;;  %v5300_v55 = vpop.f32.mrb[143].mxu0  ;;  %v5341_v43 = vpop.f32.mrb[151].mxu1  ;;  %v5349_v39 = vmul.f32 0.5, %v5345_v7  ;;  %v12615_v7 = vld [vmem:[#allocation37_spill] sm:$0xff] }
 0xd1c   :  { %v5348_v53 = vmul.f32 0.5, %v5344_v20  ;;  %v12617_v9 = vld [vmem:[#allocation57_spill] sm:$0xff] }
 0xd1d   :  { %7518 = vtanh.f32 %v5347_v8  ;;  %v12618_v8 = vld [vmem:[#allocation59_spill] sm:$0xff] }
 0xd1e   :  { %7520 = vtanh.f32 %v5348_v53 }
 0xd1f   :  { %7522 = vtanh.f32 %v5346_v35 }
 0xd20   :  { %7524 = vtanh.f32 %v5349_v39 }
 0xd27   :  { %v7519_v47 = vpop.eup %7518 }
 0xd28   :  { %v5353_v59 = vmul.f32 0.5, %v7519_v47  ;;  %v7521_v46 = vpop.eup %7520 }
 0xd29   :  { %v5354_v54 = vmul.f32 0.5, %v7521_v46  ;;  %v7523_v42 = vpop.eup %7522 }
 0xd2a   :  { %v5356_v50 = vadd.f32 0.5, %v5353_v59  ;;  %v7525_v16 = vpop.eup %7524 }
 0xd2b   :  { %v5357_v40 = vadd.f32 0.5, %v5354_v54  ;;  %v5355_v21 = vmul.f32 0.5, %v7525_v16  ;;  %v11485_v16 = vld [vmem:[#allocation3 + $0x138] sm:$0xff] }
 0xd2c   :  { %v5361_v27 = vmul.f32 %v7523_v42, %v5356_v50 }
 0xd2d   :  { %v5360_v10 = vmul.f32 %v5357_v40, %v11317_v63  ;;  %v5358_v53 = vadd.f32 0.5, %v5355_v21  ;;  %v11476_v40 = vld [vmem:[#allocation3 + $0x100] sm:$0xff] }
 0xd2f   :  { %v11469_v45 = vadd.f32 %v5361_v27, %v5360_v10  ;;  %v11479_v27 = vld [vmem:[#allocation3 + $0x110] sm:$0xff]  ;;  %v11482_v10 = vld [vmem:[#allocation3 + $0x128] sm:$0xff] }
 0xd31   :  { %7526 = vtanh.f32 %v11469_v45 }
 0xd38   :  { %v5400_v22 = vpop.f32.mrb[144].mxu0  ;;  %v5441_v61 = vpop.f32.mrb[152].mxu1 }
 0xd39   :  { %v5448_v15 = vadd.f32 %v5400_v22, %v12615_v7  ;;  %v5450_v20 = vadd.f32 %v5441_v61, %v12616_v19  ;;  %v5402_v1 = vpop.f32.mrb[145].mxu0  ;;  %v5443_v35 = vpop.f32.mrb[153].mxu1  ;;  %v11490_v22 = vld [vmem:[#allocation3 + $0x120] sm:$0xff]  ;;  %v11493_v61 = vld [vmem:[#allocation3 + $0x130] sm:$0xff]  ;;  %v11499_v19 = vld [vmem:[#allocation3 + $0x158] sm:$0xff] }
 0xd3a   :  { %v5449_v44 = vadd.f32 %v5402_v1, %v12617_v9  ;;  %v5451_v55 = vadd.f32 %v5443_v35, %v12618_v8  ;;  %v5404_v43 = vpop.f32.mrb[146].mxu0  ;;  %v5445_v63 = vpop.f32.mrb[154].mxu1  ;;  %v11505_v8 = vld [vmem:[#allocation3 + $0x150] sm:$0xff] }
 0xd3b   :  { %v5452_v39 = vmul.f32 0.5, %v5448_v15  ;;  %v5405_v47 = vpop.f32.mrb[147].mxu0  ;;  %v5446_v59 = vpop.f32.mrb[155].mxu1  ;;  %v5454_v21 = vmul.f32 0.5, %v5450_v20  ;;  %v11496_v15 = vld [vmem:[#allocation3 + $0x148] sm:$0xff]  ;;  %v11511_v63 = vld [vmem:[#allocation3 + $0x178] sm:$0xff] }
 0xd3c   :  { %v7527_v46 = vpop.eup %7526  ;;  %v5453_v50 = vmul.f32 0.5, %v5449_v44  ;;  %v11502_v44 = vld [vmem:[#allocation3 + $0x140] sm:$0xff]  ;;  %v11508_v43 = vld [vmem:[#allocation3 + $0x168] sm:$0xff] }
 0xd3d   :  { %7528 = vtanh.f32 %v5452_v39  ;;  %v5364_v54 = vmul.f32 %v7527_v46, %v5358_v53  ;;  %v11515_v59 = vld [vmem:[#allocation3 + $0x160] sm:$0xff]  ;;  %v11518_v46 = vld [vmem:[#allocation3 + $0x170] sm:$0xff] }
 0xd3e   :  { %7530 = vtanh.f32 %v5453_v50  ;;  %v11521_v50 = vld [vmem:[#allocation3 + $0x188] sm:$0xff] }
 0xd3f   :  { %v5470_v42 = vpack.c.bf16 %v5364_v54, %v5364_v54  ;;  %7532 = vtanh.f32 %v5451_v55  ;;  %v11524_v54 = vld [vmem:[#allocation3 + $0x198] sm:$0xff] }
 0xd40   :  { %7534 = vtanh.f32 %v5454_v21  ;;  %v11533_v21 = vld [vmem:[#allocation3 + $0x190] sm:$0xff] }
 0xd41   :  { %5504 = vmatmul.mubr.bf16.vlgmr.msra.gmra.mrb[148].mxu0 %v5470_v42  ;;  %5545 = vmatmul.mubr.bf16.vlgmr.msra.gmra.mrb[156].mxu1 %v5470_v42 }
 0xd42   :  { %5577 = vmatpush1.bf16.msra.mxu0 %v11476_v40  ;;  %5618 = vmatpush1.bf16.msra.mxu1 %v11479_v27 }
 0xd43   :  { %5578 = vmatprep.subr.bf16.mxu0 %v11482_v10  ;;  %5619 = vmatprep.subr.bf16.mxu1 %v11485_v16 }
 0xd44   :  { %5608 = vmatprep.mubr.bf16.mxu0 %v12218_v24  ;;  %5649 = vmatprep.mubr.bf16.mxu1 %v12218_v24 }
 0xd46   :  { %5579 = vmatpush1.bf16.msra.mxu0 %v11490_v22  ;;  %5620 = vmatpush1.bf16.msra.mxu1 %v11493_v61 }
 0xd47   :  { %v7529_v7 = vpop.eup %7528  ;;  %5580 = vmatprep.subr.bf16.mxu0 %v11496_v15  ;;  %5621 = vmatprep.subr.bf16.mxu1 %v11499_v19 }
 0xd48   :  { %v5458_v1 = vmul.f32 0.5, %v7529_v7  ;;  %v7531_v35 = vpop.eup %7530  ;;  %v11536_v7 = vld [vmem:[#allocation3 + $0x1a8] sm:$0xff] }
 0xd49   :  { %v5459_v9 = vmul.f32 0.5, %v7531_v35  ;;  %v7533_v55 = vpop.eup %7532  ;;  %12619 = vst [vmem:[#allocation71_spill] sm:$0xff] %v11536_v7 }
 0xd4a   :  { %v5461_v20 = vadd.f32 0.5, %v5458_v1  ;;  %5581 = vmatpush1.bf16.msra.mxu0 %v11502_v44  ;;  %5622 = vmatpush1.bf16.msra.mxu1 %v11505_v8  ;;  %v11539_v1 = vld [vmem:[#allocation3 + $0x1b8] sm:$0xff]  ;;  %v7535_v35 = vpop.eup %7534 }
 0xd4b   :  { %5582 = vmatprep.subr.bf16.mxu0 %v11508_v43  ;;  %5623 = vmatprep.subr.bf16.mxu1 %v11511_v63  ;;  %v5462_v53 = vadd.f32 0.5, %v5459_v9  ;;  %12620 = vst [vmem:[#allocation91_spill] sm:$0xff] %v11539_v1  ;;  %v11545_v9 = vld [vmem:[#allocation3 + $0x1b0] sm:$0xff] }
 0xd4c   :  { %v5466_v39 = vmul.f32 %v7533_v55, %v5461_v20  ;;  %v11542_v20 = vld [vmem:[#allocation3 + $0x1a0] sm:$0xff]  ;;  %12622 = vst [vmem:[#allocation93_spill] sm:$0xff] %v11545_v9  ;;  %v5460_v55 = vmul.f32 0.5, %v7535_v35  ;;  %v11563_v35 = vld [vmem:[#allocation3 + $0x1f8] sm:$0xff] }
 0xd4d   :  { %v5465_v47 = vmul.f32 %v5462_v53, %v11343_v41  ;;  %v11530_v41 = vld [vmem:[#allocation3 + $0x180] sm:$0xff]  ;;  %12621 = vst [vmem:[#allocation105_spill] sm:$0xff] %v11542_v20  ;;  %v11548_v53 = vld [vmem:[#allocation3 + $0x1c8] sm:$0xff] }
 0xd4e   :  { %5583 = vmatpush1.bf16.msra.mxu0 %v11515_v59  ;;  %5624 = vmatpush1.bf16.msra.mxu1 %v11518_v46  ;;  %12623 = vst [vmem:[#allocation106_spill] sm:$0xff] %v11548_v53 }
 0xd4f   :  { %5584 = vmatprep.subr.bf16.mxu0 %v11521_v50  ;;  %5625 = vmatprep.subr.bf16.mxu1 %v11524_v54  ;;  %v11527_v42 = vadd.f32 %v5466_v39, %v5465_v47  ;;  %v11551_v39 = vld [vmem:[#allocation3 + $0x1d8] sm:$0xff]  ;;  %v11554_v47 = vld [vmem:[#allocation3 + $0x1c0] sm:$0xff] }
 0xd50   :  { %12624 = vst [vmem:[#allocation29_spill] sm:$0xff] %v11551_v39  ;;  %12625 = vst [vmem:[#allocation39_spill] sm:$0xff] %v11554_v47 }
 0xd51   :  { %7536 = vtanh.f32 %v11527_v42 }
 0xd52   :  { %5585 = vmatpush1.bf16.msra.mxu0 %v11530_v41  ;;  %5626 = vmatpush1.bf16.msra.mxu1 %v11533_v21 }
 0xd53   :  { %5586 = vmatprep.subr.bf16.mxu0 %v11536_v7  ;;  %5627 = vmatprep.subr.bf16.mxu1 %v11539_v1  ;;  %v11557_v1 = vld [vmem:[#allocation3 + $0x1d0] sm:$0xff]  ;;  %v11560_v7 = vld [vmem:[#allocation3 + $0x1e8] sm:$0xff] }
 0xd54   :  { %12626 = vst [vmem:[#allocation30_spill] sm:$0xff] %v11557_v1 }
 0xd56   :  { %5587 = vmatpush1.bf16.msra.mxu0 %v11542_v20  ;;  %5628 = vmatpush1.bf16.msra.mxu1 %v11545_v9  ;;  %v5463_v20 = vadd.f32 0.5, %v5460_v55 }
 0xd57   :  { %5588 = vmatprep.subr.bf16.mxu0 %v11548_v53  ;;  %5629 = vmatprep.subr.bf16.mxu1 %v11551_v39  ;;  %v11566_v39 = vld [vmem:[#allocation3 + $0x1e0] sm:$0xff] }
 0xd5a   :  { %5589 = vmatpush1.bf16.msra.mxu0 %v11554_v47  ;;  %5630 = vmatpush1.bf16.msra.mxu1 %v11557_v1  ;;  %v11569_v47 = vld [vmem:[#allocation3 + $0x1f0] sm:$0xff] }
 0xd5b   :  { %5590 = vmatprep.subr.bf16.mxu0 %v11560_v7  ;;  %5631 = vmatprep.subr.bf16.mxu1 %v11563_v35  ;;  %v7537_v53 = vpop.eup %7536 }
 0xd5c   :  { %v5469_v9 = vmul.f32 %v7537_v53, %v5463_v20  ;;  %v12628_v53 = vld [vmem:[#allocation48_spill] sm:$0xff] }
 0xd5e   :  { %5591 = vmatpush1.bf16.msra.mxu0 %v11566_v39  ;;  %5632 = vmatpush1.bf16.msra.mxu1 %v11569_v47  ;;  %v5575_v1 = vpack.c.bf16 %v5469_v9, %v5469_v9  ;;  %v12627_v9 = vld [vmem:[#allocation35_spill] sm:$0xff] }
 0xd5f   :  { %5681 = vmatprep.subr.bf16.mxu0 %v11360_v14  ;;  %5722 = vmatprep.subr.bf16.mxu1 %v11363_v11 }
 0xd61   :  { %5609 = vmatmul.mubr.bf16.vlgmr.msra.gmra.mrb[152].mxu0 %v5575_v1  ;;  %5650 = vmatmul.mubr.bf16.vlgmr.msra.gmra.mrb[160].mxu1 %v5575_v1 }
 0xd62   :  { %5682 = vmatpush1.bf16.msra.mxu0 %v11366_v0  ;;  %5723 = vmatpush1.bf16.msra.mxu1 %v11369_v18 }
 0xd63   :  { %5683 = vmatprep.subr.bf16.mxu0 %v11372_v26  ;;  %5724 = vmatprep.subr.bf16.mxu1 %v11375_v30 }
 0xd64   :  { %5713 = vmatprep.mubr.bf16.mxu0 %v12218_v24  ;;  %5754 = vmatprep.mubr.bf16.mxu1 %v12218_v24 }
 0xd66   :  { %5684 = vmatpush1.bf16.msra.mxu0 %v11380_v31  ;;  %5725 = vmatpush1.bf16.msra.mxu1 %v11383_v32 }
 0xd67   :  { %5685 = vmatprep.subr.bf16.mxu0 %v11386_v29  ;;  %5726 = vmatprep.subr.bf16.mxu1 %v11389_v6 }
 0xd6a   :  { %5686 = vmatpush1.bf16.msra.mxu0 %v11392_v36  ;;  %5727 = vmatpush1.bf16.msra.mxu1 %v11395_v51 }
 0xd6b   :  { %5687 = vmatprep.subr.bf16.mxu0 %v11398_v38  ;;  %5728 = vmatprep.subr.bf16.mxu1 %v11401_v25 }
 0xd6e   :  { %5688 = vmatpush1.bf16.msra.mxu0 %v11404_v60  ;;  %5729 = vmatpush1.bf16.msra.mxu1 %v11407_v5 }
 0xd6f   :  { %5689 = vmatprep.subr.bf16.mxu0 %v11410_v12  ;;  %5730 = vmatprep.subr.bf16.mxu1 %v11413_v52 }
 0xd72   :  { %5690 = vmatpush1.bf16.msra.mxu0 %v11416_v34  ;;  %5731 = vmatpush1.bf16.msra.mxu1 %v11419_v62 }
 0xd73   :  { %5691 = vmatprep.subr.bf16.mxu0 %v11422_v56  ;;  %5732 = vmatprep.subr.bf16.mxu1 %v11425_v57 }
 0xd76   :  { %5692 = vmatpush1.bf16.msra.mxu0 %v11428_v2  ;;  %5733 = vmatpush1.bf16.msra.mxu1 %v11431_v33  ;;  %v12630_v33 = vld [vmem:[#allocation49_spill] sm:$0xff] }
 0xd77   :  { %5693 = vmatprep.subr.bf16.mxu0 %v11434_v28  ;;  %5734 = vmatprep.subr.bf16.mxu1 %v11437_v58  ;;  %v12629_v28 = vld [vmem:[#allocation36_spill] sm:$0xff] }
 0xd7a   :  { %5694 = vmatpush1.bf16.msra.mxu0 %v11440_v23  ;;  %5735 = vmatpush1.bf16.msra.mxu1 %v11443_v37 }
 0xd7b   :  { %5695 = vmatprep.subr.bf16.mxu0 %v11446_v17  ;;  %5736 = vmatprep.subr.bf16.mxu1 %v11449_v48 }
 0xd7e   :  { %5696 = vmatpush1.bf16.msra.mxu0 %v11452_v4  ;;  %5737 = vmatpush1.bf16.msra.mxu1 %v11455_v13 }
 0xd7f   :  { %5786 = vmatprep.subr.bf16.mxu0 %v11458_v3  ;;  %5827 = vmatprep.subr.bf16.mxu1 %v11461_v49 }
 0xe14   :  { %v5505_v1 = vpop.f32.mrb[148].mxu0  ;;  %v5546_v20 = vpop.f32.mrb[156].mxu1 }
 0xe15   :  { %v5553_v55 = vadd.f32 %v5505_v1, %v12627_v9  ;;  %v5555_v23 = vadd.f32 %v5546_v20, %v12628_v53  ;;  %v5507_v58 = vpop.f32.mrb[149].mxu0  ;;  %v5548_v37 = vpop.f32.mrb[157].mxu1 }
 0xe16   :  { %v5554_v17 = vadd.f32 %v5507_v58, %v12629_v28  ;;  %v5556_v48 = vadd.f32 %v5548_v37, %v12630_v33  ;;  %v5509_v2 = vpop.f32.mrb[150].mxu0  ;;  %v5550_v4 = vpop.f32.mrb[158].mxu1 }
 0xe17   :  { %v5557_v57 = vmul.f32 0.5, %v5553_v55  ;;  %v5510_v13 = vpop.f32.mrb[151].mxu0  ;;  %v5551_v56 = vpop.f32.mrb[159].mxu1  ;;  %v5559_v49 = vmul.f32 0.5, %v5555_v23  ;;  %v12632_v23 = vld [vmem:[#allocation97_spill] sm:$0xff] }
 0xe18   :  { %v5558_v3 = vmul.f32 0.5, %v5554_v17 }
 0xe19   :  { %7538 = vtanh.f32 %v5557_v57 }
 0xe1a   :  { %7540 = vtanh.f32 %v5558_v3 }
 0xe1b   :  { %7542 = vtanh.f32 %v5556_v48 }
 0xe1c   :  { %7544 = vtanh.f32 %v5559_v49  ;;  %v12634_v49 = vld [vmem:[#allocation65_spill] sm:$0xff] }
 0xe23   :  { %v7539_v62 = vpop.eup %7538 }
 0xe24   :  { %v5563_v1 = vmul.f32 0.5, %v7539_v62  ;;  %v7541_v9 = vpop.eup %7540  ;;  %v12633_v62 = vld [vmem:[#allocation28_spill] sm:$0xff] }
 0xe25   :  { %v5564_v53 = vmul.f32 0.5, %v7541_v9  ;;  %v7543_v34 = vpop.eup %7542 }
 0xe26   :  { %v5566_v20 = vadd.f32 0.5, %v5563_v1  ;;  %v7545_v56 = vpop.eup %7544  ;;  %v12635_v1 = vld [vmem:[#allocation73_spill] sm:$0xff] }
 0xe27   :  { %v5567_v28 = vadd.f32 0.5, %v5564_v53  ;;  %v5565_v57 = vmul.f32 0.5, %v7545_v56 }
 0xe28   :  { %v5571_v58 = vmul.f32 %v7543_v34, %v5566_v20 }
 0xe29   :  { %v5570_v2 = vmul.f32 %v5567_v28, %v11469_v45  ;;  %v5568_v20 = vadd.f32 0.5, %v5565_v57 }
 0xe2b   :  { %v11613_v33 = vadd.f32 %v5571_v58, %v5570_v2 }
 0xe2d   :  { %12631 = vst [vmem:[#allocation31_spill] sm:$0xff] %v11613_v33  ;;  %7546 = vtanh.f32 %v11613_v33 }
 0xe34   :  { %v5610_v37 = vpop.f32.mrb[152].mxu0  ;;  %v5651_v17 = vpop.f32.mrb[160].mxu1 }
 0xe35   :  { %v5658_v48 = vadd.f32 %v5610_v37, %v12632_v23  ;;  %v5660_v4 = vadd.f32 %v5651_v17, %v12633_v62  ;;  %v5612_v13 = vpop.f32.mrb[153].mxu0  ;;  %v5653_v3 = vpop.f32.mrb[161].mxu1 }
 0xe36   :  { %v5659_v55 = vadd.f32 %v5612_v13, %v12634_v49  ;;  %v5661_v34 = vadd.f32 %v5653_v3, %v12635_v1  ;;  %v5614_v9 = vpop.f32.mrb[154].mxu0  ;;  %v5655_v45 = vpop.f32.mrb[162].mxu1  ;;  %v12636_v1 = vld [vmem:[#allocation71_spill] sm:$0xff] }
 0xe37   :  { %v5662_v53 = vmul.f32 0.5, %v5658_v48  ;;  %v5615_v28 = vpop.f32.mrb[155].mxu0  ;;  %v5656_v58 = vpop.f32.mrb[163].mxu1  ;;  %v5664_v57 = vmul.f32 0.5, %v5660_v4  ;;  %v12638_v9 = vld [vmem:[#allocation105_spill] sm:$0xff] }
 0xe38   :  { %v7547_v2 = vpop.eup %7546  ;;  %v5663_v56 = vmul.f32 0.5, %v5659_v55  ;;  %v12639_v45 = vld [vmem:[#allocation93_spill] sm:$0xff]  ;;  %v12642_v58 = vld [vmem:[#allocation39_spill] sm:$0xff] }
 0xe39   :  { %7548 = vtanh.f32 %v5662_v53  ;;  %v5574_v33 = vmul.f32 %v7547_v2, %v5568_v20  ;;  %v12640_v53 = vld [vmem:[#allocation106_spill] sm:$0xff]  ;;  %v12641_v28 = vld [vmem:[#allocation29_spill] sm:$0xff] }
 0xe3a   :  { %7550 = vtanh.f32 %v5663_v56  ;;  %v12643_v2 = vld [vmem:[#allocation30_spill] sm:$0xff] }
 0xe3b   :  { %v5680_v37 = vpack.c.bf16 %v5574_v33, %v5574_v33  ;;  %7552 = vtanh.f32 %v5661_v34  ;;  %v12637_v34 = vld [vmem:[#allocation91_spill] sm:$0xff] }
 0xe3c   :  { %7554 = vtanh.f32 %v5664_v57 }
 0xe3d   :  { %5714 = vmatmul.mubr.bf16.vlgmr.msra.gmra.mrb[156].mxu0 %v5680_v37  ;;  %5755 = vmatmul.mubr.bf16.vlgmr.msra.gmra.mrb[164].mxu1 %v5680_v37 }
 0xe3e   :  { %5787 = vmatpush1.bf16.msra.mxu0 %v11476_v40  ;;  %5828 = vmatpush1.bf16.msra.mxu1 %v11479_v27 }
 0xe3f   :  { %5788 = vmatprep.subr.bf16.mxu0 %v11482_v10  ;;  %5829 = vmatprep.subr.bf16.mxu1 %v11485_v16 }
 0xe40   :  { %5818 = vmatprep.mubr.bf16.mxu0 %v12218_v24  ;;  %5859 = vmatprep.mubr.bf16.mxu1 %v12218_v24 }
 0xe42   :  { %5789 = vmatpush1.bf16.msra.mxu0 %v11490_v22  ;;  %5830 = vmatpush1.bf16.msra.mxu1 %v11493_v61 }
 0xe43   :  { %v7549_v33 = vpop.eup %7548  ;;  %5790 = vmatprep.subr.bf16.mxu0 %v11496_v15  ;;  %5831 = vmatprep.subr.bf16.mxu1 %v11499_v19 }
 0xe44   :  { %v5668_v17 = vmul.f32 0.5, %v7549_v33  ;;  %v7551_v23 = vpop.eup %7550 }
 0xe45   :  { %v5669_v62 = vmul.f32 0.5, %v7551_v23  ;;  %v7553_v13 = vpop.eup %7552  ;;  %v12645_v23 = vld [vmem:[#allocation107_spill] sm:$0xff] }
 0xe46   :  { %v5671_v48 = vadd.f32 0.5, %v5668_v17  ;;  %5791 = vmatpush1.bf16.msra.mxu0 %v11502_v44  ;;  %5832 = vmatpush1.bf16.msra.mxu1 %v11505_v8  ;;  %v12644_v17 = vld [vmem:[#allocation94_spill] sm:$0xff] }
 0xe47   :  { %5792 = vmatprep.subr.bf16.mxu0 %v11508_v43  ;;  %5833 = vmatprep.subr.bf16.mxu1 %v11511_v63  ;;  %v5672_v4 = vadd.f32 0.5, %v5669_v62  ;;  %v12647_v62 = vld [vmem:[#allocation108_spill] sm:$0xff] }
 0xe48   :  { %v5676_v3 = vmul.f32 %v7553_v13, %v5671_v48  ;;  %v12646_v48 = vld [vmem:[#allocation96_spill] sm:$0xff]  ;;  %v12648_v13 = vld [vmem:[#allocation61_spill] sm:$0xff] }
 0xe49   :  { %v5675_v49 = vmul.f32 %v5672_v4, %v11527_v42  ;;  %v7555_v42 = vpop.eup %7554  ;;  %v12649_v4 = vld [vmem:[#allocation67_spill] sm:$0xff] }
 0xe4a   :  { %5793 = vmatpush1.bf16.msra.mxu0 %v11515_v59  ;;  %5834 = vmatpush1.bf16.msra.mxu1 %v11518_v46  ;;  %v5670_v20 = vmul.f32 0.5, %v7555_v42  ;;  %v12652_v42 = vld [vmem:[#allocation111_spill] sm:$0xff] }
 0xe4b   :  { %5794 = vmatprep.subr.bf16.mxu0 %v11521_v50  ;;  %5835 = vmatprep.subr.bf16.mxu1 %v11524_v54  ;;  %v11639_v55 = vadd.f32 %v5676_v3, %v5675_v49  ;;  %v12650_v3 = vld [vmem:[#allocation63_spill] sm:$0xff]  ;;  %v12651_v49 = vld [vmem:[#allocation69_spill] sm:$0xff] }
 0xe4c   :  { %v5673_v56 = vadd.f32 0.5, %v5670_v20  ;;  %v12653_v20 = vld [vmem:[#allocation103_spill] sm:$0xff] }
 0xe4d   :  { %7556 = vtanh.f32 %v11639_v55 }
 0xe4e   :  { %5795 = vmatpush1.bf16.msra.mxu0 %v11530_v41  ;;  %5836 = vmatpush1.bf16.msra.mxu1 %v11533_v21 }
 0xe4f   :  { %5796 = vmatprep.subr.bf16.mxu0 %v12636_v1  ;;  %5837 = vmatprep.subr.bf16.mxu1 %v12637_v34 }
 0xe52   :  { %5797 = vmatpush1.bf16.msra.mxu0 %v12638_v9  ;;  %5838 = vmatpush1.bf16.msra.mxu1 %v12639_v45 }
 0xe53   :  { %5798 = vmatprep.subr.bf16.mxu0 %v12640_v53  ;;  %5839 = vmatprep.subr.bf16.mxu1 %v12641_v28 }
 0xe56   :  { %5799 = vmatpush1.bf16.msra.mxu0 %v12642_v58  ;;  %5840 = vmatpush1.bf16.msra.mxu1 %v12643_v2 }
 0xe57   :  { %5800 = vmatprep.subr.bf16.mxu0 %v11560_v7  ;;  %5841 = vmatprep.subr.bf16.mxu1 %v11563_v35  ;;  %v7557_v37 = vpop.eup %7556 }
 0xe58   :  { %v5679_v57 = vmul.f32 %v7557_v37, %v5673_v56  ;;  %v12654_v56 = vld [vmem:[#allocation112_spill] sm:$0xff] }
 0xe59   :  { %v12655_v37 = vld [vmem:[#allocation64_spill] sm:$0xff] }
 0xe5a   :  { %5801 = vmatpush1.bf16.msra.mxu0 %v11566_v39  ;;  %5842 = vmatpush1.bf16.msra.mxu1 %v11569_v47  ;;  %v5785_v33 = vpack.c.bf16 %v5679_v57, %v5679_v57  ;;  %v12656_v57 = vld [vmem:[#allocation70_spill] sm:$0xff] }
 0xe5b   :  { %5891 = vmatprep.subr.bf16.mxu0 %v11360_v14  ;;  %5932 = vmatprep.subr.bf16.mxu1 %v11363_v11 }
 0xe5d   :  { %5819 = vmatmul.mubr.bf16.vlgmr.msra.gmra.mrb[160].mxu0 %v5785_v33  ;;  %5860 = vmatmul.mubr.bf16.vlgmr.msra.gmra.mrb[168].mxu1 %v5785_v33  ;;  %v12657_v33 = vld [vmem:[#allocation78_spill] sm:$0xff] }
 0xe5e   :  { %5892 = vmatpush1.bf16.msra.mxu0 %v11366_v0  ;;  %5933 = vmatpush1.bf16.msra.mxu1 %v11369_v18 }
 0xe5f   :  { %5893 = vmatprep.subr.bf16.mxu0 %v11372_v26  ;;  %5934 = vmatprep.subr.bf16.mxu1 %v11375_v30 }
 0xe60   :  { %5923 = vmatprep.mubr.bf16.mxu0 %v12218_v24  ;;  %5964 = vmatprep.mubr.bf16.mxu1 %v12218_v24 }
 0xe62   :  { %5894 = vmatpush1.bf16.msra.mxu0 %v11380_v31  ;;  %5935 = vmatpush1.bf16.msra.mxu1 %v11383_v32 }
 0xe63   :  { %5895 = vmatprep.subr.bf16.mxu0 %v11386_v29  ;;  %5936 = vmatprep.subr.bf16.mxu1 %v11389_v6 }
 0xe66   :  { %5896 = vmatpush1.bf16.msra.mxu0 %v11392_v36  ;;  %5937 = vmatpush1.bf16.msra.mxu1 %v11395_v51 }
 0xe67   :  { %5897 = vmatprep.subr.bf16.mxu0 %v11398_v38  ;;  %5938 = vmatprep.subr.bf16.mxu1 %v11401_v25 }
 0xe6a   :  { %5898 = vmatpush1.bf16.msra.mxu0 %v11404_v60  ;;  %5939 = vmatpush1.bf16.msra.mxu1 %v11407_v5 }
 0xe6b   :  { %5899 = vmatprep.subr.bf16.mxu0 %v11410_v12  ;;  %5940 = vmatprep.subr.bf16.mxu1 %v11413_v52  ;;  %v12662_v52 = vld [vmem:[#allocation40_spill] sm:$0xff]  ;;  %v12663_v12 = vld [vmem:[#allocation51_spill] sm:$0xff] }
 0xe6e   :  { %5900 = vmatpush1.bf16.msra.mxu0 %v12644_v17  ;;  %5941 = vmatpush1.bf16.msra.mxu1 %v12645_v23  ;;  %v12661_v23 = vld [vmem:[#allocation50_spill] sm:$0xff] }
 0xe6f   :  { %5901 = vmatprep.subr.bf16.mxu0 %v12646_v48  ;;  %5942 = vmatprep.subr.bf16.mxu1 %v12647_v62  ;;  %v12658_v62 = vld [vmem:[#allocation72_spill] sm:$0xff]  ;;  %v12660_v48 = vld [vmem:[#allocation38_spill] sm:$0xff] }
 0xe72   :  { %5902 = vmatpush1.bf16.msra.mxu0 %v12648_v13  ;;  %5943 = vmatpush1.bf16.msra.mxu1 %v12649_v4  ;;  %v12659_v13 = vld [vmem:[#allocation80_spill] sm:$0xff] }
 0xe73   :  { %5903 = vmatprep.subr.bf16.mxu0 %v12650_v3  ;;  %5944 = vmatprep.subr.bf16.mxu1 %v12651_v49 }
 0xe76   :  { %5904 = vmatpush1.bf16.msra.mxu0 %v12652_v42  ;;  %5945 = vmatpush1.bf16.msra.mxu1 %v12653_v20 }
 0xe77   :  { %5905 = vmatprep.subr.bf16.mxu0 %v12654_v56  ;;  %5946 = vmatprep.subr.bf16.mxu1 %v12655_v37 }
 0xe7a   :  { %5906 = vmatpush1.bf16.msra.mxu0 %v12656_v57  ;;  %5947 = vmatpush1.bf16.msra.mxu1 %v12657_v33 }
 0xe7b   :  { %5996 = vmatprep.subr.bf16.mxu0 %v12658_v62  ;;  %6037 = vmatprep.subr.bf16.mxu1 %v12659_v13 }
 0xf10   :  { %v5715_v4 = vpop.f32.mrb[156].mxu0  ;;  %v5756_v3 = vpop.f32.mrb[164].mxu1 }
 0xf11   :  { %v5763_v49 = vadd.f32 %v5715_v4, %v12660_v48  ;;  %v5765_v42 = vadd.f32 %v5756_v3, %v12661_v23  ;;  %v5717_v17 = vpop.f32.mrb[157].mxu0  ;;  %v5758_v20 = vpop.f32.mrb[165].mxu1 }
 0xf12   :  { %v5764_v56 = vadd.f32 %v5717_v17, %v12662_v52  ;;  %v5766_v37 = vadd.f32 %v5758_v20, %v12663_v12  ;;  %v5719_v5 = vpop.f32.mrb[158].mxu0  ;;  %v5760_v57 = vpop.f32.mrb[166].mxu1  ;;  %v12664_v12 = vld [vmem:[#allocation31_spill] sm:$0xff] }
 0xf13   :  { %v5767_v60 = vmul.f32 0.5, %v5763_v49  ;;  %v5720_v33 = vpop.f32.mrb[159].mxu0  ;;  %v5761_v25 = vpop.f32.mrb[167].mxu1  ;;  %v5769_v13 = vmul.f32 0.5, %v5765_v42  ;;  %v12666_v42 = vld [vmem:[#allocation92_spill] sm:$0xff] }
 0xf14   :  { %v5768_v62 = vmul.f32 0.5, %v5764_v56  ;;  %v12668_v33 = vld [vmem:[#allocation95_spill] sm:$0xff] }
 0xf15   :  { %7558 = vtanh.f32 %v5767_v60 }
 0xf16   :  { %7560 = vtanh.f32 %v5768_v62 }
 0xf17   :  { %7562 = vtanh.f32 %v5766_v37 }
 0xf18   :  { %7564 = vtanh.f32 %v5769_v13 }
 0xf1f   :  { %v7559_v38 = vpop.eup %7558 }
 0xf20   :  { %v5773_v48 = vmul.f32 0.5, %v7559_v38  ;;  %v7561_v4 = vpop.eup %7560  ;;  %v12667_v38 = vld [vmem:[#allocation79_spill] sm:$0xff] }
 0xf21   :  { %v5774_v3 = vmul.f32 0.5, %v7561_v4  ;;  %v7563_v51 = vpop.eup %7562  ;;  %v12669_v4 = vld [vmem:[#allocation81_spill] sm:$0xff] }
 0xf22   :  { %v5776_v23 = vadd.f32 0.5, %v5773_v48  ;;  %v7565_v25 = vpop.eup %7564 }
 0xf23   :  { %v5777_v52 = vadd.f32 0.5, %v5774_v3  ;;  %v5775_v60 = vmul.f32 0.5, %v7565_v25 }
 0xf24   :  { %v5781_v17 = vmul.f32 %v7563_v51, %v5776_v23 }
 0xf25   :  { %v5780_v5 = vmul.f32 %v5777_v52, %v12664_v12  ;;  %v5778_v52 = vadd.f32 0.5, %v5775_v60 }
 0xf27   :  { %v11697_v20 = vadd.f32 %v5781_v17, %v5780_v5 }
 0xf29   :  { %12665 = vst [vmem:[#allocation43_spill] sm:$0xff] %v11697_v20  ;;  %7566 = vtanh.f32 %v11697_v20 }
 0xf30   :  { %v5820_v62 = vpop.f32.mrb[160].mxu0  ;;  %v5861_v49 = vpop.f32.mrb[168].mxu1 }
 0xf31   :  { %v5868_v56 = vadd.f32 %v5820_v62, %v12666_v42  ;;  %v5870_v37 = vadd.f32 %v5861_v49, %v12667_v38  ;;  %v5822_v57 = vpop.f32.mrb[161].mxu0  ;;  %v5863_v13 = vpop.f32.mrb[169].mxu1 }
 0xf32   :  { %v5869_v48 = vadd.f32 %v5822_v57, %v12668_v33  ;;  %v5871_v51 = vadd.f32 %v5863_v13, %v12669_v4  ;;  %v5824_v23 = vpop.f32.mrb[162].mxu0  ;;  %v5865_v3 = vpop.f32.mrb[170].mxu1 }
 0xf33   :  { %v5872_v17 = vmul.f32 0.5, %v5868_v56  ;;  %v5825_v12 = vpop.f32.mrb[163].mxu0  ;;  %v5866_v5 = vpop.f32.mrb[171].mxu1  ;;  %v5874_v60 = vmul.f32 0.5, %v5870_v37 }
 0xf34   :  { %v7567_v20 = vpop.eup %7566  ;;  %v5873_v25 = vmul.f32 0.5, %v5869_v48  ;;  %v12682_v12 = vld [vmem:[#allocation61_spill] sm:$0xff]  ;;  %v12683_v5 = vld [vmem:[#allocation67_spill] sm:$0xff] }
 0xf35   :  { %7568 = vtanh.f32 %v5872_v17  ;;  %v5784_v36 = vmul.f32 %v7567_v20, %v5778_v52  ;;  %v12676_v52 = vld [vmem:[#allocation68_spill] sm:$0xff] }
 0xf36   :  { %7570 = vtanh.f32 %v5873_v25  ;;  %v12681_v17 = vld [vmem:[#allocation108_spill] sm:$0xff]  ;;  %v12684_v25 = vld [vmem:[#allocation63_spill] sm:$0xff] }
 0xf37   :  { %v5890_v62 = vpack.c.bf16 %v5784_v36, %v5784_v36  ;;  %7572 = vtanh.f32 %v5871_v51 }
 0xf38   :  { %7574 = vtanh.f32 %v5874_v60  ;;  %v12686_v60 = vld [vmem:[#allocation111_spill] sm:$0xff] }
 0xf39   :  { %5924 = vmatmul.mubr.bf16.vlgmr.msra.gmra.mrb[164].mxu0 %v5890_v62  ;;  %5965 = vmatmul.mubr.bf16.vlgmr.msra.gmra.mrb[172].mxu1 %v5890_v62  ;;  %v12685_v62 = vld [vmem:[#allocation69_spill] sm:$0xff] }
 0xf3a   :  { %5997 = vmatpush1.bf16.msra.mxu0 %v11476_v40  ;;  %6038 = vmatpush1.bf16.msra.mxu1 %v11479_v27 }
 0xf3b   :  { %5998 = vmatprep.subr.bf16.mxu0 %v11482_v10  ;;  %6039 = vmatprep.subr.bf16.mxu1 %v11485_v16 }
 0xf3c   :  { %6028 = vmatprep.mubr.bf16.mxu0 %v12218_v24  ;;  %6069 = vmatprep.mubr.bf16.mxu1 %v12218_v24 }
 0xf3e   :  { %5999 = vmatpush1.bf16.msra.mxu0 %v11490_v22  ;;  %6040 = vmatpush1.bf16.msra.mxu1 %v11493_v61 }
 0xf3f   :  { %v7569_v36 = vpop.eup %7568  ;;  %6000 = vmatprep.subr.bf16.mxu0 %v11496_v15  ;;  %6041 = vmatprep.subr.bf16.mxu1 %v11499_v19 }
 0xf40   :  { %v5878_v20 = vmul.f32 0.5, %v7569_v36  ;;  %v7571_v49 = vpop.eup %7570  ;;  %v12687_v36 = vld [vmem:[#allocation103_spill] sm:$0xff] }
 0xf41   :  { %v5879_v56 = vmul.f32 0.5, %v7571_v49  ;;  %v7573_v38 = vpop.eup %7572  ;;  %v12689_v49 = vld [vmem:[#allocation64_spill] sm:$0xff] }
 0xf42   :  { %v5881_v42 = vadd.f32 0.5, %v5878_v20  ;;  %6001 = vmatpush1.bf16.msra.mxu0 %v11502_v44  ;;  %6042 = vmatpush1.bf16.msra.mxu1 %v11505_v8  ;;  %v12688_v20 = vld [vmem:[#allocation112_spill] sm:$0xff] }
 0xf43   :  { %6002 = vmatprep.subr.bf16.mxu0 %v11508_v43  ;;  %6043 = vmatprep.subr.bf16.mxu1 %v11511_v63  ;;  %v5882_v37 = vadd.f32 0.5, %v5879_v56  ;;  %v12691_v56 = vld [vmem:[#allocation78_spill] sm:$0xff] }
 0xf44   :  { %v5886_v57 = vmul.f32 %v7573_v38, %v5881_v42  ;;  %v12690_v42 = vld [vmem:[#allocation70_spill] sm:$0xff]  ;;  %v12692_v38 = vld [vmem:[#allocation72_spill] sm:$0xff] }
 0xf45   :  { %v5885_v13 = vmul.f32 %v5882_v37, %v11639_v55  ;;  %v7575_v55 = vpop.eup %7574  ;;  %v12693_v37 = vld [vmem:[#allocation80_spill] sm:$0xff] }
 0xf46   :  { %6003 = vmatpush1.bf16.msra.mxu0 %v11515_v59  ;;  %6044 = vmatpush1.bf16.msra.mxu1 %v11518_v46  ;;  %v5880_v48 = vmul.f32 0.5, %v7575_v55  ;;  %v12694_v55 = vld [vmem:[#allocation42_spill] sm:$0xff] }
 0xf47   :  { %6004 = vmatprep.subr.bf16.mxu0 %v11521_v50  ;;  %6045 = vmatprep.subr.bf16.mxu1 %v11524_v54  ;;  %v11723_v33 = vadd.f32 %v5886_v57, %v5885_v13 }
 0xf48   :  { %v5883_v4 = vadd.f32 0.5, %v5880_v48 }
 0xf49   :  { %7576 = vtanh.f32 %v11723_v33 }
 0xf4a   :  { %6005 = vmatpush1.bf16.msra.mxu0 %v11530_v41  ;;  %6046 = vmatpush1.bf16.msra.mxu1 %v11533_v21 }
 0xf4b   :  { %6006 = vmatprep.subr.bf16.mxu0 %v12636_v1  ;;  %6047 = vmatprep.subr.bf16.mxu1 %v12637_v34 }
 0xf4e   :  { %6007 = vmatpush1.bf16.msra.mxu0 %v12638_v9  ;;  %6048 = vmatpush1.bf16.msra.mxu1 %v12639_v45 }
 0xf4f   :  { %6008 = vmatprep.subr.bf16.mxu0 %v12640_v53  ;;  %6049 = vmatprep.subr.bf16.mxu1 %v12641_v28 }
 0xf52   :  { %6009 = vmatpush1.bf16.msra.mxu0 %v12642_v58  ;;  %6050 = vmatpush1.bf16.msra.mxu1 %v12643_v2 }
 0xf53   :  { %6010 = vmatprep.subr.bf16.mxu0 %v11560_v7  ;;  %6051 = vmatprep.subr.bf16.mxu1 %v11563_v35  ;;  %v7577_v51 = vpop.eup %7576 }
 0xf54   :  { %v5889_v23 = vmul.f32 %v7577_v51, %v5883_v4  ;;  %v12695_v4 = vld [vmem:[#allocation52_spill] sm:$0xff] }
 0xf56   :  { %6011 = vmatpush1.bf16.msra.mxu0 %v11566_v39  ;;  %6052 = vmatpush1.bf16.msra.mxu1 %v11569_v47  ;;  %v5995_v3 = vpack.c.bf16 %v5889_v23, %v5889_v23 }
 0xf57   :  { %6101 = vmatprep.subr.bf16.mxu0 %v11360_v14  ;;  %6142 = vmatprep.subr.bf16.mxu1 %v11363_v11  ;;  %v12670_v14 = vld [vmem:[#allocation41_spill] sm:$0xff] }
 0xf58   :  { %v12671_v11 = vld [vmem:[#allocation109_spill] sm:$0xff] }
 0xf59   :  { %6029 = vmatmul.mubr.bf16.vlgmr.msra.gmra.mrb[168].mxu0 %v5995_v3  ;;  %6070 = vmatmul.mubr.bf16.vlgmr.msra.gmra.mrb[176].mxu1 %v5995_v3 }
 0xf5a   :  { %6102 = vmatpush1.bf16.msra.mxu0 %v11366_v0  ;;  %6143 = vmatpush1.bf16.msra.mxu1 %v11369_v18  ;;  %v12672_v0 = vld [vmem:[#allocation100_spill] sm:$0xff]  ;;  %v12673_v18 = vld [vmem:[#allocation110_spill] sm:$0xff] }
 0xf5b   :  { %6103 = vmatprep.subr.bf16.mxu0 %v11372_v26  ;;  %6144 = vmatprep.subr.bf16.mxu1 %v11375_v30  ;;  %v12674_v26 = vld [vmem:[#allocation66_spill] sm:$0xff]  ;;  %v12675_v30 = vld [vmem:[#allocation75_spill] sm:$0xff] }
 0xf5c   :  { %6133 = vmatprep.mubr.bf16.mxu0 %v12218_v24  ;;  %6174 = vmatprep.mubr.bf16.mxu1 %v12218_v24 }
 0xf5e   :  { %6104 = vmatpush1.bf16.msra.mxu0 %v11380_v31  ;;  %6145 = vmatpush1.bf16.msra.mxu1 %v11383_v32  ;;  %v12677_v31 = vld [vmem:[#allocation77_spill] sm:$0xff]  ;;  %v12678_v32 = vld [vmem:[#allocation94_spill] sm:$0xff] }
 0xf5f   :  { %6105 = vmatprep.subr.bf16.mxu0 %v11386_v29  ;;  %6146 = vmatprep.subr.bf16.mxu1 %v11389_v6  ;;  %v12679_v29 = vld [vmem:[#allocation107_spill] sm:$0xff]  ;;  %v12680_v6 = vld [vmem:[#allocation96_spill] sm:$0xff] }
 0xf62   :  { %6106 = vmatpush1.bf16.msra.mxu0 %v12670_v14  ;;  %6147 = vmatpush1.bf16.msra.mxu1 %v12671_v11  ;;  %v12696_v14 = vld [vmem:[#allocation45_spill] sm:$0xff] }
 0xf63   :  { %6107 = vmatprep.subr.bf16.mxu0 %v12672_v0  ;;  %6148 = vmatprep.subr.bf16.mxu1 %v12673_v18  ;;  %v12697_v0 = vld [vmem:[#allocation53_spill] sm:$0xff] }
 0xf66   :  { %6108 = vmatpush1.bf16.msra.mxu0 %v12674_v26  ;;  %6149 = vmatpush1.bf16.msra.mxu1 %v12675_v30 }
 0xf67   :  { %6109 = vmatprep.subr.bf16.mxu0 %v12676_v52  ;;  %6150 = vmatprep.subr.bf16.mxu1 %v12677_v31 }
 0xf6a   :  { %6110 = vmatpush1.bf16.msra.mxu0 %v12678_v32  ;;  %6151 = vmatpush1.bf16.msra.mxu1 %v12679_v29 }
 0xf6b   :  { %6111 = vmatprep.subr.bf16.mxu0 %v12680_v6  ;;  %6152 = vmatprep.subr.bf16.mxu1 %v12681_v17 }
 0xf6e   :  { %6112 = vmatpush1.bf16.msra.mxu0 %v12682_v12  ;;  %6153 = vmatpush1.bf16.msra.mxu1 %v12683_v5 }
 0xf6f   :  { %6113 = vmatprep.subr.bf16.mxu0 %v12684_v25  ;;  %6154 = vmatprep.subr.bf16.mxu1 %v12685_v62 }
 0xf72   :  { %6114 = vmatpush1.bf16.msra.mxu0 %v12686_v60  ;;  %6155 = vmatpush1.bf16.msra.mxu1 %v12687_v36 }
 0xf73   :  { %6115 = vmatprep.subr.bf16.mxu0 %v12688_v20  ;;  %6156 = vmatprep.subr.bf16.mxu1 %v12689_v49  ;;  %v12698_v49 = vld [vmem:[#allocation43_spill] sm:$0xff] }
 0xf76   :  { %6116 = vmatpush1.bf16.msra.mxu0 %v12690_v42  ;;  %6157 = vmatpush1.bf16.msra.mxu1 %v12691_v56 }
 0xf77   :  { %6206 = vmatprep.subr.bf16.mxu0 %v12692_v38  ;;  %6247 = vmatprep.subr.bf16.mxu1 %v12693_v37 }
0x100c   :  { %v5925_v57 = vpop.f32.mrb[164].mxu0  ;;  %v5966_v13 = vpop.f32.mrb[172].mxu1 }
0x100d   :  { %v5973_v48 = vadd.f32 %v5925_v57, %v12694_v55  ;;  %v5975_v51 = vadd.f32 %v5966_v13, %v12695_v4  ;;  %v5927_v23 = vpop.f32.mrb[165].mxu0  ;;  %v5968_v3 = vpop.f32.mrb[173].mxu1  ;;  %v12699_v55 = vld [vmem:[#allocation101_spill] sm:$0xff]  ;;  %v12700_v4 = vld [vmem:[#allocation60_spill] sm:$0xff] }
0x100e   :  { %v5974_v11 = vadd.f32 %v5927_v23, %v12696_v14  ;;  %v5976_v18 = vadd.f32 %v5968_v3, %v12697_v0  ;;  %v5929_v26 = vpop.f32.mrb[166].mxu0  ;;  %v5970_v30 = vpop.f32.mrb[174].mxu1  ;;  %v12701_v14 = vld [vmem:[#allocation90_spill] sm:$0xff] }
0x100f   :  { %v5977_v52 = vmul.f32 0.5, %v5973_v48  ;;  %v5930_v31 = vpop.f32.mrb[167].mxu0  ;;  %v5971_v32 = vpop.f32.mrb[175].mxu1  ;;  %v5979_v6 = vmul.f32 0.5, %v5975_v51  ;;  %v12702_v0 = vld [vmem:[#allocation62_spill] sm:$0xff] }
0x1010   :  { %v5978_v29 = vmul.f32 0.5, %v5974_v11 }
0x1011   :  { %7578 = vtanh.f32 %v5977_v52 }
0x1012   :  { %7580 = vtanh.f32 %v5978_v29 }
0x1013   :  { %7582 = vtanh.f32 %v5976_v18 }
0x1014   :  { %7584 = vtanh.f32 %v5979_v6 }
0x101b   :  { %v7579_v17 = vpop.eup %7578 }
0x101c   :  { %v5983_v12 = vmul.f32 0.5, %v7579_v17  ;;  %v7581_v5 = vpop.eup %7580 }
0x101d   :  { %v5984_v62 = vmul.f32 0.5, %v7581_v5  ;;  %v7583_v60 = vpop.eup %7582 }
0x101e   :  { %v5986_v25 = vadd.f32 0.5, %v5983_v12  ;;  %v7585_v38 = vpop.eup %7584 }
0x101f   :  { %v5987_v36 = vadd.f32 0.5, %v5984_v62  ;;  %v5985_v37 = vmul.f32 0.5, %v7585_v38  ;;  %v7723_v38 = vld [vmem:[#allocation3 + $0xb8] sm:$0xff] }
0x1020   :  { %v5991_v20 = vmul.f32 %v7583_v60, %v5986_v25 }
0x1021   :  { %v5990_v42 = vmul.f32 %v5987_v36, %v12698_v49  ;;  %v5988_v52 = vadd.f32 0.5, %v5985_v37  ;;  %v7719_v36 = vld [vmem:[#allocation3 + $0x98] sm:$0xff]  ;;  %v7721_v49 = vld [vmem:[#allocation3 + $0x90] sm:$0xff]  ;;  %v7724_v37 = vld [vmem:[#allocation3 + $0xa0] sm:$0xff] }
0x1023   :  { %v11781_v56 = vadd.f32 %v5991_v20, %v5990_v42  ;;  %v7720_v20 = vld [vmem:[#allocation3 + $0x80] sm:$0xff]  ;;  %v7722_v42 = vld [vmem:[#allocation3 + $0xa8] sm:$0xff] }
0x1025   :  { %7586 = vtanh.f32 %v11781_v56 }
0x102c   :  { %v6030_v57 = vpop.f32.mrb[168].mxu0  ;;  %v6071_v13 = vpop.f32.mrb[176].mxu1 }
0x102d   :  { %v6078_v48 = vadd.f32 %v6030_v57, %v12699_v55  ;;  %v6080_v51 = vadd.f32 %v6071_v13, %v12700_v4  ;;  %v6032_v23 = vpop.f32.mrb[169].mxu0  ;;  %v6073_v3 = vpop.f32.mrb[177].mxu1  ;;  %v7725_v57 = vld [vmem:[#allocation3 + $0xb0] sm:$0xff]  ;;  %v7726_v13 = vld [vmem:[#allocation3 + $0xc8] sm:$0xff]  ;;  %v7727_v55 = vld [vmem:[#allocation3 + $0xd8] sm:$0xff] }
0x102e   :  { %v6079_v11 = vadd.f32 %v6032_v23, %v12701_v14  ;;  %v6081_v18 = vadd.f32 %v6073_v3, %v12702_v0  ;;  %v6034_v26 = vpop.f32.mrb[170].mxu0  ;;  %v6075_v30 = vpop.f32.mrb[178].mxu1  ;;  %v7729_v4 = vld [vmem:[#allocation3 + $0xd0] sm:$0xff]  ;;  %v7731_v23 = vld [vmem:[#allocation3 + $0xf8] sm:$0xff]  ;;  %v7732_v3 = vld [vmem:[#allocation3 + $0xe0] sm:$0xff] }
0x102f   :  { %v6082_v31 = vmul.f32 0.5, %v6078_v48  ;;  %v6035_v32 = vpop.f32.mrb[171].mxu0  ;;  %v6076_v29 = vpop.f32.mrb[179].mxu1  ;;  %v6084_v25 = vmul.f32 0.5, %v6080_v51  ;;  %v7728_v48 = vld [vmem:[#allocation3 + $0xc0] sm:$0xff]  ;;  %v7730_v51 = vld [vmem:[#allocation3 + $0xe8] sm:$0xff] }
0x1030   :  { %v7587_v6 = vpop.eup %7586  ;;  %v6083_v17 = vmul.f32 0.5, %v6079_v11  ;;  %v7733_v14 = vld [vmem:[#allocation3 + $0xf0] sm:$0xff]  ;;  %v7734_v11 = vld [vmem:[#allocation3 + $0x108] sm:$0xff]  ;;  %v7735_v0 = vld [vmem:[#allocation3 + $0x118] sm:$0xff] }
0x1031   :  { %7588 = vtanh.f32 %v6082_v31  ;;  %v5994_v12 = vmul.f32 %v7587_v6, %v5988_v52  ;;  %v12703_v30 = vld [vmem:[#allocation74_spill] sm:$0xff] }
0x1032   :  { %7590 = vtanh.f32 %v6083_v17  ;;  %v12704_v31 = vld [vmem:[#allocation82_spill] sm:$0xff]  ;;  %v12705_v17 = vld [vmem:[#allocation76_spill] sm:$0xff] }
0x1033   :  { %v6100_v5 = vpack.c.bf16 %v5994_v12, %v5994_v12  ;;  %7592 = vtanh.f32 %v6081_v18 }
0x1034   :  { %7594 = vtanh.f32 %v6084_v25 }
0x1035   :  { %6134 = vmatmul.mubr.bf16.vlgmr.msra.gmra.mrb[172].mxu0 %v6100_v5  ;;  %6175 = vmatmul.mubr.bf16.vlgmr.msra.gmra.mrb[180].mxu1 %v6100_v5  ;;  %v12706_v5 = vld [vmem:[#allocation84_spill] sm:$0xff] }
0x1036   :  { %6207 = vmatpush1.bf16.msra.mxu0 %v11476_v40  ;;  %6248 = vmatpush1.bf16.msra.mxu1 %v11479_v27 }
0x1037   :  { %6208 = vmatprep.subr.bf16.mxu0 %v11482_v10  ;;  %6249 = vmatprep.subr.bf16.mxu1 %v11485_v16 }
0x1038   :  { %6238 = vmatprep.mubr.bf16.mxu0 %v12218_v24  ;;  %6279 = vmatprep.mubr.bf16.mxu1 %v12218_v24 }
0x103a   :  { %6209 = vmatpush1.bf16.msra.mxu0 %v11490_v22  ;;  %6250 = vmatpush1.bf16.msra.mxu1 %v11493_v61 }
0x103b   :  { %v7589_v62 = vpop.eup %7588  ;;  %6210 = vmatprep.subr.bf16.mxu0 %v11496_v15  ;;  %6251 = vmatprep.subr.bf16.mxu1 %v11499_v19 }
0x103c   :  { %v6088_v40 = vmul.f32 0.5, %v7589_v62  ;;  %v7591_v27 = vpop.eup %7590 }
0x103d   :  { %v6089_v10 = vmul.f32 0.5, %v7591_v27  ;;  %v7593_v16 = vpop.eup %7592 }
0x103e   :  { %v6091_v60 = vadd.f32 0.5, %v6088_v40  ;;  %6211 = vmatpush1.bf16.msra.mxu0 %v11502_v44  ;;  %6252 = vmatpush1.bf16.msra.mxu1 %v11505_v8  ;;  %v7595_v44 = vpop.eup %7594 }
0x103f   :  { %6212 = vmatprep.subr.bf16.mxu0 %v11508_v43  ;;  %6253 = vmatprep.subr.bf16.mxu1 %v11511_v63  ;;  %v6092_v22 = vadd.f32 0.5, %v6089_v10  ;;  %v6090_v8 = vmul.f32 0.5, %v7595_v44 }
0x1040   :  { %v6096_v61 = vmul.f32 %v7593_v16, %v6091_v60 }
0x1041   :  { %v6095_v15 = vmul.f32 %v6092_v22, %v11723_v33  ;;  %v6093_v43 = vadd.f32 0.5, %v6090_v8  ;;  %v7718_v33 = vld [vmem:[#allocation3 + $0x88] sm:$0xff] }
0x1042   :  { %6213 = vmatpush1.bf16.msra.mxu0 %v11515_v59  ;;  %6254 = vmatpush1.bf16.msra.mxu1 %v11518_v46 }
0x1043   :  { %6214 = vmatprep.subr.bf16.mxu0 %v11521_v50  ;;  %6255 = vmatprep.subr.bf16.mxu1 %v11524_v54  ;;  %v11807_v19 = vadd.f32 %v6096_v61, %v6095_v15  ;;  %v7702_v50 = vld [vmem:[#allocation3 + $0x8] sm:$0xff]  ;;  %v7703_v54 = vld [vmem:[#allocation3 + $0x18] sm:$0xff] }
0x1045   :  { %7596 = vtanh.f32 %v11807_v19 }
0x1046   :  { %6215 = vmatpush1.bf16.msra.mxu0 %v11530_v41  ;;  %6256 = vmatpush1.bf16.msra.mxu1 %v11533_v21  ;;  %v7704_v41 = vld [vmem:[#allocation3] sm:$0xff]  ;;  %v7705_v21 = vld [vmem:[#allocation3 + $0x10] sm:$0xff] }
0x1047   :  { %6216 = vmatprep.subr.bf16.mxu0 %v12636_v1  ;;  %6257 = vmatprep.subr.bf16.mxu1 %v12637_v34  ;;  %v7710_v1 = vld [vmem:[#allocation3 + $0x48] sm:$0xff]  ;;  %v7711_v34 = vld [vmem:[#allocation3 + $0x58] sm:$0xff] }
0x104a   :  { %6217 = vmatpush1.bf16.msra.mxu0 %v12638_v9  ;;  %6258 = vmatpush1.bf16.msra.mxu1 %v12639_v45  ;;  %v7712_v9 = vld [vmem:[#allocation3 + $0x40] sm:$0xff]  ;;  %v7713_v45 = vld [vmem:[#allocation3 + $0x50] sm:$0xff] }
0x104b   :  { %6218 = vmatprep.subr.bf16.mxu0 %v12640_v53  ;;  %6259 = vmatprep.subr.bf16.mxu1 %v12641_v28  ;;  %v7714_v53 = vld [vmem:[#allocation3 + $0x68] sm:$0xff]  ;;  %v7715_v28 = vld [vmem:[#allocation3 + $0x78] sm:$0xff] }
0x104e   :  { %6219 = vmatpush1.bf16.msra.mxu0 %v12642_v58  ;;  %6260 = vmatpush1.bf16.msra.mxu1 %v12643_v2  ;;  %v7716_v58 = vld [vmem:[#allocation3 + $0x60] sm:$0xff]  ;;  %v7717_v2 = vld [vmem:[#allocation3 + $0x70] sm:$0xff] }
0x104f   :  { %6220 = vmatprep.subr.bf16.mxu0 %v11560_v7  ;;  %6261 = vmatprep.subr.bf16.mxu1 %v11563_v35  ;;  %v7597_v63 = vpop.eup %7596  ;;  %v7706_v7 = vld [vmem:[#allocation3 + $0x28] sm:$0xff]  ;;  %v7707_v35 = vld [vmem:[#allocation3 + $0x38] sm:$0xff] }
0x1050   :  { %v6099_v59 = vmul.f32 %v7597_v63, %v6093_v43 }
0x1052   :  { %6221 = vmatpush1.bf16.msra.mxu0 %v11566_v39  ;;  %6262 = vmatpush1.bf16.msra.mxu1 %v11569_v47  ;;  %v6205_v46 = vpack.c.bf16 %v6099_v59, %v6099_v59  ;;  %v7708_v39 = vld [vmem:[#allocation3 + $0x20] sm:$0xff]  ;;  %v7709_v47 = vld [vmem:[#allocation3 + $0x30] sm:$0xff] }
0x1053   :  { %6311 = vmatprep.subr.bf16.mxu0 %v7702_v50  ;;  %6352 = vmatprep.subr.bf16.mxu1 %v7703_v54 }
0x1055   :  { %6239 = vmatmul.mubr.bf16.vlgmr.msra.gmra.mrb[176].mxu0 %v6205_v46  ;;  %6280 = vmatmul.mubr.bf16.vlgmr.msra.gmra.mrb[184].mxu1 %v6205_v46 }
0x1056   :  { %6312 = vmatpush1.bf16.msra.mxu0 %v7704_v41  ;;  %6353 = vmatpush1.bf16.msra.mxu1 %v7705_v21 }
0x1057   :  { %6313 = vmatprep.subr.bf16.mxu0 %v7706_v7  ;;  %6354 = vmatprep.subr.bf16.mxu1 %v7707_v35 }
0x1058   :  { %6343 = vmatprep.mubr.bf16.mxu0 %v12218_v24  ;;  %6384 = vmatprep.mubr.bf16.mxu1 %v12218_v24 }
0x105a   :  { %6314 = vmatpush1.bf16.msra.mxu0 %v7708_v39  ;;  %6355 = vmatpush1.bf16.msra.mxu1 %v7709_v47  ;;  %v12707_v39 = vld [vmem:[#allocation88_spill] sm:$0xff] }
0x105b   :  { %6315 = vmatprep.subr.bf16.mxu0 %v7710_v1  ;;  %6356 = vmatprep.subr.bf16.mxu1 %v7711_v34  ;;  %v12708_v1 = vld [vmem:[#allocation83_spill] sm:$0xff] }
0x105e   :  { %6316 = vmatpush1.bf16.msra.mxu0 %v7712_v9  ;;  %6357 = vmatpush1.bf16.msra.mxu1 %v7713_v45 }
0x105f   :  { %6317 = vmatprep.subr.bf16.mxu0 %v7714_v53  ;;  %6358 = vmatprep.subr.bf16.mxu1 %v7715_v28  ;;  %v12709_v53 = vld [vmem:[#allocation99_spill] sm:$0xff] }
0x1062   :  { %6318 = vmatpush1.bf16.msra.mxu0 %v7716_v58  ;;  %6359 = vmatpush1.bf16.msra.mxu1 %v7717_v2  ;;  %v12710_v58 = vld [vmem:[#allocation85_spill] sm:$0xff] }
0x1063   :  { %6319 = vmatprep.subr.bf16.mxu0 %v7718_v33  ;;  %6360 = vmatprep.subr.bf16.mxu1 %v7719_v36 }
0x1066   :  { %6320 = vmatpush1.bf16.msra.mxu0 %v7720_v20  ;;  %6361 = vmatpush1.bf16.msra.mxu1 %v7721_v49 }
0x1067   :  { %6321 = vmatprep.subr.bf16.mxu0 %v7722_v42  ;;  %6362 = vmatprep.subr.bf16.mxu1 %v7723_v38 }
0x106a   :  { %6322 = vmatpush1.bf16.msra.mxu0 %v7724_v37  ;;  %6363 = vmatpush1.bf16.msra.mxu1 %v7725_v57 }
0x106b   :  { %6323 = vmatprep.subr.bf16.mxu0 %v7726_v13  ;;  %6364 = vmatprep.subr.bf16.mxu1 %v7727_v55  ;;  %v7736_v55 = vld [vmem:[#allocation3 + $0x100] sm:$0xff] }
0x106e   :  { %6324 = vmatpush1.bf16.msra.mxu0 %v7728_v48  ;;  %6365 = vmatpush1.bf16.msra.mxu1 %v7729_v4  ;;  %v7737_v48 = vld [vmem:[#allocation3 + $0x110] sm:$0xff]  ;;  %v7738_v4 = vld [vmem:[#allocation3 + $0x128] sm:$0xff] }
0x106f   :  { %6325 = vmatprep.subr.bf16.mxu0 %v7730_v51  ;;  %6366 = vmatprep.subr.bf16.mxu1 %v7731_v23  ;;  %v7739_v51 = vld [vmem:[#allocation3 + $0x138] sm:$0xff] }
0x1072   :  { %6326 = vmatpush1.bf16.msra.mxu0 %v7732_v3  ;;  %6367 = vmatpush1.bf16.msra.mxu1 %v7733_v14  ;;  %v7740_v3 = vld [vmem:[#allocation3 + $0x120] sm:$0xff]  ;;  %v7741_v14 = vld [vmem:[#allocation3 + $0x130] sm:$0xff] }
0x1073   :  { %6416 = vmatprep.subr.bf16.mxu0 %v7734_v11  ;;  %6457 = vmatprep.subr.bf16.mxu1 %v7735_v0  ;;  %v7742_v0 = vld [vmem:[#allocation3 + $0x148] sm:$0xff] }
0x1108   :  { %v6135_v18 = vpop.f32.mrb[172].mxu0  ;;  %v6176_v26 = vpop.f32.mrb[180].mxu1 }
0x1109   :  { %v6183_v52 = vadd.f32 %v6135_v18, %v12703_v30  ;;  %v6185_v32 = vadd.f32 %v6176_v26, %v12704_v31  ;;  %v6137_v29 = vpop.f32.mrb[173].mxu0  ;;  %v6178_v6 = vpop.f32.mrb[181].mxu1  ;;  %v7743_v18 = vld [vmem:[#allocation3 + $0x158] sm:$0xff] }
0x110a   :  { %v6184_v12 = vadd.f32 %v6137_v29, %v12705_v17  ;;  %v6186_v25 = vadd.f32 %v6178_v6, %v12706_v5  ;;  %v6139_v62 = vpop.f32.mrb[174].mxu0  ;;  %v6180_v40 = vpop.f32.mrb[182].mxu1  ;;  %v7745_v29 = vld [vmem:[#allocation3 + $0x150] sm:$0xff]  ;;  %v7746_v6 = vld [vmem:[#allocation3 + $0x168] sm:$0xff]  ;;  %v7747_v17 = vld [vmem:[#allocation3 + $0x178] sm:$0xff] }
0x110b   :  { %v6187_v27 = vmul.f32 0.5, %v6183_v52  ;;  %v6140_v60 = vpop.f32.mrb[175].mxu0  ;;  %v6181_v10 = vpop.f32.mrb[183].mxu1  ;;  %v6189_v22 = vmul.f32 0.5, %v6185_v32  ;;  %v7744_v32 = vld [vmem:[#allocation3 + $0x140] sm:$0xff]  ;;  %v7749_v40 = vld [vmem:[#allocation3 + $0x170] sm:$0xff] }
0x110c   :  { %v6188_v16 = vmul.f32 0.5, %v6184_v12  ;;  %v7748_v62 = vld [vmem:[#allocation3 + $0x160] sm:$0xff]  ;;  %v7751_v60 = vld [vmem:[#allocation3 + $0x198] sm:$0xff] }
0x110d   :  { %7598 = vtanh.f32 %v6187_v27  ;;  %v7750_v27 = vld [vmem:[#allocation3 + $0x188] sm:$0xff] }
0x110e   :  { %7600 = vtanh.f32 %v6188_v16  ;;  %v7752_v16 = vld [vmem:[#allocation3 + $0x180] sm:$0xff] }
0x110f   :  { %7602 = vtanh.f32 %v6186_v25 }
0x1110   :  { %7604 = vtanh.f32 %v6189_v22  ;;  %v7753_v22 = vld [vmem:[#allocation3 + $0x190] sm:$0xff] }
0x1117   :  { %v7599_v61 = vpop.eup %7598 }
0x1118   :  { %v6193_v15 = vmul.f32 0.5, %v7599_v61  ;;  %v7601_v44 = vpop.eup %7600  ;;  %v7754_v61 = vld [vmem:[#allocation3 + $0x1a8] sm:$0xff] }
0x1119   :  { %v6194_v43 = vmul.f32 0.5, %v7601_v44  ;;  %v7603_v63 = vpop.eup %7602  ;;  %v7756_v44 = vld [vmem:[#allocation3 + $0x1a0] sm:$0xff] }
0x111a   :  { %v6196_v8 = vadd.f32 0.5, %v6193_v15  ;;  %v7605_v41 = vpop.eup %7604  ;;  %v7755_v15 = vld [vmem:[#allocation3 + $0x1b8] sm:$0xff] }
0x111b   :  { %v6197_v59 = vadd.f32 0.5, %v6194_v43  ;;  %v6195_v21 = vmul.f32 0.5, %v7605_v41 }
0x111c   :  { %v6201_v46 = vmul.f32 %v7603_v63, %v6196_v8  ;;  %v7757_v8 = vld [vmem:[#allocation3 + $0x1b0] sm:$0xff]  ;;  %v7758_v63 = vld [vmem:[#allocation3 + $0x1c8] sm:$0xff] }
0x111d   :  { %v6200_v50 = vmul.f32 %v6197_v59, %v11781_v56  ;;  %v6198_v36 = vadd.f32 0.5, %v6195_v21  ;;  %v7759_v59 = vld [vmem:[#allocation3 + $0x1d8] sm:$0xff]  ;;  %v7762_v21 = vld [vmem:[#allocation3 + $0x1e8] sm:$0xff] }
0x111f   :  { %v11831_v54 = vadd.f32 %v6201_v46, %v6200_v50  ;;  %v7760_v46 = vld [vmem:[#allocation3 + $0x1c0] sm:$0xff]  ;;  %v7761_v50 = vld [vmem:[#allocation3 + $0x1d0] sm:$0xff] }
0x1121   :  { %7606 = vtanh.f32 %v11831_v54 }
0x1128   :  { %v6240_v7 = vpop.f32.mrb[176].mxu0  ;;  %v6281_v35 = vpop.f32.mrb[184].mxu1 }
0x1129   :  { %v6288_v47 = vadd.f32 %v6240_v7, %v12707_v39  ;;  %v6290_v34 = vadd.f32 %v6281_v35, %v12708_v1  ;;  %v6242_v9 = vpop.f32.mrb[177].mxu0  ;;  %v6283_v45 = vpop.f32.mrb[185].mxu1  ;;  %v7763_v7 = vld [vmem:[#allocation3 + $0x1f8] sm:$0xff]  ;;  %v7765_v1 = vld [vmem:[#allocation3 + $0x1f0] sm:$0xff] }
0x112a   :  { %v6289_v28 = vadd.f32 %v6242_v9, %v12709_v53  ;;  %v6291_v2 = vadd.f32 %v6283_v45, %v12710_v58  ;;  %v6244_v33 = vpop.f32.mrb[178].mxu0  ;;  %v6285_v56 = vpop.f32.mrb[186].mxu1  ;;  %v12711_v9 = vld [vmem:[#allocation20_spill] sm:$0xff]  ;;  %v12712_v45 = vmov 0.0   ;;  %v12715_v58 = vld [vmem:[#allocation13_spill] sm:$0xff] }
0x112b   :  { %v6292_v20 = vmul.f32 0.5, %v6288_v47  ;;  %v6245_v49 = vpop.f32.mrb[179].mxu0  ;;  %v6286_v42 = vpop.f32.mrb[187].mxu1  ;;  %v6294_v23 = vmul.f32 0.5, %v6290_v34  ;;  %v7764_v47 = vld [vmem:[#allocation3 + $0x1e0] sm:$0xff]  ;;  %v12717_v33 = vld [vmem:[#allocation14_spill] sm:$0xff] }
0x112c   :  { %v7607_v38 = vpop.eup %7606  ;;  %v6293_v37 = vmul.f32 0.5, %v6289_v28  ;;  %v12713_v53 = vld [vmem:[#allocation12_spill] sm:$0xff]  ;;  %v12714_v28 = vld [vmem:[#allocation21_spill] sm:$0xff]  ;;  %v12718_v56 = vld [vmem:[#allocation23_spill] sm:$0xff] }
0x112d   :  { %7608 = vtanh.f32 %v6292_v20  ;;  %v6204_v57 = vmul.f32 %v7607_v38, %v6198_v36  ;;  %v12719_v36 = vld [vmem:[#allocation15_spill] sm:$0xff]  ;;  %v12720_v20 = vld [vmem:[#allocation24_spill] sm:$0xff]  ;;  %v12722_v42 = vld [vmem:[#allocation25_spill] sm:$0xff] }
0x112e   :  { %7610 = vtanh.f32 %v6293_v37  ;;  %v12721_v49 = vld [vmem:[#allocation16_spill] sm:$0xff]  ;;  %v12723_v38 = vld [vmem:[#allocation17_spill] sm:$0xff]  ;;  %v12724_v37 = vld [vmem:[#allocation26_spill] sm:$0xff] }
0x112f   :  { %v6310_v13 = vpack.c.bf16 %v6204_v57, %v6204_v57  ;;  %7612 = vtanh.f32 %v6291_v2  ;;  %v12716_v2 = vld [vmem:[#allocation22_spill] sm:$0xff] }
0x1130   :  { %7614 = vtanh.f32 %v6294_v23  ;;  %v12725_v57 = vld [vmem:[#allocation18_spill] sm:$0xff]  ;;  %v7469_v23 = vld [vmem:[%s11959_s15 + $0x18] sm:$0xff]  }
0x1131   :  { %6344 = vmatmul.mubr.bf16.vlgmr.msra.gmra.mrb[180].mxu0 %v6310_v13  ;;  %6385 = vmatmul.mubr.bf16.vlgmr.msra.gmra.mrb[188].mxu1 %v6310_v13  ;;  %v12726_v13 = vld [vmem:[#allocation27_spill] sm:$0xff] }
0x1132   :  { %6417 = vmatpush1.bf16.msra.mxu0 %v7736_v55  ;;  %6458 = vmatpush1.bf16.msra.mxu1 %v7737_v48  ;;  %v12727_v55 = vld [vmem:[#allocation19_spill] sm:$0xff]  ;;  %v7466_v48 = vld [vmem:[%s11959_s15] sm:$0xff]  }
0x1133   :  { %6418 = vmatprep.subr.bf16.mxu0 %v7738_v4  ;;  %6459 = vmatprep.subr.bf16.mxu1 %v7739_v51  ;;  %v7467_v4 = vld [vmem:[%s11959_s15 + $0x8] sm:$0xff]   ;;  %v7468_v51 = vld [vmem:[%s11959_s15 + $0x10] sm:$0xff]  }
0x1134   :  { %6448 = vmatprep.mubr.bf16.mxu0 %v12218_v24  ;;  %6489 = vmatprep.mubr.bf16.mxu1 %v12218_v24 }
0x1136   :  { %6419 = vmatpush1.bf16.msra.mxu0 %v7740_v3  ;;  %6460 = vmatpush1.bf16.msra.mxu1 %v7741_v14  ;;  %v7470_v3 = vld [vmem:[%s11959_s15 + $0x20] sm:$0xff]  }
0x1137   :  { %v7609_v11 = vpop.eup %7608  ;;  %6420 = vmatprep.subr.bf16.mxu0 %v7742_v0  ;;  %6461 = vmatprep.subr.bf16.mxu1 %v7743_v18  ;;  %v12728_v0 = vld [vmem:[#allocation98_spill] sm:$0xff] }
0x1138   :  { %v6298_v26 = vmul.f32 0.5, %v7609_v11  ;;  %v7611_v30 = vpop.eup %7610 }
0x1139   :  { %v6299_v31 = vmul.f32 0.5, %v7611_v30  ;;  %v7613_v24 = vpop.eup %7612 }
0x113a   :  { %v6301_v52 = vadd.f32 0.5, %v6298_v26  ;;  %6421 = vmatpush1.bf16.msra.mxu0 %v7744_v32  ;;  %6462 = vmatpush1.bf16.msra.mxu1 %v7745_v29  ;;  %v12729_v26 = vld [vmem:[#allocation87_spill] sm:$0xff]  ;;  %v12730_v32 = vld [vmem:[#allocation102_spill] sm:$0xff] }
0x113b   :  { %6422 = vmatprep.subr.bf16.mxu0 %v7746_v6  ;;  %6463 = vmatprep.subr.bf16.mxu1 %v7747_v17  ;;  %v6302_v12 = vadd.f32 0.5, %v6299_v31 }
0x113c   :  { %v6306_v5 = vmul.f32 %v7613_v24, %v6301_v52  ;;  %v12731_v24 = vld [vmem:[#allocation89_spill] sm:$0xff] }
0x113d   :  { %v6305_v25 = vmul.f32 %v6302_v12, %v11807_v19  ;;  %v7615_v19 = vpop.eup %7614 }
0x113e   :  { %6423 = vmatpush1.bf16.msra.mxu0 %v7748_v62  ;;  %6464 = vmatpush1.bf16.msra.mxu1 %v7749_v40  ;;  %v6300_v43 = vmul.f32 0.5, %v7615_v19 }
0x113f   :  { %6424 = vmatprep.subr.bf16.mxu0 %v7750_v27  ;;  %6465 = vmatprep.subr.bf16.mxu1 %v7751_v60  ;;  %v11841_v10 = vadd.f32 %v6306_v5, %v6305_v25 }
0x1140   :  { %v6303_v41 = vadd.f32 0.5, %v6300_v43 }
0x1141   :  { %7616 = vtanh.f32 %v11841_v10 }
0x1142   :  { %6425 = vmatpush1.bf16.msra.mxu0 %v7752_v16  ;;  %6466 = vmatpush1.bf16.msra.mxu1 %v7753_v22 }
0x1143   :  { %6426 = vmatprep.subr.bf16.mxu0 %v7754_v61  ;;  %6467 = vmatprep.subr.bf16.mxu1 %v7755_v15 }
0x1146   :  { %6427 = vmatpush1.bf16.msra.mxu0 %v7756_v44  ;;  %6468 = vmatpush1.bf16.msra.mxu1 %v7757_v8 }
0x1147   :  { %6428 = vmatprep.subr.bf16.mxu0 %v7758_v63  ;;  %6469 = vmatprep.subr.bf16.mxu1 %v7759_v59 }
0x114a   :  { %6429 = vmatpush1.bf16.msra.mxu0 %v7760_v46  ;;  %6470 = vmatpush1.bf16.msra.mxu1 %v7761_v50 }
0x114b   :  { %6430 = vmatprep.subr.bf16.mxu0 %v7762_v21  ;;  %6471 = vmatprep.subr.bf16.mxu1 %v7763_v7  ;;  %v7617_v35 = vpop.eup %7616  ;;  %v12732_v21 = vld [vmem:[#allocation104_spill] sm:$0xff] }
0x114c   :  { %v6309_v39 = vmul.f32 %v7617_v35, %v6303_v41  ;;  %v12733_v35 = vld [vmem:[#allocation56_spill] sm:$0xff] }
0x114e   :  { %6431 = vmatpush1.bf16.msra.mxu0 %v7764_v47  ;;  %6472 = vmatpush1.bf16.msra.mxu1 %v7765_v1  ;;  %v6415_v34 = vpack.c.bf16 %v6309_v39, %v6309_v39 }
0x114f   :  { %7000 = vmatprep.subr.bf16.mxu0 %v12711_v9  ;;  %7036 = vmatprep.subr.bf16.mxu1 %v12712_v45 }
0x1151   :  { %6449 = vmatmul.mubr.bf16.vlgmr.msra.gmra.mrb[184].mxu0 %v6415_v34  ;;  %6490 = vmatmul.mubr.bf16.vlgmr.msra.gmra.mrb[192].mxu1 %v6415_v34  ;;  %v12734_v34 = vld [vmem:[#allocation86_spill] sm:$0xff] }
0x1152   :  { %7001 = vmatpush3.bf16.msra.mxu0 %v12713_v53  ;;  %7037 = vmatpush3.bf16.msra.mxu1 %v7466_v48  ;;  %v12735_v53 = vld [vmem:[#allocation58_spill] sm:$0xff] }
0x1153   :  { %7002 = vmatprep.subr.bf16.mxu0 %v12714_v28  ;;  %7038 = vmatprep.subr.bf16.mxu1 %v12712_v45 }
0x1154   :  { %7052 = vmatprep.mubr.msk.bf16.mxu1 %vm7774_vm10, %v12712_v45 }
0x1156   :  { %7003 = vmatpush3.bf16.msra.mxu0 %v12715_v58  ;;  %7039 = vmatpush3.bf16.msra.mxu1 %v7467_v4 }
0x1157   :  { %7004 = vmatprep.subr.bf16.mxu0 %v12716_v2  ;;  %7040 = vmatprep.subr.bf16.mxu1 %v12712_v45 }
0x115a   :  { %7005 = vmatpush3.bf16.msra.mxu0 %v12717_v33  ;;  %7041 = vmatpush3.bf16.msra.mxu1 %v7468_v51 }
0x115b   :  { %7006 = vmatprep.subr.bf16.mxu0 %v12718_v56  ;;  %7042 = vmatprep.subr.bf16.mxu1 %v12712_v45 }
0x115e   :  { %7007 = vmatpush3.bf16.msra.mxu0 %v12719_v36  ;;  %7043 = vmatpush3.bf16.msra.mxu1 %v7469_v23 }
0x115f   :  { %7008 = vmatprep.subr.bf16.mxu0 %v12720_v20  ;;  %7044 = vmatprep.subr.bf16.mxu1 %v12712_v45 }
0x1162   :  { %7009 = vmatpush3.bf16.msra.mxu0 %v12721_v49  ;;  %7045 = vmatpush3.bf16.msra.mxu1 %v7470_v3 }
0x1163   :  { %7010 = vmatprep.subr.bf16.mxu0 %v12722_v42  ;;  %7046 = vmatprep.subr.bf16.mxu1 %v12712_v45 }
0x1166   :  { %7011 = vmatpush3.bf16.msra.mxu0 %v12723_v38 }
0x1167   :  { %7012 = vmatprep.subr.bf16.mxu0 %v12724_v37 }
0x116a   :  { %7013 = vmatpush3.bf16.msra.mxu0 %v12725_v57 }
0x116b   :  { %7014 = vmatprep.subr.bf16.mxu0 %v12726_v13 }
0x116e   :  { %7015 = vmatpush3.bf16.msra.mxu0 %v12727_v55 }
0x116f   :  { %7056 = vmatprep.subr.bf16.mxu0 %v12712_v45 }
0x1204   :  { %v6345_v14 = vpop.f32.mrb[180].mxu0  ;;  %v6386_v11 = vpop.f32.mrb[188].mxu1 }
0x1205   :  { %v6393_v18 = vadd.f32 %v6345_v14, %v12728_v0  ;;  %v6395_v30 = vadd.f32 %v6386_v11, %v12729_v26  ;;  %v6347_v52 = vpop.f32.mrb[181].mxu0  ;;  %v6388_v31 = vpop.f32.mrb[189].mxu1 }
0x1206   :  { %v6394_v29 = vadd.f32 %v6347_v52, %v12730_v32  ;;  %v6396_v6 = vadd.f32 %v6388_v31, %v12731_v24  ;;  %v6349_v17 = vpop.f32.mrb[182].mxu0  ;;  %v6390_v12 = vpop.f32.mrb[190].mxu1  ;;  %v7471_v32 = vld [vmem:[%s11959_s15 + $0x28] sm:$0xff]   ;;  %v7474_v24 = vld [vmem:[%s11963_s19] sm:$0xff]  }
0x1207   :  { %v6397_v5 = vmul.f32 0.5, %v6393_v18  ;;  %v6350_v25 = vpop.f32.mrb[183].mxu0  ;;  %v6391_v62 = vpop.f32.mrb[191].mxu1  ;;  %v6399_v27 = vmul.f32 0.5, %v6395_v30  ;;  %7047 = vmatpush3.bf16.msra.mxu1 %v7471_v32  ;;  %v6977_v17 = vld [vmem:[%s11956_s12] ss:$0 sm:$0xff] }
0x1208   :  { %v6398_v40 = vmul.f32 0.5, %v6394_v29  ;;  %7048 = vmatprep.subr.bf16.mxu1 %v12712_v45  ;;  %v7473_v29 = vld [vmem:[%s11959_s15 + $0x38] sm:$0xff]   ;;  %v6978_v62 = vld [vmem:[%s11957_s13] ss:$0 sm:$0xff] }
0x1209   :  { %7618 = vtanh.f32 %v6397_v5 }
0x120a   :  { %7620 = vtanh.f32 %v6398_v40 }
0x120b   :  { %7622 = vtanh.f32 %v6396_v6 }
0x120c   :  { %7624 = vtanh.f32 %v6399_v27 }
0x1213   :  { %v7619_v60 = vpop.eup %7618 }
0x1214   :  { %v6403_v16 = vmul.f32 0.5, %v7619_v60  ;;  %v7621_v22 = vpop.eup %7620  ;;  %v6979_v60 = vld [vmem:[%s11958_s14] ss:$0 sm:$0xff] }
0x1215   :  { %v6404_v15 = vmul.f32 0.5, %v7621_v22  ;;  %v7623_v19 = vpop.eup %7622 }
0x1216   :  { %v6406_v61 = vadd.f32 0.5, %v6403_v16  ;;  %v7625_v59 = vpop.eup %7624 }
0x1217   :  { %v6407_v44 = vadd.f32 0.5, %v6404_v15  ;;  %v6405_v46 = vmul.f32 0.5, %v7625_v59  ;;  %v6989_v59 = vld [vmem:[%s11961_s17] ss:$0 sm:$0xff] }
0x1218   :  { %v6411_v8 = vmul.f32 %v7623_v19, %v6406_v61  ;;  %v7475_v19 = vld [vmem:[%s11963_s19 + $0x8] sm:$0xff]  }
0x1219   :  { %v6410_v43 = vmul.f32 %v6407_v44, %v11831_v54  ;;  %v6408_v33 = vadd.f32 0.5, %v6405_v46  ;;  %v7476_v44 = vld [vmem:[%s11963_s19 + $0x10] sm:$0xff]  }
0x121b   :  { %v6412_v63 = vadd.f32 %v6411_v8, %v6410_v43  ;;  %v7477_v8 = vld [vmem:[%s11963_s19 + $0x18] sm:$0xff]   ;;  %v6980_v43 = vld [vmem:[%s11960_s16] ss:$0 sm:$0xff] }
0x121d   :  { %7626 = vtanh.f32 %v6412_v63 }
0x1224   :  { %v6450_v50 = vpop.f32.mrb[184].mxu0  ;;  %v6491_v41 = vpop.f32.mrb[192].mxu1 }
0x1225   :  { %v6498_v7 = vadd.f32 %v6450_v50, %v12732_v21  ;;  %v6500_v39 = vadd.f32 %v6491_v41, %v12733_v35  ;;  %v6452_v47 = vpop.f32.mrb[185].mxu0  ;;  %v6493_v1 = vpop.f32.mrb[193].mxu1 }
0x1226   :  { %v6499_v9 = vadd.f32 %v6452_v47, %v12734_v34  ;;  %v6501_v28 = vadd.f32 %v6493_v1, %v12735_v53  ;;  %v6454_v58 = vpop.f32.mrb[186].mxu0  ;;  %v6495_v2 = vpop.f32.mrb[194].mxu1  ;;  %v6991_v1 = vld [vmem:[%s11964_s20] ss:$0 sm:$0xff] }
0x1227   :  { %v6502_v54 = vmul.f32 0.5, %v6498_v7  ;;  %v6455_v56 = vpop.f32.mrb[187].mxu0  ;;  %v6496_v36 = vpop.f32.mrb[195].mxu1  ;;  %v6504_v38 = vmul.f32 0.5, %v6500_v39 }
0x1228   :  { %v7627_v20 = vpop.eup %7626  ;;  %v6503_v49 = vmul.f32 0.5, %v6499_v9 }
0x1229   :  { %7628 = vtanh.f32 %v6502_v54  ;;  %v6414_v42 = vmul.f32 %v7627_v20, %v6408_v33 }
0x122a   :  { %7630 = vtanh.f32 %v6503_v49 }
0x122b   :  { %7632 = vtanh.f32 %v6501_v28  ;;  %v6520_v31 = vpack.c.bf16 %v6414_v42, %v6414_v42 }
0x122c   :  { %7634 = vtanh.f32 %v6504_v38 }
0x1233   :  { %v7629_v37 = vpop.eup %7628 }
0x1234   :  { %v6508_v57 = vmul.f32 0.5, %v7629_v37  ;;  %v7631_v13 = vpop.eup %7630 }
0x1235   :  { %v6509_v48 = vmul.f32 0.5, %v7631_v13  ;;  %v7633_v4 = vpop.eup %7632 }
0x1236   :  { %v6511_v55 = vadd.f32 0.5, %v6508_v57  ;;  %v7635_v11 = vpop.eup %7634 }
0x1237   :  { %v6512_v51 = vadd.f32 0.5, %v6509_v48  ;;  %v6510_v0 = vmul.f32 0.5, %v7635_v11 }
0x1238   :  { %v6516_v23 = vmul.f32 %v7633_v4, %v6511_v55 }
0x1239   :  { %v6515_v3 = vmul.f32 %v6512_v51, %v11841_v10  ;;  %v6513_v18 = vadd.f32 0.5, %v6510_v0  ;;  %v7472_v10 = vld [vmem:[%s11959_s15 + $0x30] sm:$0xff]  }
0x123a   :  { %7049 = vmatpush3.bf16.msra.mxu1 %v7472_v10 }
0x123b   :  { %v6517_v14 = vadd.f32 %v6516_v23, %v6515_v3  ;;  %7050 = vmatprep.subr.bf16.mxu1 %v12712_v45 }
0x123d   :  { %7636 = vtanh.f32 %v6517_v14 }
0x123e   :  { %7051 = vmatpush3.bf16.msra.mxu1 %v7473_v29 }
0x1247   :  { %v7637_v26 = vpop.eup %7636 }
0x1248   :  { %v6519_v30 = vmul.f32 %v7637_v26, %v6513_v18 }
0x124a   :  { %v6521_v52 = vpack.c.bf16 %v6519_v30, %v6519_v30 }
0x124c   :  { %6577 = vmatprep.mubr.bf16.mxu0 %v6521_v52 }
0x124d   :  { %6578 = vmatmul.mubr.bf16.vlgmr.msra.gmra.mrb[188].mxu0 %v6520_v31 }
0x124e   :  { %7064 = vmatprep.mubr.msk.bf16.mxu0 %vm7774_vm10, %v12712_v45  ;;  %7057 = vmatpush3.bf16.msra.mxu0 %v7474_v24 }
0x124f   :  { %7058 = vmatprep.subr.bf16.mxu0 %v12712_v45 }
0x1252   :  { %7059 = vmatpush3.bf16.msra.mxu0 %v7475_v19 }
0x1253   :  { %7060 = vmatprep.subr.bf16.mxu0 %v12712_v45 }
0x1256   :  { %7061 = vmatpush3.bf16.msra.mxu0 %v7476_v44 }
0x1257   :  { %7062 = vmatprep.subr.bf16.mxu0 %v12712_v45  ;;  %v6990_v45 = vld [vmem:[%s11962_s18] ss:$0 sm:$0xff] }
0x125a   :  { %7063 = vmatpush3.bf16.msra.mxu0 %v7477_v8 }
0x1320   :  { %v7016_v6 = vpop.f32.mrb[188].mxu0 }
0x1321   :  { %v7017_v12 = vpop.f32.mrb[189].mxu0 }
0x1322   :  { %v7018_v5 = vadd.f32 %v7017_v12, %v7016_v6  ;;  %v7019_v25 = vpop.f32.mrb[190].mxu0 }
0x1323   :  { %v7020_v40 = vpop.f32.mrb[191].mxu0 }
0x1324   :  { %v6580_v27 = vadd.f32 %v7018_v5, %v6977_v17 }
0x1326   :  { %v6592_v16 = vmul.f32 %v6978_v62, %v6580_v27 }
0x1328   :  { %v6600_v22 = vadd.f32 %v6979_v60, %v6592_v16 }
0x132a   :  { %v6601_v61 = vmax.f32 %v6600_v22, 0.0 }
0x132c   :  { %v6602_v15 = vpack.c.bf16 %v6601_v61, %v6601_v61 }
0x132e   :  { %7053 = vmatmul.mubr.bf16.vlgmr.msra.gmra.mrb[196].mxu1 %v6602_v15 }
0x1401   :  { %v6708_v63 = vpop.f32.mrb[196].mxu1 }
0x1402   :  { %v6709_v46 = vadd.f32 %v6980_v43, %v6708_v63  ;;  %v7054_v50 = vpop.f32.mrb[197].mxu1 }
0x1403   :  { %v6711_v41 = vpop.f32.mrb[198].mxu1 }
0x1404   :  { %v6721_v21 = vmul.f32 %v6989_v59, %v6709_v46  ;;  %v7055_v7 = vpop.f32.mrb[199].mxu1 }
0x1406   :  { %v6729_v35 = vadd.f32 %v6990_v45, %v6721_v21 }
0x1408   :  { %v6730_v39 = vmax.f32 %v6729_v35, 0.0 }
0x140a   :  { %v6731_v47 = vpack.c.bf16 %v6730_v39, %v6730_v39 }
0x140c   :  { %7065 = vmatmul.mubr.msk.bf16.vlgmr.msra.gmra.mrb[192].mxu0 %vm6771_vm11, %v6731_v47 }
0x14df   :  { %v6809_v34 = vpop.f32.mrb[192].mxu0 }
0x14e0   :  { %v6810_v9 = vadd.f32 %v6991_v1, %v6809_v34  ;;  %v7066_v53 = vpop.f32.mrb[193].mxu0 }
0x14e1   :  { %v6812_v28 = vpop.f32.mrb[194].mxu0 }
0x14e2   :  { %v6815_v58 = vmax.f32 %v6810_v9, 0.0  ;;  %v7067_v2 = vpop.f32.mrb[195].mxu0 }
0x14e4   :  { %6816 = vst [vmem:[%s11965_s21] sm:$0xff] %v6815_v58 }
0x14e5   :  { %6821 = vsyncmov [#allocation5] }
0x14e8   :  { %s6822_s4 = vpop.sfrf %6821 }
0x14e9   :  { %p6997_p0 = scmp.ne.s32.totalorder %s6822_s4, 0 }
0x14eb   :  { %6826 = shalt.err (%p6997_p0)  }
0x14ec   :  { %6828 = vsyncmov [#allocation5 + $0x1] }
0x14ef   :  { %s6829_s3 = vpop.sfrf %6828 }
0x14f0   :  { %p6998_p1 = scmp.ne.s32.totalorder %s6829_s3, 0 }
0x14f2   :  { %6833 = shalt.err (%p6998_p1)  }
0x14f3   :  { %6835 = vsyncmov [#allocation5 + $0x2] }
0x14f6   :  { %s6836_s20 = vpop.sfrf %6835 }
0x14f7   :  { %p6999_p2 = scmp.ne.s32.totalorder %s6836_s20, 0 }
0x14f9   :  { %6840 = shalt.err (%p6999_p2)  }

</bundles_post_ra>
